<compile_context>
chip_gen: v6e
topology: v6e:2x2x1
jax: 0.10.0
libtpu: 0.0.40
codegen_flags: <defaults>
</compile_context>

<pallas_src>
import functools

import jax
import jax.numpy as jnp
from jax.experimental import pallas as pl
from jax.experimental.pallas import tpu as pltpu


# ------------------------------- model config -------------------------------
N_CHANNEL = 3
N_FILTERS = 64
N_HIDDEN = 128
N_CLASSES = 18
FILTER_SIZE = 5
T_STEPS = 8              # hard-coded by the torch model's x.view(8, -1, n_filters)

BATCH = 2
SEQ_LEN = 32             # -> length 16 after four valid k=5 convs


# ------------------------------- fused kernel -------------------------------
def _har_fused_kernel(
    # inputs ------------------------------------------------------------------
    x_ref,                                    # (B, C, L)            f32
    w1_ref, b1_ref, w2_ref, b2_ref,           # conv: (K, F, C_in) bf16 / (F, 1) f32
    w3_ref, b3_ref, w4_ref, b4_ref,           #   (conv4 rows pre-permuted)
    wih1_ref, whh1_ref, bl1_ref,              # LSTM1: (F,4H) bf16 / (H,4H) bf16 / (1,4H) f32
    wih2_hbm, whh2_hbm, bl2_ref,              # LSTM2: wih2/whh2 left in HBM (pl.ANY)
    wfc_ref, bfc_ref,                         # FC: (H, n_classes) bf16 / (1, n_classes) f32
    # outputs -----------------------------------------------------------------
    o_ref,                                    # (B, n_classes)       f32
    # VMEM scratch / semaphores -----------------------------------------------
    wih2_buf, whh2_buf,                       # (H, 4H) bf16 DMA landing buffers
    dma_sem,                                  # DMA semaphores (2,)
    *, B, K, T, M, H, L_FINAL):

    # ---- overlap the LSTM2 weight fetch (~256 KiB) with conv + LSTM1 --------
    cp_ih2 = pltpu.make_async_copy(wih2_hbm, wih2_buf, dma_sem.at[0])
    cp_hh2 = pltpu.make_async_copy(whh2_hbm, whh2_buf, dma_sem.at[1])
    cp_ih2.start()
    cp_hh2.start()

    # ---- conv stack: K accumulated shifted matmuls per layer (no im2col) ----
    conv_params = ((w1_ref, b1_ref), (w2_ref, b2_ref),
                   (w3_ref, b3_ref), (w4_ref, b4_ref))
    L = x_ref.shape[2]
    acts = [x_ref[b] for b in range(B)]               # B x (C_in, L) f32 values
    for w_ref, b_ref in conv_params:
        l_out = L - K + 1
        new_acts = []
        for b in range(B):
            a16 = acts[b].astype(jnp.bfloat16)        # cast once per layer/batch
            y = None
            for k in range(K):                        # y = sum_k W_k @ a[:, k:k+l_out]
                part = jnp.dot(w_ref[k], a16[:, k:k + l_out],
                               preferred_element_type=jnp.float32)
                y = part if y is None else y + part
            new_acts.append(jnp.maximum(y + b_ref[...], 0.0))   # bias + ReLU, f32
        acts = new_acts
        L = l_out
    assert L == L_FINAL                               # trace-time shape check

    F = acts[0].shape[0]
    group = F // L_FINAL                              # conv channels per LSTM feature group

    # ---- torch's x.view(8, -1, F) folded into the LSTM1 input projection ----
    # conv4's rows were pre-permuted in the wrapper so lstm_in's column-group j
    # equals conv4p rows [j*L_FINAL, (j+1)*L_FINAL); the view never has to be
    # materialized -- gx1 is `group` accumulated block matmuls per batch.
    def input_proj_from_conv(y4p_b, wih_ref, b_ref):
        y16 = y4p_b.astype(jnp.bfloat16)
        acc = None
        for j in range(group):
            part = jnp.dot(y16[j * L_FINAL:(j + 1) * L_FINAL, :],
                           wih_ref[j * L_FINAL:(j + 1) * L_FINAL, :],
                           preferred_element_type=jnp.float32)
            acc = part if acc is None else acc + part
        return acc + b_ref[...]                       # (L_FINAL, 4H) f32

    gx1 = [input_proj_from_conv(acts[b], wih1_ref, bl1_ref) for b in range(B)]

    # ---- LSTM cell: gate order (i, f, o, g); bf16 EUP, f32 cell state -------
    def cell(gates, c):
        gb = gates.astype(jnp.bfloat16)               # bf16 transcendentals (v6e/v7x EUP)
        sfo = (jnp.tanh(0.5 * gb[:, :3 * H]) * 0.5 + 0.5).astype(jnp.float32)
        g = jnp.tanh(gb[:, 3 * H:]).astype(jnp.float32)
        c = sfo[:, H:2 * H] * c + sfo[:, :H] * g      # f * c + i * g   (f32)
        h = sfo[:, 2 * H:] * jnp.tanh(c)              # o * tanh(c)     (f32)
        return h, c

    # ---- LSTM1 (fully unrolled: T=8 static steps) ----------------------------
    # NOTE: jnp.dot with whh_ref kept instead of matmul_push_rhs/acc_lhs/pop for
    # portability; the repeated ref read is CSE-able by the compiler.
    h1 = jnp.zeros((M, H), jnp.float32)
    c1 = jnp.zeros((M, H), jnp.float32)
    hs1 = []
    for t in range(T):
        row = t * M                                   # rows of this step, all in one batch
        b_idx, r0 = row // L_FINAL, row % L_FINAL
        gates = gx1[b_idx][r0:r0 + M, :] + jnp.dot(
            h1.astype(jnp.bfloat16), whh1_ref[...],
            preferred_element_type=jnp.float32)
        h1, c1 = cell(gates, c1)
        hs1.append(h1)                                # feeds LSTM2 (values, no VMEM round trip)

    # LSTM2 weights must have landed by now (DMA overlapped with the above).
    cp_ih2.wait()
    cp_hh2.wait()

    # Rows kept by view(B, -1, n_classes)[:, -1, :]: one (t, m) pair per batch.
    rows_per_batch = T * M // B
    sel = {}
    for b in range(B):
        r = (b + 1) * rows_per_batch - 1
        sel.setdefault(r // M, []).append((b, r % M))

    # ---- LSTM2 (seeded with LSTM1's final hidden state, as in torch) --------
    feats = [None] * B
    h2, c2 = h1, c1
    for t in range(T):
        gx2_t = jnp.dot(hs1[t].astype(jnp.bfloat16), wih2_buf[...],
                        preferred_element_type=jnp.float32) + bl2_ref[...]
        gates = gx2_t + jnp.dot(h2.astype(jnp.bfloat16), whh2_buf[...],
                                preferred_element_type=jnp.float32)
        h2, c2 = cell(gates, c2)
        for b, m_sel in sel.get(t, ()):
            feats[b] = h2[m_sel:m_sel + 1, :]         # capture live, no hs2 list

    # ---- classifier on just the B selected rows ------------------------------
    # TODO(synk): training-mode dropout (p=0.5) not implemented (inference identity).
    feat_mat = jnp.concatenate(feats, axis=0)         # (B, H) f32
    o_ref[...] = jnp.dot(feat_mat.astype(jnp.bfloat16), wfc_ref[...],
                         preferred_element_type=jnp.float32) + bfc_ref[...]


# --------------------------- parameters / packing ----------------------------
def _pack_lstm(key, d_in, gate_perm):
    """Orthogonal weight_ih / weight_hh, zero biases (as in the torch
    init_weights hook), repacked for the kernel: transposed, bf16, gate order
    (i, f, o, g), b_ih + b_hh combined into one (1, 4H) row."""
    k1, k2 = jax.random.split(key)
    ortho = jax.nn.initializers.orthogonal()
    wih = ortho(k1, (4 * N_HIDDEN, d_in), jnp.float32)      # torch weight_ih_l0
    whh = ortho(k2, (4 * N_HIDDEN, N_HIDDEN), jnp.float32)  # torch weight_hh_l0
    bias = jnp.zeros((4 * N_HIDDEN,), jnp.float32)          # b_ih_l0 + b_hh_l0 (both zero)
    return (jnp.transpose(wih[gate_perm]).astype(jnp.bfloat16),
            jnp.transpose(whh[gate_perm]).astype(jnp.bfloat16),
            bias[gate_perm].reshape(1, 4 * N_HIDDEN))


def init_params(key, seq_len=SEQ_LEN):
    """Deterministic params matching the torch init scheme (orthogonal weights,
    zero biases), pre-packed into the layouts the fused kernel consumes."""
    ortho = jax.nn.initializers.orthogonal()
    keys = jax.random.split(key, 7)
    H, F, K, C = N_HIDDEN, N_FILTERS, FILTER_SIZE, N_CHANNEL
    l_final = seq_len - 4 * (K - 1)
    group = F // l_final

    # torch LSTM gate order (i, f, g, o) -> kernel order (i, f, o, g)
    gate_perm = jnp.concatenate([jnp.arange(0, 2 * H),
                                 jnp.arange(3 * H, 4 * H),
                                 jnp.arange(2 * H, 3 * H)])

    params = {}
    conv_cin = (C, F, F, F)
    for idx, cin in enumerate(conv_cin):
        w = ortho(keys[idx], (F, cin * K), jnp.float32).reshape(F, cin, K)  # torch (F, C_in, K)
        b = jnp.zeros((F,), jnp.float32)
        w_kfc = jnp.transpose(w, (2, 0, 1))              # (K, F, C_in): w_kfc[k] = W_k
        if idx == 3:
            # Permuted row i of conv4 holds original channel (i % l_final)*group
            # + i // l_final, so x.view(8, -1, F) folds into block matmuls.
            perm = (jnp.arange(F) % l_final) * group + jnp.arange(F) // l_final
            w_kfc, b = w_kfc[:, perm, :], b[perm]
        params[f"conv{idx + 1}_w"] = w_kfc.astype(jnp.bfloat16)
        params[f"conv{idx + 1}_b"] = b.reshape(F, 1)

    params["lstm1"] = _pack_lstm(keys[4], F, gate_perm)
    params["lstm2"] = _pack_lstm(keys[5], H, gate_perm)

    wfc = ortho(keys[6], (N_CLASSES, H), jnp.float32)       # torch (out, in)
    params["fc_w"] = jnp.transpose(wfc).astype(jnp.bfloat16)
    params["fc_b"] = jnp.zeros((1, N_CLASSES), jnp.float32)
    return params


# ------------------------------- forward wrapper -----------------------------
def har_forward(params, x):
    """x: (B, seq_len, n_channel), channels-last (the branch the torch model
    takes when input_channels == x.shape[2]).  Returns (B, n_classes)."""
    B, L, _ = x.shape
    K = FILTER_SIZE
    l_final = L - 4 * (K - 1)
    assert (B * l_final) % T_STEPS == 0, "x.view(8, -1, n_filters) must be exact"
    assert N_FILTERS % l_final == 0, "channel regrouping assumes l_final | n_filters"
    M = B * l_final // T_STEPS
    assert l_final % M == 0, "each LSTM step must stay within one conv batch"

    x_ncl = jnp.transpose(x, (0, 2, 1)).astype(jnp.float32)     # NCL, like torch Conv1d

    vmem = pl.BlockSpec(memory_space=pltpu.MemorySpace.VMEM)
    hbm = pl.BlockSpec(memory_space=pl.ANY)                     # stays in HBM, manual DMA

    wih1, whh1, bl1 = params["lstm1"]
    wih2, whh2, bl2 = params["lstm2"]
    args_and_specs = [
        (x_ncl, vmem),
        (params["conv1_w"], vmem), (params["conv1_b"], vmem),
        (params["conv2_w"], vmem), (params["conv2_b"], vmem),
        (params["conv3_w"], vmem), (params["conv3_b"], vmem),
        (params["conv4_w"], vmem), (params["conv4_b"], vmem),
        (wih1, vmem), (whh1, vmem), (bl1, vmem),
        (wih2, hbm), (whh2, hbm), (bl2, vmem),   # LSTM2 weights DMA'd in-kernel
        (params["fc_w"], vmem), (params["fc_b"], vmem),
    ]
    args = [a for a, _ in args_and_specs]
    in_specs = [s for _, s in args_and_specs]

    kernel = functools.partial(_har_fused_kernel, B=B, K=K, T=T_STEPS, M=M,
                               H=N_HIDDEN, L_FINAL=l_final)

    # Single launch, no grid -- the workload is latency-bound and fits entirely
    # in VMEM on v5e/v6e/v7x; no extra buffering / vmem-limit tuning needed.
    return pl.pallas_call(
        kernel,
        out_shape=jax.ShapeDtypeStruct((B, N_CLASSES), jnp.float32),
        in_specs=in_specs,
        out_specs=vmem,
        scratch_shapes=[
            pltpu.VMEM((N_HIDDEN, 4 * N_HIDDEN), jnp.bfloat16),  # wih2 landing buffer
            pltpu.VMEM((N_HIDDEN, 4 * N_HIDDEN), jnp.bfloat16),  # whh2 landing buffer
            pltpu.SemaphoreType.DMA((2,)),
        ],
    )(*args)


if __name__ == "__main__":
    key = jax.random.PRNGKey(0)
    k_param, k_x = jax.random.split(key)
    params = init_params(k_param)

    x = jax.random.normal(k_x, (BATCH, SEQ_LEN, N_CHANNEL), jnp.float32)

    out = jax.jit(har_forward)(params, x)
    out = jax.block_until_ready(out)
    assert out.shape == (BATCH, N_CLASSES) and out.dtype == jnp.float32
    print("KERNEL_OK")
</pallas_src>

<mosaic_0001>
module attributes {stable_mosaic.version = 11 : i64} {
  func.func @_har_fused_kernel(%arg0: memref<2x3x32xf32, #tpu.memory_space<vmem>>, %arg1: memref<5x64x3xbf16, #tpu.memory_space<vmem>>, %arg2: memref<64x1xf32, #tpu.memory_space<vmem>>, %arg3: memref<5x64x64xbf16, #tpu.memory_space<vmem>>, %arg4: memref<64x1xf32, #tpu.memory_space<vmem>>, %arg5: memref<5x64x64xbf16, #tpu.memory_space<vmem>>, %arg6: memref<64x1xf32, #tpu.memory_space<vmem>>, %arg7: memref<5x64x64xbf16, #tpu.memory_space<vmem>>, %arg8: memref<64x1xf32, #tpu.memory_space<vmem>>, %arg9: memref<64x512xbf16, #tpu.memory_space<vmem>>, %arg10: memref<128x512xbf16, #tpu.memory_space<vmem>>, %arg11: memref<1x512xf32, #tpu.memory_space<vmem>>, %arg12: memref<128x512xbf16, #tpu.memory_space<any>>, %arg13: memref<128x512xbf16, #tpu.memory_space<any>>, %arg14: memref<1x512xf32, #tpu.memory_space<vmem>>, %arg15: memref<128x18xbf16, #tpu.memory_space<vmem>>, %arg16: memref<1x18xf32, #tpu.memory_space<vmem>>, %arg17: memref<2x18xf32, #tpu.memory_space<vmem>>, %arg18: memref<128x512xbf16, #tpu.memory_space<vmem>>, %arg19: memref<128x512xbf16, #tpu.memory_space<vmem>>, %arg20: memref<2x!tpu.dma_semaphore, #tpu.memory_space<semaphore_mem>>) attributes {dimension_semantics = [], scalar_prefetch = 0 : i64, scratch_operands = 3 : i64, tpu.core_type = #tpu.core_type<tc>} {
    %c0_i32 = arith.constant 0 : i32
    %0 = tpu.memref_slice %arg20[%c0_i32] : memref<2x!tpu.dma_semaphore, #tpu.memory_space<semaphore_mem>> -> memref<1x!tpu.dma_semaphore, #tpu.memory_space<semaphore_mem>>
    %1 = tpu.memref_squeeze %0 : memref<1x!tpu.dma_semaphore, #tpu.memory_space<semaphore_mem>> -> memref<!tpu.dma_semaphore, #tpu.memory_space<semaphore_mem>>
    tpu.enqueue_dma source(%arg12 : memref<128x512xbf16, #tpu.memory_space<any>>) target(%arg18 : memref<128x512xbf16, #tpu.memory_space<vmem>>) target_semaphore(%1 : memref<!tpu.dma_semaphore, #tpu.memory_space<semaphore_mem>>)
    %c1_i32 = arith.constant 1 : i32
    %2 = tpu.memref_slice %arg20[%c1_i32] : memref<2x!tpu.dma_semaphore, #tpu.memory_space<semaphore_mem>> -> memref<1x!tpu.dma_semaphore, #tpu.memory_space<semaphore_mem>>
    %3 = tpu.memref_squeeze %2 : memref<1x!tpu.dma_semaphore, #tpu.memory_space<semaphore_mem>> -> memref<!tpu.dma_semaphore, #tpu.memory_space<semaphore_mem>>
    tpu.enqueue_dma source(%arg13 : memref<128x512xbf16, #tpu.memory_space<any>>) target(%arg19 : memref<128x512xbf16, #tpu.memory_space<vmem>>) target_semaphore(%3 : memref<!tpu.dma_semaphore, #tpu.memory_space<semaphore_mem>>)
    %c0 = arith.constant 0 : index
    %c0_0 = arith.constant 0 : index
    %c0_1 = arith.constant 0 : index
    %4 = vector.load %arg0[%c0, %c0_0, %c0_1] : memref<2x3x32xf32, #tpu.memory_space<vmem>>, vector<1x3x32xf32>
    %5 = vector.shape_cast %4 : vector<1x3x32xf32> to vector<3x32xf32>
    %c1 = arith.constant 1 : index
    %c0_2 = arith.constant 0 : index
    %c0_3 = arith.constant 0 : index
    %6 = vector.load %arg0[%c1, %c0_2, %c0_3] : memref<2x3x32xf32, #tpu.memory_space<vmem>>, vector<1x3x32xf32>
    %7 = vector.shape_cast %6 : vector<1x3x32xf32> to vector<3x32xf32>
    %8 = arith.truncf %5 : vector<3x32xf32> to vector<3x32xbf16>
    %c0_4 = arith.constant 0 : index
    %c0_5 = arith.constant 0 : index
    %c0_6 = arith.constant 0 : index
    %9 = vector.load %arg1[%c0_4, %c0_5, %c0_6] : memref<5x64x3xbf16, #tpu.memory_space<vmem>>, vector<1x64x3xbf16>
    %10 = vector.shape_cast %9 : vector<1x64x3xbf16> to vector<64x3xbf16>
    %11 = vector.extract_strided_slice %8 {offsets = [0, 0], sizes = [3, 28], strides = [1, 1]} : vector<3x32xbf16> to vector<3x28xbf16>
    %cst = arith.constant dense<0.000000e+00> : vector<64x28xf32>
    %12 = tpu.matmul %10, %11, %cst {dimension_numbers = #tpu.dot_dimension_numbers<[1], [0], [0], [1], [0, 0, 1, 1], [], []>} : vector<64x3xbf16>, vector<3x28xbf16>, vector<64x28xf32> -> vector<64x28xf32>
    %c1_7 = arith.constant 1 : index
    %c0_8 = arith.constant 0 : index
    %c0_9 = arith.constant 0 : index
    %13 = vector.load %arg1[%c1_7, %c0_8, %c0_9] : memref<5x64x3xbf16, #tpu.memory_space<vmem>>, vector<1x64x3xbf16>
    %14 = vector.shape_cast %13 : vector<1x64x3xbf16> to vector<64x3xbf16>
    %15 = vector.extract_strided_slice %8 {offsets = [0, 1], sizes = [3, 28], strides = [1, 1]} : vector<3x32xbf16> to vector<3x28xbf16>
    %cst_10 = arith.constant dense<0.000000e+00> : vector<64x28xf32>
    %16 = tpu.matmul %14, %15, %cst_10 {dimension_numbers = #tpu.dot_dimension_numbers<[1], [0], [0], [1], [0, 0, 1, 1], [], []>} : vector<64x3xbf16>, vector<3x28xbf16>, vector<64x28xf32> -> vector<64x28xf32>
    %17 = arith.addf %12, %16 : vector<64x28xf32>
    %c2 = arith.constant 2 : index
    %c0_11 = arith.constant 0 : index
    %c0_12 = arith.constant 0 : index
    %18 = vector.load %arg1[%c2, %c0_11, %c0_12] : memref<5x64x3xbf16, #tpu.memory_space<vmem>>, vector<1x64x3xbf16>
    %19 = vector.shape_cast %18 : vector<1x64x3xbf16> to vector<64x3xbf16>
    %20 = vector.extract_strided_slice %8 {offsets = [0, 2], sizes = [3, 28], strides = [1, 1]} : vector<3x32xbf16> to vector<3x28xbf16>
    %cst_13 = arith.constant dense<0.000000e+00> : vector<64x28xf32>
    %21 = tpu.matmul %19, %20, %cst_13 {dimension_numbers = #tpu.dot_dimension_numbers<[1], [0], [0], [1], [0, 0, 1, 1], [], []>} : vector<64x3xbf16>, vector<3x28xbf16>, vector<64x28xf32> -> vector<64x28xf32>
    %22 = arith.addf %17, %21 : vector<64x28xf32>
    %c3 = arith.constant 3 : index
    %c0_14 = arith.constant 0 : index
    %c0_15 = arith.constant 0 : index
    %23 = vector.load %arg1[%c3, %c0_14, %c0_15] : memref<5x64x3xbf16, #tpu.memory_space<vmem>>, vector<1x64x3xbf16>
    %24 = vector.shape_cast %23 : vector<1x64x3xbf16> to vector<64x3xbf16>
    %25 = vector.extract_strided_slice %8 {offsets = [0, 3], sizes = [3, 28], strides = [1, 1]} : vector<3x32xbf16> to vector<3x28xbf16>
    %cst_16 = arith.constant dense<0.000000e+00> : vector<64x28xf32>
    %26 = tpu.matmul %24, %25, %cst_16 {dimension_numbers = #tpu.dot_dimension_numbers<[1], [0], [0], [1], [0, 0, 1, 1], [], []>} : vector<64x3xbf16>, vector<3x28xbf16>, vector<64x28xf32> -> vector<64x28xf32>
    %27 = arith.addf %22, %26 : vector<64x28xf32>
    %c4 = arith.constant 4 : index
    %c0_17 = arith.constant 0 : index
    %c0_18 = arith.constant 0 : index
    %28 = vector.load %arg1[%c4, %c0_17, %c0_18] : memref<5x64x3xbf16, #tpu.memory_space<vmem>>, vector<1x64x3xbf16>
    %29 = vector.shape_cast %28 : vector<1x64x3xbf16> to vector<64x3xbf16>
    %30 = vector.extract_strided_slice %8 {offsets = [0, 4], sizes = [3, 28], strides = [1, 1]} : vector<3x32xbf16> to vector<3x28xbf16>
    %cst_19 = arith.constant dense<0.000000e+00> : vector<64x28xf32>
    %31 = tpu.matmul %29, %30, %cst_19 {dimension_numbers = #tpu.dot_dimension_numbers<[1], [0], [0], [1], [0, 0, 1, 1], [], []>} : vector<64x3xbf16>, vector<3x28xbf16>, vector<64x28xf32> -> vector<64x28xf32>
    %32 = arith.addf %27, %31 : vector<64x28xf32>
    %c0_20 = arith.constant 0 : index
    %c0_21 = arith.constant 0 : index
    %33 = vector.load %arg2[%c0_20, %c0_21] : memref<64x1xf32, #tpu.memory_space<vmem>>, vector<64x1xf32>
    %34 = vector.broadcast %33 : vector<64x1xf32> to vector<64x28xf32>
    %35 = arith.addf %32, %34 : vector<64x28xf32>
    %cst_22 = arith.constant 0.000000e+00 : f32
    %36 = vector.broadcast %cst_22 : f32 to vector<64x28xf32>
    %37 = arith.maximumf %35, %36 : vector<64x28xf32>
    %38 = arith.truncf %7 : vector<3x32xf32> to vector<3x32xbf16>
    %c0_23 = arith.constant 0 : index
    %c0_24 = arith.constant 0 : index
    %c0_25 = arith.constant 0 : index
    %39 = vector.load %arg1[%c0_23, %c0_24, %c0_25] : memref<5x64x3xbf16, #tpu.memory_space<vmem>>, vector<1x64x3xbf16>
    %40 = vector.shape_cast %39 : vector<1x64x3xbf16> to vector<64x3xbf16>
    %41 = vector.extract_strided_slice %38 {offsets = [0, 0], sizes = [3, 28], strides = [1, 1]} : vector<3x32xbf16> to vector<3x28xbf16>
    %cst_26 = arith.constant dense<0.000000e+00> : vector<64x28xf32>
    %42 = tpu.matmul %40, %41, %cst_26 {dimension_numbers = #tpu.dot_dimension_numbers<[1], [0], [0], [1], [0, 0, 1, 1], [], []>} : vector<64x3xbf16>, vector<3x28xbf16>, vector<64x28xf32> -> vector<64x28xf32>
    %c1_27 = arith.constant 1 : index
    %c0_28 = arith.constant 0 : index
    %c0_29 = arith.constant 0 : index
    %43 = vector.load %arg1[%c1_27, %c0_28, %c0_29] : memref<5x64x3xbf16, #tpu.memory_space<vmem>>, vector<1x64x3xbf16>
    %44 = vector.shape_cast %43 : vector<1x64x3xbf16> to vector<64x3xbf16>
    %45 = vector.extract_strided_slice %38 {offsets = [0, 1], sizes = [3, 28], strides = [1, 1]} : vector<3x32xbf16> to vector<3x28xbf16>
    %cst_30 = arith.constant dense<0.000000e+00> : vector<64x28xf32>
    %46 = tpu.matmul %44, %45, %cst_30 {dimension_numbers = #tpu.dot_dimension_numbers<[1], [0], [0], [1], [0, 0, 1, 1], [], []>} : vector<64x3xbf16>, vector<3x28xbf16>, vector<64x28xf32> -> vector<64x28xf32>
    %47 = arith.addf %42, %46 : vector<64x28xf32>
    %c2_31 = arith.constant 2 : index
    %c0_32 = arith.constant 0 : index
    %c0_33 = arith.constant 0 : index
    %48 = vector.load %arg1[%c2_31, %c0_32, %c0_33] : memref<5x64x3xbf16, #tpu.memory_space<vmem>>, vector<1x64x3xbf16>
    %49 = vector.shape_cast %48 : vector<1x64x3xbf16> to vector<64x3xbf16>
    %50 = vector.extract_strided_slice %38 {offsets = [0, 2], sizes = [3, 28], strides = [1, 1]} : vector<3x32xbf16> to vector<3x28xbf16>
    %cst_34 = arith.constant dense<0.000000e+00> : vector<64x28xf32>
    %51 = tpu.matmul %49, %50, %cst_34 {dimension_numbers = #tpu.dot_dimension_numbers<[1], [0], [0], [1], [0, 0, 1, 1], [], []>} : vector<64x3xbf16>, vector<3x28xbf16>, vector<64x28xf32> -> vector<64x28xf32>
    %52 = arith.addf %47, %51 : vector<64x28xf32>
    %c3_35 = arith.constant 3 : index
    %c0_36 = arith.constant 0 : index
    %c0_37 = arith.constant 0 : index
    %53 = vector.load %arg1[%c3_35, %c0_36, %c0_37] : memref<5x64x3xbf16, #tpu.memory_space<vmem>>, vector<1x64x3xbf16>
    %54 = vector.shape_cast %53 : vector<1x64x3xbf16> to vector<64x3xbf16>
    %55 = vector.extract_strided_slice %38 {offsets = [0, 3], sizes = [3, 28], strides = [1, 1]} : vector<3x32xbf16> to vector<3x28xbf16>
    %cst_38 = arith.constant dense<0.000000e+00> : vector<64x28xf32>
    %56 = tpu.matmul %54, %55, %cst_38 {dimension_numbers = #tpu.dot_dimension_numbers<[1], [0], [0], [1], [0, 0, 1, 1], [], []>} : vector<64x3xbf16>, vector<3x28xbf16>, vector<64x28xf32> -> vector<64x28xf32>
    %57 = arith.addf %52, %56 : vector<64x28xf32>
    %c4_39 = arith.constant 4 : index
    %c0_40 = arith.constant 0 : index
    %c0_41 = arith.constant 0 : index
    %58 = vector.load %arg1[%c4_39, %c0_40, %c0_41] : memref<5x64x3xbf16, #tpu.memory_space<vmem>>, vector<1x64x3xbf16>
    %59 = vector.shape_cast %58 : vector<1x64x3xbf16> to vector<64x3xbf16>
    %60 = vector.extract_strided_slice %38 {offsets = [0, 4], sizes = [3, 28], strides = [1, 1]} : vector<3x32xbf16> to vector<3x28xbf16>
    %cst_42 = arith.constant dense<0.000000e+00> : vector<64x28xf32>
    %61 = tpu.matmul %59, %60, %cst_42 {dimension_numbers = #tpu.dot_dimension_numbers<[1], [0], [0], [1], [0, 0, 1, 1], [], []>} : vector<64x3xbf16>, vector<3x28xbf16>, vector<64x28xf32> -> vector<64x28xf32>
    %62 = arith.addf %57, %61 : vector<64x28xf32>
    %c0_43 = arith.constant 0 : index
    %c0_44 = arith.constant 0 : index
    %63 = vector.load %arg2[%c0_43, %c0_44] : memref<64x1xf32, #tpu.memory_space<vmem>>, vector<64x1xf32>
    %64 = vector.broadcast %63 : vector<64x1xf32> to vector<64x28xf32>
    %65 = arith.addf %62, %64 : vector<64x28xf32>
    %cst_45 = arith.constant 0.000000e+00 : f32
    %66 = vector.broadcast %cst_45 : f32 to vector<64x28xf32>
    %67 = arith.maximumf %65, %66 : vector<64x28xf32>
    %68 = arith.truncf %37 : vector<64x28xf32> to vector<64x28xbf16>
    %c0_46 = arith.constant 0 : index
    %c0_47 = arith.constant 0 : index
    %c0_48 = arith.constant 0 : index
    %69 = vector.load %arg3[%c0_46, %c0_47, %c0_48] : memref<5x64x64xbf16, #tpu.memory_space<vmem>>, vector<1x64x64xbf16>
    %70 = vector.shape_cast %69 : vector<1x64x64xbf16> to vector<64x64xbf16>
    %71 = vector.extract_strided_slice %68 {offsets = [0, 0], sizes = [64, 24], strides = [1, 1]} : vector<64x28xbf16> to vector<64x24xbf16>
    %cst_49 = arith.constant dense<0.000000e+00> : vector<64x24xf32>
    %72 = tpu.matmul %70, %71, %cst_49 {dimension_numbers = #tpu.dot_dimension_numbers<[1], [0], [0], [1], [0, 0, 1, 1], [], []>} : vector<64x64xbf16>, vector<64x24xbf16>, vector<64x24xf32> -> vector<64x24xf32>
    %c1_50 = arith.constant 1 : index
    %c0_51 = arith.constant 0 : index
    %c0_52 = arith.constant 0 : index
    %73 = vector.load %arg3[%c1_50, %c0_51, %c0_52] : memref<5x64x64xbf16, #tpu.memory_space<vmem>>, vector<1x64x64xbf16>
    %74 = vector.shape_cast %73 : vector<1x64x64xbf16> to vector<64x64xbf16>
    %75 = vector.extract_strided_slice %68 {offsets = [0, 1], sizes = [64, 24], strides = [1, 1]} : vector<64x28xbf16> to vector<64x24xbf16>
    %cst_53 = arith.constant dense<0.000000e+00> : vector<64x24xf32>
    %76 = tpu.matmul %74, %75, %cst_53 {dimension_numbers = #tpu.dot_dimension_numbers<[1], [0], [0], [1], [0, 0, 1, 1], [], []>} : vector<64x64xbf16>, vector<64x24xbf16>, vector<64x24xf32> -> vector<64x24xf32>
    %77 = arith.addf %72, %76 : vector<64x24xf32>
    %c2_54 = arith.constant 2 : index
    %c0_55 = arith.constant 0 : index
    %c0_56 = arith.constant 0 : index
    %78 = vector.load %arg3[%c2_54, %c0_55, %c0_56] : memref<5x64x64xbf16, #tpu.memory_space<vmem>>, vector<1x64x64xbf16>
    %79 = vector.shape_cast %78 : vector<1x64x64xbf16> to vector<64x64xbf16>
    %80 = vector.extract_strided_slice %68 {offsets = [0, 2], sizes = [64, 24], strides = [1, 1]} : vector<64x28xbf16> to vector<64x24xbf16>
    %cst_57 = arith.constant dense<0.000000e+00> : vector<64x24xf32>
    %81 = tpu.matmul %79, %80, %cst_57 {dimension_numbers = #tpu.dot_dimension_numbers<[1], [0], [0], [1], [0, 0, 1, 1], [], []>} : vector<64x64xbf16>, vector<64x24xbf16>, vector<64x24xf32> -> vector<64x24xf32>
    %82 = arith.addf %77, %81 : vector<64x24xf32>
    %c3_58 = arith.constant 3 : index
    %c0_59 = arith.constant 0 : index
    %c0_60 = arith.constant 0 : index
    %83 = vector.load %arg3[%c3_58, %c0_59, %c0_60] : memref<5x64x64xbf16, #tpu.memory_space<vmem>>, vector<1x64x64xbf16>
    %84 = vector.shape_cast %83 : vector<1x64x64xbf16> to vector<64x64xbf16>
    %85 = vector.extract_strided_slice %68 {offsets = [0, 3], sizes = [64, 24], strides = [1, 1]} : vector<64x28xbf16> to vector<64x24xbf16>
    %cst_61 = arith.constant dense<0.000000e+00> : vector<64x24xf32>
    %86 = tpu.matmul %84, %85, %cst_61 {dimension_numbers = #tpu.dot_dimension_numbers<[1], [0], [0], [1], [0, 0, 1, 1], [], []>} : vector<64x64xbf16>, vector<64x24xbf16>, vector<64x24xf32> -> vector<64x24xf32>
    %87 = arith.addf %82, %86 : vector<64x24xf32>
    %c4_62 = arith.constant 4 : index
    %c0_63 = arith.constant 0 : index
    %c0_64 = arith.constant 0 : index
    %88 = vector.load %arg3[%c4_62, %c0_63, %c0_64] : memref<5x64x64xbf16, #tpu.memory_space<vmem>>, vector<1x64x64xbf16>
    %89 = vector.shape_cast %88 : vector<1x64x64xbf16> to vector<64x64xbf16>
    %90 = vector.extract_strided_slice %68 {offsets = [0, 4], sizes = [64, 24], strides = [1, 1]} : vector<64x28xbf16> to vector<64x24xbf16>
    %cst_65 = arith.constant dense<0.000000e+00> : vector<64x24xf32>
    %91 = tpu.matmul %89, %90, %cst_65 {dimension_numbers = #tpu.dot_dimension_numbers<[1], [0], [0], [1], [0, 0, 1, 1], [], []>} : vector<64x64xbf16>, vector<64x24xbf16>, vector<64x24xf32> -> vector<64x24xf32>
    %92 = arith.addf %87, %91 : vector<64x24xf32>
    %c0_66 = arith.constant 0 : index
    %c0_67 = arith.constant 0 : index
    %93 = vector.load %arg4[%c0_66, %c0_67] : memref<64x1xf32, #tpu.memory_space<vmem>>, vector<64x1xf32>
    %94 = vector.broadcast %93 : vector<64x1xf32> to vector<64x24xf32>
    %95 = arith.addf %92, %94 : vector<64x24xf32>
    %cst_68 = arith.constant 0.000000e+00 : f32
    %96 = vector.broadcast %cst_68 : f32 to vector<64x24xf32>
    %97 = arith.maximumf %95, %96 : vector<64x24xf32>
    %98 = arith.truncf %67 : vector<64x28xf32> to vector<64x28xbf16>
    %c0_69 = arith.constant 0 : index
    %c0_70 = arith.constant 0 : index
    %c0_71 = arith.constant 0 : index
    %99 = vector.load %arg3[%c0_69, %c0_70, %c0_71] : memref<5x64x64xbf16, #tpu.memory_space<vmem>>, vector<1x64x64xbf16>
    %100 = vector.shape_cast %99 : vector<1x64x64xbf16> to vector<64x64xbf16>
    %101 = vector.extract_strided_slice %98 {offsets = [0, 0], sizes = [64, 24], strides = [1, 1]} : vector<64x28xbf16> to vector<64x24xbf16>
    %cst_72 = arith.constant dense<0.000000e+00> : vector<64x24xf32>
    %102 = tpu.matmul %100, %101, %cst_72 {dimension_numbers = #tpu.dot_dimension_numbers<[1], [0], [0], [1], [0, 0, 1, 1], [], []>} : vector<64x64xbf16>, vector<64x24xbf16>, vector<64x24xf32> -> vector<64x24xf32>
    %c1_73 = arith.constant 1 : index
    %c0_74 = arith.constant 0 : index
    %c0_75 = arith.constant 0 : index
    %103 = vector.load %arg3[%c1_73, %c0_74, %c0_75] : memref<5x64x64xbf16, #tpu.memory_space<vmem>>, vector<1x64x64xbf16>
    %104 = vector.shape_cast %103 : vector<1x64x64xbf16> to vector<64x64xbf16>
    %105 = vector.extract_strided_slice %98 {offsets = [0, 1], sizes = [64, 24], strides = [1, 1]} : vector<64x28xbf16> to vector<64x24xbf16>
    %cst_76 = arith.constant dense<0.000000e+00> : vector<64x24xf32>
    %106 = tpu.matmul %104, %105, %cst_76 {dimension_numbers = #tpu.dot_dimension_numbers<[1], [0], [0], [1], [0, 0, 1, 1], [], []>} : vector<64x64xbf16>, vector<64x24xbf16>, vector<64x24xf32> -> vector<64x24xf32>
    %107 = arith.addf %102, %106 : vector<64x24xf32>
    %c2_77 = arith.constant 2 : index
    %c0_78 = arith.constant 0 : index
    %c0_79 = arith.constant 0 : index
    %108 = vector.load %arg3[%c2_77, %c0_78, %c0_79] : memref<5x64x64xbf16, #tpu.memory_space<vmem>>, vector<1x64x64xbf16>
    %109 = vector.shape_cast %108 : vector<1x64x64xbf16> to vector<64x64xbf16>
    %110 = vector.extract_strided_slice %98 {offsets = [0, 2], sizes = [64, 24], strides = [1, 1]} : vector<64x28xbf16> to vector<64x24xbf16>
    %cst_80 = arith.constant dense<0.000000e+00> : vector<64x24xf32>
    %111 = tpu.matmul %109, %110, %cst_80 {dimension_numbers = #tpu.dot_dimension_numbers<[1], [0], [0], [1], [0, 0, 1, 1], [], []>} : vector<64x64xbf16>, vector<64x24xbf16>, vector<64x24xf32> -> vector<64x24xf32>
    %112 = arith.addf %107, %111 : vector<64x24xf32>
    %c3_81 = arith.constant 3 : index
    %c0_82 = arith.constant 0 : index
    %c0_83 = arith.constant 0 : index
    %113 = vector.load %arg3[%c3_81, %c0_82, %c0_83] : memref<5x64x64xbf16, #tpu.memory_space<vmem>>, vector<1x64x64xbf16>
    %114 = vector.shape_cast %113 : vector<1x64x64xbf16> to vector<64x64xbf16>
    %115 = vector.extract_strided_slice %98 {offsets = [0, 3], sizes = [64, 24], strides = [1, 1]} : vector<64x28xbf16> to vector<64x24xbf16>
    %cst_84 = arith.constant dense<0.000000e+00> : vector<64x24xf32>
    %116 = tpu.matmul %114, %115, %cst_84 {dimension_numbers = #tpu.dot_dimension_numbers<[1], [0], [0], [1], [0, 0, 1, 1], [], []>} : vector<64x64xbf16>, vector<64x24xbf16>, vector<64x24xf32> -> vector<64x24xf32>
    %117 = arith.addf %112, %116 : vector<64x24xf32>
    %c4_85 = arith.constant 4 : index
    %c0_86 = arith.constant 0 : index
    %c0_87 = arith.constant 0 : index
    %118 = vector.load %arg3[%c4_85, %c0_86, %c0_87] : memref<5x64x64xbf16, #tpu.memory_space<vmem>>, vector<1x64x64xbf16>
    %119 = vector.shape_cast %118 : vector<1x64x64xbf16> to vector<64x64xbf16>
    %120 = vector.extract_strided_slice %98 {offsets = [0, 4], sizes = [64, 24], strides = [1, 1]} : vector<64x28xbf16> to vector<64x24xbf16>
    %cst_88 = arith.constant dense<0.000000e+00> : vector<64x24xf32>
    %121 = tpu.matmul %119, %120, %cst_88 {dimension_numbers = #tpu.dot_dimension_numbers<[1], [0], [0], [1], [0, 0, 1, 1], [], []>} : vector<64x64xbf16>, vector<64x24xbf16>, vector<64x24xf32> -> vector<64x24xf32>
    %122 = arith.addf %117, %121 : vector<64x24xf32>
    %c0_89 = arith.constant 0 : index
    %c0_90 = arith.constant 0 : index
    %123 = vector.load %arg4[%c0_89, %c0_90] : memref<64x1xf32, #tpu.memory_space<vmem>>, vector<64x1xf32>
    %124 = vector.broadcast %123 : vector<64x1xf32> to vector<64x24xf32>
    %125 = arith.addf %122, %124 : vector<64x24xf32>
    %cst_91 = arith.constant 0.000000e+00 : f32
    %126 = vector.broadcast %cst_91 : f32 to vector<64x24xf32>
    %127 = arith.maximumf %125, %126 : vector<64x24xf32>
    %128 = arith.truncf %97 : vector<64x24xf32> to vector<64x24xbf16>
    %c0_92 = arith.constant 0 : index
    %c0_93 = arith.constant 0 : index
    %c0_94 = arith.constant 0 : index
    %129 = vector.load %arg5[%c0_92, %c0_93, %c0_94] : memref<5x64x64xbf16, #tpu.memory_space<vmem>>, vector<1x64x64xbf16>
    %130 = vector.shape_cast %129 : vector<1x64x64xbf16> to vector<64x64xbf16>
    %131 = vector.extract_strided_slice %128 {offsets = [0, 0], sizes = [64, 20], strides = [1, 1]} : vector<64x24xbf16> to vector<64x20xbf16>
    %cst_95 = arith.constant dense<0.000000e+00> : vector<64x20xf32>
    %132 = tpu.matmul %130, %131, %cst_95 {dimension_numbers = #tpu.dot_dimension_numbers<[1], [0], [0], [1], [0, 0, 1, 1], [], []>} : vector<64x64xbf16>, vector<64x20xbf16>, vector<64x20xf32> -> vector<64x20xf32>
    %c1_96 = arith.constant 1 : index
    %c0_97 = arith.constant 0 : index
    %c0_98 = arith.constant 0 : index
    %133 = vector.load %arg5[%c1_96, %c0_97, %c0_98] : memref<5x64x64xbf16, #tpu.memory_space<vmem>>, vector<1x64x64xbf16>
    %134 = vector.shape_cast %133 : vector<1x64x64xbf16> to vector<64x64xbf16>
    %135 = vector.extract_strided_slice %128 {offsets = [0, 1], sizes = [64, 20], strides = [1, 1]} : vector<64x24xbf16> to vector<64x20xbf16>
    %cst_99 = arith.constant dense<0.000000e+00> : vector<64x20xf32>
    %136 = tpu.matmul %134, %135, %cst_99 {dimension_numbers = #tpu.dot_dimension_numbers<[1], [0], [0], [1], [0, 0, 1, 1], [], []>} : vector<64x64xbf16>, vector<64x20xbf16>, vector<64x20xf32> -> vector<64x20xf32>
    %137 = arith.addf %132, %136 : vector<64x20xf32>
    %c2_100 = arith.constant 2 : index
    %c0_101 = arith.constant 0 : index
    %c0_102 = arith.constant 0 : index
    %138 = vector.load %arg5[%c2_100, %c0_101, %c0_102] : memref<5x64x64xbf16, #tpu.memory_space<vmem>>, vector<1x64x64xbf16>
    %139 = vector.shape_cast %138 : vector<1x64x64xbf16> to vector<64x64xbf16>
    %140 = vector.extract_strided_slice %128 {offsets = [0, 2], sizes = [64, 20], strides = [1, 1]} : vector<64x24xbf16> to vector<64x20xbf16>
    %cst_103 = arith.constant dense<0.000000e+00> : vector<64x20xf32>
    %141 = tpu.matmul %139, %140, %cst_103 {dimension_numbers = #tpu.dot_dimension_numbers<[1], [0], [0], [1], [0, 0, 1, 1], [], []>} : vector<64x64xbf16>, vector<64x20xbf16>, vector<64x20xf32> -> vector<64x20xf32>
    %142 = arith.addf %137, %141 : vector<64x20xf32>
    %c3_104 = arith.constant 3 : index
    %c0_105 = arith.constant 0 : index
    %c0_106 = arith.constant 0 : index
    %143 = vector.load %arg5[%c3_104, %c0_105, %c0_106] : memref<5x64x64xbf16, #tpu.memory_space<vmem>>, vector<1x64x64xbf16>
    %144 = vector.shape_cast %143 : vector<1x64x64xbf16> to vector<64x64xbf16>
    %145 = vector.extract_strided_slice %128 {offsets = [0, 3], sizes = [64, 20], strides = [1, 1]} : vector<64x24xbf16> to vector<64x20xbf16>
    %cst_107 = arith.constant dense<0.000000e+00> : vector<64x20xf32>
    %146 = tpu.matmul %144, %145, %cst_107 {dimension_numbers = #tpu.dot_dimension_numbers<[1], [0], [0], [1], [0, 0, 1, 1], [], []>} : vector<64x64xbf16>, vector<64x20xbf16>, vector<64x20xf32> -> vector<64x20xf32>
    %147 = arith.addf %142, %146 : vector<64x20xf32>
    %c4_108 = arith.constant 4 : index
    %c0_109 = arith.constant 0 : index
    %c0_110 = arith.constant 0 : index
    %148 = vector.load %arg5[%c4_108, %c0_109, %c0_110] : memref<5x64x64xbf16, #tpu.memory_space<vmem>>, vector<1x64x64xbf16>
    %149 = vector.shape_cast %148 : vector<1x64x64xbf16> to vector<64x64xbf16>
    %150 = vector.extract_strided_slice %128 {offsets = [0, 4], sizes = [64, 20], strides = [1, 1]} : vector<64x24xbf16> to vector<64x20xbf16>
    %cst_111 = arith.constant dense<0.000000e+00> : vector<64x20xf32>
    %151 = tpu.matmul %149, %150, %cst_111 {dimension_numbers = #tpu.dot_dimension_numbers<[1], [0], [0], [1], [0, 0, 1, 1], [], []>} : vector<64x64xbf16>, vector<64x20xbf16>, vector<64x20xf32> -> vector<64x20xf32>
    %152 = arith.addf %147, %151 : vector<64x20xf32>
    %c0_112 = arith.constant 0 : index
    %c0_113 = arith.constant 0 : index
    %153 = vector.load %arg6[%c0_112, %c0_113] : memref<64x1xf32, #tpu.memory_space<vmem>>, vector<64x1xf32>
    %154 = vector.broadcast %153 : vector<64x1xf32> to vector<64x20xf32>
    %155 = arith.addf %152, %154 : vector<64x20xf32>
    %cst_114 = arith.constant 0.000000e+00 : f32
    %156 = vector.broadcast %cst_114 : f32 to vector<64x20xf32>
    %157 = arith.maximumf %155, %156 : vector<64x20xf32>
    %158 = arith.truncf %127 : vector<64x24xf32> to vector<64x24xbf16>
    %c0_115 = arith.constant 0 : index
    %c0_116 = arith.constant 0 : index
    %c0_117 = arith.constant 0 : index
    %159 = vector.load %arg5[%c0_115, %c0_116, %c0_117] : memref<5x64x64xbf16, #tpu.memory_space<vmem>>, vector<1x64x64xbf16>
    %160 = vector.shape_cast %159 : vector<1x64x64xbf16> to vector<64x64xbf16>
    %161 = vector.extract_strided_slice %158 {offsets = [0, 0], sizes = [64, 20], strides = [1, 1]} : vector<64x24xbf16> to vector<64x20xbf16>
    %cst_118 = arith.constant dense<0.000000e+00> : vector<64x20xf32>
    %162 = tpu.matmul %160, %161, %cst_118 {dimension_numbers = #tpu.dot_dimension_numbers<[1], [0], [0], [1], [0, 0, 1, 1], [], []>} : vector<64x64xbf16>, vector<64x20xbf16>, vector<64x20xf32> -> vector<64x20xf32>
    %c1_119 = arith.constant 1 : index
    %c0_120 = arith.constant 0 : index
    %c0_121 = arith.constant 0 : index
    %163 = vector.load %arg5[%c1_119, %c0_120, %c0_121] : memref<5x64x64xbf16, #tpu.memory_space<vmem>>, vector<1x64x64xbf16>
    %164 = vector.shape_cast %163 : vector<1x64x64xbf16> to vector<64x64xbf16>
    %165 = vector.extract_strided_slice %158 {offsets = [0, 1], sizes = [64, 20], strides = [1, 1]} : vector<64x24xbf16> to vector<64x20xbf16>
    %cst_122 = arith.constant dense<0.000000e+00> : vector<64x20xf32>
    %166 = tpu.matmul %164, %165, %cst_122 {dimension_numbers = #tpu.dot_dimension_numbers<[1], [0], [0], [1], [0, 0, 1, 1], [], []>} : vector<64x64xbf16>, vector<64x20xbf16>, vector<64x20xf32> -> vector<64x20xf32>
    %167 = arith.addf %162, %166 : vector<64x20xf32>
    %c2_123 = arith.constant 2 : index
    %c0_124 = arith.constant 0 : index
    %c0_125 = arith.constant 0 : index
    %168 = vector.load %arg5[%c2_123, %c0_124, %c0_125] : memref<5x64x64xbf16, #tpu.memory_space<vmem>>, vector<1x64x64xbf16>
    %169 = vector.shape_cast %168 : vector<1x64x64xbf16> to vector<64x64xbf16>
    %170 = vector.extract_strided_slice %158 {offsets = [0, 2], sizes = [64, 20], strides = [1, 1]} : vector<64x24xbf16> to vector<64x20xbf16>
    %cst_126 = arith.constant dense<0.000000e+00> : vector<64x20xf32>
    %171 = tpu.matmul %169, %170, %cst_126 {dimension_numbers = #tpu.dot_dimension_numbers<[1], [0], [0], [1], [0, 0, 1, 1], [], []>} : vector<64x64xbf16>, vector<64x20xbf16>, vector<64x20xf32> -> vector<64x20xf32>
    %172 = arith.addf %167, %171 : vector<64x20xf32>
    %c3_127 = arith.constant 3 : index
    %c0_128 = arith.constant 0 : index
    %c0_129 = arith.constant 0 : index
    %173 = vector.load %arg5[%c3_127, %c0_128, %c0_129] : memref<5x64x64xbf16, #tpu.memory_space<vmem>>, vector<1x64x64xbf16>
    %174 = vector.shape_cast %173 : vector<1x64x64xbf16> to vector<64x64xbf16>
    %175 = vector.extract_strided_slice %158 {offsets = [0, 3], sizes = [64, 20], strides = [1, 1]} : vector<64x24xbf16> to vector<64x20xbf16>
    %cst_130 = arith.constant dense<0.000000e+00> : vector<64x20xf32>
    %176 = tpu.matmul %174, %175, %cst_130 {dimension_numbers = #tpu.dot_dimension_numbers<[1], [0], [0], [1], [0, 0, 1, 1], [], []>} : vector<64x64xbf16>, vector<64x20xbf16>, vector<64x20xf32> -> vector<64x20xf32>
    %177 = arith.addf %172, %176 : vector<64x20xf32>
    %c4_131 = arith.constant 4 : index
    %c0_132 = arith.constant 0 : index
    %c0_133 = arith.constant 0 : index
    %178 = vector.load %arg5[%c4_131, %c0_132, %c0_133] : memref<5x64x64xbf16, #tpu.memory_space<vmem>>, vector<1x64x64xbf16>
    %179 = vector.shape_cast %178 : vector<1x64x64xbf16> to vector<64x64xbf16>
    %180 = vector.extract_strided_slice %158 {offsets = [0, 4], sizes = [64, 20], strides = [1, 1]} : vector<64x24xbf16> to vector<64x20xbf16>
    %cst_134 = arith.constant dense<0.000000e+00> : vector<64x20xf32>
    %181 = tpu.matmul %179, %180, %cst_134 {dimension_numbers = #tpu.dot_dimension_numbers<[1], [0], [0], [1], [0, 0, 1, 1], [], []>} : vector<64x64xbf16>, vector<64x20xbf16>, vector<64x20xf32> -> vector<64x20xf32>
    %182 = arith.addf %177, %181 : vector<64x20xf32>
    %c0_135 = arith.constant 0 : index
    %c0_136 = arith.constant 0 : index
    %183 = vector.load %arg6[%c0_135, %c0_136] : memref<64x1xf32, #tpu.memory_space<vmem>>, vector<64x1xf32>
    %184 = vector.broadcast %183 : vector<64x1xf32> to vector<64x20xf32>
    %185 = arith.addf %182, %184 : vector<64x20xf32>
    %cst_137 = arith.constant 0.000000e+00 : f32
    %186 = vector.broadcast %cst_137 : f32 to vector<64x20xf32>
    %187 = arith.maximumf %185, %186 : vector<64x20xf32>
    %188 = arith.truncf %157 : vector<64x20xf32> to vector<64x20xbf16>
    %c0_138 = arith.constant 0 : index
    %c0_139 = arith.constant 0 : index
    %c0_140 = arith.constant 0 : index
    %189 = vector.load %arg7[%c0_138, %c0_139, %c0_140] : memref<5x64x64xbf16, #tpu.memory_space<vmem>>, vector<1x64x64xbf16>
    %190 = vector.shape_cast %189 : vector<1x64x64xbf16> to vector<64x64xbf16>
    %191 = vector.extract_strided_slice %188 {offsets = [0, 0], sizes = [64, 16], strides = [1, 1]} : vector<64x20xbf16> to vector<64x16xbf16>
    %cst_141 = arith.constant dense<0.000000e+00> : vector<64x16xf32>
    %192 = tpu.matmul %190, %191, %cst_141 {dimension_numbers = #tpu.dot_dimension_numbers<[1], [0], [0], [1], [0, 0, 1, 1], [], []>} : vector<64x64xbf16>, vector<64x16xbf16>, vector<64x16xf32> -> vector<64x16xf32>
    %c1_142 = arith.constant 1 : index
    %c0_143 = arith.constant 0 : index
    %c0_144 = arith.constant 0 : index
    %193 = vector.load %arg7[%c1_142, %c0_143, %c0_144] : memref<5x64x64xbf16, #tpu.memory_space<vmem>>, vector<1x64x64xbf16>
    %194 = vector.shape_cast %193 : vector<1x64x64xbf16> to vector<64x64xbf16>
    %195 = vector.extract_strided_slice %188 {offsets = [0, 1], sizes = [64, 16], strides = [1, 1]} : vector<64x20xbf16> to vector<64x16xbf16>
    %cst_145 = arith.constant dense<0.000000e+00> : vector<64x16xf32>
    %196 = tpu.matmul %194, %195, %cst_145 {dimension_numbers = #tpu.dot_dimension_numbers<[1], [0], [0], [1], [0, 0, 1, 1], [], []>} : vector<64x64xbf16>, vector<64x16xbf16>, vector<64x16xf32> -> vector<64x16xf32>
    %197 = arith.addf %192, %196 : vector<64x16xf32>
    %c2_146 = arith.constant 2 : index
    %c0_147 = arith.constant 0 : index
    %c0_148 = arith.constant 0 : index
    %198 = vector.load %arg7[%c2_146, %c0_147, %c0_148] : memref<5x64x64xbf16, #tpu.memory_space<vmem>>, vector<1x64x64xbf16>
    %199 = vector.shape_cast %198 : vector<1x64x64xbf16> to vector<64x64xbf16>
    %200 = vector.extract_strided_slice %188 {offsets = [0, 2], sizes = [64, 16], strides = [1, 1]} : vector<64x20xbf16> to vector<64x16xbf16>
    %cst_149 = arith.constant dense<0.000000e+00> : vector<64x16xf32>
    %201 = tpu.matmul %199, %200, %cst_149 {dimension_numbers = #tpu.dot_dimension_numbers<[1], [0], [0], [1], [0, 0, 1, 1], [], []>} : vector<64x64xbf16>, vector<64x16xbf16>, vector<64x16xf32> -> vector<64x16xf32>
    %202 = arith.addf %197, %201 : vector<64x16xf32>
    %c3_150 = arith.constant 3 : index
    %c0_151 = arith.constant 0 : index
    %c0_152 = arith.constant 0 : index
    %203 = vector.load %arg7[%c3_150, %c0_151, %c0_152] : memref<5x64x64xbf16, #tpu.memory_space<vmem>>, vector<1x64x64xbf16>
    %204 = vector.shape_cast %203 : vector<1x64x64xbf16> to vector<64x64xbf16>
    %205 = vector.extract_strided_slice %188 {offsets = [0, 3], sizes = [64, 16], strides = [1, 1]} : vector<64x20xbf16> to vector<64x16xbf16>
    %cst_153 = arith.constant dense<0.000000e+00> : vector<64x16xf32>
    %206 = tpu.matmul %204, %205, %cst_153 {dimension_numbers = #tpu.dot_dimension_numbers<[1], [0], [0], [1], [0, 0, 1, 1], [], []>} : vector<64x64xbf16>, vector<64x16xbf16>, vector<64x16xf32> -> vector<64x16xf32>
    %207 = arith.addf %202, %206 : vector<64x16xf32>
    %c4_154 = arith.constant 4 : index
    %c0_155 = arith.constant 0 : index
    %c0_156 = arith.constant 0 : index
    %208 = vector.load %arg7[%c4_154, %c0_155, %c0_156] : memref<5x64x64xbf16, #tpu.memory_space<vmem>>, vector<1x64x64xbf16>
    %209 = vector.shape_cast %208 : vector<1x64x64xbf16> to vector<64x64xbf16>
    %210 = vector.extract_strided_slice %188 {offsets = [0, 4], sizes = [64, 16], strides = [1, 1]} : vector<64x20xbf16> to vector<64x16xbf16>
    %cst_157 = arith.constant dense<0.000000e+00> : vector<64x16xf32>
    %211 = tpu.matmul %209, %210, %cst_157 {dimension_numbers = #tpu.dot_dimension_numbers<[1], [0], [0], [1], [0, 0, 1, 1], [], []>} : vector<64x64xbf16>, vector<64x16xbf16>, vector<64x16xf32> -> vector<64x16xf32>
    %212 = arith.addf %207, %211 : vector<64x16xf32>
    %c0_158 = arith.constant 0 : index
    %c0_159 = arith.constant 0 : index
    %213 = vector.load %arg8[%c0_158, %c0_159] : memref<64x1xf32, #tpu.memory_space<vmem>>, vector<64x1xf32>
    %214 = vector.broadcast %213 : vector<64x1xf32> to vector<64x16xf32>
    %215 = arith.addf %212, %214 : vector<64x16xf32>
    %cst_160 = arith.constant 0.000000e+00 : f32
    %216 = vector.broadcast %cst_160 : f32 to vector<64x16xf32>
    %217 = arith.maximumf %215, %216 : vector<64x16xf32>
    %218 = arith.truncf %187 : vector<64x20xf32> to vector<64x20xbf16>
    %c0_161 = arith.constant 0 : index
    %c0_162 = arith.constant 0 : index
    %c0_163 = arith.constant 0 : index
    %219 = vector.load %arg7[%c0_161, %c0_162, %c0_163] : memref<5x64x64xbf16, #tpu.memory_space<vmem>>, vector<1x64x64xbf16>
    %220 = vector.shape_cast %219 : vector<1x64x64xbf16> to vector<64x64xbf16>
    %221 = vector.extract_strided_slice %218 {offsets = [0, 0], sizes = [64, 16], strides = [1, 1]} : vector<64x20xbf16> to vector<64x16xbf16>
    %cst_164 = arith.constant dense<0.000000e+00> : vector<64x16xf32>
    %222 = tpu.matmul %220, %221, %cst_164 {dimension_numbers = #tpu.dot_dimension_numbers<[1], [0], [0], [1], [0, 0, 1, 1], [], []>} : vector<64x64xbf16>, vector<64x16xbf16>, vector<64x16xf32> -> vector<64x16xf32>
    %c1_165 = arith.constant 1 : index
    %c0_166 = arith.constant 0 : index
    %c0_167 = arith.constant 0 : index
    %223 = vector.load %arg7[%c1_165, %c0_166, %c0_167] : memref<5x64x64xbf16, #tpu.memory_space<vmem>>, vector<1x64x64xbf16>
    %224 = vector.shape_cast %223 : vector<1x64x64xbf16> to vector<64x64xbf16>
    %225 = vector.extract_strided_slice %218 {offsets = [0, 1], sizes = [64, 16], strides = [1, 1]} : vector<64x20xbf16> to vector<64x16xbf16>
    %cst_168 = arith.constant dense<0.000000e+00> : vector<64x16xf32>
    %226 = tpu.matmul %224, %225, %cst_168 {dimension_numbers = #tpu.dot_dimension_numbers<[1], [0], [0], [1], [0, 0, 1, 1], [], []>} : vector<64x64xbf16>, vector<64x16xbf16>, vector<64x16xf32> -> vector<64x16xf32>
    %227 = arith.addf %222, %226 : vector<64x16xf32>
    %c2_169 = arith.constant 2 : index
    %c0_170 = arith.constant 0 : index
    %c0_171 = arith.constant 0 : index
    %228 = vector.load %arg7[%c2_169, %c0_170, %c0_171] : memref<5x64x64xbf16, #tpu.memory_space<vmem>>, vector<1x64x64xbf16>
    %229 = vector.shape_cast %228 : vector<1x64x64xbf16> to vector<64x64xbf16>
    %230 = vector.extract_strided_slice %218 {offsets = [0, 2], sizes = [64, 16], strides = [1, 1]} : vector<64x20xbf16> to vector<64x16xbf16>
    %cst_172 = arith.constant dense<0.000000e+00> : vector<64x16xf32>
    %231 = tpu.matmul %229, %230, %cst_172 {dimension_numbers = #tpu.dot_dimension_numbers<[1], [0], [0], [1], [0, 0, 1, 1], [], []>} : vector<64x64xbf16>, vector<64x16xbf16>, vector<64x16xf32> -> vector<64x16xf32>
    %232 = arith.addf %227, %231 : vector<64x16xf32>
    %c3_173 = arith.constant 3 : index
    %c0_174 = arith.constant 0 : index
    %c0_175 = arith.constant 0 : index
    %233 = vector.load %arg7[%c3_173, %c0_174, %c0_175] : memref<5x64x64xbf16, #tpu.memory_space<vmem>>, vector<1x64x64xbf16>
    %234 = vector.shape_cast %233 : vector<1x64x64xbf16> to vector<64x64xbf16>
    %235 = vector.extract_strided_slice %218 {offsets = [0, 3], sizes = [64, 16], strides = [1, 1]} : vector<64x20xbf16> to vector<64x16xbf16>
    %cst_176 = arith.constant dense<0.000000e+00> : vector<64x16xf32>
    %236 = tpu.matmul %234, %235, %cst_176 {dimension_numbers = #tpu.dot_dimension_numbers<[1], [0], [0], [1], [0, 0, 1, 1], [], []>} : vector<64x64xbf16>, vector<64x16xbf16>, vector<64x16xf32> -> vector<64x16xf32>
    %237 = arith.addf %232, %236 : vector<64x16xf32>
    %c4_177 = arith.constant 4 : index
    %c0_178 = arith.constant 0 : index
    %c0_179 = arith.constant 0 : index
    %238 = vector.load %arg7[%c4_177, %c0_178, %c0_179] : memref<5x64x64xbf16, #tpu.memory_space<vmem>>, vector<1x64x64xbf16>
    %239 = vector.shape_cast %238 : vector<1x64x64xbf16> to vector<64x64xbf16>
    %240 = vector.extract_strided_slice %218 {offsets = [0, 4], sizes = [64, 16], strides = [1, 1]} : vector<64x20xbf16> to vector<64x16xbf16>
    %cst_180 = arith.constant dense<0.000000e+00> : vector<64x16xf32>
    %241 = tpu.matmul %239, %240, %cst_180 {dimension_numbers = #tpu.dot_dimension_numbers<[1], [0], [0], [1], [0, 0, 1, 1], [], []>} : vector<64x64xbf16>, vector<64x16xbf16>, vector<64x16xf32> -> vector<64x16xf32>
    %242 = arith.addf %237, %241 : vector<64x16xf32>
    %c0_181 = arith.constant 0 : index
    %c0_182 = arith.constant 0 : index
    %243 = vector.load %arg8[%c0_181, %c0_182] : memref<64x1xf32, #tpu.memory_space<vmem>>, vector<64x1xf32>
    %244 = vector.broadcast %243 : vector<64x1xf32> to vector<64x16xf32>
    %245 = arith.addf %242, %244 : vector<64x16xf32>
    %cst_183 = arith.constant 0.000000e+00 : f32
    %246 = vector.broadcast %cst_183 : f32 to vector<64x16xf32>
    %247 = arith.maximumf %245, %246 : vector<64x16xf32>
    %248 = arith.truncf %217 : vector<64x16xf32> to vector<64x16xbf16>
    %249 = vector.extract_strided_slice %248 {offsets = [0, 0], sizes = [16, 16], strides = [1, 1]} : vector<64x16xbf16> to vector<16x16xbf16>
    %c0_184 = arith.constant 0 : index
    %c0_185 = arith.constant 0 : index
    %250 = vector.load %arg9[%c0_184, %c0_185] : memref<64x512xbf16, #tpu.memory_space<vmem>>, vector<16x512xbf16>
    %cst_186 = arith.constant dense<0.000000e+00> : vector<16x512xf32>
    %251 = tpu.matmul %249, %250, %cst_186 {dimension_numbers = #tpu.dot_dimension_numbers<[1], [0], [0], [1], [0, 0, 1, 1], [], []>} : vector<16x16xbf16>, vector<16x512xbf16>, vector<16x512xf32> -> vector<16x512xf32>
    %252 = vector.extract_strided_slice %248 {offsets = [16, 0], sizes = [16, 16], strides = [1, 1]} : vector<64x16xbf16> to vector<16x16xbf16>
    %c16 = arith.constant 16 : index
    %c0_187 = arith.constant 0 : index
    %253 = vector.load %arg9[%c16, %c0_187] : memref<64x512xbf16, #tpu.memory_space<vmem>>, vector<16x512xbf16>
    %cst_188 = arith.constant dense<0.000000e+00> : vector<16x512xf32>
    %254 = tpu.matmul %252, %253, %cst_188 {dimension_numbers = #tpu.dot_dimension_numbers<[1], [0], [0], [1], [0, 0, 1, 1], [], []>} : vector<16x16xbf16>, vector<16x512xbf16>, vector<16x512xf32> -> vector<16x512xf32>
    %255 = arith.addf %251, %254 : vector<16x512xf32>
    %256 = vector.extract_strided_slice %248 {offsets = [32, 0], sizes = [16, 16], strides = [1, 1]} : vector<64x16xbf16> to vector<16x16xbf16>
    %c32 = arith.constant 32 : index
    %c0_189 = arith.constant 0 : index
    %257 = vector.load %arg9[%c32, %c0_189] : memref<64x512xbf16, #tpu.memory_space<vmem>>, vector<16x512xbf16>
    %cst_190 = arith.constant dense<0.000000e+00> : vector<16x512xf32>
    %258 = tpu.matmul %256, %257, %cst_190 {dimension_numbers = #tpu.dot_dimension_numbers<[1], [0], [0], [1], [0, 0, 1, 1], [], []>} : vector<16x16xbf16>, vector<16x512xbf16>, vector<16x512xf32> -> vector<16x512xf32>
    %259 = arith.addf %255, %258 : vector<16x512xf32>
    %260 = vector.extract_strided_slice %248 {offsets = [48, 0], sizes = [16, 16], strides = [1, 1]} : vector<64x16xbf16> to vector<16x16xbf16>
    %c48 = arith.constant 48 : index
    %c0_191 = arith.constant 0 : index
    %261 = vector.load %arg9[%c48, %c0_191] : memref<64x512xbf16, #tpu.memory_space<vmem>>, vector<16x512xbf16>
    %cst_192 = arith.constant dense<0.000000e+00> : vector<16x512xf32>
    %262 = tpu.matmul %260, %261, %cst_192 {dimension_numbers = #tpu.dot_dimension_numbers<[1], [0], [0], [1], [0, 0, 1, 1], [], []>} : vector<16x16xbf16>, vector<16x512xbf16>, vector<16x512xf32> -> vector<16x512xf32>
    %263 = arith.addf %259, %262 : vector<16x512xf32>
    %c0_193 = arith.constant 0 : index
    %c0_194 = arith.constant 0 : index
    %264 = vector.load %arg11[%c0_193, %c0_194] : memref<1x512xf32, #tpu.memory_space<vmem>>, vector<1x512xf32>
    %265 = vector.broadcast %264 : vector<1x512xf32> to vector<16x512xf32>
    %266 = arith.addf %263, %265 : vector<16x512xf32>
    %267 = arith.truncf %247 : vector<64x16xf32> to vector<64x16xbf16>
    %268 = vector.extract_strided_slice %267 {offsets = [0, 0], sizes = [16, 16], strides = [1, 1]} : vector<64x16xbf16> to vector<16x16xbf16>
    %c0_195 = arith.constant 0 : index
    %c0_196 = arith.constant 0 : index
    %269 = vector.load %arg9[%c0_195, %c0_196] : memref<64x512xbf16, #tpu.memory_space<vmem>>, vector<16x512xbf16>
    %cst_197 = arith.constant dense<0.000000e+00> : vector<16x512xf32>
    %270 = tpu.matmul %268, %269, %cst_197 {dimension_numbers = #tpu.dot_dimension_numbers<[1], [0], [0], [1], [0, 0, 1, 1], [], []>} : vector<16x16xbf16>, vector<16x512xbf16>, vector<16x512xf32> -> vector<16x512xf32>
    %271 = vector.extract_strided_slice %267 {offsets = [16, 0], sizes = [16, 16], strides = [1, 1]} : vector<64x16xbf16> to vector<16x16xbf16>
    %c16_198 = arith.constant 16 : index
    %c0_199 = arith.constant 0 : index
    %272 = vector.load %arg9[%c16_198, %c0_199] : memref<64x512xbf16, #tpu.memory_space<vmem>>, vector<16x512xbf16>
    %cst_200 = arith.constant dense<0.000000e+00> : vector<16x512xf32>
    %273 = tpu.matmul %271, %272, %cst_200 {dimension_numbers = #tpu.dot_dimension_numbers<[1], [0], [0], [1], [0, 0, 1, 1], [], []>} : vector<16x16xbf16>, vector<16x512xbf16>, vector<16x512xf32> -> vector<16x512xf32>
    %274 = arith.addf %270, %273 : vector<16x512xf32>
    %275 = vector.extract_strided_slice %267 {offsets = [32, 0], sizes = [16, 16], strides = [1, 1]} : vector<64x16xbf16> to vector<16x16xbf16>
    %c32_201 = arith.constant 32 : index
    %c0_202 = arith.constant 0 : index
    %276 = vector.load %arg9[%c32_201, %c0_202] : memref<64x512xbf16, #tpu.memory_space<vmem>>, vector<16x512xbf16>
    %cst_203 = arith.constant dense<0.000000e+00> : vector<16x512xf32>
    %277 = tpu.matmul %275, %276, %cst_203 {dimension_numbers = #tpu.dot_dimension_numbers<[1], [0], [0], [1], [0, 0, 1, 1], [], []>} : vector<16x16xbf16>, vector<16x512xbf16>, vector<16x512xf32> -> vector<16x512xf32>
    %278 = arith.addf %274, %277 : vector<16x512xf32>
    %279 = vector.extract_strided_slice %267 {offsets = [48, 0], sizes = [16, 16], strides = [1, 1]} : vector<64x16xbf16> to vector<16x16xbf16>
    %c48_204 = arith.constant 48 : index
    %c0_205 = arith.constant 0 : index
    %280 = vector.load %arg9[%c48_204, %c0_205] : memref<64x512xbf16, #tpu.memory_space<vmem>>, vector<16x512xbf16>
    %cst_206 = arith.constant dense<0.000000e+00> : vector<16x512xf32>
    %281 = tpu.matmul %279, %280, %cst_206 {dimension_numbers = #tpu.dot_dimension_numbers<[1], [0], [0], [1], [0, 0, 1, 1], [], []>} : vector<16x16xbf16>, vector<16x512xbf16>, vector<16x512xf32> -> vector<16x512xf32>
    %282 = arith.addf %278, %281 : vector<16x512xf32>
    %c0_207 = arith.constant 0 : index
    %c0_208 = arith.constant 0 : index
    %283 = vector.load %arg11[%c0_207, %c0_208] : memref<1x512xf32, #tpu.memory_space<vmem>>, vector<1x512xf32>
    %284 = vector.broadcast %283 : vector<1x512xf32> to vector<16x512xf32>
    %285 = arith.addf %282, %284 : vector<16x512xf32>
    %cst_209 = arith.constant 0.000000e+00 : f32
    %286 = vector.broadcast %cst_209 : f32 to vector<4x128xf32>
    %cst_210 = arith.constant 0.000000e+00 : f32
    %287 = vector.broadcast %cst_210 : f32 to vector<4x128xf32>
    %288 = vector.extract_strided_slice %266 {offsets = [0, 0], sizes = [4, 512], strides = [1, 1]} : vector<16x512xf32> to vector<4x512xf32>
    %289 = arith.truncf %286 : vector<4x128xf32> to vector<4x128xbf16>
    %c0_211 = arith.constant 0 : index
    %c0_212 = arith.constant 0 : index
    %290 = vector.load %arg10[%c0_211, %c0_212] : memref<128x512xbf16, #tpu.memory_space<vmem>>, vector<128x512xbf16>
    %cst_213 = arith.constant dense<0.000000e+00> : vector<4x512xf32>
    %291 = tpu.matmul %289, %290, %cst_213 {dimension_numbers = #tpu.dot_dimension_numbers<[1], [0], [0], [1], [0, 0, 1, 1], [], []>} : vector<4x128xbf16>, vector<128x512xbf16>, vector<4x512xf32> -> vector<4x512xf32>
    %292 = arith.addf %288, %291 : vector<4x512xf32>
    %293 = arith.truncf %292 : vector<4x512xf32> to vector<4x512xbf16>
    %294 = vector.extract_strided_slice %293 {offsets = [0, 0], sizes = [4, 384], strides = [1, 1]} : vector<4x512xbf16> to vector<4x384xbf16>
    %cst_214 = arith.constant 5.000000e-01 : bf16
    %295 = vector.broadcast %cst_214 : bf16 to vector<4x384xbf16>
    %296 = arith.mulf %295, %294 : vector<4x384xbf16>
    %297 = math.tanh %296 : vector<4x384xbf16>
    %cst_215 = arith.constant 5.000000e-01 : bf16
    %298 = vector.broadcast %cst_215 : bf16 to vector<4x384xbf16>
    %299 = arith.mulf %297, %298 : vector<4x384xbf16>
    %cst_216 = arith.constant 5.000000e-01 : bf16
    %300 = vector.broadcast %cst_216 : bf16 to vector<4x384xbf16>
    %301 = arith.addf %299, %300 : vector<4x384xbf16>
    %302 = arith.extf %301 : vector<4x384xbf16> to vector<4x384xf32>
    %303 = vector.extract_strided_slice %293 {offsets = [0, 384], sizes = [4, 128], strides = [1, 1]} : vector<4x512xbf16> to vector<4x128xbf16>
    %304 = math.tanh %303 : vector<4x128xbf16>
    %305 = arith.extf %304 : vector<4x128xbf16> to vector<4x128xf32>
    %306 = vector.extract_strided_slice %302 {offsets = [0, 128], sizes = [4, 128], strides = [1, 1]} : vector<4x384xf32> to vector<4x128xf32>
    %307 = arith.mulf %306, %287 : vector<4x128xf32>
    %308 = vector.extract_strided_slice %302 {offsets = [0, 0], sizes = [4, 128], strides = [1, 1]} : vector<4x384xf32> to vector<4x128xf32>
    %309 = arith.mulf %308, %305 : vector<4x128xf32>
    %310 = arith.addf %307, %309 : vector<4x128xf32>
    %311 = vector.extract_strided_slice %302 {offsets = [0, 256], sizes = [4, 128], strides = [1, 1]} : vector<4x384xf32> to vector<4x128xf32>
    %312 = math.tanh %310 : vector<4x128xf32>
    %313 = arith.mulf %311, %312 : vector<4x128xf32>
    %314 = vector.extract_strided_slice %266 {offsets = [4, 0], sizes = [4, 512], strides = [1, 1]} : vector<16x512xf32> to vector<4x512xf32>
    %315 = arith.truncf %313 : vector<4x128xf32> to vector<4x128xbf16>
    %c0_217 = arith.constant 0 : index
    %c0_218 = arith.constant 0 : index
    %316 = vector.load %arg10[%c0_217, %c0_218] : memref<128x512xbf16, #tpu.memory_space<vmem>>, vector<128x512xbf16>
    %cst_219 = arith.constant dense<0.000000e+00> : vector<4x512xf32>
    %317 = tpu.matmul %315, %316, %cst_219 {dimension_numbers = #tpu.dot_dimension_numbers<[1], [0], [0], [1], [0, 0, 1, 1], [], []>} : vector<4x128xbf16>, vector<128x512xbf16>, vector<4x512xf32> -> vector<4x512xf32>
    %318 = arith.addf %314, %317 : vector<4x512xf32>
    %319 = arith.truncf %318 : vector<4x512xf32> to vector<4x512xbf16>
    %320 = vector.extract_strided_slice %319 {offsets = [0, 0], sizes = [4, 384], strides = [1, 1]} : vector<4x512xbf16> to vector<4x384xbf16>
    %cst_220 = arith.constant 5.000000e-01 : bf16
    %321 = vector.broadcast %cst_220 : bf16 to vector<4x384xbf16>
    %322 = arith.mulf %321, %320 : vector<4x384xbf16>
    %323 = math.tanh %322 : vector<4x384xbf16>
    %cst_221 = arith.constant 5.000000e-01 : bf16
    %324 = vector.broadcast %cst_221 : bf16 to vector<4x384xbf16>
    %325 = arith.mulf %323, %324 : vector<4x384xbf16>
    %cst_222 = arith.constant 5.000000e-01 : bf16
    %326 = vector.broadcast %cst_222 : bf16 to vector<4x384xbf16>
    %327 = arith.addf %325, %326 : vector<4x384xbf16>
    %328 = arith.extf %327 : vector<4x384xbf16> to vector<4x384xf32>
    %329 = vector.extract_strided_slice %319 {offsets = [0, 384], sizes = [4, 128], strides = [1, 1]} : vector<4x512xbf16> to vector<4x128xbf16>
    %330 = math.tanh %329 : vector<4x128xbf16>
    %331 = arith.extf %330 : vector<4x128xbf16> to vector<4x128xf32>
    %332 = vector.extract_strided_slice %328 {offsets = [0, 128], sizes = [4, 128], strides = [1, 1]} : vector<4x384xf32> to vector<4x128xf32>
    %333 = arith.mulf %332, %310 : vector<4x128xf32>
    %334 = vector.extract_strided_slice %328 {offsets = [0, 0], sizes = [4, 128], strides = [1, 1]} : vector<4x384xf32> to vector<4x128xf32>
    %335 = arith.mulf %334, %331 : vector<4x128xf32>
    %336 = arith.addf %333, %335 : vector<4x128xf32>
    %337 = vector.extract_strided_slice %328 {offsets = [0, 256], sizes = [4, 128], strides = [1, 1]} : vector<4x384xf32> to vector<4x128xf32>
    %338 = math.tanh %336 : vector<4x128xf32>
    %339 = arith.mulf %337, %338 : vector<4x128xf32>
    %340 = vector.extract_strided_slice %266 {offsets = [8, 0], sizes = [4, 512], strides = [1, 1]} : vector<16x512xf32> to vector<4x512xf32>
    %341 = arith.truncf %339 : vector<4x128xf32> to vector<4x128xbf16>
    %c0_223 = arith.constant 0 : index
    %c0_224 = arith.constant 0 : index
    %342 = vector.load %arg10[%c0_223, %c0_224] : memref<128x512xbf16, #tpu.memory_space<vmem>>, vector<128x512xbf16>
    %cst_225 = arith.constant dense<0.000000e+00> : vector<4x512xf32>
    %343 = tpu.matmul %341, %342, %cst_225 {dimension_numbers = #tpu.dot_dimension_numbers<[1], [0], [0], [1], [0, 0, 1, 1], [], []>} : vector<4x128xbf16>, vector<128x512xbf16>, vector<4x512xf32> -> vector<4x512xf32>
    %344 = arith.addf %340, %343 : vector<4x512xf32>
    %345 = arith.truncf %344 : vector<4x512xf32> to vector<4x512xbf16>
    %346 = vector.extract_strided_slice %345 {offsets = [0, 0], sizes = [4, 384], strides = [1, 1]} : vector<4x512xbf16> to vector<4x384xbf16>
    %cst_226 = arith.constant 5.000000e-01 : bf16
    %347 = vector.broadcast %cst_226 : bf16 to vector<4x384xbf16>
    %348 = arith.mulf %347, %346 : vector<4x384xbf16>
    %349 = math.tanh %348 : vector<4x384xbf16>
    %cst_227 = arith.constant 5.000000e-01 : bf16
    %350 = vector.broadcast %cst_227 : bf16 to vector<4x384xbf16>
    %351 = arith.mulf %349, %350 : vector<4x384xbf16>
    %cst_228 = arith.constant 5.000000e-01 : bf16
    %352 = vector.broadcast %cst_228 : bf16 to vector<4x384xbf16>
    %353 = arith.addf %351, %352 : vector<4x384xbf16>
    %354 = arith.extf %353 : vector<4x384xbf16> to vector<4x384xf32>
    %355 = vector.extract_strided_slice %345 {offsets = [0, 384], sizes = [4, 128], strides = [1, 1]} : vector<4x512xbf16> to vector<4x128xbf16>
    %356 = math.tanh %355 : vector<4x128xbf16>
    %357 = arith.extf %356 : vector<4x128xbf16> to vector<4x128xf32>
    %358 = vector.extract_strided_slice %354 {offsets = [0, 128], sizes = [4, 128], strides = [1, 1]} : vector<4x384xf32> to vector<4x128xf32>
    %359 = arith.mulf %358, %336 : vector<4x128xf32>
    %360 = vector.extract_strided_slice %354 {offsets = [0, 0], sizes = [4, 128], strides = [1, 1]} : vector<4x384xf32> to vector<4x128xf32>
    %361 = arith.mulf %360, %357 : vector<4x128xf32>
    %362 = arith.addf %359, %361 : vector<4x128xf32>
    %363 = vector.extract_strided_slice %354 {offsets = [0, 256], sizes = [4, 128], strides = [1, 1]} : vector<4x384xf32> to vector<4x128xf32>
    %364 = math.tanh %362 : vector<4x128xf32>
    %365 = arith.mulf %363, %364 : vector<4x128xf32>
    %366 = vector.extract_strided_slice %266 {offsets = [12, 0], sizes = [4, 512], strides = [1, 1]} : vector<16x512xf32> to vector<4x512xf32>
    %367 = arith.truncf %365 : vector<4x128xf32> to vector<4x128xbf16>
    %c0_229 = arith.constant 0 : index
    %c0_230 = arith.constant 0 : index
    %368 = vector.load %arg10[%c0_229, %c0_230] : memref<128x512xbf16, #tpu.memory_space<vmem>>, vector<128x512xbf16>
    %cst_231 = arith.constant dense<0.000000e+00> : vector<4x512xf32>
    %369 = tpu.matmul %367, %368, %cst_231 {dimension_numbers = #tpu.dot_dimension_numbers<[1], [0], [0], [1], [0, 0, 1, 1], [], []>} : vector<4x128xbf16>, vector<128x512xbf16>, vector<4x512xf32> -> vector<4x512xf32>
    %370 = arith.addf %366, %369 : vector<4x512xf32>
    %371 = arith.truncf %370 : vector<4x512xf32> to vector<4x512xbf16>
    %372 = vector.extract_strided_slice %371 {offsets = [0, 0], sizes = [4, 384], strides = [1, 1]} : vector<4x512xbf16> to vector<4x384xbf16>
    %cst_232 = arith.constant 5.000000e-01 : bf16
    %373 = vector.broadcast %cst_232 : bf16 to vector<4x384xbf16>
    %374 = arith.mulf %373, %372 : vector<4x384xbf16>
    %375 = math.tanh %374 : vector<4x384xbf16>
    %cst_233 = arith.constant 5.000000e-01 : bf16
    %376 = vector.broadcast %cst_233 : bf16 to vector<4x384xbf16>
    %377 = arith.mulf %375, %376 : vector<4x384xbf16>
    %cst_234 = arith.constant 5.000000e-01 : bf16
    %378 = vector.broadcast %cst_234 : bf16 to vector<4x384xbf16>
    %379 = arith.addf %377, %378 : vector<4x384xbf16>
    %380 = arith.extf %379 : vector<4x384xbf16> to vector<4x384xf32>
    %381 = vector.extract_strided_slice %371 {offsets = [0, 384], sizes = [4, 128], strides = [1, 1]} : vector<4x512xbf16> to vector<4x128xbf16>
    %382 = math.tanh %381 : vector<4x128xbf16>
    %383 = arith.extf %382 : vector<4x128xbf16> to vector<4x128xf32>
    %384 = vector.extract_strided_slice %380 {offsets = [0, 128], sizes = [4, 128], strides = [1, 1]} : vector<4x384xf32> to vector<4x128xf32>
    %385 = arith.mulf %384, %362 : vector<4x128xf32>
    %386 = vector.extract_strided_slice %380 {offsets = [0, 0], sizes = [4, 128], strides = [1, 1]} : vector<4x384xf32> to vector<4x128xf32>
    %387 = arith.mulf %386, %383 : vector<4x128xf32>
    %388 = arith.addf %385, %387 : vector<4x128xf32>
    %389 = vector.extract_strided_slice %380 {offsets = [0, 256], sizes = [4, 128], strides = [1, 1]} : vector<4x384xf32> to vector<4x128xf32>
    %390 = math.tanh %388 : vector<4x128xf32>
    %391 = arith.mulf %389, %390 : vector<4x128xf32>
    %392 = vector.extract_strided_slice %285 {offsets = [0, 0], sizes = [4, 512], strides = [1, 1]} : vector<16x512xf32> to vector<4x512xf32>
    %393 = arith.truncf %391 : vector<4x128xf32> to vector<4x128xbf16>
    %c0_235 = arith.constant 0 : index
    %c0_236 = arith.constant 0 : index
    %394 = vector.load %arg10[%c0_235, %c0_236] : memref<128x512xbf16, #tpu.memory_space<vmem>>, vector<128x512xbf16>
    %cst_237 = arith.constant dense<0.000000e+00> : vector<4x512xf32>
    %395 = tpu.matmul %393, %394, %cst_237 {dimension_numbers = #tpu.dot_dimension_numbers<[1], [0], [0], [1], [0, 0, 1, 1], [], []>} : vector<4x128xbf16>, vector<128x512xbf16>, vector<4x512xf32> -> vector<4x512xf32>
    %396 = arith.addf %392, %395 : vector<4x512xf32>
    %397 = arith.truncf %396 : vector<4x512xf32> to vector<4x512xbf16>
    %398 = vector.extract_strided_slice %397 {offsets = [0, 0], sizes = [4, 384], strides = [1, 1]} : vector<4x512xbf16> to vector<4x384xbf16>
    %cst_238 = arith.constant 5.000000e-01 : bf16
    %399 = vector.broadcast %cst_238 : bf16 to vector<4x384xbf16>
    %400 = arith.mulf %399, %398 : vector<4x384xbf16>
    %401 = math.tanh %400 : vector<4x384xbf16>
    %cst_239 = arith.constant 5.000000e-01 : bf16
    %402 = vector.broadcast %cst_239 : bf16 to vector<4x384xbf16>
    %403 = arith.mulf %401, %402 : vector<4x384xbf16>
    %cst_240 = arith.constant 5.000000e-01 : bf16
    %404 = vector.broadcast %cst_240 : bf16 to vector<4x384xbf16>
    %405 = arith.addf %403, %404 : vector<4x384xbf16>
    %406 = arith.extf %405 : vector<4x384xbf16> to vector<4x384xf32>
    %407 = vector.extract_strided_slice %397 {offsets = [0, 384], sizes = [4, 128], strides = [1, 1]} : vector<4x512xbf16> to vector<4x128xbf16>
    %408 = math.tanh %407 : vector<4x128xbf16>
    %409 = arith.extf %408 : vector<4x128xbf16> to vector<4x128xf32>
    %410 = vector.extract_strided_slice %406 {offsets = [0, 128], sizes = [4, 128], strides = [1, 1]} : vector<4x384xf32> to vector<4x128xf32>
    %411 = arith.mulf %410, %388 : vector<4x128xf32>
    %412 = vector.extract_strided_slice %406 {offsets = [0, 0], sizes = [4, 128], strides = [1, 1]} : vector<4x384xf32> to vector<4x128xf32>
    %413 = arith.mulf %412, %409 : vector<4x128xf32>
    %414 = arith.addf %411, %413 : vector<4x128xf32>
    %415 = vector.extract_strided_slice %406 {offsets = [0, 256], sizes = [4, 128], strides = [1, 1]} : vector<4x384xf32> to vector<4x128xf32>
    %416 = math.tanh %414 : vector<4x128xf32>
    %417 = arith.mulf %415, %416 : vector<4x128xf32>
    %418 = vector.extract_strided_slice %285 {offsets = [4, 0], sizes = [4, 512], strides = [1, 1]} : vector<16x512xf32> to vector<4x512xf32>
    %419 = arith.truncf %417 : vector<4x128xf32> to vector<4x128xbf16>
    %c0_241 = arith.constant 0 : index
    %c0_242 = arith.constant 0 : index
    %420 = vector.load %arg10[%c0_241, %c0_242] : memref<128x512xbf16, #tpu.memory_space<vmem>>, vector<128x512xbf16>
    %cst_243 = arith.constant dense<0.000000e+00> : vector<4x512xf32>
    %421 = tpu.matmul %419, %420, %cst_243 {dimension_numbers = #tpu.dot_dimension_numbers<[1], [0], [0], [1], [0, 0, 1, 1], [], []>} : vector<4x128xbf16>, vector<128x512xbf16>, vector<4x512xf32> -> vector<4x512xf32>
    %422 = arith.addf %418, %421 : vector<4x512xf32>
    %423 = arith.truncf %422 : vector<4x512xf32> to vector<4x512xbf16>
    %424 = vector.extract_strided_slice %423 {offsets = [0, 0], sizes = [4, 384], strides = [1, 1]} : vector<4x512xbf16> to vector<4x384xbf16>
    %cst_244 = arith.constant 5.000000e-01 : bf16
    %425 = vector.broadcast %cst_244 : bf16 to vector<4x384xbf16>
    %426 = arith.mulf %425, %424 : vector<4x384xbf16>
    %427 = math.tanh %426 : vector<4x384xbf16>
    %cst_245 = arith.constant 5.000000e-01 : bf16
    %428 = vector.broadcast %cst_245 : bf16 to vector<4x384xbf16>
    %429 = arith.mulf %427, %428 : vector<4x384xbf16>
    %cst_246 = arith.constant 5.000000e-01 : bf16
    %430 = vector.broadcast %cst_246 : bf16 to vector<4x384xbf16>
    %431 = arith.addf %429, %430 : vector<4x384xbf16>
    %432 = arith.extf %431 : vector<4x384xbf16> to vector<4x384xf32>
    %433 = vector.extract_strided_slice %423 {offsets = [0, 384], sizes = [4, 128], strides = [1, 1]} : vector<4x512xbf16> to vector<4x128xbf16>
    %434 = math.tanh %433 : vector<4x128xbf16>
    %435 = arith.extf %434 : vector<4x128xbf16> to vector<4x128xf32>
    %436 = vector.extract_strided_slice %432 {offsets = [0, 128], sizes = [4, 128], strides = [1, 1]} : vector<4x384xf32> to vector<4x128xf32>
    %437 = arith.mulf %436, %414 : vector<4x128xf32>
    %438 = vector.extract_strided_slice %432 {offsets = [0, 0], sizes = [4, 128], strides = [1, 1]} : vector<4x384xf32> to vector<4x128xf32>
    %439 = arith.mulf %438, %435 : vector<4x128xf32>
    %440 = arith.addf %437, %439 : vector<4x128xf32>
    %441 = vector.extract_strided_slice %432 {offsets = [0, 256], sizes = [4, 128], strides = [1, 1]} : vector<4x384xf32> to vector<4x128xf32>
    %442 = math.tanh %440 : vector<4x128xf32>
    %443 = arith.mulf %441, %442 : vector<4x128xf32>
    %444 = vector.extract_strided_slice %285 {offsets = [8, 0], sizes = [4, 512], strides = [1, 1]} : vector<16x512xf32> to vector<4x512xf32>
    %445 = arith.truncf %443 : vector<4x128xf32> to vector<4x128xbf16>
    %c0_247 = arith.constant 0 : index
    %c0_248 = arith.constant 0 : index
    %446 = vector.load %arg10[%c0_247, %c0_248] : memref<128x512xbf16, #tpu.memory_space<vmem>>, vector<128x512xbf16>
    %cst_249 = arith.constant dense<0.000000e+00> : vector<4x512xf32>
    %447 = tpu.matmul %445, %446, %cst_249 {dimension_numbers = #tpu.dot_dimension_numbers<[1], [0], [0], [1], [0, 0, 1, 1], [], []>} : vector<4x128xbf16>, vector<128x512xbf16>, vector<4x512xf32> -> vector<4x512xf32>
    %448 = arith.addf %444, %447 : vector<4x512xf32>
    %449 = arith.truncf %448 : vector<4x512xf32> to vector<4x512xbf16>
    %450 = vector.extract_strided_slice %449 {offsets = [0, 0], sizes = [4, 384], strides = [1, 1]} : vector<4x512xbf16> to vector<4x384xbf16>
    %cst_250 = arith.constant 5.000000e-01 : bf16
    %451 = vector.broadcast %cst_250 : bf16 to vector<4x384xbf16>
    %452 = arith.mulf %451, %450 : vector<4x384xbf16>
    %453 = math.tanh %452 : vector<4x384xbf16>
    %cst_251 = arith.constant 5.000000e-01 : bf16
    %454 = vector.broadcast %cst_251 : bf16 to vector<4x384xbf16>
    %455 = arith.mulf %453, %454 : vector<4x384xbf16>
    %cst_252 = arith.constant 5.000000e-01 : bf16
    %456 = vector.broadcast %cst_252 : bf16 to vector<4x384xbf16>
    %457 = arith.addf %455, %456 : vector<4x384xbf16>
    %458 = arith.extf %457 : vector<4x384xbf16> to vector<4x384xf32>
    %459 = vector.extract_strided_slice %449 {offsets = [0, 384], sizes = [4, 128], strides = [1, 1]} : vector<4x512xbf16> to vector<4x128xbf16>
    %460 = math.tanh %459 : vector<4x128xbf16>
    %461 = arith.extf %460 : vector<4x128xbf16> to vector<4x128xf32>
    %462 = vector.extract_strided_slice %458 {offsets = [0, 128], sizes = [4, 128], strides = [1, 1]} : vector<4x384xf32> to vector<4x128xf32>
    %463 = arith.mulf %462, %440 : vector<4x128xf32>
    %464 = vector.extract_strided_slice %458 {offsets = [0, 0], sizes = [4, 128], strides = [1, 1]} : vector<4x384xf32> to vector<4x128xf32>
    %465 = arith.mulf %464, %461 : vector<4x128xf32>
    %466 = arith.addf %463, %465 : vector<4x128xf32>
    %467 = vector.extract_strided_slice %458 {offsets = [0, 256], sizes = [4, 128], strides = [1, 1]} : vector<4x384xf32> to vector<4x128xf32>
    %468 = math.tanh %466 : vector<4x128xf32>
    %469 = arith.mulf %467, %468 : vector<4x128xf32>
    %470 = vector.extract_strided_slice %285 {offsets = [12, 0], sizes = [4, 512], strides = [1, 1]} : vector<16x512xf32> to vector<4x512xf32>
    %471 = arith.truncf %469 : vector<4x128xf32> to vector<4x128xbf16>
    %c0_253 = arith.constant 0 : index
    %c0_254 = arith.constant 0 : index
    %472 = vector.load %arg10[%c0_253, %c0_254] : memref<128x512xbf16, #tpu.memory_space<vmem>>, vector<128x512xbf16>
    %cst_255 = arith.constant dense<0.000000e+00> : vector<4x512xf32>
    %473 = tpu.matmul %471, %472, %cst_255 {dimension_numbers = #tpu.dot_dimension_numbers<[1], [0], [0], [1], [0, 0, 1, 1], [], []>} : vector<4x128xbf16>, vector<128x512xbf16>, vector<4x512xf32> -> vector<4x512xf32>
    %474 = arith.addf %470, %473 : vector<4x512xf32>
    %475 = arith.truncf %474 : vector<4x512xf32> to vector<4x512xbf16>
    %476 = vector.extract_strided_slice %475 {offsets = [0, 0], sizes = [4, 384], strides = [1, 1]} : vector<4x512xbf16> to vector<4x384xbf16>
    %cst_256 = arith.constant 5.000000e-01 : bf16
    %477 = vector.broadcast %cst_256 : bf16 to vector<4x384xbf16>
    %478 = arith.mulf %477, %476 : vector<4x384xbf16>
    %479 = math.tanh %478 : vector<4x384xbf16>
    %cst_257 = arith.constant 5.000000e-01 : bf16
    %480 = vector.broadcast %cst_257 : bf16 to vector<4x384xbf16>
    %481 = arith.mulf %479, %480 : vector<4x384xbf16>
    %cst_258 = arith.constant 5.000000e-01 : bf16
    %482 = vector.broadcast %cst_258 : bf16 to vector<4x384xbf16>
    %483 = arith.addf %481, %482 : vector<4x384xbf16>
    %484 = arith.extf %483 : vector<4x384xbf16> to vector<4x384xf32>
    %485 = vector.extract_strided_slice %475 {offsets = [0, 384], sizes = [4, 128], strides = [1, 1]} : vector<4x512xbf16> to vector<4x128xbf16>
    %486 = math.tanh %485 : vector<4x128xbf16>
    %487 = arith.extf %486 : vector<4x128xbf16> to vector<4x128xf32>
    %488 = vector.extract_strided_slice %484 {offsets = [0, 128], sizes = [4, 128], strides = [1, 1]} : vector<4x384xf32> to vector<4x128xf32>
    %489 = arith.mulf %488, %466 : vector<4x128xf32>
    %490 = vector.extract_strided_slice %484 {offsets = [0, 0], sizes = [4, 128], strides = [1, 1]} : vector<4x384xf32> to vector<4x128xf32>
    %491 = arith.mulf %490, %487 : vector<4x128xf32>
    %492 = arith.addf %489, %491 : vector<4x128xf32>
    %493 = vector.extract_strided_slice %484 {offsets = [0, 256], sizes = [4, 128], strides = [1, 1]} : vector<4x384xf32> to vector<4x128xf32>
    %494 = math.tanh %492 : vector<4x128xf32>
    %495 = arith.mulf %493, %494 : vector<4x128xf32>
    %c0_i32_259 = arith.constant 0 : i32
    %496 = tpu.memref_slice %arg20[%c0_i32_259] : memref<2x!tpu.dma_semaphore, #tpu.memory_space<semaphore_mem>> -> memref<1x!tpu.dma_semaphore, #tpu.memory_space<semaphore_mem>>
    %497 = tpu.memref_squeeze %496 : memref<1x!tpu.dma_semaphore, #tpu.memory_space<semaphore_mem>> -> memref<!tpu.dma_semaphore, #tpu.memory_space<semaphore_mem>>
    tpu.wait_dma2 semaphore(%497 : memref<!tpu.dma_semaphore, #tpu.memory_space<semaphore_mem>>) src(%arg12 : memref<128x512xbf16, #tpu.memory_space<any>>) dst(%arg18 : memref<128x512xbf16, #tpu.memory_space<vmem>>)
    %c1_i32_260 = arith.constant 1 : i32
    %498 = tpu.memref_slice %arg20[%c1_i32_260] : memref<2x!tpu.dma_semaphore, #tpu.memory_space<semaphore_mem>> -> memref<1x!tpu.dma_semaphore, #tpu.memory_space<semaphore_mem>>
    %499 = tpu.memref_squeeze %498 : memref<1x!tpu.dma_semaphore, #tpu.memory_space<semaphore_mem>> -> memref<!tpu.dma_semaphore, #tpu.memory_space<semaphore_mem>>
    tpu.wait_dma2 semaphore(%499 : memref<!tpu.dma_semaphore, #tpu.memory_space<semaphore_mem>>) src(%arg13 : memref<128x512xbf16, #tpu.memory_space<any>>) dst(%arg19 : memref<128x512xbf16, #tpu.memory_space<vmem>>)
    %500 = arith.truncf %313 : vector<4x128xf32> to vector<4x128xbf16>
    %c0_261 = arith.constant 0 : index
    %c0_262 = arith.constant 0 : index
    %501 = vector.load %arg18[%c0_261, %c0_262] : memref<128x512xbf16, #tpu.memory_space<vmem>>, vector<128x512xbf16>
    %cst_263 = arith.constant dense<0.000000e+00> : vector<4x512xf32>
    %502 = tpu.matmul %500, %501, %cst_263 {dimension_numbers = #tpu.dot_dimension_numbers<[1], [0], [0], [1], [0, 0, 1, 1], [], []>} : vector<4x128xbf16>, vector<128x512xbf16>, vector<4x512xf32> -> vector<4x512xf32>
    %c0_264 = arith.constant 0 : index
    %c0_265 = arith.constant 0 : index
    %503 = vector.load %arg14[%c0_264, %c0_265] : memref<1x512xf32, #tpu.memory_space<vmem>>, vector<1x512xf32>
    %504 = vector.broadcast %503 : vector<1x512xf32> to vector<4x512xf32>
    %505 = arith.addf %502, %504 : vector<4x512xf32>
    %506 = arith.truncf %495 : vector<4x128xf32> to vector<4x128xbf16>
    %c0_266 = arith.constant 0 : index
    %c0_267 = arith.constant 0 : index
    %507 = vector.load %arg19[%c0_266, %c0_267] : memref<128x512xbf16, #tpu.memory_space<vmem>>, vector<128x512xbf16>
    %cst_268 = arith.constant dense<0.000000e+00> : vector<4x512xf32>
    %508 = tpu.matmul %506, %507, %cst_268 {dimension_numbers = #tpu.dot_dimension_numbers<[1], [0], [0], [1], [0, 0, 1, 1], [], []>} : vector<4x128xbf16>, vector<128x512xbf16>, vector<4x512xf32> -> vector<4x512xf32>
    %509 = arith.addf %505, %508 : vector<4x512xf32>
    %510 = arith.truncf %509 : vector<4x512xf32> to vector<4x512xbf16>
    %511 = vector.extract_strided_slice %510 {offsets = [0, 0], sizes = [4, 384], strides = [1, 1]} : vector<4x512xbf16> to vector<4x384xbf16>
    %cst_269 = arith.constant 5.000000e-01 : bf16
    %512 = vector.broadcast %cst_269 : bf16 to vector<4x384xbf16>
    %513 = arith.mulf %512, %511 : vector<4x384xbf16>
    %514 = math.tanh %513 : vector<4x384xbf16>
    %cst_270 = arith.constant 5.000000e-01 : bf16
    %515 = vector.broadcast %cst_270 : bf16 to vector<4x384xbf16>
    %516 = arith.mulf %514, %515 : vector<4x384xbf16>
    %cst_271 = arith.constant 5.000000e-01 : bf16
    %517 = vector.broadcast %cst_271 : bf16 to vector<4x384xbf16>
    %518 = arith.addf %516, %517 : vector<4x384xbf16>
    %519 = arith.extf %518 : vector<4x384xbf16> to vector<4x384xf32>
    %520 = vector.extract_strided_slice %510 {offsets = [0, 384], sizes = [4, 128], strides = [1, 1]} : vector<4x512xbf16> to vector<4x128xbf16>
    %521 = math.tanh %520 : vector<4x128xbf16>
    %522 = arith.extf %521 : vector<4x128xbf16> to vector<4x128xf32>
    %523 = vector.extract_strided_slice %519 {offsets = [0, 128], sizes = [4, 128], strides = [1, 1]} : vector<4x384xf32> to vector<4x128xf32>
    %524 = arith.mulf %523, %492 : vector<4x128xf32>
    %525 = vector.extract_strided_slice %519 {offsets = [0, 0], sizes = [4, 128], strides = [1, 1]} : vector<4x384xf32> to vector<4x128xf32>
    %526 = arith.mulf %525, %522 : vector<4x128xf32>
    %527 = arith.addf %524, %526 : vector<4x128xf32>
    %528 = vector.extract_strided_slice %519 {offsets = [0, 256], sizes = [4, 128], strides = [1, 1]} : vector<4x384xf32> to vector<4x128xf32>
    %529 = math.tanh %527 : vector<4x128xf32>
    %530 = arith.mulf %528, %529 : vector<4x128xf32>
    %531 = arith.truncf %339 : vector<4x128xf32> to vector<4x128xbf16>
    %c0_272 = arith.constant 0 : index
    %c0_273 = arith.constant 0 : index
    %532 = vector.load %arg18[%c0_272, %c0_273] : memref<128x512xbf16, #tpu.memory_space<vmem>>, vector<128x512xbf16>
    %cst_274 = arith.constant dense<0.000000e+00> : vector<4x512xf32>
    %533 = tpu.matmul %531, %532, %cst_274 {dimension_numbers = #tpu.dot_dimension_numbers<[1], [0], [0], [1], [0, 0, 1, 1], [], []>} : vector<4x128xbf16>, vector<128x512xbf16>, vector<4x512xf32> -> vector<4x512xf32>
    %c0_275 = arith.constant 0 : index
    %c0_276 = arith.constant 0 : index
    %534 = vector.load %arg14[%c0_275, %c0_276] : memref<1x512xf32, #tpu.memory_space<vmem>>, vector<1x512xf32>
    %535 = vector.broadcast %534 : vector<1x512xf32> to vector<4x512xf32>
    %536 = arith.addf %533, %535 : vector<4x512xf32>
    %537 = arith.truncf %530 : vector<4x128xf32> to vector<4x128xbf16>
    %c0_277 = arith.constant 0 : index
    %c0_278 = arith.constant 0 : index
    %538 = vector.load %arg19[%c0_277, %c0_278] : memref<128x512xbf16, #tpu.memory_space<vmem>>, vector<128x512xbf16>
    %cst_279 = arith.constant dense<0.000000e+00> : vector<4x512xf32>
    %539 = tpu.matmul %537, %538, %cst_279 {dimension_numbers = #tpu.dot_dimension_numbers<[1], [0], [0], [1], [0, 0, 1, 1], [], []>} : vector<4x128xbf16>, vector<128x512xbf16>, vector<4x512xf32> -> vector<4x512xf32>
    %540 = arith.addf %536, %539 : vector<4x512xf32>
    %541 = arith.truncf %540 : vector<4x512xf32> to vector<4x512xbf16>
    %542 = vector.extract_strided_slice %541 {offsets = [0, 0], sizes = [4, 384], strides = [1, 1]} : vector<4x512xbf16> to vector<4x384xbf16>
    %cst_280 = arith.constant 5.000000e-01 : bf16
    %543 = vector.broadcast %cst_280 : bf16 to vector<4x384xbf16>
    %544 = arith.mulf %543, %542 : vector<4x384xbf16>
    %545 = math.tanh %544 : vector<4x384xbf16>
    %cst_281 = arith.constant 5.000000e-01 : bf16
    %546 = vector.broadcast %cst_281 : bf16 to vector<4x384xbf16>
    %547 = arith.mulf %545, %546 : vector<4x384xbf16>
    %cst_282 = arith.constant 5.000000e-01 : bf16
    %548 = vector.broadcast %cst_282 : bf16 to vector<4x384xbf16>
    %549 = arith.addf %547, %548 : vector<4x384xbf16>
    %550 = arith.extf %549 : vector<4x384xbf16> to vector<4x384xf32>
    %551 = vector.extract_strided_slice %541 {offsets = [0, 384], sizes = [4, 128], strides = [1, 1]} : vector<4x512xbf16> to vector<4x128xbf16>
    %552 = math.tanh %551 : vector<4x128xbf16>
    %553 = arith.extf %552 : vector<4x128xbf16> to vector<4x128xf32>
    %554 = vector.extract_strided_slice %550 {offsets = [0, 128], sizes = [4, 128], strides = [1, 1]} : vector<4x384xf32> to vector<4x128xf32>
    %555 = arith.mulf %554, %527 : vector<4x128xf32>
    %556 = vector.extract_strided_slice %550 {offsets = [0, 0], sizes = [4, 128], strides = [1, 1]} : vector<4x384xf32> to vector<4x128xf32>
    %557 = arith.mulf %556, %553 : vector<4x128xf32>
    %558 = arith.addf %555, %557 : vector<4x128xf32>
    %559 = vector.extract_strided_slice %550 {offsets = [0, 256], sizes = [4, 128], strides = [1, 1]} : vector<4x384xf32> to vector<4x128xf32>
    %560 = math.tanh %558 : vector<4x128xf32>
    %561 = arith.mulf %559, %560 : vector<4x128xf32>
    %562 = arith.truncf %365 : vector<4x128xf32> to vector<4x128xbf16>
    %c0_283 = arith.constant 0 : index
    %c0_284 = arith.constant 0 : index
    %563 = vector.load %arg18[%c0_283, %c0_284] : memref<128x512xbf16, #tpu.memory_space<vmem>>, vector<128x512xbf16>
    %cst_285 = arith.constant dense<0.000000e+00> : vector<4x512xf32>
    %564 = tpu.matmul %562, %563, %cst_285 {dimension_numbers = #tpu.dot_dimension_numbers<[1], [0], [0], [1], [0, 0, 1, 1], [], []>} : vector<4x128xbf16>, vector<128x512xbf16>, vector<4x512xf32> -> vector<4x512xf32>
    %c0_286 = arith.constant 0 : index
    %c0_287 = arith.constant 0 : index
    %565 = vector.load %arg14[%c0_286, %c0_287] : memref<1x512xf32, #tpu.memory_space<vmem>>, vector<1x512xf32>
    %566 = vector.broadcast %565 : vector<1x512xf32> to vector<4x512xf32>
    %567 = arith.addf %564, %566 : vector<4x512xf32>
    %568 = arith.truncf %561 : vector<4x128xf32> to vector<4x128xbf16>
    %c0_288 = arith.constant 0 : index
    %c0_289 = arith.constant 0 : index
    %569 = vector.load %arg19[%c0_288, %c0_289] : memref<128x512xbf16, #tpu.memory_space<vmem>>, vector<128x512xbf16>
    %cst_290 = arith.constant dense<0.000000e+00> : vector<4x512xf32>
    %570 = tpu.matmul %568, %569, %cst_290 {dimension_numbers = #tpu.dot_dimension_numbers<[1], [0], [0], [1], [0, 0, 1, 1], [], []>} : vector<4x128xbf16>, vector<128x512xbf16>, vector<4x512xf32> -> vector<4x512xf32>
    %571 = arith.addf %567, %570 : vector<4x512xf32>
    %572 = arith.truncf %571 : vector<4x512xf32> to vector<4x512xbf16>
    %573 = vector.extract_strided_slice %572 {offsets = [0, 0], sizes = [4, 384], strides = [1, 1]} : vector<4x512xbf16> to vector<4x384xbf16>
    %cst_291 = arith.constant 5.000000e-01 : bf16
    %574 = vector.broadcast %cst_291 : bf16 to vector<4x384xbf16>
    %575 = arith.mulf %574, %573 : vector<4x384xbf16>
    %576 = math.tanh %575 : vector<4x384xbf16>
    %cst_292 = arith.constant 5.000000e-01 : bf16
    %577 = vector.broadcast %cst_292 : bf16 to vector<4x384xbf16>
    %578 = arith.mulf %576, %577 : vector<4x384xbf16>
    %cst_293 = arith.constant 5.000000e-01 : bf16
    %579 = vector.broadcast %cst_293 : bf16 to vector<4x384xbf16>
    %580 = arith.addf %578, %579 : vector<4x384xbf16>
    %581 = arith.extf %580 : vector<4x384xbf16> to vector<4x384xf32>
    %582 = vector.extract_strided_slice %572 {offsets = [0, 384], sizes = [4, 128], strides = [1, 1]} : vector<4x512xbf16> to vector<4x128xbf16>
    %583 = math.tanh %582 : vector<4x128xbf16>
    %584 = arith.extf %583 : vector<4x128xbf16> to vector<4x128xf32>
    %585 = vector.extract_strided_slice %581 {offsets = [0, 128], sizes = [4, 128], strides = [1, 1]} : vector<4x384xf32> to vector<4x128xf32>
    %586 = arith.mulf %585, %558 : vector<4x128xf32>
    %587 = vector.extract_strided_slice %581 {offsets = [0, 0], sizes = [4, 128], strides = [1, 1]} : vector<4x384xf32> to vector<4x128xf32>
    %588 = arith.mulf %587, %584 : vector<4x128xf32>
    %589 = arith.addf %586, %588 : vector<4x128xf32>
    %590 = vector.extract_strided_slice %581 {offsets = [0, 256], sizes = [4, 128], strides = [1, 1]} : vector<4x384xf32> to vector<4x128xf32>
    %591 = math.tanh %589 : vector<4x128xf32>
    %592 = arith.mulf %590, %591 : vector<4x128xf32>
    %593 = arith.truncf %391 : vector<4x128xf32> to vector<4x128xbf16>
    %c0_294 = arith.constant 0 : index
    %c0_295 = arith.constant 0 : index
    %594 = vector.load %arg18[%c0_294, %c0_295] : memref<128x512xbf16, #tpu.memory_space<vmem>>, vector<128x512xbf16>
    %cst_296 = arith.constant dense<0.000000e+00> : vector<4x512xf32>
    %595 = tpu.matmul %593, %594, %cst_296 {dimension_numbers = #tpu.dot_dimension_numbers<[1], [0], [0], [1], [0, 0, 1, 1], [], []>} : vector<4x128xbf16>, vector<128x512xbf16>, vector<4x512xf32> -> vector<4x512xf32>
    %c0_297 = arith.constant 0 : index
    %c0_298 = arith.constant 0 : index
    %596 = vector.load %arg14[%c0_297, %c0_298] : memref<1x512xf32, #tpu.memory_space<vmem>>, vector<1x512xf32>
    %597 = vector.broadcast %596 : vector<1x512xf32> to vector<4x512xf32>
    %598 = arith.addf %595, %597 : vector<4x512xf32>
    %599 = arith.truncf %592 : vector<4x128xf32> to vector<4x128xbf16>
    %c0_299 = arith.constant 0 : index
    %c0_300 = arith.constant 0 : index
    %600 = vector.load %arg19[%c0_299, %c0_300] : memref<128x512xbf16, #tpu.memory_space<vmem>>, vector<128x512xbf16>
    %cst_301 = arith.constant dense<0.000000e+00> : vector<4x512xf32>
    %601 = tpu.matmul %599, %600, %cst_301 {dimension_numbers = #tpu.dot_dimension_numbers<[1], [0], [0], [1], [0, 0, 1, 1], [], []>} : vector<4x128xbf16>, vector<128x512xbf16>, vector<4x512xf32> -> vector<4x512xf32>
    %602 = arith.addf %598, %601 : vector<4x512xf32>
    %603 = arith.truncf %602 : vector<4x512xf32> to vector<4x512xbf16>
    %604 = vector.extract_strided_slice %603 {offsets = [0, 0], sizes = [4, 384], strides = [1, 1]} : vector<4x512xbf16> to vector<4x384xbf16>
    %cst_302 = arith.constant 5.000000e-01 : bf16
    %605 = vector.broadcast %cst_302 : bf16 to vector<4x384xbf16>
    %606 = arith.mulf %605, %604 : vector<4x384xbf16>
    %607 = math.tanh %606 : vector<4x384xbf16>
    %cst_303 = arith.constant 5.000000e-01 : bf16
    %608 = vector.broadcast %cst_303 : bf16 to vector<4x384xbf16>
    %609 = arith.mulf %607, %608 : vector<4x384xbf16>
    %cst_304 = arith.constant 5.000000e-01 : bf16
    %610 = vector.broadcast %cst_304 : bf16 to vector<4x384xbf16>
    %611 = arith.addf %609, %610 : vector<4x384xbf16>
    %612 = arith.extf %611 : vector<4x384xbf16> to vector<4x384xf32>
    %613 = vector.extract_strided_slice %603 {offsets = [0, 384], sizes = [4, 128], strides = [1, 1]} : vector<4x512xbf16> to vector<4x128xbf16>
    %614 = math.tanh %613 : vector<4x128xbf16>
    %615 = arith.extf %614 : vector<4x128xbf16> to vector<4x128xf32>
    %616 = vector.extract_strided_slice %612 {offsets = [0, 128], sizes = [4, 128], strides = [1, 1]} : vector<4x384xf32> to vector<4x128xf32>
    %617 = arith.mulf %616, %589 : vector<4x128xf32>
    %618 = vector.extract_strided_slice %612 {offsets = [0, 0], sizes = [4, 128], strides = [1, 1]} : vector<4x384xf32> to vector<4x128xf32>
    %619 = arith.mulf %618, %615 : vector<4x128xf32>
    %620 = arith.addf %617, %619 : vector<4x128xf32>
    %621 = vector.extract_strided_slice %612 {offsets = [0, 256], sizes = [4, 128], strides = [1, 1]} : vector<4x384xf32> to vector<4x128xf32>
    %622 = math.tanh %620 : vector<4x128xf32>
    %623 = arith.mulf %621, %622 : vector<4x128xf32>
    %624 = vector.extract_strided_slice %623 {offsets = [3, 0], sizes = [1, 128], strides = [1, 1]} : vector<4x128xf32> to vector<1x128xf32>
    %625 = arith.truncf %417 : vector<4x128xf32> to vector<4x128xbf16>
    %c0_305 = arith.constant 0 : index
    %c0_306 = arith.constant 0 : index
    %626 = vector.load %arg18[%c0_305, %c0_306] : memref<128x512xbf16, #tpu.memory_space<vmem>>, vector<128x512xbf16>
    %cst_307 = arith.constant dense<0.000000e+00> : vector<4x512xf32>
    %627 = tpu.matmul %625, %626, %cst_307 {dimension_numbers = #tpu.dot_dimension_numbers<[1], [0], [0], [1], [0, 0, 1, 1], [], []>} : vector<4x128xbf16>, vector<128x512xbf16>, vector<4x512xf32> -> vector<4x512xf32>
    %c0_308 = arith.constant 0 : index
    %c0_309 = arith.constant 0 : index
    %628 = vector.load %arg14[%c0_308, %c0_309] : memref<1x512xf32, #tpu.memory_space<vmem>>, vector<1x512xf32>
    %629 = vector.broadcast %628 : vector<1x512xf32> to vector<4x512xf32>
    %630 = arith.addf %627, %629 : vector<4x512xf32>
    %631 = arith.truncf %623 : vector<4x128xf32> to vector<4x128xbf16>
    %c0_310 = arith.constant 0 : index
    %c0_311 = arith.constant 0 : index
    %632 = vector.load %arg19[%c0_310, %c0_311] : memref<128x512xbf16, #tpu.memory_space<vmem>>, vector<128x512xbf16>
    %cst_312 = arith.constant dense<0.000000e+00> : vector<4x512xf32>
    %633 = tpu.matmul %631, %632, %cst_312 {dimension_numbers = #tpu.dot_dimension_numbers<[1], [0], [0], [1], [0, 0, 1, 1], [], []>} : vector<4x128xbf16>, vector<128x512xbf16>, vector<4x512xf32> -> vector<4x512xf32>
    %634 = arith.addf %630, %633 : vector<4x512xf32>
    %635 = arith.truncf %634 : vector<4x512xf32> to vector<4x512xbf16>
    %636 = vector.extract_strided_slice %635 {offsets = [0, 0], sizes = [4, 384], strides = [1, 1]} : vector<4x512xbf16> to vector<4x384xbf16>
    %cst_313 = arith.constant 5.000000e-01 : bf16
    %637 = vector.broadcast %cst_313 : bf16 to vector<4x384xbf16>
    %638 = arith.mulf %637, %636 : vector<4x384xbf16>
    %639 = math.tanh %638 : vector<4x384xbf16>
    %cst_314 = arith.constant 5.000000e-01 : bf16
    %640 = vector.broadcast %cst_314 : bf16 to vector<4x384xbf16>
    %641 = arith.mulf %639, %640 : vector<4x384xbf16>
    %cst_315 = arith.constant 5.000000e-01 : bf16
    %642 = vector.broadcast %cst_315 : bf16 to vector<4x384xbf16>
    %643 = arith.addf %641, %642 : vector<4x384xbf16>
    %644 = arith.extf %643 : vector<4x384xbf16> to vector<4x384xf32>
    %645 = vector.extract_strided_slice %635 {offsets = [0, 384], sizes = [4, 128], strides = [1, 1]} : vector<4x512xbf16> to vector<4x128xbf16>
    %646 = math.tanh %645 : vector<4x128xbf16>
    %647 = arith.extf %646 : vector<4x128xbf16> to vector<4x128xf32>
    %648 = vector.extract_strided_slice %644 {offsets = [0, 128], sizes = [4, 128], strides = [1, 1]} : vector<4x384xf32> to vector<4x128xf32>
    %649 = arith.mulf %648, %620 : vector<4x128xf32>
    %650 = vector.extract_strided_slice %644 {offsets = [0, 0], sizes = [4, 128], strides = [1, 1]} : vector<4x384xf32> to vector<4x128xf32>
    %651 = arith.mulf %650, %647 : vector<4x128xf32>
    %652 = arith.addf %649, %651 : vector<4x128xf32>
    %653 = vector.extract_strided_slice %644 {offsets = [0, 256], sizes = [4, 128], strides = [1, 1]} : vector<4x384xf32> to vector<4x128xf32>
    %654 = math.tanh %652 : vector<4x128xf32>
    %655 = arith.mulf %653, %654 : vector<4x128xf32>
    %656 = arith.truncf %443 : vector<4x128xf32> to vector<4x128xbf16>
    %c0_316 = arith.constant 0 : index
    %c0_317 = arith.constant 0 : index
    %657 = vector.load %arg18[%c0_316, %c0_317] : memref<128x512xbf16, #tpu.memory_space<vmem>>, vector<128x512xbf16>
    %cst_318 = arith.constant dense<0.000000e+00> : vector<4x512xf32>
    %658 = tpu.matmul %656, %657, %cst_318 {dimension_numbers = #tpu.dot_dimension_numbers<[1], [0], [0], [1], [0, 0, 1, 1], [], []>} : vector<4x128xbf16>, vector<128x512xbf16>, vector<4x512xf32> -> vector<4x512xf32>
    %c0_319 = arith.constant 0 : index
    %c0_320 = arith.constant 0 : index
    %659 = vector.load %arg14[%c0_319, %c0_320] : memref<1x512xf32, #tpu.memory_space<vmem>>, vector<1x512xf32>
    %660 = vector.broadcast %659 : vector<1x512xf32> to vector<4x512xf32>
    %661 = arith.addf %658, %660 : vector<4x512xf32>
    %662 = arith.truncf %655 : vector<4x128xf32> to vector<4x128xbf16>
    %c0_321 = arith.constant 0 : index
    %c0_322 = arith.constant 0 : index
    %663 = vector.load %arg19[%c0_321, %c0_322] : memref<128x512xbf16, #tpu.memory_space<vmem>>, vector<128x512xbf16>
    %cst_323 = arith.constant dense<0.000000e+00> : vector<4x512xf32>
    %664 = tpu.matmul %662, %663, %cst_323 {dimension_numbers = #tpu.dot_dimension_numbers<[1], [0], [0], [1], [0, 0, 1, 1], [], []>} : vector<4x128xbf16>, vector<128x512xbf16>, vector<4x512xf32> -> vector<4x512xf32>
    %665 = arith.addf %661, %664 : vector<4x512xf32>
    %666 = arith.truncf %665 : vector<4x512xf32> to vector<4x512xbf16>
    %667 = vector.extract_strided_slice %666 {offsets = [0, 0], sizes = [4, 384], strides = [1, 1]} : vector<4x512xbf16> to vector<4x384xbf16>
    %cst_324 = arith.constant 5.000000e-01 : bf16
    %668 = vector.broadcast %cst_324 : bf16 to vector<4x384xbf16>
    %669 = arith.mulf %668, %667 : vector<4x384xbf16>
    %670 = math.tanh %669 : vector<4x384xbf16>
    %cst_325 = arith.constant 5.000000e-01 : bf16
    %671 = vector.broadcast %cst_325 : bf16 to vector<4x384xbf16>
    %672 = arith.mulf %670, %671 : vector<4x384xbf16>
    %cst_326 = arith.constant 5.000000e-01 : bf16
    %673 = vector.broadcast %cst_326 : bf16 to vector<4x384xbf16>
    %674 = arith.addf %672, %673 : vector<4x384xbf16>
    %675 = arith.extf %674 : vector<4x384xbf16> to vector<4x384xf32>
    %676 = vector.extract_strided_slice %666 {offsets = [0, 384], sizes = [4, 128], strides = [1, 1]} : vector<4x512xbf16> to vector<4x128xbf16>
    %677 = math.tanh %676 : vector<4x128xbf16>
    %678 = arith.extf %677 : vector<4x128xbf16> to vector<4x128xf32>
    %679 = vector.extract_strided_slice %675 {offsets = [0, 128], sizes = [4, 128], strides = [1, 1]} : vector<4x384xf32> to vector<4x128xf32>
    %680 = arith.mulf %679, %652 : vector<4x128xf32>
    %681 = vector.extract_strided_slice %675 {offsets = [0, 0], sizes = [4, 128], strides = [1, 1]} : vector<4x384xf32> to vector<4x128xf32>
    %682 = arith.mulf %681, %678 : vector<4x128xf32>
    %683 = arith.addf %680, %682 : vector<4x128xf32>
    %684 = vector.extract_strided_slice %675 {offsets = [0, 256], sizes = [4, 128], strides = [1, 1]} : vector<4x384xf32> to vector<4x128xf32>
    %685 = math.tanh %683 : vector<4x128xf32>
    %686 = arith.mulf %684, %685 : vector<4x128xf32>
    %687 = arith.truncf %469 : vector<4x128xf32> to vector<4x128xbf16>
    %c0_327 = arith.constant 0 : index
    %c0_328 = arith.constant 0 : index
    %688 = vector.load %arg18[%c0_327, %c0_328] : memref<128x512xbf16, #tpu.memory_space<vmem>>, vector<128x512xbf16>
    %cst_329 = arith.constant dense<0.000000e+00> : vector<4x512xf32>
    %689 = tpu.matmul %687, %688, %cst_329 {dimension_numbers = #tpu.dot_dimension_numbers<[1], [0], [0], [1], [0, 0, 1, 1], [], []>} : vector<4x128xbf16>, vector<128x512xbf16>, vector<4x512xf32> -> vector<4x512xf32>
    %c0_330 = arith.constant 0 : index
    %c0_331 = arith.constant 0 : index
    %690 = vector.load %arg14[%c0_330, %c0_331] : memref<1x512xf32, #tpu.memory_space<vmem>>, vector<1x512xf32>
    %691 = vector.broadcast %690 : vector<1x512xf32> to vector<4x512xf32>
    %692 = arith.addf %689, %691 : vector<4x512xf32>
    %693 = arith.truncf %686 : vector<4x128xf32> to vector<4x128xbf16>
    %c0_332 = arith.constant 0 : index
    %c0_333 = arith.constant 0 : index
    %694 = vector.load %arg19[%c0_332, %c0_333] : memref<128x512xbf16, #tpu.memory_space<vmem>>, vector<128x512xbf16>
    %cst_334 = arith.constant dense<0.000000e+00> : vector<4x512xf32>
    %695 = tpu.matmul %693, %694, %cst_334 {dimension_numbers = #tpu.dot_dimension_numbers<[1], [0], [0], [1], [0, 0, 1, 1], [], []>} : vector<4x128xbf16>, vector<128x512xbf16>, vector<4x512xf32> -> vector<4x512xf32>
    %696 = arith.addf %692, %695 : vector<4x512xf32>
    %697 = arith.truncf %696 : vector<4x512xf32> to vector<4x512xbf16>
    %698 = vector.extract_strided_slice %697 {offsets = [0, 0], sizes = [4, 384], strides = [1, 1]} : vector<4x512xbf16> to vector<4x384xbf16>
    %cst_335 = arith.constant 5.000000e-01 : bf16
    %699 = vector.broadcast %cst_335 : bf16 to vector<4x384xbf16>
    %700 = arith.mulf %699, %698 : vector<4x384xbf16>
    %701 = math.tanh %700 : vector<4x384xbf16>
    %cst_336 = arith.constant 5.000000e-01 : bf16
    %702 = vector.broadcast %cst_336 : bf16 to vector<4x384xbf16>
    %703 = arith.mulf %701, %702 : vector<4x384xbf16>
    %cst_337 = arith.constant 5.000000e-01 : bf16
    %704 = vector.broadcast %cst_337 : bf16 to vector<4x384xbf16>
    %705 = arith.addf %703, %704 : vector<4x384xbf16>
    %706 = arith.extf %705 : vector<4x384xbf16> to vector<4x384xf32>
    %707 = vector.extract_strided_slice %697 {offsets = [0, 384], sizes = [4, 128], strides = [1, 1]} : vector<4x512xbf16> to vector<4x128xbf16>
    %708 = math.tanh %707 : vector<4x128xbf16>
    %709 = arith.extf %708 : vector<4x128xbf16> to vector<4x128xf32>
    %710 = vector.extract_strided_slice %706 {offsets = [0, 128], sizes = [4, 128], strides = [1, 1]} : vector<4x384xf32> to vector<4x128xf32>
    %711 = arith.mulf %710, %683 : vector<4x128xf32>
    %712 = vector.extract_strided_slice %706 {offsets = [0, 0], sizes = [4, 128], strides = [1, 1]} : vector<4x384xf32> to vector<4x128xf32>
    %713 = arith.mulf %712, %709 : vector<4x128xf32>
    %714 = arith.addf %711, %713 : vector<4x128xf32>
    %715 = vector.extract_strided_slice %706 {offsets = [0, 256], sizes = [4, 128], strides = [1, 1]} : vector<4x384xf32> to vector<4x128xf32>
    %716 = math.tanh %714 : vector<4x128xf32>
    %717 = arith.mulf %715, %716 : vector<4x128xf32>
    %718 = arith.truncf %495 : vector<4x128xf32> to vector<4x128xbf16>
    %c0_338 = arith.constant 0 : index
    %c0_339 = arith.constant 0 : index
    %719 = vector.load %arg18[%c0_338, %c0_339] : memref<128x512xbf16, #tpu.memory_space<vmem>>, vector<128x512xbf16>
    %cst_340 = arith.constant dense<0.000000e+00> : vector<4x512xf32>
    %720 = tpu.matmul %718, %719, %cst_340 {dimension_numbers = #tpu.dot_dimension_numbers<[1], [0], [0], [1], [0, 0, 1, 1], [], []>} : vector<4x128xbf16>, vector<128x512xbf16>, vector<4x512xf32> -> vector<4x512xf32>
    %c0_341 = arith.constant 0 : index
    %c0_342 = arith.constant 0 : index
    %721 = vector.load %arg14[%c0_341, %c0_342] : memref<1x512xf32, #tpu.memory_space<vmem>>, vector<1x512xf32>
    %722 = vector.broadcast %721 : vector<1x512xf32> to vector<4x512xf32>
    %723 = arith.addf %720, %722 : vector<4x512xf32>
    %724 = arith.truncf %717 : vector<4x128xf32> to vector<4x128xbf16>
    %c0_343 = arith.constant 0 : index
    %c0_344 = arith.constant 0 : index
    %725 = vector.load %arg19[%c0_343, %c0_344] : memref<128x512xbf16, #tpu.memory_space<vmem>>, vector<128x512xbf16>
    %cst_345 = arith.constant dense<0.000000e+00> : vector<4x512xf32>
    %726 = tpu.matmul %724, %725, %cst_345 {dimension_numbers = #tpu.dot_dimension_numbers<[1], [0], [0], [1], [0, 0, 1, 1], [], []>} : vector<4x128xbf16>, vector<128x512xbf16>, vector<4x512xf32> -> vector<4x512xf32>
    %727 = arith.addf %723, %726 : vector<4x512xf32>
    %728 = arith.truncf %727 : vector<4x512xf32> to vector<4x512xbf16>
    %729 = vector.extract_strided_slice %728 {offsets = [0, 0], sizes = [4, 384], strides = [1, 1]} : vector<4x512xbf16> to vector<4x384xbf16>
    %cst_346 = arith.constant 5.000000e-01 : bf16
    %730 = vector.broadcast %cst_346 : bf16 to vector<4x384xbf16>
    %731 = arith.mulf %730, %729 : vector<4x384xbf16>
    %732 = math.tanh %731 : vector<4x384xbf16>
    %cst_347 = arith.constant 5.000000e-01 : bf16
    %733 = vector.broadcast %cst_347 : bf16 to vector<4x384xbf16>
    %734 = arith.mulf %732, %733 : vector<4x384xbf16>
    %cst_348 = arith.constant 5.000000e-01 : bf16
    %735 = vector.broadcast %cst_348 : bf16 to vector<4x384xbf16>
    %736 = arith.addf %734, %735 : vector<4x384xbf16>
    %737 = arith.extf %736 : vector<4x384xbf16> to vector<4x384xf32>
    %738 = vector.extract_strided_slice %728 {offsets = [0, 384], sizes = [4, 128], strides = [1, 1]} : vector<4x512xbf16> to vector<4x128xbf16>
    %739 = math.tanh %738 : vector<4x128xbf16>
    %740 = arith.extf %739 : vector<4x128xbf16> to vector<4x128xf32>
    %741 = vector.extract_strided_slice %737 {offsets = [0, 128], sizes = [4, 128], strides = [1, 1]} : vector<4x384xf32> to vector<4x128xf32>
    %742 = arith.mulf %741, %714 : vector<4x128xf32>
    %743 = vector.extract_strided_slice %737 {offsets = [0, 0], sizes = [4, 128], strides = [1, 1]} : vector<4x384xf32> to vector<4x128xf32>
    %744 = arith.mulf %743, %740 : vector<4x128xf32>
    %745 = arith.addf %742, %744 : vector<4x128xf32>
    %746 = vector.extract_strided_slice %737 {offsets = [0, 256], sizes = [4, 128], strides = [1, 1]} : vector<4x384xf32> to vector<4x128xf32>
    %747 = math.tanh %745 : vector<4x128xf32>
    %748 = arith.mulf %746, %747 : vector<4x128xf32>
    %749 = vector.extract_strided_slice %748 {offsets = [3, 0], sizes = [1, 128], strides = [1, 1]} : vector<4x128xf32> to vector<1x128xf32>
    %750 = tpu.concatenate %624, %749 in 0 : vector<1x128xf32>, vector<1x128xf32> -> vector<2x128xf32>
    %751 = arith.truncf %750 : vector<2x128xf32> to vector<2x128xbf16>
    %c0_349 = arith.constant 0 : index
    %c0_350 = arith.constant 0 : index
    %752 = vector.load %arg15[%c0_349, %c0_350] : memref<128x18xbf16, #tpu.memory_space<vmem>>, vector<128x18xbf16>
    %cst_351 = arith.constant dense<0.000000e+00> : vector<2x18xf32>
    %753 = tpu.matmul %751, %752, %cst_351 {dimension_numbers = #tpu.dot_dimension_numbers<[1], [0], [0], [1], [0, 0, 1, 1], [], []>} : vector<2x128xbf16>, vector<128x18xbf16>, vector<2x18xf32> -> vector<2x18xf32>
    %c0_352 = arith.constant 0 : index
    %c0_353 = arith.constant 0 : index
    %754 = vector.load %arg16[%c0_352, %c0_353] : memref<1x18xf32, #tpu.memory_space<vmem>>, vector<1x18xf32>
    %755 = vector.broadcast %754 : vector<1x18xf32> to vector<2x18xf32>
    %756 = arith.addf %753, %755 : vector<2x18xf32>
    %c0_354 = arith.constant 0 : index
    %c0_355 = arith.constant 0 : index
    %757 = vector.load %arg17[%c0_354, %c0_355] : memref<2x18xf32, #tpu.memory_space<vmem>>, vector<2x18xf32>
    tpu.vector_store %arg17[%c0_354, %c0_355], %756 {strides = array<i32>} : memref<2x18xf32, #tpu.memory_space<vmem>>, vector<2x18xf32>,
    return
  }
}

</mosaic_0001>

<bundles_post_ra>
// kernel: har_forward.1
= control target key start
LH: loop header
LB: loop body
LE: loop exit
PB: predicated region body
PF: predicated region fallthrough
CT: control target
= control target key end

     0   :  { %s13993_s0 = inlined_call_operand.vmem [shape: f32[2,3,32], index: 0, kind: input, shape index: {}]   ;;  %s13994_s1 = inlined_call_operand.vmem [shape: bf16[5,64,3], index: 1, kind: input, shape index: {}]   ;;  %s13995_s2 = inlined_call_operand.vmem [shape: f32[64,1], index: 2, kind: input, shape index: {}]   ;;  %s13996_s3 = inlined_call_operand.hbm [shape: bf16[5,64,64], index: 3, kind: input, shape index: {}]   ;;  %s13997_s4 = inlined_call_operand.vmem [shape: f32[64,1], index: 4, kind: input, shape index: {}]   ;;  %s13998_s5 = inlined_call_operand.hbm [shape: bf16[5,64,64], index: 5, kind: input, shape index: {}]   ;;  %s13999_s6 = inlined_call_operand.vmem [shape: f32[64,1], index: 6, kind: input, shape index: {}]   ;;  %s14000_s7 = inlined_call_operand.hbm [shape: bf16[5,64,64], index: 7, kind: input, shape index: {}]   ;;  %s14001_s8 = inlined_call_operand.vmem [shape: f32[64,1], index: 8, kind: input, shape index: {}]   ;;  %s14002_s9 = inlined_call_operand.hbm [shape: bf16[64,512], index: 9, kind: input, shape index: {}]   ;;  %s14003_s10 = inlined_call_operand.vmem [shape: bf16[128,512], index: 10, kind: input, shape index: {}]   ;;  %s14004_s11 = inlined_call_operand.vmem [shape: f32[1,512], index: 11, kind: input, shape index: {}]   ;;  %s14005_s12 = inlined_call_operand.vmem [shape: bf16[128,512], index: 12, kind: input, shape index: {}]   ;;  %s14006_s13 = inlined_call_operand.hbm [shape: bf16[128,512], index: 13, kind: input, shape index: {}]   ;;  %s14007_s14 = inlined_call_operand.vmem [shape: f32[1,512], index: 14, kind: input, shape index: {}]   ;;  %s14008_s15 = inlined_call_operand.vmem [shape: bf16[128,18], index: 15, kind: input, shape index: {}]   ;;  %s14009_s16 = inlined_call_operand.vmem [shape: f32[1,18], index: 16, kind: input, shape index: {}]   ;;  %s14010_s17 = inlined_call_operand.hbm [shape: f32[2,18], index: 17, kind: output, shape index: {}]  }
   0x1   :  { %14220 = sst [smem:[#allocation83_spill]] %s13993_s0 }
   0x2   :  { %14221 = sst [smem:[#allocation84_spill]] %s13994_s1 }
   0x3   :  { %22 = vsyncpa [#allocation6], 0 }
   0x4   :  { %23 = vsyncpa [#allocation9], 0 }
   0x5   :  { %24 = vsyncpa [#allocation12], 0 }
   0x6   :  { %25 = vsyncpa [#allocation7], 0  ;;  %s10642_s24 = smov [#allocation8]   ;;  %s10643_s26 = smov [#allocation5]  }
   0x7   :  { %s51_s25 = sshll.u32 %s10642_s24, 4  ;;  %s37_s27 = sshll.u32 %s10643_s26, 4  ;;  %s52_s25 = int_to_ptr.vmem [resolvable:$true] %s51_s25  ;;  %s38_s27 = int_to_ptr.vmem [resolvable:$true] %s37_s27 }
   0x8   :  { %s10518_s28 = scalar_lea.vmem %s52_s25, 2560  ;;  %p10523_p1 = scmp.lt.s32.totalorder %s52_s25, %s52_s25 }
   0x9   :  { %p10519_p0 = scmp.ne.s32.totalorder %s52_s25, %s10518_s28  ;;  %p10524_p2 = scmp.lt.s32.totalorder %s10518_s28, %s10518_s28 }
   0xb   :  { %p10525_p3 = por %p10524_p2, %p10523_p1 }
   0xd   :  { %p10526_p4 = pnand %p10525_p3, %p10519_p0 }
   0xf   :  { %10529 = shalt.err (!%p10526_p4)
}
  0x10   :  { %s10644_s29 = smov 64   ;;  %s10645_s0 = smov 4  }
  0x11   :  { %57 = dma.hbm_to_vmem [thread:$0]  %s13998_s5, 2560, %s52_s25, [#allocation9], %s10644_s29, %s10644_s29, %s10645_s0  }
  0x12   :  { %s10538_s19 = scalar_lea.vmem %s38_s27, 2560  ;;  %p10543_p6 = scmp.lt.s32.totalorder %s38_s27, %s38_s27 }
  0x13   :  { %p10539_p5 = scmp.ne.s32.totalorder %s38_s27, %s10538_s19  ;;  %p10544_p7 = scmp.lt.s32.totalorder %s10538_s19, %s10538_s19 }
  0x15   :  { %p10545_p8 = por %p10544_p7, %p10543_p6 }
  0x17   :  { %p10546_p9 = pnand %p10545_p8, %p10539_p5 }
  0x19   :  { %10549 = shalt.err (!%p10546_p9)
}
  0x1a   :  { %43 = dma.hbm_to_vmem [thread:$0]  %s13996_s3, 2560, %s38_s27, [#allocation6], %s10644_s29, %s10644_s29, %s10645_s0  }
  0x1b   :  { %s10646_s21 = smov [#allocation10]   ;;  %s10647_s23 = smov [#allocation11]  }
  0x1c   :  { %s65_s22 = sshll.u32 %s10646_s21, 4  ;;  %s79_s24 = sshll.u32 %s10647_s23, 4  ;;  %s66_s22 = int_to_ptr.vmem [resolvable:$true] %s65_s22  ;;  %s80_s24 = int_to_ptr.vmem [resolvable:$true] %s79_s24 }
  0x1d   :  { %s10558_s26 = scalar_lea.vmem %s66_s22, 2560  ;;  %p10563_p11 = scmp.lt.s32.totalorder %s66_s22, %s66_s22 }
  0x1e   :  { %p10559_p10 = scmp.ne.s32.totalorder %s66_s22, %s10558_s26  ;;  %p10564_p12 = scmp.lt.s32.totalorder %s10558_s26, %s10558_s26 }
  0x20   :  { %p10565_p13 = por %p10564_p12, %p10563_p11 }
  0x22   :  { %p10566_p0 = pnand %p10565_p13, %p10559_p10 }
  0x24   :  { %10569 = shalt.err (!%p10566_p0)
}
  0x25   :  { %71 = dma.hbm_to_vmem [thread:$0]  %s14000_s7, 2560, %s66_s22, [#allocation9], %s10644_s29, %s10644_s29, %s10645_s0  }
  0x26   :  { %s10578_s28 = scalar_lea.vmem %s80_s24, 2048  ;;  %p10583_p2 = scmp.lt.s32.totalorder %s80_s24, %s80_s24 }
  0x27   :  { %p10579_p1 = scmp.ne.s32.totalorder %s80_s24, %s10578_s28  ;;  %p10584_p3 = scmp.lt.s32.totalorder %s10578_s28, %s10578_s28 }
  0x29   :  { %p10585_p4 = por %p10584_p3, %p10583_p2 }
  0x2b   :  { %p10586_p5 = pnand %p10585_p4, %p10579_p1 }
  0x2d   :  { %10589 = shalt.err (!%p10586_p5)
}
  0x2e   :  { %s10648_s3 = smov 256   ;;  %s10649_s27 = smov 16  }
  0x2f   :  { %85 = dma.hbm_to_vmem [thread:$0]  %s14002_s9, 2048, %s80_s24, [#allocation12], %s10648_s3, %s10648_s3, %s10649_s27  }
  0x30   :  { %10630 = dma.done.wait [#allocation6], 2560  }
  0x31   :  { %10631 = vsyncadd [#allocation6], 4294964736 }
  0x32   :  { %10632 = dma.done.wait [#allocation9], 5120  }
  0x33   :  { %10633 = vsyncadd [#allocation9], 4294962176 }
  0x34   :  { %10634 = dma.done.wait [#allocation12], 2048  }
  0x35   :  { %10635 = vsyncadd [#allocation12], 4294965248  ;;  %v10765_v0 = vld [vmem:[%s14005_s12] sm:$0xff]  ;;  %v10770_v1 = vld [vmem:[%s14005_s12 + $0x8] sm:$0xff]  ;;  %s14254_s23 = sld [smem:[#allocation83_spill]]  ;;  %vm271_vm0 = vcmask 23552  }
  0x36   :  { %14222 = vst [vmem:[#allocation25_spill] sm:$0xff] %v10765_v0  ;;  %14223 = vst [vmem:[#allocation26_spill] sm:$0xff] %v10770_v1  ;;  %v10775_v2 = vld [vmem:[%s14005_s12 + $0x10] sm:$0xff]  ;;  %v10780_v3 = vld [vmem:[%s14005_s12 + $0x18] sm:$0xff]  ;;  %s14255_s28 = sld [smem:[#allocation84_spill]]  ;;  %s10650_s3 = smov 127  }
  0x37   :  { %14224 = vst [vmem:[#allocation27_spill] sm:$0xff] %v10775_v2  ;;  %14225 = vst [vmem:[#allocation28_spill] sm:$0xff] %v10780_v3  ;;  %v10785_v4 = vld [vmem:[%s14005_s12 + $0x20] sm:$0xff]  ;;  %v10790_v5 = vld [vmem:[%s14005_s12 + $0x28] sm:$0xff]  ;;  %s10652_s27 = smov 126   ;;  %s10653_s30 = smov 124  }
  0x38   :  { %14226 = vst [vmem:[#allocation29_spill] sm:$0xff] %v10785_v4  ;;  %14227 = vst [vmem:[#allocation30_spill] sm:$0xff] %v10790_v5  ;;  %v10795_v6 = vld [vmem:[%s14005_s12 + $0x30] sm:$0xff]  ;;  %v10800_v7 = vld [vmem:[%s14005_s12 + $0x38] sm:$0xff] }
  0x39   :  { %14228 = vst [vmem:[#allocation31_spill] sm:$0xff] %v10795_v6  ;;  %14229 = vst [vmem:[#allocation32_spill] sm:$0xff] %v10800_v7  ;;  %v10805_v8 = vld [vmem:[%s14005_s12 + $0x40] sm:$0xff]  ;;  %v10810_v9 = vld [vmem:[%s14005_s12 + $0x48] sm:$0xff] }
  0x3a   :  { %14230 = vst [vmem:[#allocation33_spill] sm:$0xff] %v10805_v8  ;;  %14231 = vst [vmem:[#allocation34_spill] sm:$0xff] %v10810_v9  ;;  %v10815_v10 = vld [vmem:[%s14005_s12 + $0x50] sm:$0xff]  ;;  %v10820_v11 = vld [vmem:[%s14005_s12 + $0x58] sm:$0xff] }
  0x3b   :  { %14232 = vst [vmem:[#allocation35_spill] sm:$0xff] %v10815_v10  ;;  %14233 = vst [vmem:[#allocation36_spill] sm:$0xff] %v10820_v11  ;;  %v10825_v12 = vld [vmem:[%s14005_s12 + $0x60] sm:$0xff]  ;;  %v10830_v13 = vld [vmem:[%s14005_s12 + $0x68] sm:$0xff] }
  0x3c   :  { %14234 = vst [vmem:[#allocation37_spill] sm:$0xff] %v10825_v12  ;;  %14235 = vst [vmem:[#allocation38_spill] sm:$0xff] %v10830_v13  ;;  %v10835_v14 = vld [vmem:[%s14005_s12 + $0x70] sm:$0xff]  ;;  %v10840_v15 = vld [vmem:[%s14005_s12 + $0x78] sm:$0xff] }
  0x3d   :  { %14236 = vst [vmem:[#allocation39_spill] sm:$0xff] %v10835_v14  ;;  %14237 = vst [vmem:[#allocation40_spill] sm:$0xff] %v10840_v15  ;;  %v10845_v16 = vld [vmem:[%s14005_s12 + $0x80] sm:$0xff]  ;;  %v10850_v17 = vld [vmem:[%s14005_s12 + $0x88] sm:$0xff] }
  0x3e   :  { %14238 = vst [vmem:[#allocation41_spill] sm:$0xff] %v10845_v16  ;;  %14239 = vst [vmem:[#allocation42_spill] sm:$0xff] %v10850_v17  ;;  %v10855_v18 = vld [vmem:[%s14005_s12 + $0x90] sm:$0xff]  ;;  %v10860_v19 = vld [vmem:[%s14005_s12 + $0x98] sm:$0xff] }
  0x3f   :  { %14240 = vst [vmem:[#allocation43_spill] sm:$0xff] %v10855_v18  ;;  %14241 = vst [vmem:[#allocation44_spill] sm:$0xff] %v10860_v19  ;;  %v10865_v20 = vld [vmem:[%s14005_s12 + $0xa0] sm:$0xff]  ;;  %v10870_v21 = vld [vmem:[%s14005_s12 + $0xa8] sm:$0xff] }
  0x40   :  { %14242 = vst [vmem:[#allocation45_spill] sm:$0xff] %v10865_v20  ;;  %14243 = vst [vmem:[#allocation46_spill] sm:$0xff] %v10870_v21  ;;  %v10875_v22 = vld [vmem:[%s14005_s12 + $0xb0] sm:$0xff]  ;;  %v10880_v23 = vld [vmem:[%s14005_s12 + $0xb8] sm:$0xff] }
  0x41   :  { %14244 = vst [vmem:[#allocation47_spill] sm:$0xff] %v10875_v22  ;;  %14245 = vst [vmem:[#allocation48_spill] sm:$0xff] %v10880_v23  ;;  %v10885_v24 = vld [vmem:[%s14005_s12 + $0xc0] sm:$0xff]  ;;  %v10890_v25 = vld [vmem:[%s14005_s12 + $0xc8] sm:$0xff] }
  0x42   :  { %14246 = vst [vmem:[#allocation49_spill] sm:$0xff] %v10885_v24  ;;  %14247 = vst [vmem:[#allocation50_spill] sm:$0xff] %v10890_v25  ;;  %v10895_v26 = vld [vmem:[%s14005_s12 + $0xd0] sm:$0xff]  ;;  %v10900_v27 = vld [vmem:[%s14005_s12 + $0xd8] sm:$0xff] }
  0x43   :  { %14248 = vst [vmem:[#allocation51_spill] sm:$0xff] %v10895_v26  ;;  %14249 = vst [vmem:[#allocation52_spill] sm:$0xff] %v10900_v27  ;;  %v10905_v28 = vld [vmem:[%s14005_s12 + $0xe0] sm:$0xff]  ;;  %v10910_v29 = vld [vmem:[%s14005_s12 + $0xe8] sm:$0xff] }
  0x44   :  { %14250 = vst [vmem:[#allocation53_spill] sm:$0xff] %v10905_v28  ;;  %14251 = vst [vmem:[#allocation54_spill] sm:$0xff] %v10910_v29  ;;  %v10915_v30 = vld [vmem:[%s14005_s12 + $0xf0] sm:$0xff]  ;;  %v10920_v31 = vld [vmem:[%s14005_s12 + $0xf8] sm:$0xff]  ;;  %s10651_s12 = smov 125  }
  0x45   :  { %14252 = vst [vmem:[#allocation55_spill] sm:$0xff] %v10915_v30  ;;  %14253 = vst [vmem:[#allocation56_spill] sm:$0xff] %v10920_v31  ;;  %v227_v32 = vld [vmem:[%s14254_s23] sm:$0x7]  ;;  %v8747_v34 = vld [vmem:[%s14254_s23 + $0x4] sm:$0x7] }
  0x46   :  { %v230_v33 = vpack.c.bf16 %v227_v32, %v227_v32  ;;  %v10931_v35 = vld [vmem:[%s14255_s28 + $0x20] sm:$0xff]   ;;  %v877_v36 = vpack.c.bf16 %v8747_v34, %v8747_v34 }
  0x47   :  { %9460 = vmatprep.mubr.msk.bf16.mxu1 %vm271_vm0, %v10931_v35  ;;  %v10942_v37 = vld [vmem:[%s14255_s28 + $0x40] sm:$0xff]  }
  0x48   :  { %269 = vrot.lane.b32.xlu0 %v230_v33, %s10650_s3  ;;  %604 = vrot.lane.b32.xlu1 %v230_v33, %s10651_s12 }
  0x49   :  { %9480 = vmatprep.mubr.msk.bf16.mxu0 %vm271_vm0, %v10942_v37 }
  0x4c   :  { %485 = vrot.lane.b32.xlu0 %v230_v33, %s10652_s27  ;;  %723 = vrot.lane.b32.xlu1 %v230_v33, %s10653_s30 }
  0x50   :  { %879 = vrot.lane.b32.xlu0 %v877_v36, %s10650_s3  ;;  %1017 = vrot.lane.b32.xlu1 %v877_v36, %s10652_s27 }
  0x54   :  { %1095 = vrot.lane.b32.xlu0 %v877_v36, %s10651_s12  ;;  %1173 = vrot.lane.b32.xlu1 %v877_v36, %s10653_s30 }
  0x55   :  { %214 = vsyncadd [#allocation4], 4096  ;;  %v820_v38 = vld [vmem:[%s13995_s2 + $0x38] sm:$0xff]  ;;  %v819_v39 = vld [vmem:[%s13995_s2 + $0x30] sm:$0xff]  ;;  %v14013_v40 = vmov 0   ;;  %vm284_vm1 = vcmask 1040384  }
  0x56   :  { %10077 = vset.pattern.permute.xlu1 %v14013_v40  ;;  %10076 = vset.pattern.permute.xlu0 %v14013_v40  ;;  %v817_v41 = vld [vmem:[%s13995_s2 + $0x20] sm:$0xff]  ;;  %v818_v42 = vld [vmem:[%s13995_s2 + $0x28] sm:$0xff]  ;;  %v815_v43 = vld [vmem:[%s13995_s2 + $0x10] sm:$0xff]  ;;  %vm285_vm2 = vcmask 1041408   ;;  %v10655_v47 = vmov 65535   ;;  %vm1324_vm3 = vcmask 523264  }
  0x57   :  { %v816_v44 = vld [vmem:[%s13995_s2 + $0x18] sm:$0xff]  ;;  %v813_v45 = vld [vmem:[%s13995_s2] sm:$0xff]  ;;  %v814_v46 = vld [vmem:[%s13995_s2 + $0x8] sm:$0xff]  ;;  %v286_v48 = vsel %vm284_vm1, 4294967295, %v10655_v47  ;;  %vm4582_vm4 = vcmask 130048  }
  0x58   :  { %858 = vperm.xlu1 %10077, %v820_v38   ;;  %853 = vperm.xlu0 %10076, %v819_v39   ;;  %v10977_v49 = vsel %vm285_vm2, %v286_v48, 0  ;;  %v10984_v54 = vld [vmem:[%s14255_s28 + $0x28] sm:$0xff]   ;;  %v10989_v55 = vld [vmem:[%s14255_s28 + $0x30] sm:$0xff]   ;;  %v10081_v32 = vld [vmem:[%s14255_s28 + $0x38] sm:$0xff]  }
  0x59   :  { %v389_v53 = vand.u32 %v10977_v49, %v230_v33  ;;  %v11001_v61 = vld [vmem:[%s14255_s28 + $0x48] sm:$0xff]   ;;  %v11006_v62 = vld [vmem:[%s14255_s28 + $0x50] sm:$0xff]   ;;  %v950_v63 = vand.u32 %v877_v36, %v10977_v49  ;;  %v10082_v33 = vld [vmem:[%s14255_s28] sm:$0xff]  }
  0x5a   :  { %v10089_v34 = vld [vmem:[%s14255_s28 + $0x58] sm:$0xff]   ;;  %v10091_v36 = vld [vmem:[%s14255_s28 + $0x80] sm:$0xff]   ;;  %v10084_v39 = vld [vmem:[%s14255_s28 + $0x8] sm:$0xff]  }
  0x5b   :  { %v10088_v47 = vld [vmem:[%s14255_s28 + $0x18] sm:$0xff]   ;;  %v10090_v48 = vld [vmem:[%s14255_s28 + $0x60] sm:$0xff]  }
  0x5c   :  { %843 = vperm.xlu1 %10077, %v817_v41   ;;  %848 = vperm.xlu0 %10076, %v818_v42   ;;  %v10086_v41 = vld [vmem:[%s14255_s28 + $0x10] sm:$0xff]  }
  0x60   :  { %833 = vperm.xlu1 %10077, %v815_v43   ;;  %838 = vperm.xlu0 %10076, %v816_v44   ;;  %v10093_v44 = vld [vmem:[%s14255_s28 + $0x88] sm:$0xff]  }
  0x64   :  { %823 = vperm.xlu1 %10077, %v813_v45   ;;  %828 = vperm.xlu0 %10076, %v814_v46   ;;  %v10095_v45 = vld [vmem:[%s14255_s28 + $0x90] sm:$0xff]  }
  0xba   :  { %v270_v50 = vpop.permute.xlu0 %269  ;;  %v605_v51 = vpop.permute.xlu1 %604 }
  0xbb   :  { %v289_v52 = vand.u32 %v10977_v49, %v270_v50  ;;  %v619_v58 = vand.u32 %v605_v51, %v10977_v49  ;;  %v10097_v50 = vld [vmem:[%s14255_s28 + $0x98] sm:$0xff]  }
  0xbd   :  { %9458 = vmatprep.subr.bf16.mxu1 %v289_v52 }
  0xbe   :  { %9459 = vmatpush3.bf16.msra.mxu1 %v289_v52  ;;  %v486_v56 = vpop.permute.xlu0 %485  ;;  %v724_v57 = vpop.permute.xlu1 %723  ;;  %v10092_v52 = vld [vmem:[%s14255_s28 + $0x68] sm:$0xff]  }
  0xbf   :  { %9468 = vmatprep.subr.bf16.mxu1 %v389_v53  ;;  %v500_v59 = vand.u32 %v486_v56, %v10977_v49  ;;  %v738_v60 = vand.u32 %v724_v57, %v10977_v49  ;;  %v10096_v57 = vld [vmem:[%s14255_s28 + $0x78] sm:$0xff]  }
  0xc1   :  { %9461 = vmatmul.mubr.msk.bf16.vlgmr.msra.gmra.mxu1 %vm271_vm0, %v10984_v54  ;;  %9478 = vmatprep.subr.bf16.mxu0 %v500_v59 }
  0xc2   :  { %9469 = vmatpush3.bf16.msra.mxu1 %v389_v53  ;;  %9464 = vmatprep.mubr.msk.bf16.mxu1 %vm271_vm0, %v10989_v55  ;;  %v880_v38 = vpop.permute.xlu0 %879  ;;  %v1018_v51 = vpop.permute.xlu1 %1017  ;;  %v10094_v53 = vld [vmem:[%s14255_s28 + $0x70] sm:$0xff]  }
  0xc3   :  { %9479 = vmatpush3.bf16.msra.mxu0 %v500_v59  ;;  %9488 = vmatprep.subr.bf16.mxu1 %v619_v58  ;;  %v882_v42 = vand.u32 %v880_v38, %v10977_v49  ;;  %v1020_v56 = vand.u32 %v1018_v51, %v10977_v49 }
  0xc4   :  { %9498 = vmatprep.subr.bf16.mxu0 %v738_v60 }
  0xc6   :  { %9481 = vmatmul.mubr.msk.bf16.vlgmr.msra.gmra.mxu0 %vm271_vm0, %v11001_v61  ;;  %v1096_v43 = vpop.permute.xlu0 %1095 }
  0xc7   :  { %9484 = vmatprep.mubr.msk.bf16.mxu0 %vm271_vm0, %v11006_v62  ;;  %9499 = vmatpush3.bf16.msra.mxu0 %v738_v60  ;;  %v1098_v46 = vand.u32 %v1096_v43, %v10977_v49 }
  0xc8   :  { %9518 = vmatprep.subr.bf16.mxu0 %v950_v63 }
  0xc9   :  { %9465 = vmatmul.mubr.msk.bf16.gmra.mxu1 %vm271_vm0, %v10081_v32 }
  0xca   :  { %9470 = vmatprep.mubr.msk.bf16.mxu1 %vm271_vm0, %v10082_v33 }
  0xce   :  { %9485 = vmatmul.mubr.msk.bf16.gmra.mxu0 %vm271_vm0, %v10089_v34 }
  0xcf   :  { %9500 = vmatprep.mubr.msk.bf16.mxu0 %vm271_vm0, %v10091_v36 }
  0xd1   :  { %9471 = vmatmul.mubr.msk.bf16.vlgmr.msra.gmra.mxu1 %vm271_vm0, %v10084_v39 }
  0xd2   :  { %9489 = vmatpush3.bf16.msra.mxu1 %v619_v58  ;;  %9474 = vmatprep.mubr.msk.bf16.mxu1 %vm271_vm0, %v10086_v41  ;;  %v1174_v58 = vpop.permute.xlu1 %1173 }
  0xd3   :  { %9508 = vmatprep.subr.bf16.mxu1 %v882_v42  ;;  %v1176_v59 = vand.u32 %v1174_v58, %v10977_v49 }
  0xd6   :  { %9501 = vmatmul.mubr.msk.bf16.vlgmr.msra.gmra.mxu0 %vm271_vm0, %v10093_v44 }
  0xd7   :  { %9504 = vmatprep.mubr.msk.bf16.mxu0 %vm271_vm0, %v10095_v45  ;;  %9519 = vmatpush3.bf16.msra.mxu0 %v950_v63 }
  0xd8   :  { %9538 = vmatprep.subr.bf16.mxu0 %v1098_v46 }
  0xd9   :  { %9475 = vmatmul.mubr.msk.bf16.gmra.mxu1 %vm271_vm0, %v10088_v47 }
  0xda   :  { %9490 = vmatprep.mubr.msk.bf16.mxu1 %vm271_vm0, %v10090_v48 }
  0xde   :  { %9505 = vmatmul.mubr.msk.bf16.gmra.mxu0 %vm271_vm0, %v10097_v50 }
  0xdf   :  { %9520 = vmatprep.mubr.msk.bf16.mxu0 %vm271_vm0, %v10082_v33 }
  0xe1   :  { %9491 = vmatmul.mubr.msk.bf16.vlgmr.msra.gmra.mxu1 %vm271_vm0, %v10092_v52 }
  0xe2   :  { %9509 = vmatpush3.bf16.msra.mxu1 %v882_v42  ;;  %9494 = vmatprep.mubr.msk.bf16.mxu1 %vm271_vm0, %v10094_v53 }
  0xe3   :  { %9528 = vmatprep.subr.bf16.mxu1 %v1020_v56 }
  0xe6   :  { %9521 = vmatmul.mubr.msk.bf16.vlgmr.msra.gmra.mxu0 %vm271_vm0, %v10084_v39 }
  0xe7   :  { %9524 = vmatprep.mubr.msk.bf16.mxu0 %vm271_vm0, %v10086_v41  ;;  %9539 = vmatpush3.bf16.msra.mxu0 %v1098_v46 }
  0xe9   :  { %9495 = vmatmul.mubr.msk.bf16.gmra.mxu1 %vm271_vm0, %v10096_v57 }
  0xea   :  { %9510 = vmatprep.mubr.msk.bf16.mxu1 %vm271_vm0, %v10931_v35 }
  0xee   :  { %9525 = vmatmul.mubr.msk.bf16.gmra.mxu0 %vm271_vm0, %v10088_v47 }
  0xef   :  { %9540 = vmatprep.mubr.msk.bf16.mxu0 %vm271_vm0, %v10090_v48 }
  0xf1   :  { %9511 = vmatmul.mubr.msk.bf16.vlgmr.msra.gmra.mxu1 %vm271_vm0, %v10984_v54 }
  0xf2   :  { %9529 = vmatpush3.bf16.msra.mxu1 %v1020_v56  ;;  %9514 = vmatprep.mubr.msk.bf16.mxu1 %vm271_vm0, %v10989_v55  ;;  %v11101_v56 = vpop.permute.xlu0 %853 }
  0xf3   :  { %9548 = vmatprep.subr.bf16.mxu1 %v1176_v59 }
  0xf6   :  { %9541 = vmatmul.mubr.msk.bf16.vlgmr.msra.gmra.mxu0 %vm271_vm0, %v10092_v52  ;;  %v11105_v5 = vpop.permute.xlu0 %848 }
  0xf7   :  { %9544 = vmatprep.mubr.msk.bf16.mxu0 %vm271_vm0, %v10094_v53 }
  0xf9   :  { %9515 = vmatmul.mubr.msk.bf16.gmra.mxu1 %vm271_vm0, %v10081_v32 }
  0xfa   :  { %9530 = vmatprep.mubr.msk.bf16.mxu1 %vm271_vm0, %v10942_v37 }
  0xfe   :  { %9545 = vmatmul.mubr.msk.bf16.gmra.mxu0 %vm271_vm0, %v10096_v57 }
 0x101   :  { %9531 = vmatmul.mubr.msk.bf16.vlgmr.msra.gmra.mxu1 %vm271_vm0, %v11001_v61 }
 0x102   :  { %9549 = vmatpush3.bf16.msra.mxu1 %v1176_v59  ;;  %9534 = vmatprep.mubr.msk.bf16.mxu1 %vm271_vm0, %v11006_v62  ;;  %v11103_v59 = vpop.permute.xlu1 %858 }
 0x106   :  { %v11107_v8 = vpop.permute.xlu1 %843 }
 0x109   :  { %9535 = vmatmul.mubr.msk.bf16.gmra.mxu1 %vm271_vm0, %v10089_v34 }
 0x10a   :  { %9550 = vmatprep.mubr.msk.bf16.mxu1 %vm271_vm0, %v10091_v36 }
 0x111   :  { %9551 = vmatmul.mubr.msk.bf16.vlgmr.msra.gmra.mxu1 %vm271_vm0, %v10093_v44 }
 0x112   :  { %9554 = vmatprep.mubr.msk.bf16.mxu1 %vm271_vm0, %v10095_v45 }
 0x119   :  { %9555 = vmatmul.mubr.msk.bf16.gmra.mxu1 %vm271_vm0, %v10097_v50 }
 0x181   :  { %v9462_v35 = vpop.f32.mrf.mxu1 }
 0x183   :  { %v325_v37 = vpop.f32.mrf.mxu1 }
 0x185   :  { %v9463_v49 = vpop.f32.mrf.mxu1 }
 0x186   :  { %v9482_v54 = vpop.f32.mrf.mxu0 }
 0x187   :  { %v328_v55 = vpop.f32.mrf.mxu1 }
 0x188   :  { %v536_v60 = vpop.f32.mrf.mxu0 }
 0x189   :  { %v9466_v61 = vpop.f32.mrf.mxu1 }
 0x18a   :  { %v9483_v63 = vpop.f32.mrf.mxu0 }
 0x18b   :  { %v341_v32 = vpop.f32.mrf.mxu1 }
 0x18c   :  { %v539_v62 = vpop.f32.mrf.mxu0 }
 0x18d   :  { %v9467_v33 = vpop.f32.mrf.mxu1 }
 0x18e   :  { %v9486_v34 = vpop.f32.mrf.mxu0 }
 0x18f   :  { %v344_v38 = vpop.f32.mrf.mxu1 }
 0x190   :  { %v552_v36 = vpop.f32.mrf.mxu0 }
 0x191   :  { %v9472_v39 = vpop.f32.mrf.mxu1 }
 0x192   :  { %v9487_v41 = vpop.f32.mrf.mxu0  ;;  %v434_v13 = vadd.f32 %v9472_v39, %v9462_v35  ;;  %v11117_v39 = vpop.permute.xlu1 %833 }
 0x193   :  { %v425_v42 = vpop.f32.mrf.mxu1 }
 0x194   :  { %v555_v43 = vpop.f32.mrf.mxu0  ;;  %v426_v12 = vadd.f32 %v425_v42, %v325_v37 }
 0x195   :  { %v9473_v44 = vpop.f32.mrf.mxu1 }
 0x196   :  { %v9502_v45 = vpop.f32.mrf.mxu0  ;;  %v437_v4 = vadd.f32 %v9473_v44, %v9463_v49  ;;  %v11113_v49 = vpop.permute.xlu0 %838  ;;  %v569_v44 = vadd.f32 %v9482_v54, %v434_v13  ;;  %v567_v35 = vadd.f32 %v536_v60, %v426_v12 }
 0x197   :  { %v428_v46 = vpop.f32.mrf.mxu1 }
 0x198   :  { %v11099_v47 = vpop.f32.mrf.mxu0  ;;  %v429_v9 = vadd.f32 %v428_v46, %v328_v55  ;;  %v570_v19 = vadd.f32 %v9483_v63, %v437_v4 }
 0x199   :  { %v9476_v48 = vpop.f32.mrf.mxu1 }
 0x19a   :  { %v9503_v50 = vpop.f32.mrf.mxu0  ;;  %v450_v2 = vadd.f32 %v9476_v48, %v9466_v61  ;;  %v568_v48 = vadd.f32 %v539_v62, %v429_v9 }
 0x19b   :  { %v441_v51 = vpop.f32.mrf.mxu1 }
 0x19c   :  { %v777_v52 = vpop.f32.mrf.mxu0  ;;  %v442_v11 = vadd.f32 %v441_v51, %v341_v32  ;;  %v573_v14 = vadd.f32 %v9486_v34, %v450_v2 }
 0x19d   :  { %v9477_v53 = vpop.f32.mrf.mxu1 }
 0x19e   :  { %v9506_v57 = vpop.f32.mrf.mxu0  ;;  %v453_v16 = vadd.f32 %v9477_v53, %v9467_v33  ;;  %v571_v18 = vadd.f32 %v552_v36, %v442_v11 }
 0x19f   :  { %v444_v58 = vpop.f32.mrf.mxu1 }
 0x1a0   :  { %v790_v40 = vpop.f32.mrf.mxu0  ;;  %v445_v21 = vadd.f32 %v444_v58, %v344_v38  ;;  %v574_v34 = vadd.f32 %v9487_v41, %v453_v16 }
 0x1a1   :  { %v9492_v1 = vpop.f32.mrf.mxu1 }
 0x1a2   :  { %v9507_v3 = vpop.f32.mrf.mxu0  ;;  %v688_v4 = vadd.f32 %v9492_v1, %v569_v44  ;;  %v572_v38 = vadd.f32 %v555_v43, %v445_v21 }
 0x1a3   :  { %v655_v0 = vpop.f32.mrf.mxu1 }
 0x1a4   :  { %v793_v7 = vpop.f32.mrf.mxu0  ;;  %v686_v11 = vadd.f32 %v655_v0, %v567_v35 }
 0x1a5   :  { %v9493_v6 = vpop.f32.mrf.mxu1 }
 0x1a6   :  { %v11109_v10 = vpop.f32.mrf.mxu0  ;;  %v689_v46 = vadd.f32 %v9493_v6, %v570_v19  ;;  %v11121_v6 = vpop.permute.xlu0 %828  ;;  %v807_v19 = vadd.f32 %v9502_v45, %v688_v4  ;;  %v805_v54 = vadd.f32 %v11099_v47, %v686_v11  ;;  %v11151_v4 = vld [vmem:[#allocation5 + $0x20] sm:$0xff]  }
 0x1a7   :  { %v658_v15 = vpop.f32.mrf.mxu1  ;;  %9566 = vmatprep.mubr.msk.bf16.mxu0 %vm1324_vm3, %v11151_v4 }
 0x1a8   :  { %v11111_v17 = vpop.f32.mrf.mxu0  ;;  %v687_v2 = vadd.f32 %v658_v15, %v568_v48 }
 0x1a9   :  { %v9496_v61 = vpop.f32.mrf.mxu1 }
 0x1aa   :  { %v692_v55 = vadd.f32 %v9496_v61, %v573_v14  ;;  %v11115_v32 = vpop.f32.mrf.mxu0  ;;  %v808_v14 = vadd.f32 %v9503_v50, %v689_v46  ;;  %v806_v13 = vadd.f32 %v777_v52, %v687_v2  ;;  %v11138_v50 = vld [vmem:[#allocation5] sm:$0xff]   ;;  %v863_v52 = vadd.f32 %v11117_v39, %v807_v19 }
 0x1ab   :  { %v671_v51 = vpop.f32.mrf.mxu1  ;;  %9582 = vmatprep.mubr.msk.bf16.mxu1 %vm1324_vm3, %v11138_v50 }
 0x1ac   :  { %v690_v37 = vadd.f32 %v671_v51, %v571_v18  ;;  %v811_v63 = vadd.f32 %v9506_v57, %v692_v55  ;;  %v11119_v9 = vpop.f32.mrf.mxu0  ;;  %v864_v60 = vadd.f32 %v11113_v49, %v808_v14  ;;  %v862_v45 = vadd.f32 %v11121_v6, %v806_v13 }
 0x1ad   :  { %v9497_v33 = vpop.f32.mrf.mxu1  ;;  %v871_v2 = vmax.f32 %v863_v52, 0.0  ;;  %v11190_v52 = vld [vmem:[#allocation5 + $0x18] sm:$0xff]  }
 0x1ae   :  { %v809_v62 = vadd.f32 %v790_v40, %v690_v37  ;;  %v693_v36 = vadd.f32 %v9497_v33, %v574_v34  ;;  %v867_v15 = vadd.f32 %v11101_v56, %v811_v63  ;;  %v11126_v1 = vpop.f32.mrf.mxu0  ;;  %v11130_v40 = vpop.permute.xlu1 %823  ;;  %v872_v55 = vmax.f32 %v864_v60, 0.0 }
 0x1af   :  { %v674_v42 = vpop.f32.mrf.mxu1  ;;  %v861_v58 = vadd.f32 %v11130_v40, %v805_v54  ;;  %v870_v51 = vmax.f32 %v862_v45, 0.0  ;;  %v11178_v54 = vld [vmem:[#allocation5 + $0x10] sm:$0xff]  }
 0x1b0   :  { %v691_v12 = vadd.f32 %v674_v42, %v572_v38  ;;  %v812_v18 = vadd.f32 %v9507_v3, %v693_v36  ;;  %v865_v0 = vadd.f32 %v11107_v8, %v809_v62  ;;  %v875_v47 = vmax.f32 %v867_v15, 0.0 }
 0x1b1   :  { %v11124_v16 = vpop.f32.mrf.mxu1  ;;  %v869_v63 = vmax.f32 %v861_v58, 0.0  ;;  %v11154_v33 = vpack.c.bf16 %v872_v55, %v871_v2 }
 0x1b2   :  { %v810_v21 = vadd.f32 %v793_v7, %v691_v12  ;;  %v868_v41 = vadd.f32 %v11103_v59, %v812_v18  ;;  %v11143_v7 = vpop.f32.mrf.mxu0  ;;  %v873_v61 = vmax.f32 %v865_v0, 0.0  ;;  %v11174_v18 = vld [vmem:[#allocation5 + $0x8] sm:$0xff]   ;;  %v995_v23 = vadd.f32 %v11109_v10, %v11124_v16 }
 0x1b3   :  { %v11134_v43 = vpop.f32.mrf.mxu1  ;;  %v11158_v62 = vpack.c.bf16 %v870_v51, %v869_v63 }
 0x1b4   :  { %v866_v3 = vadd.f32 %v11105_v5, %v810_v21  ;;  %v876_v53 = vmax.f32 %v868_v41, 0.0  ;;  %v9527_v34 = vpop.f32.mrf.mxu0 }
 0x1b5   :  { %v11141_v57 = vpop.f32.mrf.mxu1 }
 0x1b6   :  { %v874_v48 = vmax.f32 %v866_v3, 0.0  ;;  %v1270_v44 = vpack.c.bf16 %v876_v53, %v875_v47  ;;  %v1005_v14 = vpop.f32.mrf.mxu0  ;;  %v11194_v47 = vld [vmem:[#allocation5 + $0x60] sm:$0xff]   ;;  %v998_v2 = vadd.f32 %v11115_v32, %v11141_v57 }
 0x1b7   :  { %v11148_v46 = vpop.f32.mrf.mxu1 }
 0x1b8   :  { %v1269_v35 = vpack.c.bf16 %v874_v48, %v873_v61  ;;  %1318 = vrot.lane.b32.xlu1 %v1270_v44, %s10650_s3  ;;  %9574 = vmatprep.subr.bf16.mxu1 %v1270_v44  ;;  %v9542_v42 = vpop.f32.mrf.mxu0 }
 0x1b9   :  { %v9516_v37 = vpop.f32.mrf.mxu1  ;;  %9575 = vmatpush3.bf16.msra.mxu1 %v1270_v44 }
 0x1ba   :  { %1316 = vrot.lane.b32.xlu0 %v1269_v35, %s10650_s3  ;;  %9576 = vmatprep.subr.bf16.mxu1 %v1269_v35  ;;  %v11171_v19 = vpop.f32.mrf.mxu0  ;;  %v1011_v48 = vadd.f32 %v11126_v1, %v9516_v37 }
 0x1bb   :  { %v934_v11 = vpop.f32.mrf.mxu1 }
 0x1bc   :  { %1314 = vrot.lane.b32.xlu1 %v11154_v33, %s10650_s3  ;;  %v9543_v21 = vpop.f32.mrf.mxu0  ;;  %v1003_v20 = vadd.f32 %v11143_v7, %v934_v11 }
 0x1bd   :  { %v9517_v38 = vpop.f32.mrf.mxu1  ;;  %9577 = vmatpush3.bf16.msra.mxu1 %v1269_v35 }
 0x1be   :  { %1312 = vrot.lane.b32.xlu0 %v11158_v62, %s10650_s3  ;;  %9578 = vmatprep.subr.bf16.mxu1 %v11154_v33  ;;  %v1137_v41 = vpop.f32.mrf.mxu0  ;;  %v1014_v22 = vadd.f32 %v9527_v34, %v9517_v38 }
 0x1bf   :  { %v937_v36 = vpop.f32.mrf.mxu1 }
 0x1c0   :  { %1534 = vrot.lane.b32.xlu1 %v1270_v44, %s10652_s27  ;;  %v9546_v53 = vpop.f32.mrf.mxu0  ;;  %v1006_v24 = vadd.f32 %v1005_v14, %v937_v36 }
 0x1c1   :  { %v9532_v13 = vpop.f32.mrf.mxu1  ;;  %9579 = vmatpush3.bf16.msra.mxu1 %v11154_v33 }
 0x1c2   :  { %1660 = vrot.lane.b32.xlu0 %v1270_v44, %s10651_s12  ;;  %9580 = vmatprep.subr.bf16.mxu1 %v11158_v62  ;;  %v1150_v55 = vpop.f32.mrf.mxu0  ;;  %v1089_v1 = vadd.f32 %v9532_v13, %v995_v23 }
 0x1c3   :  { %v11169_v12 = vpop.f32.mrf.mxu1 }
 0x1c4   :  { %1532 = vrot.lane.b32.xlu1 %v1269_v35, %s10652_s27  ;;  %v9547_v37 = vpop.f32.mrf.mxu0  ;;  %v1167_v7 = vadd.f32 %v9542_v42, %v1089_v1 }
 0x1c5   :  { %v9533_v15 = vpop.f32.mrf.mxu1  ;;  %9581 = vmatpush3.bf16.msra.mxu1 %v11158_v62 }
 0x1c6   :  { %1658 = vrot.lane.b32.xlu0 %v1269_v35, %s10651_s12  ;;  %v1090_v25 = vadd.f32 %v9533_v15, %v998_v2  ;;  %v1153_v34 = vpop.f32.mrf.mxu0  ;;  %v1880_v2 = vld [vmem:[%s13997_s4 + $0x18] sm:$0xff] }
 0x1c7   :  { %v1059_v0 = vpop.f32.mrf.mxu1 }
 0x1c8   :  { %1530 = vrot.lane.b32.xlu1 %v11154_v33, %s10652_s27  ;;  %9583 = vmatmul.mubr.msk.bf16.vlgmr.msra.gmra.mxu1 %vm1324_vm3, %v11174_v18  ;;  %v1168_v57 = vadd.f32 %v9543_v21, %v1090_v25 }
 0x1c9   :  { %v9536_v60 = vpop.f32.mrf.mxu1  ;;  %9586 = vmatprep.mubr.msk.bf16.mxu1 %vm1324_vm3, %v11178_v54 }
 0x1ca   :  { %1656 = vrot.lane.b32.xlu0 %v11154_v33, %s10651_s12  ;;  %v1093_v63 = vadd.f32 %v9536_v60, %v1011_v48  ;;  %v1877_v48 = vld [vmem:[%s13997_s4] sm:$0xff] }
 0x1cb   :  { %v1072_v45 = vpop.f32.mrf.mxu1 }
 0x1cc   :  { %1528 = vrot.lane.b32.xlu1 %v11158_v62, %s10652_s27  ;;  %v1091_v26 = vadd.f32 %v1072_v45, %v1003_v20  ;;  %v1171_v29 = vadd.f32 %v9546_v53, %v1093_v63  ;;  %v987_v20 = vadd.f32 %v11111_v17, %v11134_v43  ;;  %v1878_v63 = vld [vmem:[%s13997_s4 + $0x8] sm:$0xff] }
 0x1cd   :  { %v9537_v3 = vpop.f32.mrf.mxu1 }
 0x1ce   :  { %1654 = vrot.lane.b32.xlu0 %v11158_v62, %s10651_s12  ;;  %v1094_v31 = vadd.f32 %v9537_v3, %v1014_v22  ;;  %v1169_v23 = vadd.f32 %v1150_v55, %v1091_v26  ;;  %v1884_v55 = vld [vmem:[%s13997_s4 + $0x38] sm:$0xff] }
 0x1cf   :  { %v1075_v58 = vpop.f32.mrf.mxu1 }
 0x1d0   :  { %1786 = vrot.lane.b32.xlu1 %v1270_v44, %s10653_s30  ;;  %9587 = vmatmul.mubr.msk.bf16.gmra.mxu1 %vm1324_vm3, %v11190_v52  ;;  %v1092_v10 = vadd.f32 %v1075_v58, %v1006_v24  ;;  %v1172_v38 = vadd.f32 %v9547_v37, %v1094_v31 }
 0x1d1   :  { %v9552_v61 = vpop.f32.mrf.mxu1  ;;  %9614 = vmatprep.mubr.msk.bf16.mxu1 %vm1324_vm3, %v11194_v47 }
 0x1d2   :  { %v1245_v14 = vadd.f32 %v9552_v61, %v1167_v7  ;;  %v1170_v24 = vadd.f32 %v1153_v34, %v1092_v10  ;;  %v1879_v61 = vld [vmem:[%s13997_s4 + $0x10] sm:$0xff]  ;;  %v11290_v7 = vld [vmem:[#allocation5 + $0x28] sm:$0xff]  }
 0x1d3   :  { %v1212_v51 = vpop.f32.mrf.mxu1 }
 0x1d4   :  { %1784 = vrot.lane.b32.xlu1 %v1269_v35, %s10653_s30  ;;  %v990_v35 = vadd.f32 %v11119_v9, %v11148_v46  ;;  %v1087_v46 = vadd.f32 %v11169_v12, %v987_v20  ;;  %v1253_v43 = vadd.f32 %v1245_v14, %v11117_v39  ;;  %v11298_v20 = vld [vmem:[#allocation5 + $0x38] sm:$0xff]   ;;  %v11302_v14 = vld [vmem:[#allocation5 + $0x68] sm:$0xff]  }
 0x1d5   :  { %v9553_v44 = vpop.f32.mrf.mxu1 }
 0x1d6   :  { %v1246_v13 = vadd.f32 %v9553_v44, %v1168_v57  ;;  %v1088_v22 = vadd.f32 %v1059_v0, %v990_v35 }
 0x1d7   :  { %v1215_v27 = vpop.f32.mrf.mxu1 }
 0x1d8   :  { %1782 = vrot.lane.b32.xlu1 %v11154_v33, %s10653_s30  ;;  %v1254_v26 = vadd.f32 %v1246_v13, %v11113_v49  ;;  %v1166_v17 = vadd.f32 %v1137_v41, %v1088_v22  ;;  %v1261_v49 = vmax.f32 %v1253_v43, 0.0  ;;  %v11300_v22 = vld [vmem:[#allocation5 + $0x40] sm:$0xff]  }
 0x1d9   :  { %v9556_v32 = vpop.f32.mrf.mxu1 }
 0x1da   :  { %v1249_v16 = vadd.f32 %v9556_v32, %v1171_v29  ;;  %v1262_v60 = vmax.f32 %v1254_v26, 0.0  ;;  %v1244_v45 = vadd.f32 %v1215_v27, %v1166_v17  ;;  %v11328_v26 = vld [vmem:[#allocation5 + $0x58] sm:$0xff]  }
 0x1db   :  { %v1228_v11 = vpop.f32.mrf.mxu1 }
 0x1dc   :  { %1780 = vrot.lane.b32.xlu1 %v11158_v62, %s10653_s30  ;;  %v1257_v29 = vadd.f32 %v1249_v16, %v11101_v56  ;;  %v1247_v33 = vadd.f32 %v1228_v11, %v1169_v23  ;;  %v1165_v56 = vadd.f32 %v11171_v19, %v1087_v46  ;;  %v11292_v11 = vld [vmem:[#allocation5 + $0x30] sm:$0xff]   ;;  %v11318_v46 = vld [vmem:[#allocation5 + $0x78] sm:$0xff]  }
 0x1dd   :  { %v9557_v25 = vpop.f32.mrf.mxu1 }
 0x1de   :  { %v1250_v9 = vadd.f32 %v9557_v25, %v1172_v38  ;;  %v1265_v15 = vmax.f32 %v1257_v29, 0.0  ;;  %v1255_v62 = vadd.f32 %v1247_v33, %v11107_v8  ;;  %v1243_v53 = vadd.f32 %v1212_v51, %v1165_v56  ;;  %v1882_v51 = vld [vmem:[%s13997_s4 + $0x28] sm:$0xff]  ;;  %v11347_v56 = vld [vmem:[#allocation5 + $0x98] sm:$0xff]  }
 0x1df   :  { %v1231_v36 = vpop.f32.mrf.mxu1  ;;  %v11230_v8 = vpack.c.bf16 %v1262_v60, %v1261_v49  ;;  %v11314_v33 = vld [vmem:[#allocation5 + $0x48] sm:$0xff]  }
 0x1e0   :  { %v1258_v31 = vadd.f32 %v1250_v9, %v11103_v59  ;;  %v1248_v42 = vadd.f32 %v1231_v36, %v1170_v24  ;;  %v1263_v59 = vmax.f32 %v1255_v62, 0.0  ;;  %v1251_v27 = vadd.f32 %v1243_v53, %v11130_v40  ;;  %v1881_v40 = vld [vmem:[%s13997_s4 + $0x20] sm:$0xff]  ;;  %v11304_v24 = vld [vmem:[#allocation5 + $0x70] sm:$0xff]  }
 0x1e1   :  { %v11316_v9 = vld [vmem:[#allocation5 + $0x50] sm:$0xff]  }
 0x1e2   :  { %v1266_v0 = vmax.f32 %v1258_v31, 0.0  ;;  %v1256_v21 = vadd.f32 %v1248_v42, %v11105_v5  ;;  %v1252_v5 = vadd.f32 %v1244_v45, %v11121_v6  ;;  %v1259_v41 = vmax.f32 %v1251_v27, 0.0  ;;  %v1883_v6 = vld [vmem:[%s13997_s4 + $0x30] sm:$0xff]  ;;  %v11330_v31 = vld [vmem:[#allocation5 + $0x80] sm:$0xff]  }
 0x1e4   :  { %v11224_v12 = vpack.c.bf16 %v1266_v0, %v1265_v15  ;;  %v1264_v3 = vmax.f32 %v1256_v21, 0.0  ;;  %v1260_v19 = vmax.f32 %v1252_v5, 0.0  ;;  %v11336_v15 = vld [vmem:[#allocation5 + $0x88] sm:$0xff]  }
 0x1e6   :  { %2097 = vrot.lane.b32.xlu1 %v11224_v12, %s10652_s27  ;;  %1955 = vrot.lane.b32.xlu0 %v11224_v12, %s10650_s3  ;;  %v11233_v39 = vpack.c.bf16 %v1264_v3, %v1263_v59  ;;  %v11244_v58 = vpack.c.bf16 %v1260_v19, %v1259_v41 }
 0x1ea   :  { %2093 = vrot.lane.b32.xlu1 %v11230_v8, %s10652_s27  ;;  %1953 = vrot.lane.b32.xlu0 %v11233_v39, %s10650_s3 }
 0x1ee   :  { %2182 = vrot.lane.b32.xlu1 %v11224_v12, %s10651_s12  ;;  %1951 = vrot.lane.b32.xlu0 %v11230_v8, %s10650_s3 }
 0x1f2   :  { %2180 = vrot.lane.b32.xlu1 %v11233_v39, %s10651_s12  ;;  %1949 = vrot.lane.b32.xlu0 %v11244_v58, %s10650_s3 }
 0x1f6   :  { %2178 = vrot.lane.b32.xlu1 %v11230_v8, %s10651_s12  ;;  %2095 = vrot.lane.b32.xlu0 %v11233_v39, %s10652_s27 }
 0x1fa   :  { %2176 = vrot.lane.b32.xlu1 %v11244_v58, %s10651_s12  ;;  %2091 = vrot.lane.b32.xlu0 %v11244_v58, %s10652_s27 }
 0x1fe   :  { %1917 = vperm.xlu1 %10077, %v1883_v6   ;;  %2267 = vrot.lane.b32.xlu0 %v11224_v12, %s10653_s30 }
 0x202   :  { %1907 = vperm.xlu1 %10077, %v1881_v40   ;;  %2265 = vrot.lane.b32.xlu0 %v11233_v39, %s10653_s30 }
 0x206   :  { %1897 = vperm.xlu1 %10077, %v1879_v61   ;;  %2263 = vrot.lane.b32.xlu0 %v11230_v8, %s10653_s30 }
 0x20a   :  { %1887 = vperm.xlu1 %10077, %v1877_v48   ;;  %2261 = vrot.lane.b32.xlu0 %v11244_v58, %s10653_s30 }
 0x20e   :  { %1922 = vperm.xlu0 %10076, %v1884_v55  }
 0x212   :  { %1912 = vperm.xlu0 %10076, %v1882_v51  }
 0x216   :  { %1902 = vperm.xlu0 %10076, %v1880_v2  }
 0x21a   :  { %1892 = vperm.xlu0 %10076, %v1878_v63  }
 0x22a   :  { %v1319_v44 = vpop.permute.xlu1 %1318 }
 0x22b   :  { %9558 = vmatprep.subr.bf16.mxu0 %v1319_v44 }
 0x22c   :  { %v1317_v1 = vpop.permute.xlu0 %1316  ;;  %9559 = vmatpush3.bf16.msra.mxu0 %v1319_v44 }
 0x22d   :  { %9560 = vmatprep.subr.bf16.mxu0 %v1317_v1 }
 0x22e   :  { %v1315_v37 = vpop.permute.xlu1 %1314 }
 0x230   :  { %v1313_v32 = vpop.permute.xlu0 %1312  ;;  %9561 = vmatpush3.bf16.msra.mxu0 %v1317_v1 }
 0x231   :  { %9562 = vmatprep.subr.bf16.mxu0 %v1315_v37 }
 0x232   :  { %v1535_v57 = vpop.permute.xlu1 %1534 }
 0x234   :  { %v1661_v10 = vpop.permute.xlu0 %1660  ;;  %9563 = vmatpush3.bf16.msra.mxu0 %v1315_v37 }
 0x235   :  { %9606 = vmatprep.subr.bf16.mxu1 %v1661_v10  ;;  %9564 = vmatprep.subr.bf16.mxu0 %v1313_v32 }
 0x236   :  { %9607 = vmatpush3.bf16.msra.mxu1 %v1661_v10  ;;  %v1533_v16 = vpop.permute.xlu1 %1532 }
 0x238   :  { %v1659_v35 = vpop.permute.xlu0 %1658  ;;  %9565 = vmatpush3.bf16.msra.mxu0 %v1313_v32 }
 0x239   :  { %9608 = vmatprep.subr.bf16.mxu1 %v1659_v35  ;;  %9590 = vmatprep.subr.bf16.mxu0 %v1535_v57 }
 0x23a   :  { %9609 = vmatpush3.bf16.msra.mxu1 %v1659_v35  ;;  %v1531_v34 = vpop.permute.xlu1 %1530 }
 0x23b   :  { %9567 = vmatmul.mubr.msk.bf16.vlgmr.msra.gmra.mxu0 %vm1324_vm3, %v11290_v7 }
 0x23c   :  { %v1657_v23 = vpop.permute.xlu0 %1656  ;;  %9591 = vmatpush3.bf16.msra.mxu0 %v1535_v57  ;;  %9570 = vmatprep.mubr.msk.bf16.mxu0 %vm1324_vm3, %v11292_v11 }
 0x23d   :  { %9610 = vmatprep.subr.bf16.mxu1 %v1657_v23  ;;  %9592 = vmatprep.subr.bf16.mxu0 %v1533_v16 }
 0x23e   :  { %9611 = vmatpush3.bf16.msra.mxu1 %v1657_v23  ;;  %v1529_v38 = vpop.permute.xlu1 %1528 }
 0x240   :  { %v1655_v13 = vpop.permute.xlu0 %1654  ;;  %9593 = vmatpush3.bf16.msra.mxu0 %v1533_v16 }
 0x241   :  { %9612 = vmatprep.subr.bf16.mxu1 %v1655_v13  ;;  %9594 = vmatprep.subr.bf16.mxu0 %v1531_v34 }
 0x242   :  { %9613 = vmatpush3.bf16.msra.mxu1 %v1655_v13  ;;  %v1787_v25 = vpop.permute.xlu1 %1786 }
 0x243   :  { %9571 = vmatmul.mubr.msk.bf16.gmra.mxu0 %vm1324_vm3, %v11298_v20 }
 0x244   :  { %9595 = vmatpush3.bf16.msra.mxu0 %v1531_v34  ;;  %9598 = vmatprep.mubr.msk.bf16.mxu0 %vm1324_vm3, %v11300_v22 }
 0x245   :  { %9596 = vmatprep.subr.bf16.mxu0 %v1529_v38  ;;  %9615 = vmatmul.mubr.msk.bf16.vlgmr.msra.gmra.mxu1 %vm1324_vm3, %v11302_v14 }
 0x246   :  { %9618 = vmatprep.mubr.msk.bf16.mxu1 %vm1324_vm3, %v11304_v24  ;;  %v1785_v29 = vpop.permute.xlu1 %1784 }
 0x248   :  { %9597 = vmatpush3.bf16.msra.mxu0 %v1529_v38 }
 0x249   :  { %9622 = vmatprep.subr.bf16.mxu0 %v1787_v25 }
 0x24a   :  { %v1783_v36 = vpop.permute.xlu1 %1782 }
 0x24b   :  { %9599 = vmatmul.mubr.msk.bf16.vlgmr.msra.gmra.mxu0 %vm1324_vm3, %v11314_v33 }
 0x24c   :  { %9623 = vmatpush3.bf16.msra.mxu0 %v1787_v25  ;;  %9602 = vmatprep.mubr.msk.bf16.mxu0 %vm1324_vm3, %v11316_v9 }
 0x24d   :  { %9624 = vmatprep.subr.bf16.mxu0 %v1785_v29  ;;  %9619 = vmatmul.mubr.msk.bf16.gmra.mxu1 %vm1324_vm3, %v11318_v46 }
 0x24e   :  { %9646 = vmatprep.mubr.msk.bf16.mxu1 %vm1324_vm3, %v11151_v4  ;;  %v1781_v42 = vpop.permute.xlu1 %1780  ;;  %v11339_v4 = vld [vmem:[#allocation5 + $0x90] sm:$0xff]  }
 0x250   :  { %9625 = vmatpush3.bf16.msra.mxu0 %v1785_v29 }
 0x251   :  { %9626 = vmatprep.subr.bf16.mxu0 %v1783_v36 }
 0x253   :  { %9603 = vmatmul.mubr.msk.bf16.gmra.mxu0 %vm1324_vm3, %v11328_v26 }
 0x254   :  { %9627 = vmatpush3.bf16.msra.mxu0 %v1783_v36  ;;  %9630 = vmatprep.mubr.msk.bf16.mxu0 %vm1324_vm3, %v11330_v31 }
 0x255   :  { %9628 = vmatprep.subr.bf16.mxu0 %v1781_v42 }
 0x258   :  { %v2098_v17 = vpop.permute.xlu1 %2097  ;;  %v1956_v43 = vpop.permute.xlu0 %1955  ;;  %9629 = vmatpush3.bf16.msra.mxu0 %v1781_v42 }
 0x259   :  { %9638 = vmatprep.subr.bf16.mxu1 %v1956_v43  ;;  %9654 = vmatprep.subr.bf16.mxu0 %v11224_v12 }
 0x25a   :  { %9639 = vmatpush3.bf16.msra.mxu1 %v1956_v43 }
 0x25b   :  { %9631 = vmatmul.mubr.msk.bf16.vlgmr.msra.gmra.mxu0 %vm1324_vm3, %v11336_v15 }
 0x25c   :  { %v1954_v62 = vpop.permute.xlu0 %1953  ;;  %v2094_v0 = vpop.permute.xlu1 %2093  ;;  %9655 = vmatpush3.bf16.msra.mxu0 %v11224_v12  ;;  %9634 = vmatprep.mubr.msk.bf16.mxu0 %vm1324_vm3, %v11339_v4 }
 0x25d   :  { %9640 = vmatprep.subr.bf16.mxu1 %v1954_v62  ;;  %9656 = vmatprep.subr.bf16.mxu0 %v11233_v39 }
 0x25e   :  { %9641 = vmatpush3.bf16.msra.mxu1 %v1954_v62 }
 0x260   :  { %v1952_v21 = vpop.permute.xlu0 %1951  ;;  %9657 = vmatpush3.bf16.msra.mxu0 %v11233_v39  ;;  %v2183_v60 = vpop.permute.xlu1 %2182 }
 0x261   :  { %9642 = vmatprep.subr.bf16.mxu1 %v1952_v21  ;;  %9658 = vmatprep.subr.bf16.mxu0 %v11230_v8 }
 0x262   :  { %9643 = vmatpush3.bf16.msra.mxu1 %v1952_v21 }
 0x263   :  { %9635 = vmatmul.mubr.msk.bf16.gmra.mxu0 %vm1324_vm3, %v11347_v56 }
 0x264   :  { %v1950_v45 = vpop.permute.xlu0 %1949  ;;  %9659 = vmatpush3.bf16.msra.mxu0 %v11230_v8  ;;  %9662 = vmatprep.mubr.msk.bf16.mxu0 %vm1324_vm3, %v11138_v50  ;;  %v2181_v3 = vpop.permute.xlu1 %2180 }
 0x265   :  { %9644 = vmatprep.subr.bf16.mxu1 %v1950_v45  ;;  %9660 = vmatprep.subr.bf16.mxu0 %v11244_v58 }
 0x266   :  { %9645 = vmatpush3.bf16.msra.mxu1 %v1950_v45 }
 0x267   :  { %9670 = vmatprep.subr.bf16.mxu1 %v2098_v17 }
 0x268   :  { %v2096_v12 = vpop.permute.xlu0 %2095  ;;  %9661 = vmatpush3.bf16.msra.mxu0 %v11244_v58  ;;  %v2179_v50 = vpop.permute.xlu1 %2178 }
 0x269   :  { %9647 = vmatmul.mubr.msk.bf16.vlgmr.msra.gmra.mxu1 %vm1324_vm3, %v11290_v7  ;;  %9686 = vmatprep.subr.bf16.mxu0 %v2183_v60 }
 0x26a   :  { %9671 = vmatpush3.bf16.msra.mxu1 %v2098_v17  ;;  %9650 = vmatprep.mubr.msk.bf16.mxu1 %vm1324_vm3, %v11292_v11 }
 0x26b   :  { %9672 = vmatprep.subr.bf16.mxu1 %v2096_v12  ;;  %9663 = vmatmul.mubr.msk.bf16.vlgmr.msra.gmra.mxu0 %vm1324_vm3, %v11174_v18 }
 0x26c   :  { %v2092_v49 = vpop.permute.xlu0 %2091  ;;  %9687 = vmatpush3.bf16.msra.mxu0 %v2183_v60  ;;  %9666 = vmatprep.mubr.msk.bf16.mxu0 %vm1324_vm3, %v11178_v54  ;;  %v2177_v18 = vpop.permute.xlu1 %2176 }
 0x26d   :  { %9688 = vmatprep.subr.bf16.mxu0 %v2181_v3 }
 0x26e   :  { %9673 = vmatpush3.bf16.msra.mxu1 %v2096_v12 }
 0x26f   :  { %9674 = vmatprep.subr.bf16.mxu1 %v2094_v0 }
 0x270   :  { %v2268_v53 = vpop.permute.xlu0 %2267  ;;  %9689 = vmatpush3.bf16.msra.mxu0 %v2181_v3 }
 0x271   :  { %9651 = vmatmul.mubr.msk.bf16.gmra.mxu1 %vm1324_vm3, %v11298_v20  ;;  %9690 = vmatprep.subr.bf16.mxu0 %v2179_v50 }
 0x272   :  { %9675 = vmatpush3.bf16.msra.mxu1 %v2094_v0  ;;  %9678 = vmatprep.mubr.msk.bf16.mxu1 %vm1324_vm3, %v11300_v22 }
 0x273   :  { %9676 = vmatprep.subr.bf16.mxu1 %v2092_v49  ;;  %9667 = vmatmul.mubr.msk.bf16.gmra.mxu0 %vm1324_vm3, %v11190_v52 }
 0x274   :  { %9691 = vmatpush3.bf16.msra.mxu0 %v2179_v50  ;;  %9694 = vmatprep.mubr.msk.bf16.mxu0 %vm1324_vm3, %v11194_v47  ;;  %v2266_v54 = vpop.permute.xlu0 %2265 }
 0x275   :  { %9692 = vmatprep.subr.bf16.mxu0 %v2177_v18 }
 0x276   :  { %9677 = vmatpush3.bf16.msra.mxu1 %v2092_v49 }
 0x277   :  { %9702 = vmatprep.subr.bf16.mxu1 %v2268_v53 }
 0x278   :  { %9693 = vmatpush3.bf16.msra.mxu0 %v2177_v18  ;;  %v2264_v59 = vpop.permute.xlu0 %2263 }
 0x279   :  { %9679 = vmatmul.mubr.msk.bf16.vlgmr.msra.gmra.mxu1 %vm1324_vm3, %v11314_v33  ;;  %v11396_v20 = vpop.permute.xlu1 %1917 }
 0x27a   :  { %9703 = vmatpush3.bf16.msra.mxu1 %v2268_v53  ;;  %9682 = vmatprep.mubr.msk.bf16.mxu1 %vm1324_vm3, %v11316_v9 }
 0x27b   :  { %9704 = vmatprep.subr.bf16.mxu1 %v2266_v54  ;;  %9695 = vmatmul.mubr.msk.bf16.vlgmr.msra.gmra.mxu0 %vm1324_vm3, %v11302_v14 }
 0x27c   :  { %9698 = vmatprep.mubr.msk.bf16.mxu0 %vm1324_vm3, %v11304_v24  ;;  %v2262_v52 = vpop.permute.xlu0 %2261 }
 0x27e   :  { %9705 = vmatpush3.bf16.msra.mxu1 %v2266_v54 }
 0x27f   :  { %9706 = vmatprep.subr.bf16.mxu1 %v2264_v59 }
 0x281   :  { %9683 = vmatmul.mubr.msk.bf16.gmra.mxu1 %vm1324_vm3, %v11328_v26 }
 0x282   :  { %9707 = vmatpush3.bf16.msra.mxu1 %v2264_v59  ;;  %9710 = vmatprep.mubr.msk.bf16.mxu1 %vm1324_vm3, %v11330_v31  ;;  %v11400_v31 = vpop.permute.xlu1 %1907 }
 0x283   :  { %9708 = vmatprep.subr.bf16.mxu1 %v2262_v52  ;;  %9699 = vmatmul.mubr.msk.bf16.gmra.mxu0 %vm1324_vm3, %v11318_v46 }
 0x286   :  { %9709 = vmatpush3.bf16.msra.mxu1 %v2262_v52 }
 0x288   :  { %v9584_v47 = vpop.f32.mrf.mxu1 }
 0x289   :  { %9711 = vmatmul.mubr.msk.bf16.vlgmr.msra.gmra.mxu1 %vm1324_vm3, %v11336_v15  ;;  %v11394_v23 = vpop.permute.xlu0 %1922 }
 0x28a   :  { %9714 = vmatprep.mubr.msk.bf16.mxu1 %vm1324_vm3, %v11339_v4  ;;  %v1468_v8 = vpop.f32.mrf.mxu1 }
 0x28c   :  { %v9585_v5 = vpop.f32.mrf.mxu1 }
 0x28d   :  { %v11398_v29 = vpop.permute.xlu0 %1912 }
 0x28e   :  { %v1471_v39 = vpop.f32.mrf.mxu1 }
 0x290   :  { %v9588_v27 = vpop.f32.mrf.mxu1 }
 0x291   :  { %9715 = vmatmul.mubr.msk.bf16.gmra.mxu1 %vm1324_vm3, %v11347_v56  ;;  %v11402_v50 = vpop.permute.xlu0 %1902 }
 0x292   :  { %v1484_v58 = vpop.f32.mrf.mxu1 }
 0x294   :  { %v9589_v61 = vpop.f32.mrf.mxu1 }
 0x296   :  { %v1487_v51 = vpop.f32.mrf.mxu1 }
 0x2fb   :  { %v9568_v19 = vpop.f32.mrf.mxu0 }
 0x2fc   :  { %v1477_v36 = vadd.f32 %v9584_v47, %v9568_v19 }
 0x2fd   :  { %v1371_v41 = vpop.f32.mrf.mxu0 }
 0x2fe   :  { %v1469_v4 = vadd.f32 %v1468_v8, %v1371_v41 }
 0x2ff   :  { %v9569_v6 = vpop.f32.mrf.mxu0 }
 0x300   :  { %v1480_v33 = vadd.f32 %v9585_v5, %v9569_v6 }
 0x301   :  { %v1374_v40 = vpop.f32.mrf.mxu0 }
 0x302   :  { %v1472_v42 = vadd.f32 %v1471_v39, %v1374_v40  ;;  %v11404_v39 = vpop.permute.xlu1 %1897 }
 0x303   :  { %v9572_v48 = vpop.f32.mrf.mxu0 }
 0x304   :  { %v1493_v14 = vadd.f32 %v9588_v27, %v9572_v48 }
 0x305   :  { %v1387_v55 = vpop.f32.mrf.mxu0  ;;  %v9616_v44 = vpop.f32.mrf.mxu1 }
 0x306   :  { %v1485_v9 = vadd.f32 %v1484_v58, %v1387_v55 }
 0x307   :  { %v9573_v2 = vpop.f32.mrf.mxu0  ;;  %v1712_v32 = vpop.f32.mrf.mxu1 }
 0x308   :  { %v1496_v17 = vadd.f32 %v9589_v61, %v9573_v2 }
 0x309   :  { %v1390_v63 = vpop.f32.mrf.mxu0  ;;  %v9617_v16 = vpop.f32.mrf.mxu1 }
 0x30a   :  { %v1488_v56 = vadd.f32 %v1487_v51, %v1390_v63 }
 0x30b   :  { %v9600_v1 = vpop.f32.mrf.mxu0  ;;  %v1715_v7 = vpop.f32.mrf.mxu1 }
 0x30c   :  { %v1619_v62 = vadd.f32 %v9600_v1, %v1477_v36 }
 0x30d   :  { %v1586_v37 = vpop.f32.mrf.mxu0  ;;  %v9620_v38 = vpop.f32.mrf.mxu1 }
 0x30e   :  { %v1617_v3 = vadd.f32 %v1586_v37, %v1469_v4  ;;  %v1745_v52 = vadd.f32 %v9616_v44, %v1619_v62 }
 0x30f   :  { %v9601_v57 = vpop.f32.mrf.mxu0  ;;  %v1728_v25 = vpop.f32.mrf.mxu1 }
 0x310   :  { %v1620_v43 = vadd.f32 %v9601_v57, %v1480_v33  ;;  %v1743_v58 = vadd.f32 %v1712_v32, %v1617_v3  ;;  %v11414_v32 = vpop.permute.xlu0 %1892 }
 0x311   :  { %v1589_v10 = vpop.f32.mrf.mxu0  ;;  %v9621_v0 = vpop.f32.mrf.mxu1 }
 0x312   :  { %v1618_v60 = vadd.f32 %v1589_v10, %v1472_v42  ;;  %v1746_v53 = vadd.f32 %v9617_v16, %v1620_v43 }
 0x313   :  { %v9604_v35 = vpop.f32.mrf.mxu0  ;;  %v1731_v47 = vpop.f32.mrf.mxu1 }
 0x314   :  { %v1623_v46 = vadd.f32 %v9604_v35, %v1493_v14  ;;  %v1744_v8 = vadd.f32 %v1715_v7, %v1618_v60 }
 0x315   :  { %v1602_v34 = vpop.f32.mrf.mxu0 }
 0x316   :  { %v1621_v15 = vadd.f32 %v1602_v34, %v1485_v9  ;;  %v1749_v45 = vadd.f32 %v9620_v38, %v1623_v46  ;;  %v11419_v34 = vld [vmem:[#allocation8] sm:$0xff]  }
 0x317   :  { %v9605_v11 = vpop.f32.mrf.mxu0  ;;  %9742 = vmatprep.mubr.msk.bf16.mxu1 %vm1324_vm3, %v11419_v34 }
 0x318   :  { %v1624_v12 = vadd.f32 %v9605_v11, %v1496_v17  ;;  %v1747_v18 = vadd.f32 %v1728_v25, %v1621_v15  ;;  %v11421_v11 = vpop.permute.xlu1 %1887 }
 0x319   :  { %v1605_v13 = vpop.f32.mrf.mxu0 }
 0x31a   :  { %v1622_v54 = vadd.f32 %v1605_v13, %v1488_v56  ;;  %v1750_v27 = vadd.f32 %v9621_v0, %v1624_v12  ;;  %v11439_v0 = vld [vmem:[#allocation8 + $0x20] sm:$0xff]  }
 0x31b   :  { %v9632_v22 = vpop.f32.mrf.mxu0  ;;  %9726 = vmatprep.mubr.msk.bf16.mxu0 %vm1324_vm3, %v11439_v0 }
 0x31c   :  { %v1871_v6 = vadd.f32 %v9632_v22, %v1745_v52  ;;  %v1748_v61 = vadd.f32 %v1731_v47, %v1622_v54 }
 0x31d   :  { %v1838_v24 = vpop.f32.mrf.mxu0 }
 0x31e   :  { %v1869_v63 = vadd.f32 %v1838_v24, %v1743_v58  ;;  %v1927_v35 = vadd.f32 %v11404_v39, %v1871_v6 }
 0x31f   :  { %v9633_v26 = vpop.f32.mrf.mxu0 }
 0x320   :  { %v1872_v19 = vadd.f32 %v9633_v26, %v1746_v53  ;;  %v1925_v24 = vadd.f32 %v11421_v11, %v1869_v63  ;;  %v1935_v43 = vmax.f32 %v1927_v35, 0.0  ;;  %v11487_v63 = vld [vmem:[#allocation8 + $0x60] sm:$0xff]  }
 0x321   :  { %v1841_v21 = vpop.f32.mrf.mxu0 }
 0x322   :  { %v1870_v48 = vadd.f32 %v1841_v21, %v1744_v8  ;;  %v1928_v1 = vadd.f32 %v11402_v50, %v1872_v19  ;;  %v1933_v56 = vmax.f32 %v1925_v24, 0.0 }
 0x323   :  { %v9636_v49 = vpop.f32.mrf.mxu0 }
 0x324   :  { %v1875_v59 = vadd.f32 %v9636_v49, %v1749_v45  ;;  %v1926_v38 = vadd.f32 %v11414_v32, %v1870_v48  ;;  %v1936_v9 = vmax.f32 %v1928_v1, 0.0 }
 0x325   :  { %v1854_v5 = vpop.f32.mrf.mxu0 }
 0x326   :  { %v1873_v41 = vadd.f32 %v1854_v5, %v1747_v18  ;;  %v1931_v55 = vadd.f32 %v11396_v20, %v1875_v59  ;;  %v1934_v15 = vmax.f32 %v1926_v38, 0.0  ;;  %v11443_v60 = vpack.c.bf16 %v1936_v9, %v1935_v43 }
 0x327   :  { %v9637_v40 = vpop.f32.mrf.mxu0 }
 0x328   :  { %v1876_v51 = vadd.f32 %v9637_v40, %v1750_v27  ;;  %v1929_v37 = vadd.f32 %v11400_v31, %v1873_v41  ;;  %v1939_v13 = vmax.f32 %v1931_v55, 0.0  ;;  %v11450_v3 = vpack.c.bf16 %v1934_v15, %v1933_v56  ;;  %v11466_v27 = vld [vmem:[#allocation8 + $0x8] sm:$0xff]   ;;  %v11471_v41 = vld [vmem:[#allocation8 + $0x10] sm:$0xff]  }
 0x329   :  { %v11407_v2 = vpop.f32.mrf.mxu1  ;;  %v1857_v44 = vpop.f32.mrf.mxu0 }
 0x32a   :  { %v1932_v57 = vadd.f32 %v11394_v23, %v1876_v51  ;;  %v1874_v10 = vadd.f32 %v1857_v44, %v1748_v61  ;;  %v1937_v46 = vmax.f32 %v1929_v37, 0.0  ;;  %v11485_v51 = vld [vmem:[#allocation8 + $0x18] sm:$0xff]  }
 0x32b   :  { %v11412_v16 = vpop.f32.mrf.mxu1  ;;  %v11417_v7 = vpop.f32.mrf.mxu0 }
 0x32c   :  { %v1940_v22 = vmax.f32 %v1932_v57, 0.0  ;;  %v1930_v14 = vadd.f32 %v11398_v29, %v1874_v10 }
 0x32d   :  { %v11425_v25 = vpop.f32.mrf.mxu1  ;;  %v11428_v33 = vpop.f32.mrf.mxu0 }
 0x32e   :  { %v2365_v36 = vpack.c.bf16 %v1940_v22, %v1939_v13  ;;  %v1938_v26 = vmax.f32 %v1930_v14, 0.0  ;;  %v2069_v22 = vadd.f32 %v11417_v7, %v11407_v2 }
 0x32f   :  { %v11432_v42 = vpop.f32.mrf.mxu1  ;;  %v11434_v17 = vpop.f32.mrf.mxu0 }
 0x330   :  { %v11436_v4 = vpack.c.bf16 %v1938_v26, %v1937_v46  ;;  %2413 = vrot.lane.b32.xlu1 %v2365_v36, %s10650_s3  ;;  %9734 = vmatprep.subr.bf16.mxu1 %v2365_v36  ;;  %v2072_v38 = vadd.f32 %v11434_v17, %v11425_v25 }
 0x331   :  { %v9652_v62 = vpop.f32.mrf.mxu1  ;;  %v11441_v21 = vpop.f32.mrf.mxu0  ;;  %9735 = vmatpush3.bf16.msra.mxu1 %v2365_v36 }
 0x332   :  { %2411 = vrot.lane.b32.xlu0 %v11436_v4, %s10650_s3  ;;  %9736 = vmatprep.subr.bf16.mxu1 %v11436_v4 }
 0x333   :  { %v2011_v45 = vpop.f32.mrf.mxu1  ;;  %v9668_v12 = vpop.f32.mrf.mxu0 }
 0x334   :  { %2409 = vrot.lane.b32.xlu1 %v11443_v60, %s10650_s3  ;;  %v2085_v57 = vadd.f32 %v9668_v12, %v9652_v62 }
 0x335   :  { %v9653_v49 = vpop.f32.mrf.mxu1  ;;  %v2076_v53 = vpop.f32.mrf.mxu0  ;;  %9737 = vmatpush3.bf16.msra.mxu1 %v11436_v4 }
 0x336   :  { %9738 = vmatprep.subr.bf16.mxu1 %v11443_v60  ;;  %2407 = vrot.lane.b32.xlu0 %v11450_v3, %s10650_s3  ;;  %v2077_v24 = vadd.f32 %v2076_v53, %v2011_v45 }
 0x337   :  { %v2014_v18 = vpop.f32.mrf.mxu1  ;;  %v9669_v54 = vpop.f32.mrf.mxu0 }
 0x338   :  { %2628 = vrot.lane.b32.xlu1 %v2365_v36, %s10652_s27  ;;  %v2088_v9 = vadd.f32 %v9669_v54, %v9653_v49 }
 0x339   :  { %v9680_v59 = vpop.f32.mrf.mxu1  ;;  %v2079_v52 = vpop.f32.mrf.mxu0  ;;  %9739 = vmatpush3.bf16.msra.mxu1 %v11443_v60 }
 0x33a   :  { %2754 = vrot.lane.b32.xlu0 %v2365_v36, %s10651_s12  ;;  %9740 = vmatprep.subr.bf16.mxu1 %v11450_v3  ;;  %v2080_v15 = vadd.f32 %v2079_v52, %v2014_v18  ;;  %v2061_v18 = vadd.f32 %v11428_v33, %v11412_v16 }
 0x33b   :  { %v11462_v47 = vpop.f32.mrf.mxu1  ;;  %v9696_v5 = vpop.f32.mrf.mxu0 }
 0x33c   :  { %2626 = vrot.lane.b32.xlu1 %v11436_v4, %s10652_s27 }
 0x33d   :  { %v9681_v8 = vpop.f32.mrf.mxu1  ;;  %v11468_v19 = vpop.f32.mrf.mxu0  ;;  %9741 = vmatpush3.bf16.msra.mxu1 %v11450_v3 }
 0x33e   :  { %2752 = vrot.lane.b32.xlu0 %v11436_v4, %s10651_s12  ;;  %v2171_v46 = vadd.f32 %v9681_v8, %v2072_v38 }
 0x33f   :  { %v2140_v58 = vpop.f32.mrf.mxu1  ;;  %v9697_v6 = vpop.f32.mrf.mxu0 }
 0x340   :  { %2624 = vrot.lane.b32.xlu1 %v11443_v60, %s10652_s27  ;;  %9743 = vmatmul.mubr.msk.bf16.vlgmr.msra.gmra.mxu1 %vm1324_vm3, %v11466_v27  ;;  %v2256_v17 = vadd.f32 %v9697_v6, %v2171_v46  ;;  %v2971_v46 = vld [vmem:[%s13999_s6] sm:$0xff] }
 0x341   :  { %v9684_v40 = vpop.f32.mrf.mxu1  ;;  %9746 = vmatprep.mubr.msk.bf16.mxu1 %vm1324_vm3, %v11471_v41  ;;  %v2225_v61 = vpop.f32.mrf.mxu0 }
 0x342   :  { %2750 = vrot.lane.b32.xlu0 %v11443_v60, %s10651_s12  ;;  %v2174_v13 = vadd.f32 %v9684_v40, %v2085_v57 }
 0x343   :  { %v2153_v48 = vpop.f32.mrf.mxu1  ;;  %v9700_v44 = vpop.f32.mrf.mxu0 }
 0x344   :  { %2622 = vrot.lane.b32.xlu1 %v11450_v3, %s10652_s27  ;;  %v2172_v62 = vadd.f32 %v2153_v48, %v2077_v24  ;;  %v2259_v56 = vadd.f32 %v9700_v44, %v2174_v13 }
 0x345   :  { %v9685_v55 = vpop.f32.mrf.mxu1  ;;  %v2238_v10 = vpop.f32.mrf.mxu0 }
 0x346   :  { %2748 = vrot.lane.b32.xlu0 %v11450_v3, %s10651_s12  ;;  %v2175_v12 = vadd.f32 %v9685_v55, %v2088_v9  ;;  %v2257_v54 = vadd.f32 %v2238_v10, %v2172_v62  ;;  %v2973_v9 = vld [vmem:[%s13999_s6 + $0x10] sm:$0xff] }
 0x347   :  { %v2156_v1 = vpop.f32.mrf.mxu1  ;;  %v9701_v26 = vpop.f32.mrf.mxu0 }
 0x348   :  { %2880 = vrot.lane.b32.xlu1 %v2365_v36, %s10653_s30  ;;  %9747 = vmatmul.mubr.msk.bf16.gmra.mxu1 %vm1324_vm3, %v11485_v51  ;;  %v2170_v36 = vadd.f32 %v9680_v59, %v2069_v22  ;;  %v2173_v2 = vadd.f32 %v2156_v1, %v2080_v15  ;;  %v2260_v59 = vadd.f32 %v9701_v26, %v2175_v12  ;;  %v2976_v26 = vld [vmem:[%s13999_s6 + $0x28] sm:$0xff] }
 0x349   :  { %v9712_v37 = vpop.f32.mrf.mxu1  ;;  %9774 = vmatprep.mubr.msk.bf16.mxu1 %vm1324_vm3, %v11487_v63  ;;  %v2241_v49 = vpop.f32.mrf.mxu0  ;;  %v2972_v15 = vld [vmem:[%s13999_s6 + $0x8] sm:$0xff] }
 0x34a   :  { %v2255_v45 = vadd.f32 %v9696_v5, %v2170_v36  ;;  %v2258_v6 = vadd.f32 %v2241_v49, %v2173_v2  ;;  %v2978_v36 = vld [vmem:[%s13999_s6 + $0x38] sm:$0xff]  ;;  %v11586_v49 = vld [vmem:[#allocation8 + $0x30] sm:$0xff]  }
 0x34b   :  { %v2307_v35 = vpop.f32.mrf.mxu1 }
 0x34c   :  { %2878 = vrot.lane.b32.xlu1 %v11436_v4, %s10653_s30  ;;  %v2064_v4 = vadd.f32 %v11441_v21, %v11432_v42  ;;  %v2340_v40 = vadd.f32 %v9712_v37, %v2255_v45  ;;  %v2168_v21 = vadd.f32 %v11462_v47, %v2061_v18 }
 0x34d   :  { %v9713_v14 = vpop.f32.mrf.mxu1 }
 0x34e   :  { %v2341_v8 = vadd.f32 %v9713_v14, %v2256_v17  ;;  %v2169_v52 = vadd.f32 %v2140_v58, %v2064_v4  ;;  %v2348_v33 = vadd.f32 %v2340_v40, %v11404_v39  ;;  %v11584_v4 = vld [vmem:[#allocation8 + $0x28] sm:$0xff]  }
 0x34f   :  { %v2310_v43 = vpop.f32.mrf.mxu1  ;;  %v11596_v40 = vld [vmem:[#allocation8 + $0x68] sm:$0xff]  }
 0x350   :  { %2876 = vrot.lane.b32.xlu1 %v11443_v60, %s10653_s30  ;;  %v2349_v44 = vadd.f32 %v2341_v8, %v11402_v50  ;;  %v2254_v16 = vadd.f32 %v2225_v61, %v2169_v52  ;;  %v2356_v50 = vmax.f32 %v2348_v33, 0.0  ;;  %v11592_v8 = vld [vmem:[#allocation8 + $0x38] sm:$0xff]   ;;  %v11594_v52 = vld [vmem:[#allocation8 + $0x40] sm:$0xff]  }
 0x351   :  { %v9716_v25 = vpop.f32.mrf.mxu1 }
 0x352   :  { %v2344_v7 = vadd.f32 %v9716_v25, %v2259_v56  ;;  %v2357_v38 = vmax.f32 %v2349_v44, 0.0  ;;  %v2339_v13 = vadd.f32 %v2310_v43, %v2254_v16  ;;  %v2974_v43 = vld [vmem:[%s13999_s6 + $0x18] sm:$0xff] }
 0x353   :  { %v2323_v53 = vpop.f32.mrf.mxu1  ;;  %v11622_v44 = vld [vmem:[#allocation8 + $0x58] sm:$0xff]  }
 0x354   :  { %2874 = vrot.lane.b32.xlu1 %v11450_v3, %s10653_s30  ;;  %v2352_v48 = vadd.f32 %v2344_v7, %v11396_v20  ;;  %v2342_v55 = vadd.f32 %v2323_v53, %v2257_v54  ;;  %v2253_v20 = vadd.f32 %v11468_v19, %v2168_v21  ;;  %v11612_v21 = vld [vmem:[#allocation8 + $0x78] sm:$0xff]  }
 0x355   :  { %v9717_v60 = vpop.f32.mrf.mxu1 }
 0x356   :  { %v2345_v42 = vadd.f32 %v9717_v60, %v2260_v59  ;;  %v2360_v58 = vmax.f32 %v2352_v48, 0.0  ;;  %v2350_v3 = vadd.f32 %v2342_v55, %v11400_v31  ;;  %v2338_v14 = vadd.f32 %v2307_v35, %v2253_v20  ;;  %v11608_v55 = vld [vmem:[#allocation8 + $0x48] sm:$0xff]   ;;  %v11641_v20 = vld [vmem:[#allocation8 + $0x98] sm:$0xff]  }
 0x357   :  { %v2326_v5 = vpop.f32.mrf.mxu1  ;;  %v11524_v31 = vpack.c.bf16 %v2357_v38, %v2356_v50 }
 0x358   :  { %v2353_v1 = vadd.f32 %v2345_v42, %v11394_v23  ;;  %v2343_v57 = vadd.f32 %v2326_v5, %v2258_v6  ;;  %v2358_v23 = vmax.f32 %v2350_v3, 0.0  ;;  %v2346_v19 = vadd.f32 %v2338_v14, %v11421_v11  ;;  %v2975_v11 = vld [vmem:[%s13999_s6 + $0x20] sm:$0xff]  ;;  %v11598_v6 = vld [vmem:[#allocation8 + $0x70] sm:$0xff]  }
 0x359   :  { %v11610_v42 = vld [vmem:[#allocation8 + $0x50] sm:$0xff]  }
 0x35a   :  { %v2361_v37 = vmax.f32 %v2353_v1, 0.0  ;;  %v2351_v10 = vadd.f32 %v2343_v57, %v11398_v29  ;;  %v2347_v29 = vadd.f32 %v2339_v13, %v11414_v32  ;;  %v2354_v35 = vmax.f32 %v2346_v19, 0.0  ;;  %v2977_v32 = vld [vmem:[%s13999_s6 + $0x30] sm:$0xff]  ;;  %v11624_v1 = vld [vmem:[#allocation8 + $0x80] sm:$0xff]  }
 0x35c   :  { %v11518_v47 = vpack.c.bf16 %v2361_v37, %v2360_v58  ;;  %v2359_v22 = vmax.f32 %v2351_v10, 0.0  ;;  %v2355_v61 = vmax.f32 %v2347_v29, 0.0  ;;  %v11630_v58 = vld [vmem:[#allocation8 + $0x88] sm:$0xff]  }
 0x35e   :  { %3191 = vrot.lane.b32.xlu1 %v11518_v47, %s10652_s27  ;;  %3049 = vrot.lane.b32.xlu0 %v11518_v47, %s10650_s3  ;;  %v11527_v39 = vpack.c.bf16 %v2359_v22, %v2358_v23  ;;  %v11538_v24 = vpack.c.bf16 %v2355_v61, %v2354_v35 }
 0x362   :  { %3187 = vrot.lane.b32.xlu1 %v11524_v31, %s10652_s27  ;;  %3047 = vrot.lane.b32.xlu0 %v11527_v39, %s10650_s3 }
 0x366   :  { %3276 = vrot.lane.b32.xlu1 %v11518_v47, %s10651_s12  ;;  %3045 = vrot.lane.b32.xlu0 %v11524_v31, %s10650_s3 }
 0x36a   :  { %3274 = vrot.lane.b32.xlu1 %v11527_v39, %s10651_s12  ;;  %3043 = vrot.lane.b32.xlu0 %v11538_v24, %s10650_s3 }
 0x36e   :  { %3272 = vrot.lane.b32.xlu1 %v11524_v31, %s10651_s12  ;;  %3189 = vrot.lane.b32.xlu0 %v11527_v39, %s10652_s27 }
 0x372   :  { %3270 = vrot.lane.b32.xlu1 %v11538_v24, %s10651_s12  ;;  %3185 = vrot.lane.b32.xlu0 %v11538_v24, %s10652_s27 }
 0x376   :  { %3011 = vperm.xlu1 %10077, %v2977_v32   ;;  %3361 = vrot.lane.b32.xlu0 %v11518_v47, %s10653_s30 }
 0x37a   :  { %3001 = vperm.xlu1 %10077, %v2975_v11   ;;  %3359 = vrot.lane.b32.xlu0 %v11527_v39, %s10653_s30 }
 0x37e   :  { %2991 = vperm.xlu1 %10077, %v2973_v9   ;;  %3357 = vrot.lane.b32.xlu0 %v11524_v31, %s10653_s30 }
 0x382   :  { %2981 = vperm.xlu1 %10077, %v2971_v46   ;;  %3355 = vrot.lane.b32.xlu0 %v11538_v24, %s10653_s30 }
 0x386   :  { %3016 = vperm.xlu0 %10076, %v2978_v36  }
 0x38a   :  { %3006 = vperm.xlu0 %10076, %v2976_v26  }
 0x38e   :  { %2996 = vperm.xlu0 %10076, %v2974_v43  }
 0x392   :  { %2986 = vperm.xlu0 %10076, %v2972_v15  }
 0x3a2   :  { %v2414_v62 = vpop.permute.xlu1 %2413 }
 0x3a3   :  { %9718 = vmatprep.subr.bf16.mxu0 %v2414_v62 }
 0x3a4   :  { %9719 = vmatpush3.bf16.msra.mxu0 %v2414_v62  ;;  %v2412_v56 = vpop.permute.xlu0 %2411 }
 0x3a5   :  { %9720 = vmatprep.subr.bf16.mxu0 %v2412_v56 }
 0x3a6   :  { %v2410_v12 = vpop.permute.xlu1 %2409 }
 0x3a8   :  { %9721 = vmatpush3.bf16.msra.mxu0 %v2412_v56  ;;  %v2408_v25 = vpop.permute.xlu0 %2407 }
 0x3a9   :  { %9722 = vmatprep.subr.bf16.mxu0 %v2410_v12 }
 0x3aa   :  { %v2629_v17 = vpop.permute.xlu1 %2628 }
 0x3ac   :  { %9723 = vmatpush3.bf16.msra.mxu0 %v2410_v12  ;;  %v2755_v2 = vpop.permute.xlu0 %2754 }
 0x3ad   :  { %9724 = vmatprep.subr.bf16.mxu0 %v2408_v25  ;;  %9766 = vmatprep.subr.bf16.mxu1 %v2755_v2 }
 0x3ae   :  { %v2627_v7 = vpop.permute.xlu1 %2626  ;;  %9767 = vmatpush3.bf16.msra.mxu1 %v2755_v2 }
 0x3b0   :  { %9725 = vmatpush3.bf16.msra.mxu0 %v2408_v25  ;;  %v2753_v45 = vpop.permute.xlu0 %2752 }
 0x3b1   :  { %9750 = vmatprep.subr.bf16.mxu0 %v2629_v17  ;;  %9768 = vmatprep.subr.bf16.mxu1 %v2753_v45 }
 0x3b2   :  { %v2625_v53 = vpop.permute.xlu1 %2624  ;;  %9769 = vmatpush3.bf16.msra.mxu1 %v2753_v45 }
 0x3b3   :  { %9727 = vmatmul.mubr.msk.bf16.vlgmr.msra.gmra.mxu0 %vm1324_vm3, %v11584_v4 }
 0x3b4   :  { %9751 = vmatpush3.bf16.msra.mxu0 %v2629_v17  ;;  %v2751_v54 = vpop.permute.xlu0 %2750  ;;  %9730 = vmatprep.mubr.msk.bf16.mxu0 %vm1324_vm3, %v11586_v49 }
 0x3b5   :  { %9752 = vmatprep.subr.bf16.mxu0 %v2627_v7  ;;  %9770 = vmatprep.subr.bf16.mxu1 %v2751_v54 }
 0x3b6   :  { %v2623_v59 = vpop.permute.xlu1 %2622  ;;  %9771 = vmatpush3.bf16.msra.mxu1 %v2751_v54 }
 0x3b8   :  { %9753 = vmatpush3.bf16.msra.mxu0 %v2627_v7  ;;  %v2749_v18 = vpop.permute.xlu0 %2748 }
 0x3b9   :  { %9754 = vmatprep.subr.bf16.mxu0 %v2625_v53  ;;  %9772 = vmatprep.subr.bf16.mxu1 %v2749_v18 }
 0x3ba   :  { %v2881_v60 = vpop.permute.xlu1 %2880  ;;  %9773 = vmatpush3.bf16.msra.mxu1 %v2749_v18 }
 0x3bb   :  { %9731 = vmatmul.mubr.msk.bf16.gmra.mxu0 %vm1324_vm3, %v11592_v8 }
 0x3bc   :  { %9755 = vmatpush3.bf16.msra.mxu0 %v2625_v53  ;;  %9758 = vmatprep.mubr.msk.bf16.mxu0 %vm1324_vm3, %v11594_v52 }
 0x3bd   :  { %9756 = vmatprep.subr.bf16.mxu0 %v2623_v59  ;;  %9775 = vmatmul.mubr.msk.bf16.vlgmr.msra.gmra.mxu1 %vm1324_vm3, %v11596_v40 }
 0x3be   :  { %9778 = vmatprep.mubr.msk.bf16.mxu1 %vm1324_vm3, %v11598_v6  ;;  %v2879_v48 = vpop.permute.xlu1 %2878 }
 0x3c0   :  { %9757 = vmatpush3.bf16.msra.mxu0 %v2623_v59 }
 0x3c1   :  { %9782 = vmatprep.subr.bf16.mxu0 %v2881_v60 }
 0x3c2   :  { %v2877_v5 = vpop.permute.xlu1 %2876 }
 0x3c3   :  { %9759 = vmatmul.mubr.msk.bf16.vlgmr.msra.gmra.mxu0 %vm1324_vm3, %v11608_v55 }
 0x3c4   :  { %9783 = vmatpush3.bf16.msra.mxu0 %v2881_v60  ;;  %9762 = vmatprep.mubr.msk.bf16.mxu0 %vm1324_vm3, %v11610_v42 }
 0x3c5   :  { %9784 = vmatprep.subr.bf16.mxu0 %v2879_v48  ;;  %9779 = vmatmul.mubr.msk.bf16.gmra.mxu1 %vm1324_vm3, %v11612_v21 }
 0x3c6   :  { %9806 = vmatprep.mubr.msk.bf16.mxu1 %vm1324_vm3, %v11439_v0  ;;  %v2875_v57 = vpop.permute.xlu1 %2874  ;;  %v11633_v0 = vld [vmem:[#allocation8 + $0x90] sm:$0xff]  }
 0x3c8   :  { %9785 = vmatpush3.bf16.msra.mxu0 %v2879_v48 }
 0x3c9   :  { %9786 = vmatprep.subr.bf16.mxu0 %v2877_v5 }
 0x3cb   :  { %9763 = vmatmul.mubr.msk.bf16.gmra.mxu0 %vm1324_vm3, %v11622_v44 }
 0x3cc   :  { %9787 = vmatpush3.bf16.msra.mxu0 %v2877_v5  ;;  %9790 = vmatprep.mubr.msk.bf16.mxu0 %vm1324_vm3, %v11624_v1 }
 0x3cd   :  { %9788 = vmatprep.subr.bf16.mxu0 %v2875_v57 }
 0x3d0   :  { %v3192_v16 = vpop.permute.xlu1 %3191  ;;  %v3050_v33 = vpop.permute.xlu0 %3049  ;;  %9789 = vmatpush3.bf16.msra.mxu0 %v2875_v57 }
 0x3d1   :  { %9798 = vmatprep.subr.bf16.mxu1 %v3050_v33  ;;  %9814 = vmatprep.subr.bf16.mxu0 %v11518_v47 }
 0x3d2   :  { %9799 = vmatpush3.bf16.msra.mxu1 %v3050_v33 }
 0x3d3   :  { %9791 = vmatmul.mubr.msk.bf16.vlgmr.msra.gmra.mxu0 %vm1324_vm3, %v11630_v58 }
 0x3d4   :  { %v3048_v3 = vpop.permute.xlu0 %3047  ;;  %v3188_v37 = vpop.permute.xlu1 %3187  ;;  %9815 = vmatpush3.bf16.msra.mxu0 %v11518_v47  ;;  %9794 = vmatprep.mubr.msk.bf16.mxu0 %vm1324_vm3, %v11633_v0 }
 0x3d5   :  { %9800 = vmatprep.subr.bf16.mxu1 %v3048_v3  ;;  %9816 = vmatprep.subr.bf16.mxu0 %v11527_v39 }
 0x3d6   :  { %9801 = vmatpush3.bf16.msra.mxu1 %v3048_v3 }
 0x3d8   :  { %v3046_v10 = vpop.permute.xlu0 %3045  ;;  %9817 = vmatpush3.bf16.msra.mxu0 %v11527_v39  ;;  %v3277_v38 = vpop.permute.xlu1 %3276 }
 0x3d9   :  { %9802 = vmatprep.subr.bf16.mxu1 %v3046_v10  ;;  %9818 = vmatprep.subr.bf16.mxu0 %v11524_v31 }
 0x3da   :  { %9803 = vmatpush3.bf16.msra.mxu1 %v3046_v10 }
 0x3db   :  { %9795 = vmatmul.mubr.msk.bf16.gmra.mxu0 %vm1324_vm3, %v11641_v20 }
 0x3dc   :  { %v3044_v13 = vpop.permute.xlu0 %3043  ;;  %9819 = vmatpush3.bf16.msra.mxu0 %v11524_v31  ;;  %9822 = vmatprep.mubr.msk.bf16.mxu0 %vm1324_vm3, %v11419_v34  ;;  %v3275_v22 = vpop.permute.xlu1 %3274 }
 0x3dd   :  { %9804 = vmatprep.subr.bf16.mxu1 %v3044_v13  ;;  %9820 = vmatprep.subr.bf16.mxu0 %v11538_v24 }
 0x3de   :  { %9805 = vmatpush3.bf16.msra.mxu1 %v3044_v13 }
 0x3df   :  { %9830 = vmatprep.subr.bf16.mxu1 %v3192_v16 }
 0x3e0   :  { %v3190_v47 = vpop.permute.xlu0 %3189  ;;  %9821 = vmatpush3.bf16.msra.mxu0 %v11538_v24  ;;  %v3273_v34 = vpop.permute.xlu1 %3272 }
 0x3e1   :  { %9807 = vmatmul.mubr.msk.bf16.vlgmr.msra.gmra.mxu1 %vm1324_vm3, %v11584_v4  ;;  %9846 = vmatprep.subr.bf16.mxu0 %v3277_v38 }
 0x3e2   :  { %9831 = vmatpush3.bf16.msra.mxu1 %v3192_v16  ;;  %9810 = vmatprep.mubr.msk.bf16.mxu1 %vm1324_vm3, %v11586_v49 }
 0x3e3   :  { %9832 = vmatprep.subr.bf16.mxu1 %v3190_v47  ;;  %9823 = vmatmul.mubr.msk.bf16.vlgmr.msra.gmra.mxu0 %vm1324_vm3, %v11466_v27 }
 0x3e4   :  { %v3186_v50 = vpop.permute.xlu0 %3185  ;;  %9847 = vmatpush3.bf16.msra.mxu0 %v3277_v38  ;;  %9826 = vmatprep.mubr.msk.bf16.mxu0 %vm1324_vm3, %v11471_v41  ;;  %v3271_v27 = vpop.permute.xlu1 %3270 }
 0x3e5   :  { %9848 = vmatprep.subr.bf16.mxu0 %v3275_v22 }
 0x3e6   :  { %9833 = vmatpush3.bf16.msra.mxu1 %v3190_v47 }
 0x3e7   :  { %9834 = vmatprep.subr.bf16.mxu1 %v3188_v37 }
 0x3e8   :  { %v3362_v14 = vpop.permute.xlu0 %3361  ;;  %9849 = vmatpush3.bf16.msra.mxu0 %v3275_v22 }
 0x3e9   :  { %9811 = vmatmul.mubr.msk.bf16.gmra.mxu1 %vm1324_vm3, %v11592_v8  ;;  %9850 = vmatprep.subr.bf16.mxu0 %v3273_v34 }
 0x3ea   :  { %9835 = vmatpush3.bf16.msra.mxu1 %v3188_v37  ;;  %9838 = vmatprep.mubr.msk.bf16.mxu1 %vm1324_vm3, %v11594_v52 }
 0x3eb   :  { %9836 = vmatprep.subr.bf16.mxu1 %v3186_v50  ;;  %9827 = vmatmul.mubr.msk.bf16.gmra.mxu0 %vm1324_vm3, %v11485_v51 }
 0x3ec   :  { %9851 = vmatpush3.bf16.msra.mxu0 %v3273_v34  ;;  %9854 = vmatprep.mubr.msk.bf16.mxu0 %vm1324_vm3, %v11487_v63  ;;  %v3360_v41 = vpop.permute.xlu0 %3359 }
 0x3ed   :  { %9852 = vmatprep.subr.bf16.mxu0 %v3271_v27 }
 0x3ee   :  { %9837 = vmatpush3.bf16.msra.mxu1 %v3186_v50 }
 0x3ef   :  { %9862 = vmatprep.subr.bf16.mxu1 %v3362_v14 }
 0x3f0   :  { %9853 = vmatpush3.bf16.msra.mxu0 %v3271_v27  ;;  %v3358_v23 = vpop.permute.xlu0 %3357 }
 0x3f1   :  { %9839 = vmatmul.mubr.msk.bf16.vlgmr.msra.gmra.mxu1 %vm1324_vm3, %v11608_v55  ;;  %v11690_v18 = vpop.permute.xlu1 %3011 }
 0x3f2   :  { %9863 = vmatpush3.bf16.msra.mxu1 %v3362_v14  ;;  %9842 = vmatprep.mubr.msk.bf16.mxu1 %vm1324_vm3, %v11610_v42 }
 0x3f3   :  { %9864 = vmatprep.subr.bf16.mxu1 %v3360_v41  ;;  %9855 = vmatmul.mubr.msk.bf16.vlgmr.msra.gmra.mxu0 %vm1324_vm3, %v11596_v40 }
 0x3f4   :  { %9858 = vmatprep.mubr.msk.bf16.mxu0 %vm1324_vm3, %v11598_v6  ;;  %v3356_v51 = vpop.permute.xlu0 %3355 }
 0x3f6   :  { %9865 = vmatpush3.bf16.msra.mxu1 %v3360_v41 }
 0x3f7   :  { %9866 = vmatprep.subr.bf16.mxu1 %v3358_v23 }
 0x3f9   :  { %9843 = vmatmul.mubr.msk.bf16.gmra.mxu1 %vm1324_vm3, %v11622_v44 }
 0x3fa   :  { %9867 = vmatpush3.bf16.msra.mxu1 %v3358_v23  ;;  %9870 = vmatprep.mubr.msk.bf16.mxu1 %vm1324_vm3, %v11624_v1  ;;  %v11694_v1 = vpop.permute.xlu1 %3001 }
 0x3fb   :  { %9868 = vmatprep.subr.bf16.mxu1 %v3356_v51  ;;  %9859 = vmatmul.mubr.msk.bf16.gmra.mxu0 %vm1324_vm3, %v11612_v21 }
 0x3fe   :  { %9869 = vmatpush3.bf16.msra.mxu1 %v3356_v51 }
 0x400   :  { %v9744_v63 = vpop.f32.mrf.mxu1 }
 0x401   :  { %9871 = vmatmul.mubr.msk.bf16.vlgmr.msra.gmra.mxu1 %vm1324_vm3, %v11630_v58  ;;  %v11688_v54 = vpop.permute.xlu0 %3016 }
 0x402   :  { %9874 = vmatprep.mubr.msk.bf16.mxu1 %vm1324_vm3, %v11633_v0  ;;  %v2562_v31 = vpop.f32.mrf.mxu1 }
 0x404   :  { %v9745_v29 = vpop.f32.mrf.mxu1 }
 0x405   :  { %v11692_v48 = vpop.permute.xlu0 %3006 }
 0x406   :  { %v2565_v39 = vpop.f32.mrf.mxu1 }
 0x408   :  { %v9748_v19 = vpop.f32.mrf.mxu1 }
 0x409   :  { %9875 = vmatmul.mubr.msk.bf16.gmra.mxu1 %vm1324_vm3, %v11641_v20  ;;  %v11696_v34 = vpop.permute.xlu0 %2996 }
 0x40a   :  { %v2578_v24 = vpop.f32.mrf.mxu1 }
 0x40c   :  { %v9749_v9 = vpop.f32.mrf.mxu1 }
 0x40e   :  { %v2581_v26 = vpop.f32.mrf.mxu1 }
 0x473   :  { %v9728_v61 = vpop.f32.mrf.mxu0 }
 0x474   :  { %v2571_v5 = vadd.f32 %v9744_v63, %v9728_v61 }
 0x475   :  { %v2465_v35 = vpop.f32.mrf.mxu0 }
 0x476   :  { %v2563_v0 = vadd.f32 %v2562_v31, %v2465_v35 }
 0x477   :  { %v9729_v32 = vpop.f32.mrf.mxu0 }
 0x478   :  { %v2574_v55 = vadd.f32 %v9745_v29, %v9729_v32 }
 0x479   :  { %v2468_v11 = vpop.f32.mrf.mxu0 }
 0x47a   :  { %v2566_v57 = vadd.f32 %v2565_v39, %v2468_v11  ;;  %v11698_v39 = vpop.permute.xlu1 %2991 }
 0x47b   :  { %v9732_v46 = vpop.f32.mrf.mxu0 }
 0x47c   :  { %v2587_v40 = vadd.f32 %v9748_v19, %v9732_v46 }
 0x47d   :  { %v2481_v36 = vpop.f32.mrf.mxu0  ;;  %v9776_v62 = vpop.f32.mrf.mxu1 }
 0x47e   :  { %v2579_v42 = vadd.f32 %v2578_v24, %v2481_v36 }
 0x47f   :  { %v9733_v43 = vpop.f32.mrf.mxu0  ;;  %v2806_v25 = vpop.f32.mrf.mxu1 }
 0x480   :  { %v2590_v16 = vadd.f32 %v9749_v9, %v9733_v43 }
 0x481   :  { %v2484_v15 = vpop.f32.mrf.mxu0  ;;  %v9777_v7 = vpop.f32.mrf.mxu1 }
 0x482   :  { %v2582_v20 = vadd.f32 %v2581_v26, %v2484_v15 }
 0x483   :  { %v9760_v56 = vpop.f32.mrf.mxu0  ;;  %v2809_v45 = vpop.f32.mrf.mxu1 }
 0x484   :  { %v2713_v3 = vadd.f32 %v9760_v56, %v2571_v5 }
 0x485   :  { %v2680_v12 = vpop.f32.mrf.mxu0  ;;  %v9780_v59 = vpop.f32.mrf.mxu1 }
 0x486   :  { %v2711_v22 = vadd.f32 %v2680_v12, %v2563_v0  ;;  %v2839_v51 = vadd.f32 %v9776_v62, %v2713_v3 }
 0x487   :  { %v9761_v17 = vpop.f32.mrf.mxu0  ;;  %v2822_v60 = vpop.f32.mrf.mxu1 }
 0x488   :  { %v2714_v33 = vadd.f32 %v9761_v17, %v2574_v55  ;;  %v2837_v24 = vadd.f32 %v2806_v25, %v2711_v22  ;;  %v11708_v25 = vpop.permute.xlu0 %2986 }
 0x489   :  { %v2683_v2 = vpop.f32.mrf.mxu0  ;;  %v9781_v37 = vpop.f32.mrf.mxu1 }
 0x48a   :  { %v2712_v38 = vadd.f32 %v2683_v2, %v2566_v57  ;;  %v2840_v14 = vadd.f32 %v9777_v7, %v2714_v33 }
 0x48b   :  { %v9764_v4 = vpop.f32.mrf.mxu0  ;;  %v2825_v63 = vpop.f32.mrf.mxu1 }
 0x48c   :  { %v2717_v21 = vadd.f32 %v9764_v4, %v2587_v40  ;;  %v2838_v31 = vadd.f32 %v2809_v45, %v2712_v38 }
 0x48d   :  { %v2696_v49 = vpop.f32.mrf.mxu0 }
 0x48e   :  { %v2715_v58 = vadd.f32 %v2696_v49, %v2579_v42  ;;  %v2843_v13 = vadd.f32 %v9780_v59, %v2717_v21  ;;  %v11713_v49 = vld [vmem:[#allocation10] sm:$0xff]  }
 0x48f   :  { %v9765_v53 = vpop.f32.mrf.mxu0  ;;  %9902 = vmatprep.mubr.msk.bf16.mxu1 %vm1324_vm3, %v11713_v49 }
 0x490   :  { %v2718_v47 = vadd.f32 %v9765_v53, %v2590_v16  ;;  %v2841_v27 = vadd.f32 %v2822_v60, %v2715_v58  ;;  %v11715_v53 = vpop.permute.xlu1 %2981 }
 0x491   :  { %v2699_v8 = vpop.f32.mrf.mxu0 }
 0x492   :  { %v2716_v41 = vadd.f32 %v2699_v8, %v2582_v20  ;;  %v2844_v19 = vadd.f32 %v9781_v37, %v2718_v47  ;;  %v11733_v37 = vld [vmem:[#allocation10 + $0x20] sm:$0xff]  }
 0x493   :  { %v9792_v52 = vpop.f32.mrf.mxu0  ;;  %9886 = vmatprep.mubr.msk.bf16.mxu0 %vm1324_vm3, %v11733_v37 }
 0x494   :  { %v2965_v32 = vadd.f32 %v9792_v52, %v2839_v51  ;;  %v2842_v9 = vadd.f32 %v2825_v63, %v2716_v41 }
 0x495   :  { %v2932_v6 = vpop.f32.mrf.mxu0 }
 0x496   :  { %v2963_v15 = vadd.f32 %v2932_v6, %v2837_v24  ;;  %v3021_v4 = vadd.f32 %v11698_v39, %v2965_v32 }
 0x497   :  { %v9793_v44 = vpop.f32.mrf.mxu0 }
 0x498   :  { %v2966_v61 = vadd.f32 %v9793_v44, %v2840_v14  ;;  %v3019_v6 = vadd.f32 %v11715_v53, %v2963_v15  ;;  %v3029_v33 = vmax.f32 %v3021_v4, 0.0  ;;  %v11781_v15 = vld [vmem:[#allocation10 + $0x60] sm:$0xff]  }
 0x499   :  { %v2935_v10 = vpop.f32.mrf.mxu0 }
 0x49a   :  { %v2964_v46 = vadd.f32 %v2935_v10, %v2838_v31  ;;  %v3022_v56 = vadd.f32 %v11696_v34, %v2966_v61  ;;  %v3027_v20 = vmax.f32 %v3019_v6, 0.0 }
 0x49b   :  { %v9796_v50 = vpop.f32.mrf.mxu0 }
 0x49c   :  { %v2969_v23 = vadd.f32 %v9796_v50, %v2843_v13  ;;  %v3020_v59 = vadd.f32 %v11708_v25, %v2964_v46  ;;  %v3030_v42 = vmax.f32 %v3022_v56, 0.0 }
 0x49d   :  { %v2948_v29 = vpop.f32.mrf.mxu0 }
 0x49e   :  { %v2967_v35 = vadd.f32 %v2948_v29, %v2841_v27  ;;  %v3025_v36 = vadd.f32 %v11690_v18, %v2969_v23  ;;  %v3028_v58 = vmax.f32 %v3020_v59, 0.0  ;;  %v11737_v38 = vpack.c.bf16 %v3030_v42, %v3029_v33 }
 0x49f   :  { %v9797_v11 = vpop.f32.mrf.mxu0 }
 0x4a0   :  { %v2970_v26 = vadd.f32 %v9797_v11, %v2844_v19  ;;  %v3023_v12 = vadd.f32 %v11694_v1, %v2967_v35  ;;  %v3033_v8 = vmax.f32 %v3025_v36, 0.0  ;;  %v11744_v22 = vpack.c.bf16 %v3028_v58, %v3027_v20  ;;  %v11760_v19 = vld [vmem:[#allocation10 + $0x8] sm:$0xff]   ;;  %v11765_v35 = vld [vmem:[#allocation10 + $0x10] sm:$0xff]  }
 0x4a1   :  { %v11701_v43 = vpop.f32.mrf.mxu1  ;;  %v2951_v62 = vpop.f32.mrf.mxu0 }
 0x4a2   :  { %v3026_v17 = vadd.f32 %v11688_v54, %v2970_v26  ;;  %v2968_v2 = vadd.f32 %v2951_v62, %v2842_v9  ;;  %v3031_v21 = vmax.f32 %v3023_v12, 0.0  ;;  %v11779_v26 = vld [vmem:[#allocation10 + $0x18] sm:$0xff]  }
 0x4a3   :  { %v11706_v7 = vpop.f32.mrf.mxu1  ;;  %v11711_v45 = vpop.f32.mrf.mxu0 }
 0x4a4   :  { %v3034_v52 = vmax.f32 %v3026_v17, 0.0  ;;  %v3024_v40 = vadd.f32 %v11692_v48, %v2968_v2 }
 0x4a5   :  { %v11719_v60 = vpop.f32.mrf.mxu1  ;;  %v11722_v55 = vpop.f32.mrf.mxu0 }
 0x4a6   :  { %v3459_v5 = vpack.c.bf16 %v3034_v52, %v3033_v8  ;;  %v3032_v44 = vmax.f32 %v3024_v40, 0.0  ;;  %v3163_v52 = vadd.f32 %v11711_v45, %v11701_v43 }
 0x4a7   :  { %v11726_v57 = vpop.f32.mrf.mxu1  ;;  %v11728_v16 = vpop.f32.mrf.mxu0 }
 0x4a8   :  { %v11730_v0 = vpack.c.bf16 %v3032_v44, %v3031_v21  ;;  %3507 = vrot.lane.b32.xlu1 %v3459_v5, %s10650_s3  ;;  %9894 = vmatprep.subr.bf16.mxu1 %v3459_v5  ;;  %v3166_v59 = vadd.f32 %v11728_v16, %v11719_v60 }
 0x4a9   :  { %v9812_v3 = vpop.f32.mrf.mxu1  ;;  %v11735_v10 = vpop.f32.mrf.mxu0  ;;  %9895 = vmatpush3.bf16.msra.mxu1 %v3459_v5 }
 0x4aa   :  { %3505 = vrot.lane.b32.xlu0 %v11730_v0, %s10650_s3  ;;  %9896 = vmatprep.subr.bf16.mxu1 %v11730_v0 }
 0x4ab   :  { %v3105_v13 = vpop.f32.mrf.mxu1  ;;  %v9828_v47 = vpop.f32.mrf.mxu0 }
 0x4ac   :  { %3503 = vrot.lane.b32.xlu1 %v11737_v38, %s10650_s3  ;;  %v3179_v17 = vadd.f32 %v9828_v47, %v9812_v3 }
 0x4ad   :  { %v9813_v50 = vpop.f32.mrf.mxu1  ;;  %v3170_v14 = vpop.f32.mrf.mxu0  ;;  %9897 = vmatpush3.bf16.msra.mxu1 %v11730_v0 }
 0x4ae   :  { %9898 = vmatprep.subr.bf16.mxu1 %v11737_v38  ;;  %3501 = vrot.lane.b32.xlu0 %v11744_v22, %s10650_s3  ;;  %v3171_v6 = vadd.f32 %v3170_v14, %v3105_v13 }
 0x4af   :  { %v3108_v27 = vpop.f32.mrf.mxu1  ;;  %v9829_v41 = vpop.f32.mrf.mxu0 }
 0x4b0   :  { %3722 = vrot.lane.b32.xlu1 %v3459_v5, %s10652_s27  ;;  %v3182_v42 = vadd.f32 %v9829_v41, %v9813_v50 }
 0x4b1   :  { %v9840_v23 = vpop.f32.mrf.mxu1  ;;  %v3173_v51 = vpop.f32.mrf.mxu0  ;;  %9899 = vmatpush3.bf16.msra.mxu1 %v11737_v38 }
 0x4b2   :  { %3848 = vrot.lane.b32.xlu0 %v3459_v5, %s10651_s12  ;;  %9900 = vmatprep.subr.bf16.mxu1 %v11744_v22  ;;  %v3174_v58 = vadd.f32 %v3173_v51, %v3108_v27  ;;  %v3155_v27 = vadd.f32 %v11722_v55, %v11706_v7 }
 0x4b3   :  { %v11756_v63 = vpop.f32.mrf.mxu1  ;;  %v9856_v29 = vpop.f32.mrf.mxu0 }
 0x4b4   :  { %3720 = vrot.lane.b32.xlu1 %v11730_v0, %s10652_s27 }
 0x4b5   :  { %v9841_v31 = vpop.f32.mrf.mxu1  ;;  %v11762_v61 = vpop.f32.mrf.mxu0  ;;  %9901 = vmatpush3.bf16.msra.mxu1 %v11744_v22 }
 0x4b6   :  { %3846 = vrot.lane.b32.xlu0 %v11730_v0, %s10651_s12  ;;  %v3265_v21 = vadd.f32 %v9841_v31, %v3166_v59 }
 0x4b7   :  { %v3234_v24 = vpop.f32.mrf.mxu1  ;;  %v9857_v32 = vpop.f32.mrf.mxu0 }
 0x4b8   :  { %3718 = vrot.lane.b32.xlu1 %v11737_v38, %s10652_s27  ;;  %9903 = vmatmul.mubr.msk.bf16.vlgmr.msra.gmra.mxu1 %vm1324_vm3, %v11760_v19  ;;  %v3350_v16 = vadd.f32 %v9857_v32, %v3265_v21  ;;  %v4071_v21 = vld [vmem:[%s14001_s8 + $0x30] sm:$0xff] }
 0x4b9   :  { %v9844_v11 = vpop.f32.mrf.mxu1  ;;  %9906 = vmatprep.mubr.msk.bf16.mxu1 %vm1324_vm3, %v11765_v35  ;;  %v3319_v9 = vpop.f32.mrf.mxu0 }
 0x4ba   :  { %3844 = vrot.lane.b32.xlu0 %v11737_v38, %s10651_s12  ;;  %v3268_v8 = vadd.f32 %v9844_v11, %v3179_v17 }
 0x4bb   :  { %v3247_v46 = vpop.f32.mrf.mxu1  ;;  %v9860_v62 = vpop.f32.mrf.mxu0 }
 0x4bc   :  { %3716 = vrot.lane.b32.xlu1 %v11744_v22, %s10652_s27  ;;  %v3266_v3 = vadd.f32 %v3247_v46, %v3171_v6  ;;  %v3353_v20 = vadd.f32 %v9860_v62, %v3268_v8 }
 0x4bd   :  { %v9845_v36 = vpop.f32.mrf.mxu1  ;;  %v3332_v2 = vpop.f32.mrf.mxu0 }
 0x4be   :  { %3842 = vrot.lane.b32.xlu0 %v11744_v22, %s10651_s12  ;;  %v3269_v47 = vadd.f32 %v9845_v36, %v3182_v42  ;;  %v3351_v41 = vadd.f32 %v3332_v2, %v3266_v3  ;;  %v4069_v42 = vld [vmem:[%s14001_s8 + $0x20] sm:$0xff] }
 0x4bf   :  { %v3250_v56 = vpop.f32.mrf.mxu1  ;;  %v9861_v44 = vpop.f32.mrf.mxu0 }
 0x4c0   :  { %3974 = vrot.lane.b32.xlu1 %v3459_v5, %s10653_s30  ;;  %9907 = vmatmul.mubr.msk.bf16.gmra.mxu1 %vm1324_vm3, %v11779_v26  ;;  %v3264_v5 = vadd.f32 %v9840_v23, %v3163_v52  ;;  %v3267_v43 = vadd.f32 %v3250_v56, %v3174_v58  ;;  %v3354_v23 = vadd.f32 %v9861_v44, %v3269_v47  ;;  %v4066_v44 = vld [vmem:[%s14001_s8 + $0x8] sm:$0xff]  ;;  %v4072_v58 = vld [vmem:[%s14001_s8 + $0x38] sm:$0xff] }
 0x4c1   :  { %v9872_v12 = vpop.f32.mrf.mxu1  ;;  %9934 = vmatprep.mubr.msk.bf16.mxu1 %vm1324_vm3, %v11781_v15  ;;  %v3335_v50 = vpop.f32.mrf.mxu0 }
 0x4c2   :  { %v3349_v13 = vadd.f32 %v9856_v29, %v3264_v5  ;;  %v3352_v32 = vadd.f32 %v3335_v50, %v3267_v43  ;;  %v4068_v5 = vld [vmem:[%s14001_s8 + $0x18] sm:$0xff]  ;;  %v11880_v50 = vld [vmem:[#allocation10 + $0x30] sm:$0xff]  }
 0x4c3   :  { %v3401_v4 = vpop.f32.mrf.mxu1 }
 0x4c4   :  { %3972 = vrot.lane.b32.xlu1 %v11730_v0, %s10653_s30  ;;  %v3158_v0 = vadd.f32 %v11735_v10, %v11726_v57  ;;  %v3434_v11 = vadd.f32 %v9872_v12, %v3349_v13  ;;  %v3262_v10 = vadd.f32 %v11756_v63, %v3155_v27 }
 0x4c5   :  { %v9873_v40 = vpop.f32.mrf.mxu1 }
 0x4c6   :  { %v3435_v31 = vadd.f32 %v9873_v40, %v3350_v16  ;;  %v3263_v51 = vadd.f32 %v3234_v24, %v3158_v0  ;;  %v3442_v55 = vadd.f32 %v3434_v11, %v11698_v39  ;;  %v11878_v0 = vld [vmem:[#allocation10 + $0x28] sm:$0xff]  }
 0x4c7   :  { %v3404_v33 = vpop.f32.mrf.mxu1  ;;  %v11890_v11 = vld [vmem:[#allocation10 + $0x68] sm:$0xff]  }
 0x4c8   :  { %3970 = vrot.lane.b32.xlu1 %v11737_v38, %s10653_s30  ;;  %v3443_v62 = vadd.f32 %v3435_v31, %v11696_v34  ;;  %v3348_v7 = vadd.f32 %v3319_v9, %v3263_v51  ;;  %v3450_v34 = vmax.f32 %v3442_v55, 0.0  ;;  %v11886_v31 = vld [vmem:[#allocation10 + $0x38] sm:$0xff]   ;;  %v11888_v51 = vld [vmem:[#allocation10 + $0x40] sm:$0xff]  }
 0x4c9   :  { %v9876_v60 = vpop.f32.mrf.mxu1 }
 0x4ca   :  { %v3438_v45 = vadd.f32 %v9876_v60, %v3353_v20  ;;  %v3451_v59 = vmax.f32 %v3443_v62, 0.0  ;;  %v3433_v8 = vadd.f32 %v3404_v33, %v3348_v7  ;;  %v4070_v33 = vld [vmem:[%s14001_s8 + $0x28] sm:$0xff]  ;;  %v11916_v62 = vld [vmem:[#allocation10 + $0x58] sm:$0xff]  }
 0x4cb   :  { %v3417_v14 = vpop.f32.mrf.mxu1 }
 0x4cc   :  { %3968 = vrot.lane.b32.xlu1 %v11744_v22, %s10653_s30  ;;  %v3446_v46 = vadd.f32 %v3438_v45, %v11690_v18  ;;  %v3436_v36 = vadd.f32 %v3417_v14, %v3351_v41  ;;  %v3347_v18 = vadd.f32 %v11762_v61, %v3262_v10  ;;  %v11906_v10 = vld [vmem:[#allocation10 + $0x78] sm:$0xff]  }
 0x4cd   :  { %v9877_v38 = vpop.f32.mrf.mxu1 }
 0x4ce   :  { %v3439_v57 = vadd.f32 %v9877_v38, %v3354_v23  ;;  %v3454_v24 = vmax.f32 %v3446_v46, 0.0  ;;  %v3444_v22 = vadd.f32 %v3436_v36, %v11694_v1  ;;  %v3432_v40 = vadd.f32 %v3401_v4, %v3347_v18  ;;  %v11902_v36 = vld [vmem:[#allocation10 + $0x48] sm:$0xff]   ;;  %v11935_v18 = vld [vmem:[#allocation10 + $0x98] sm:$0xff]  }
 0x4cf   :  { %v3420_v29 = vpop.f32.mrf.mxu1  ;;  %v11818_v1 = vpack.c.bf16 %v3451_v59, %v3450_v34 }
 0x4d0   :  { %v3447_v56 = vadd.f32 %v3439_v57, %v11688_v54  ;;  %v3437_v17 = vadd.f32 %v3420_v29, %v3352_v32  ;;  %v3452_v54 = vmax.f32 %v3444_v22, 0.0  ;;  %v3440_v61 = vadd.f32 %v3432_v40, %v11715_v53  ;;  %v4065_v53 = vld [vmem:[%s14001_s8] sm:$0xff]  ;;  %v11892_v32 = vld [vmem:[#allocation10 + $0x70] sm:$0xff]  }
 0x4d1   :  { %v11904_v57 = vld [vmem:[#allocation10 + $0x50] sm:$0xff]  }
 0x4d2   :  { %v3455_v12 = vmax.f32 %v3447_v56, 0.0  ;;  %v3445_v2 = vadd.f32 %v3437_v17, %v11692_v48  ;;  %v3441_v48 = vadd.f32 %v3433_v8, %v11708_v25  ;;  %v3448_v4 = vmax.f32 %v3440_v61, 0.0  ;;  %v4067_v25 = vld [vmem:[%s14001_s8 + $0x10] sm:$0xff]  ;;  %v11918_v56 = vld [vmem:[#allocation10 + $0x80] sm:$0xff]   ;;  %v11990_v61 = vld [vmem:[#allocation11 + $0x28] ss:$16 sps:$4 sm:$0xff]  }
 0x4d4   :  { %v11812_v63 = vpack.c.bf16 %v3455_v12, %v3454_v24  ;;  %v3453_v52 = vmax.f32 %v3445_v2, 0.0  ;;  %v3449_v9 = vmax.f32 %v3441_v48, 0.0  ;;  %v11924_v24 = vld [vmem:[#allocation10 + $0x88] sm:$0xff]  }
 0x4d5   :  { %v11986_v48 = vld [vmem:[#allocation11 + $0x2c] ss:$16 sps:$4 sm:$0xff]  }
 0x4d6   :  { %4285 = vrot.lane.b32.xlu1 %v11812_v63, %s10652_s27  ;;  %4143 = vrot.lane.b32.xlu0 %v11812_v63, %s10650_s3  ;;  %v11821_v39 = vpack.c.bf16 %v3453_v52, %v3452_v54  ;;  %v11832_v6 = vpack.c.bf16 %v3449_v9, %v3448_v4  ;;  %v11996_v9 = vld [vmem:[#allocation11 + $0x4] ss:$16 sps:$4 sm:$0xff]   ;;  %v11998_v4 = vld [vmem:[#allocation11 + $0xc] ss:$16 sps:$4 sm:$0xff]  }
 0x4da   :  { %4281 = vrot.lane.b32.xlu1 %v11818_v1, %s10652_s27  ;;  %4141 = vrot.lane.b32.xlu0 %v11821_v39, %s10650_s3 }
 0x4de   :  { %4370 = vrot.lane.b32.xlu1 %v11812_v63, %s10651_s12  ;;  %4139 = vrot.lane.b32.xlu0 %v11818_v1, %s10650_s3 }
 0x4e2   :  { %4368 = vrot.lane.b32.xlu1 %v11821_v39, %s10651_s12  ;;  %4137 = vrot.lane.b32.xlu0 %v11832_v6, %s10650_s3 }
 0x4e6   :  { %4366 = vrot.lane.b32.xlu1 %v11818_v1, %s10651_s12  ;;  %4283 = vrot.lane.b32.xlu0 %v11821_v39, %s10652_s27 }
 0x4ea   :  { %4364 = vrot.lane.b32.xlu1 %v11832_v6, %s10651_s12  ;;  %4279 = vrot.lane.b32.xlu0 %v11832_v6, %s10652_s27 }
 0x4ee   :  { %4085 = vperm.xlu1 %10077, %v4067_v25   ;;  %4455 = vrot.lane.b32.xlu0 %v11812_v63, %s10653_s30 }
 0x4f2   :  { %4075 = vperm.xlu1 %10077, %v4065_v53   ;;  %4453 = vrot.lane.b32.xlu0 %v11821_v39, %s10653_s30 }
 0x4f6   :  { %4095 = vperm.xlu1 %10077, %v4069_v42   ;;  %4451 = vrot.lane.b32.xlu0 %v11818_v1, %s10653_s30 }
 0x4fa   :  { %4105 = vperm.xlu1 %10077, %v4071_v21   ;;  %4449 = vrot.lane.b32.xlu0 %v11832_v6, %s10653_s30 }
 0x4fe   :  { %4090 = vperm.xlu0 %10076, %v4068_v5  }
 0x502   :  { %4080 = vperm.xlu0 %10076, %v4066_v44  }
 0x506   :  { %4100 = vperm.xlu0 %10076, %v4070_v33  }
 0x50a   :  { %4110 = vperm.xlu0 %10076, %v4072_v58  }
 0x51a   :  { %v3508_v3 = vpop.permute.xlu1 %3507 }
 0x51b   :  { %9878 = vmatprep.subr.bf16.mxu0 %v3508_v3 }
 0x51c   :  { %9879 = vmatpush3.bf16.msra.mxu0 %v3508_v3  ;;  %v3506_v20 = vpop.permute.xlu0 %3505 }
 0x51d   :  { %9880 = vmatprep.subr.bf16.mxu0 %v3506_v20 }
 0x51e   :  { %v3504_v47 = vpop.permute.xlu1 %3503 }
 0x520   :  { %9881 = vmatpush3.bf16.msra.mxu0 %v3506_v20  ;;  %v3502_v60 = vpop.permute.xlu0 %3501 }
 0x521   :  { %9882 = vmatprep.subr.bf16.mxu0 %v3504_v47 }
 0x522   :  { %v3723_v16 = vpop.permute.xlu1 %3722 }
 0x524   :  { %9883 = vmatpush3.bf16.msra.mxu0 %v3504_v47  ;;  %v3849_v43 = vpop.permute.xlu0 %3848 }
 0x525   :  { %9884 = vmatprep.subr.bf16.mxu0 %v3502_v60  ;;  %9926 = vmatprep.subr.bf16.mxu1 %v3849_v43 }
 0x526   :  { %v3721_v45 = vpop.permute.xlu1 %3720  ;;  %9927 = vmatpush3.bf16.msra.mxu1 %v3849_v43 }
 0x528   :  { %9885 = vmatpush3.bf16.msra.mxu0 %v3502_v60  ;;  %v3847_v13 = vpop.permute.xlu0 %3846 }
 0x529   :  { %9910 = vmatprep.subr.bf16.mxu0 %v3723_v16  ;;  %9928 = vmatprep.subr.bf16.mxu1 %v3847_v13 }
 0x52a   :  { %v3719_v14 = vpop.permute.xlu1 %3718  ;;  %9929 = vmatpush3.bf16.msra.mxu1 %v3847_v13 }
 0x52b   :  { %9887 = vmatmul.mubr.msk.bf16.vlgmr.msra.gmra.mxu0 %vm1324_vm3, %v11878_v0 }
 0x52c   :  { %9911 = vmatpush3.bf16.msra.mxu0 %v3723_v16  ;;  %v3845_v41 = vpop.permute.xlu0 %3844  ;;  %9890 = vmatprep.mubr.msk.bf16.mxu0 %vm1324_vm3, %v11880_v50 }
 0x52d   :  { %9912 = vmatprep.subr.bf16.mxu0 %v3721_v45  ;;  %9930 = vmatprep.subr.bf16.mxu1 %v3845_v41 }
 0x52e   :  { %v3717_v23 = vpop.permute.xlu1 %3716  ;;  %9931 = vmatpush3.bf16.msra.mxu1 %v3845_v41 }
 0x530   :  { %9913 = vmatpush3.bf16.msra.mxu0 %v3721_v45  ;;  %v3843_v27 = vpop.permute.xlu0 %3842 }
 0x531   :  { %9914 = vmatprep.subr.bf16.mxu0 %v3719_v14  ;;  %9932 = vmatprep.subr.bf16.mxu1 %v3843_v27 }
 0x532   :  { %v3975_v38 = vpop.permute.xlu1 %3974  ;;  %9933 = vmatpush3.bf16.msra.mxu1 %v3843_v27 }
 0x533   :  { %9891 = vmatmul.mubr.msk.bf16.gmra.mxu0 %vm1324_vm3, %v11886_v31 }
 0x534   :  { %9915 = vmatpush3.bf16.msra.mxu0 %v3719_v14  ;;  %9918 = vmatprep.mubr.msk.bf16.mxu0 %vm1324_vm3, %v11888_v51 }
 0x535   :  { %9916 = vmatprep.subr.bf16.mxu0 %v3717_v23  ;;  %9935 = vmatmul.mubr.msk.bf16.vlgmr.msra.gmra.mxu1 %vm1324_vm3, %v11890_v11 }
 0x536   :  { %9938 = vmatprep.mubr.msk.bf16.mxu1 %vm1324_vm3, %v11892_v32  ;;  %v3973_v46 = vpop.permute.xlu1 %3972 }
 0x538   :  { %9917 = vmatpush3.bf16.msra.mxu0 %v3717_v23 }
 0x539   :  { %9942 = vmatprep.subr.bf16.mxu0 %v3975_v38 }
 0x53a   :  { %v3971_v29 = vpop.permute.xlu1 %3970 }
 0x53b   :  { %9919 = vmatmul.mubr.msk.bf16.vlgmr.msra.gmra.mxu0 %vm1324_vm3, %v11902_v36 }
 0x53c   :  { %9943 = vmatpush3.bf16.msra.mxu0 %v3975_v38  ;;  %9922 = vmatprep.mubr.msk.bf16.mxu0 %vm1324_vm3, %v11904_v57 }
 0x53d   :  { %9944 = vmatprep.subr.bf16.mxu0 %v3973_v46  ;;  %9939 = vmatmul.mubr.msk.bf16.gmra.mxu1 %vm1324_vm3, %v11906_v10 }
 0x53e   :  { %9966 = vmatprep.mubr.msk.bf16.mxu1 %vm1324_vm3, %v11733_v37  ;;  %v3969_v17 = vpop.permute.xlu1 %3968  ;;  %v11927_v37 = vld [vmem:[#allocation10 + $0x90] sm:$0xff]  }
 0x540   :  { %9945 = vmatpush3.bf16.msra.mxu0 %v3973_v46 }
 0x541   :  { %9946 = vmatprep.subr.bf16.mxu0 %v3971_v29 }
 0x543   :  { %9923 = vmatmul.mubr.msk.bf16.gmra.mxu0 %vm1324_vm3, %v11916_v62 }
 0x544   :  { %9947 = vmatpush3.bf16.msra.mxu0 %v3971_v29  ;;  %9950 = vmatprep.mubr.msk.bf16.mxu0 %vm1324_vm3, %v11918_v56 }
 0x545   :  { %9948 = vmatprep.subr.bf16.mxu0 %v3969_v17 }
 0x548   :  { %v4286_v7 = vpop.permute.xlu1 %4285  ;;  %v4144_v55 = vpop.permute.xlu0 %4143  ;;  %9949 = vmatpush3.bf16.msra.mxu0 %v3969_v17 }
 0x549   :  { %9958 = vmatprep.subr.bf16.mxu1 %v4144_v55  ;;  %9974 = vmatprep.subr.bf16.mxu0 %v11812_v63 }
 0x54a   :  { %9959 = vmatpush3.bf16.msra.mxu1 %v4144_v55 }
 0x54b   :  { %9951 = vmatmul.mubr.msk.bf16.vlgmr.msra.gmra.mxu0 %vm1324_vm3, %v11924_v24 }
 0x54c   :  { %v4142_v22 = vpop.permute.xlu0 %4141  ;;  %v4282_v12 = vpop.permute.xlu1 %4281  ;;  %9975 = vmatpush3.bf16.msra.mxu0 %v11812_v63  ;;  %9954 = vmatprep.mubr.msk.bf16.mxu0 %vm1324_vm3, %v11927_v37 }
 0x54d   :  { %9960 = vmatprep.subr.bf16.mxu1 %v4142_v22  ;;  %9976 = vmatprep.subr.bf16.mxu0 %v11821_v39 }
 0x54e   :  { %9961 = vmatpush3.bf16.msra.mxu1 %v4142_v22 }
 0x550   :  { %v4140_v2 = vpop.permute.xlu0 %4139  ;;  %9977 = vmatpush3.bf16.msra.mxu0 %v11821_v39  ;;  %v4371_v59 = vpop.permute.xlu1 %4370  ;;  %v11988_v39 = vld [vmem:[#allocation11 + $0x20] ss:$16 sps:$4 sm:$0xff]  }
 0x551   :  { %9962 = vmatprep.subr.bf16.mxu1 %v4140_v2  ;;  %9978 = vmatprep.subr.bf16.mxu0 %v11818_v1 }
 0x552   :  { %9963 = vmatpush3.bf16.msra.mxu1 %v4140_v2 }
 0x553   :  { %9955 = vmatmul.mubr.msk.bf16.gmra.mxu0 %vm1324_vm3, %v11935_v18 }
 0x554   :  { %v4138_v8 = vpop.permute.xlu0 %4137  ;;  %9979 = vmatpush3.bf16.msra.mxu0 %v11818_v1  ;;  %9982 = vmatprep.mubr.msk.bf16.mxu0 %vm1324_vm3, %v11713_v49  ;;  %v4369_v52 = vpop.permute.xlu1 %4368  ;;  %v11984_v1 = vld [vmem:[#allocation11 + $0x24] ss:$16 sps:$4 sm:$0xff]  }
 0x555   :  { %9964 = vmatprep.subr.bf16.mxu1 %v4138_v8  ;;  %9980 = vmatprep.subr.bf16.mxu0 %v11832_v6 }
 0x556   :  { %9965 = vmatpush3.bf16.msra.mxu1 %v4138_v8 }
 0x557   :  { %9990 = vmatprep.subr.bf16.mxu1 %v4286_v7 }
 0x558   :  { %v4284_v63 = vpop.permute.xlu0 %4283  ;;  %9981 = vmatpush3.bf16.msra.mxu0 %v11832_v6  ;;  %v4367_v49 = vpop.permute.xlu1 %4366 }
 0x559   :  { %9967 = vmatmul.mubr.msk.bf16.vlgmr.msra.gmra.mxu1 %vm1324_vm3, %v11878_v0  ;;  %10006 = vmatprep.subr.bf16.mxu0 %v4371_v59 }
 0x55a   :  { %9991 = vmatpush3.bf16.msra.mxu1 %v4286_v7  ;;  %9970 = vmatprep.mubr.msk.bf16.mxu1 %vm1324_vm3, %v11880_v50 }
 0x55b   :  { %9992 = vmatprep.subr.bf16.mxu1 %v4284_v63  ;;  %9983 = vmatmul.mubr.msk.bf16.vlgmr.msra.gmra.mxu0 %vm1324_vm3, %v11760_v19 }
 0x55c   :  { %v4280_v34 = vpop.permute.xlu0 %4279  ;;  %10007 = vmatpush3.bf16.msra.mxu0 %v4371_v59  ;;  %9986 = vmatprep.mubr.msk.bf16.mxu0 %vm1324_vm3, %v11765_v35  ;;  %v4365_v19 = vpop.permute.xlu1 %4364 }
 0x55d   :  { %10008 = vmatprep.subr.bf16.mxu0 %v4369_v52 }
 0x55e   :  { %9993 = vmatpush3.bf16.msra.mxu1 %v4284_v63 }
 0x55f   :  { %9994 = vmatprep.subr.bf16.mxu1 %v4282_v12 }
 0x560   :  { %v4456_v40 = vpop.permute.xlu0 %4455  ;;  %10009 = vmatpush3.bf16.msra.mxu0 %v4369_v52 }
 0x561   :  { %9971 = vmatmul.mubr.msk.bf16.gmra.mxu1 %vm1324_vm3, %v11886_v31  ;;  %10010 = vmatprep.subr.bf16.mxu0 %v4367_v49 }
 0x562   :  { %9995 = vmatpush3.bf16.msra.mxu1 %v4282_v12  ;;  %9998 = vmatprep.mubr.msk.bf16.mxu1 %vm1324_vm3, %v11888_v51 }
 0x563   :  { %9996 = vmatprep.subr.bf16.mxu1 %v4280_v34  ;;  %9987 = vmatmul.mubr.msk.bf16.gmra.mxu0 %vm1324_vm3, %v11779_v26 }
 0x564   :  { %10011 = vmatpush3.bf16.msra.mxu0 %v4367_v49  ;;  %10014 = vmatprep.mubr.msk.bf16.mxu0 %vm1324_vm3, %v11781_v15  ;;  %v4454_v35 = vpop.permute.xlu0 %4453  ;;  %v14256_v15 = vmov 0  }
 0x565   :  { %10012 = vmatprep.subr.bf16.mxu0 %v4365_v19 }
 0x566   :  { %9997 = vmatpush3.bf16.msra.mxu1 %v4280_v34 }
 0x567   :  { %10022 = vmatprep.subr.bf16.mxu1 %v4456_v40 }
 0x568   :  { %10013 = vmatpush3.bf16.msra.mxu0 %v4365_v19  ;;  %v4452_v54 = vpop.permute.xlu0 %4451 }
 0x569   :  { %9999 = vmatmul.mubr.msk.bf16.vlgmr.msra.gmra.mxu1 %vm1324_vm3, %v11902_v36  ;;  %4600 = vmatprep.subr.bf16.mxu0 %v11984_v1  ;;  %v12018_v59 = vpop.permute.xlu1 %4085 }
 0x56a   :  { %10023 = vmatpush3.bf16.msra.mxu1 %v4456_v40  ;;  %10002 = vmatprep.mubr.msk.bf16.mxu1 %vm1324_vm3, %v11904_v57 }
 0x56b   :  { %10024 = vmatprep.subr.bf16.mxu1 %v4454_v35  ;;  %10015 = vmatmul.mubr.msk.bf16.vlgmr.msra.gmra.mxu0 %vm1324_vm3, %v11890_v11 }
 0x56c   :  { %10018 = vmatprep.mubr.msk.bf16.mxu0 %vm1324_vm3, %v11892_v32  ;;  %v4450_v26 = vpop.permute.xlu0 %4449  ;;  %4601 = vmatpush1.bf16.msra.mxu0 %v11988_v39 }
 0x56d   :  { %4709 = vmatprep.subr.bf16.mxu0 %v11996_v9 }
 0x56e   :  { %10025 = vmatpush3.bf16.msra.mxu1 %v4454_v35 }
 0x56f   :  { %10026 = vmatprep.subr.bf16.mxu1 %v4452_v54 }
 0x571   :  { %10003 = vmatmul.mubr.msk.bf16.gmra.mxu1 %vm1324_vm3, %v11916_v62 }
 0x572   :  { %10027 = vmatpush3.bf16.msra.mxu1 %v4452_v54  ;;  %10030 = vmatprep.mubr.msk.bf16.mxu1 %vm1324_vm3, %v11918_v56 }
 0x573   :  { %10028 = vmatprep.subr.bf16.mxu1 %v4450_v26  ;;  %10019 = vmatmul.mubr.msk.bf16.gmra.mxu0 %vm1324_vm3, %v11906_v10 }
 0x574   :  { %4618 = vmatprep.mubr.bf16.mxu0 %v14256_v15 }
 0x576   :  { %10029 = vmatpush3.bf16.msra.mxu1 %v4450_v26 }
 0x577   :  { %4643 = vmatprep.subr.bf16.mxu1 %v11986_v48 }
 0x578   :  { %v9904_v6 = vpop.f32.mrf.mxu1 }
 0x579   :  { %10031 = vmatmul.mubr.msk.bf16.vlgmr.msra.gmra.mxu1 %vm1324_vm3, %v11924_v24  ;;  %v12016_v12 = vpop.permute.xlu0 %4090 }
 0x57a   :  { %10034 = vmatprep.mubr.msk.bf16.mxu1 %vm1324_vm3, %v11927_v37  ;;  %4644 = vmatpush1.bf16.msra.mxu1 %v11990_v61  ;;  %v3656_v25 = vpop.f32.mrf.mxu1 }
 0x57b   :  { %4752 = vmatprep.subr.bf16.mxu1 %v11998_v4 }
 0x57c   :  { %v9905_v53 = vpop.f32.mrf.mxu1 }
 0x57e   :  { %v3659_v42 = vpop.f32.mrf.mxu1 }
 0x580   :  { %v12002_v21 = vpop.f32.mrf.mxu1 }
 0x581   :  { %10035 = vmatmul.mubr.msk.bf16.gmra.mxu1 %vm1324_vm3, %v11935_v18 }
 0x582   :  { %4661 = vmatprep.mubr.bf16.mxu1 %v14256_v15  ;;  %v3672_v33 = vpop.f32.mrf.mxu1 }
 0x584   :  { %v12004_v20 = vpop.f32.mrf.mxu1 }
 0x586   :  { %v3675_v16 = vpop.f32.mrf.mxu1 }
 0x5eb   :  { %v9888_v5 = vpop.f32.mrf.mxu0 }
 0x5ec   :  { %v3665_v51 = vadd.f32 %v9904_v6, %v9888_v5 }
 0x5ed   :  { %v3559_v44 = vpop.f32.mrf.mxu0 }
 0x5ee   :  { %v3657_v7 = vadd.f32 %v3656_v25, %v3559_v44 }
 0x5ef   :  { %v9889_v58 = vpop.f32.mrf.mxu0 }
 0x5f0   :  { %v3668_v36 = vadd.f32 %v9905_v53, %v9889_v58  ;;  %v12024_v53 = vpop.permute.xlu0 %4080 }
 0x5f1   :  { %v3562_v3 = vpop.f32.mrf.mxu0 }
 0x5f2   :  { %v3660_v29 = vadd.f32 %v3659_v42, %v3562_v3 }
 0x5f3   :  { %v12006_v47 = vpop.f32.mrf.mxu0 }
 0x5f5   :  { %v3575_v60 = vpop.f32.mrf.mxu0  ;;  %v9936_v0 = vpop.f32.mrf.mxu1 }
 0x5f6   :  { %v3673_v6 = vadd.f32 %v3672_v33, %v3575_v60  ;;  %v12031_v33 = vpop.permute.xlu1 %4075 }
 0x5f7   :  { %v12008_v43 = vpop.f32.mrf.mxu0  ;;  %v3900_v14 = vpop.f32.mrf.mxu1 }
 0x5f9   :  { %v3578_v45 = vpop.f32.mrf.mxu0  ;;  %v9937_v31 = vpop.f32.mrf.mxu1 }
 0x5fa   :  { %v3676_v19 = vadd.f32 %v3675_v16, %v3578_v45 }
 0x5fb   :  { %v9920_v13 = vpop.f32.mrf.mxu0  ;;  %v3903_v11 = vpop.f32.mrf.mxu1 }
 0x5fc   :  { %v3807_v32 = vadd.f32 %v9920_v13, %v3665_v51  ;;  %v12026_v13 = vld [vmem:[#allocation11] ss:$16 sps:$4 sm:$0xff]  }
 0x5fd   :  { %v3774_v50 = vpop.f32.mrf.mxu0  ;;  %v12014_v57 = vpop.f32.mrf.mxu1 }
 0x5fe   :  { %v3933_v62 = vadd.f32 %v9936_v0, %v3807_v32  ;;  %v3805_v2 = vadd.f32 %v3774_v50, %v3657_v7  ;;  %v12028_v50 = vld [vmem:[#allocation11 + $0x8] ss:$16 sps:$4 sm:$0xff]   ;;  %v3684_v32 = vadd.f32 %v12004_v20, %v12008_v43 }
 0x5ff   :  { %v9921_v41 = vpop.f32.mrf.mxu0  ;;  %v3916_v37 = vpop.f32.mrf.mxu1 }
 0x600   :  { %v3808_v56 = vadd.f32 %v9921_v41, %v3668_v36  ;;  %v3931_v35 = vadd.f32 %v3900_v14, %v3805_v2  ;;  %v12033_v41 = vld [vmem:[#allocation11 + $0x44] ss:$16 sps:$4 sm:$0xff]   ;;  %v12065_v2 = vld [vmem:[#allocation11 + $0x48] ss:$16 sps:$4 sm:$0xff]  }
 0x601   :  { %v3777_v23 = vpop.f32.mrf.mxu0  ;;  %v9941_v49 = vpop.f32.mrf.mxu1 }
 0x602   :  { %v3806_v55 = vadd.f32 %v3777_v23, %v3660_v29  ;;  %v3934_v18 = vadd.f32 %v9937_v31, %v3808_v56  ;;  %v12035_v23 = vld [vmem:[#allocation11 + $0x4c] ss:$16 sps:$4 sm:$0xff]  }
 0x603   :  { %v12010_v27 = vpop.f32.mrf.mxu0  ;;  %v3919_v3 = vpop.f32.mrf.mxu1 }
 0x604   :  { %v3932_v63 = vadd.f32 %v3903_v11, %v3806_v55 }
 0x605   :  { %v3790_v38 = vpop.f32.mrf.mxu0 }
 0x606   :  { %v3809_v16 = vadd.f32 %v3790_v38, %v3673_v6 }
 0x607   :  { %v12012_v46 = vpop.f32.mrf.mxu0 }
 0x608   :  { %v3935_v36 = vadd.f32 %v3916_v37, %v3809_v16  ;;  %v3812_v20 = vadd.f32 %v12012_v46, %v3684_v32  ;;  %v12104_v16 = vld [vmem:[#allocation11 + $0x68] ss:$16 sps:$4 sm:$0xff]  }
 0x609   :  { %v3793_v10 = vpop.f32.mrf.mxu0 }
 0x60a   :  { %v3810_v42 = vadd.f32 %v3793_v10, %v3676_v19 }
 0x60b   :  { %v9952_v17 = vpop.f32.mrf.mxu0 }
 0x60c   :  { %v4059_v24 = vadd.f32 %v9952_v17, %v3933_v62  ;;  %v3936_v31 = vadd.f32 %v3919_v3, %v3810_v42  ;;  %v3681_v17 = vadd.f32 %v12002_v21, %v12006_v47  ;;  %v12071_v47 = vpop.permute.xlu1 %4095 }
 0x60d   :  { %v4026_v22 = vpop.f32.mrf.mxu0 }
 0x60e   :  { %v4115_v52 = vadd.f32 %v12018_v59, %v4059_v24  ;;  %v4057_v44 = vadd.f32 %v4026_v22, %v3931_v35  ;;  %v12059_v24 = vpop.permute.xlu0 %4100  ;;  %v12063_v22 = vld [vmem:[#allocation11 + $0x40] ss:$16 sps:$4 sm:$0xff]  }
 0x60f   :  { %v9953_v8 = vpop.f32.mrf.mxu0 }
 0x610   :  { %v4060_v34 = vadd.f32 %v9953_v8, %v3934_v18  ;;  %v4123_v5 = vmax.f32 %v4115_v52, 0.0  ;;  %v4113_v51 = vadd.f32 %v12031_v33, %v4057_v44  ;;  %v3811_v18 = vadd.f32 %v12010_v27, %v3681_v17  ;;  %v12075_v52 = vld [vmem:[#allocation11 + $0x64] ss:$16 sps:$4 sm:$0xff]  }
 0x611   :  { %v4029_v40 = vpop.f32.mrf.mxu0 }
 0x612   :  { %v4116_v54 = vadd.f32 %v12016_v12, %v4060_v34  ;;  %v4058_v26 = vadd.f32 %v4029_v40, %v3932_v63  ;;  %v4121_v43 = vmax.f32 %v4113_v51, 0.0  ;;  %v12077_v34 = vld [vmem:[#allocation11 + $0x6c] ss:$16 sps:$4 sm:$0xff]   ;;  %v3938_v40 = vadd.f32 %v9941_v49, %v3812_v20 }
 0x613   :  { %v12022_v25 = vpop.f32.mrf.mxu0 }
 0x614   :  { %v4124_v58 = vmax.f32 %v4116_v54, 0.0  ;;  %v4114_v14 = vadd.f32 %v12024_v53, %v4058_v26  ;;  %v3937_v54 = vadd.f32 %v12014_v57, %v3811_v18  ;;  %v12098_v57 = vpop.permute.xlu0 %4110 }
 0x615   :  { %v4042_v0 = vpop.f32.mrf.mxu0 }
 0x616   :  { %v4551_v45 = vpack.c.bf16 %v4124_v58, %v4123_v5  ;;  %v4122_v10 = vmax.f32 %v4114_v14, 0.0  ;;  %v4061_v7 = vadd.f32 %v4042_v0, %v3935_v36  ;;  %v4063_v5 = vadd.f32 %v12022_v25, %v3937_v54  ;;  %v12102_v0 = vld [vmem:[#allocation11 + $0x60] ss:$16 sps:$4 sm:$0xff]  }
 0x617   :  { %v9957_v60 = vpop.f32.mrf.mxu0 }
 0x618   :  { %9024 = vmatmul.mubr.msk.bf16.vlgmr.msra.gmra.mxu0 %vm4582_vm4, %v4551_v45  ;;  %9025 = vmatmul.mubr.msk.bf16.vlgmr.msra.gmra.mxu1 %vm4582_vm4, %v4551_v45  ;;  %v4550_v8 = vpack.c.bf16 %v4122_v10, %v4121_v43  ;;  %v4117_v19 = vadd.f32 %v12071_v47, %v4061_v7  ;;  %v4064_v26 = vadd.f32 %v9957_v60, %v3938_v40 }
 0x619   :  { %v12040_v11 = vpop.f32.mrf.mxu1  ;;  %v4045_v38 = vpop.f32.mrf.mxu0  ;;  %4710 = vmatpush1.bf16.msra.mxu0 %v12026_v13  ;;  %4753 = vmatpush1.bf16.msra.mxu1 %v12028_v50 }
 0x61a   :  { %v4062_v29 = vadd.f32 %v4045_v38, %v3936_v31  ;;  %4727 = vmatprep.mubr.bf16.mxu0 %v14256_v15  ;;  %4770 = vmatprep.mubr.bf16.mxu1 %v14256_v15  ;;  %v4125_v44 = vmax.f32 %v4117_v19, 0.0  ;;  %v4120_v45 = vadd.f32 %v12098_v57, %v4064_v26  ;;  %v12107_v31 = vpop.permute.xlu1 %4105 }
 0x61b   :  { %v12046_v62 = vpop.f32.mrf.mxu1  ;;  %v12050_v56 = vpop.f32.mrf.mxu0  ;;  %4822 = vmatprep.subr.bf16.mxu0 %v12033_v41  ;;  %4865 = vmatprep.subr.bf16.mxu1 %v12035_v23  ;;  %v4119_v25 = vadd.f32 %v12107_v31, %v4063_v5 }
 0x61c   :  { %v4118_v63 = vadd.f32 %v12059_v24, %v4062_v29  ;;  %v4128_v36 = vmax.f32 %v4120_v45, 0.0  ;;  %v4257_v40 = vadd.f32 %v12050_v56, %v12040_v11 }
 0x61d   :  { %v12057_v55 = vpop.f32.mrf.mxu1  ;;  %v12061_v37 = vpop.f32.mrf.mxu0  ;;  %v4127_v17 = vmax.f32 %v4119_v25, 0.0 }
 0x61e   :  { %v4126_v6 = vmax.f32 %v4118_v63, 0.0 }
 0x61f   :  { %v12069_v21 = vpop.f32.mrf.mxu1  ;;  %v12073_v46 = vpop.f32.mrf.mxu0  ;;  %v4553_v7 = vpack.c.bf16 %v4128_v36, %v4127_v17 }
 0x620   :  { %9030 = vmatmul.mubr.msk.bf16.vlgmr.msra.gmra.mxu0 %vm4582_vm4, %v4550_v8  ;;  %9031 = vmatmul.mubr.msk.bf16.vlgmr.msra.gmra.mxu1 %vm4582_vm4, %v4550_v8  ;;  %v4552_v14 = vpack.c.bf16 %v4126_v6, %v4125_v44  ;;  %v4260_v26 = vadd.f32 %v12073_v46, %v12057_v55  ;;  %v4249_v44 = vadd.f32 %v12061_v37, %v12046_v62 }
 0x621   :  { %v12082_v27 = vpop.f32.mrf.mxu1  ;;  %v4251_v35 = vpop.f32.mrf.mxu0  ;;  %4823 = vmatpush1.bf16.msra.mxu0 %v12063_v22  ;;  %4866 = vmatpush1.bf16.msra.mxu1 %v12065_v2 }
 0x622   :  { %4840 = vmatprep.mubr.bf16.mxu0 %v14256_v15  ;;  %4883 = vmatprep.mubr.bf16.mxu1 %v14256_v15 }
 0x623   :  { %v12087_v42 = vpop.f32.mrf.mxu1  ;;  %v12091_v49 = vpop.f32.mrf.mxu0  ;;  %4943 = vmatprep.subr.bf16.mxu0 %v12075_v52  ;;  %4986 = vmatprep.subr.bf16.mxu1 %v12077_v34 }
 0x625   :  { %v12096_v58 = vpop.f32.mrf.mxu1  ;;  %v12100_v3 = vpop.f32.mrf.mxu0 }
 0x626   :  { %v4265_v62 = vadd.f32 %v12100_v3, %v12087_v42 }
 0x627   :  { %v4202_v60 = vpop.f32.mrf.mxu1  ;;  %v12109_v51 = vpop.f32.mrf.mxu0 }
 0x628   :  { %9036 = vmatmul.mubr.msk.bf16.vlgmr.msra.gmra.mxu0 %vm4582_vm4, %v4552_v14  ;;  %9037 = vmatmul.mubr.msk.bf16.vlgmr.msra.gmra.mxu1 %vm4582_vm4, %v4552_v14  ;;  %v4276_v42 = vadd.f32 %v12109_v51, %v12096_v58 }
 0x629   :  { %v10000_v38 = vpop.f32.mrf.mxu1  ;;  %v4267_v32 = vpop.f32.mrf.mxu0  ;;  %4944 = vmatpush1.bf16.msra.mxu0 %v12102_v0  ;;  %4987 = vmatpush1.bf16.msra.mxu1 %v12104_v16 }
 0x62a   :  { %4961 = vmatprep.mubr.bf16.mxu0 %v14256_v15  ;;  %5004 = vmatprep.mubr.bf16.mxu1 %v14256_v15  ;;  %v4358_v19 = vadd.f32 %v10000_v38, %v4257_v40 }
 0x62b   :  { %v4325_v10 = vpop.f32.mrf.mxu1  ;;  %v10016_v29 = vpop.f32.mrf.mxu0  ;;  %5074 = vmatprep.subr.bf16.mxu0 %v11984_v1  ;;  %5117 = vmatprep.subr.bf16.mxu1 %v11986_v48 }
 0x62c   :  { %v4443_v56 = vadd.f32 %v10016_v29, %v4358_v19 }
 0x62d   :  { %v10001_v20 = vpop.f32.mrf.mxu1  ;;  %v4410_v43 = vpop.f32.mrf.mxu0 }
 0x62e   :  { %v4359_v6 = vadd.f32 %v10001_v20, %v4260_v26 }
 0x62f   :  { %v4328_v18 = vpop.f32.mrf.mxu1  ;;  %v10017_v8 = vpop.f32.mrf.mxu0 }
 0x630   :  { %9042 = vmatmul.mubr.msk.bf16.vlgmr.msra.gmra.mxu0 %vm4582_vm4, %v4553_v7  ;;  %9043 = vmatmul.mubr.msk.bf16.vlgmr.msra.gmra.mxu1 %vm4582_vm4, %v4553_v7  ;;  %v4444_v38 = vadd.f32 %v10017_v8, %v4359_v6 }
 0x631   :  { %v12122_v63 = vpop.f32.mrf.mxu1  ;;  %5075 = vmatpush1.bf16.msra.mxu0 %v11988_v39  ;;  %5118 = vmatpush1.bf16.msra.mxu1 %v11990_v61  ;;  %v4413_v1 = vpop.f32.mrf.mxu0  ;;  %v4252_v61 = vadd.f32 %v4251_v35, %v12069_v21  ;;  %v4268_v21 = vadd.f32 %v4267_v32, %v4202_v60 }
 0x632   :  { %5092 = vmatprep.mubr.bf16.mxu0 %v14256_v15  ;;  %5135 = vmatprep.mubr.bf16.mxu1 %v14256_v15 }
 0x633   :  { %v4341_v48 = vpop.f32.mrf.mxu1  ;;  %5163 = vmatprep.subr.bf16.mxu0 %v11996_v9  ;;  %5206 = vmatprep.subr.bf16.mxu1 %v11998_v4  ;;  %v12134_v11 = vpop.f32.mrf.mxu0  ;;  %v4357_v45 = vadd.f32 %v4328_v18, %v4252_v61  ;;  %v4356_v4 = vadd.f32 %v4325_v10, %v4249_v44 }
 0x634   :  { %v4360_v61 = vadd.f32 %v4341_v48, %v4265_v62  ;;  %v12314_v62 = vld [vmem:[%s14003_s10 + $0x40] ss:$16 sps:$4 sm:$0xff]  }
 0x635   :  { %v10005_v54 = vpop.f32.mrf.mxu1  ;;  %v4426_v9 = vpop.f32.mrf.mxu0  ;;  %v4442_v17 = vadd.f32 %v4413_v1, %v4357_v45  ;;  %v4441_v35 = vadd.f32 %v4410_v43, %v4356_v4  ;;  %v12216_v45 = vld [vmem:[%s14003_s10 + $0xc0] ss:$16 sps:$4 sm:$0xff]   ;;  %14265 = vst [vmem:[#allocation65_spill] sm:$0xff] %v12314_v62 }
 0x636   :  { %v4445_v3 = vadd.f32 %v4426_v9, %v4360_v61  ;;  %v12228_v9 = vld [vmem:[%s14003_s10 + $0xa4] ss:$16 sps:$4 sm:$0xff]   ;;  %v12242_v4 = vld [vmem:[%s14003_s10 + $0xa0] ss:$16 sps:$4 sm:$0xff]  }
 0x637   :  { %v4344_v39 = vpop.f32.mrf.mxu1  ;;  %v10021_v7 = vpop.f32.mrf.mxu0  ;;  %v12362_v61 = vld [vmem:[%s14003_s10] ss:$16 sps:$4 sm:$0xff]  }
 0x638   :  { %v4361_v18 = vadd.f32 %v4344_v39, %v4268_v21  ;;  %v12290_v21 = vld [vmem:[%s14003_s10 + $0x60] ss:$16 sps:$4 sm:$0xff]   ;;  %14273 = vst [vmem:[#allocation73_spill] sm:$0xff] %v12362_v61 }
 0x639   :  { %v10032_v5 = vpop.f32.mrf.mxu1  ;;  %v4429_v26 = vpop.f32.mrf.mxu0  ;;  %14261 = vst [vmem:[#allocation61_spill] sm:$0xff] %v12290_v21 }
 0x63a   :  { %v4528_v14 = vadd.f32 %v10032_v5, %v4443_v56  ;;  %v4446_v60 = vadd.f32 %v4429_v26, %v4361_v18  ;;  %v12326_v18 = vld [vmem:[%s14003_s10 + $0x24] ss:$16 sps:$4 sm:$0xff]  }
 0x63b   :  { %v4495_v25 = vpop.f32.mrf.mxu1  ;;  %14267 = vst [vmem:[#allocation67_spill] sm:$0xff] %v12326_v18  ;;  %v12350_v26 = vld [vmem:[%s14003_s10 + $0x4] ss:$16 sps:$4 sm:$0xff]  }
 0x63c   :  { %v4536_v55 = vadd.f32 %v4528_v14, %v12018_v59  ;;  %v4526_v10 = vadd.f32 %v4495_v25, %v4441_v35  ;;  %v12221_v14 = vld [vmem:[%s14003_s10 + $0xc8] ss:$16 sps:$4 sm:$0xff]   ;;  %v12233_v25 = vld [vmem:[%s14003_s10 + $0xac] ss:$16 sps:$4 sm:$0xff]   ;;  %14271 = vst [vmem:[#allocation71_spill] sm:$0xff] %v12350_v26 }
 0x63d   :  { %v10033_v36 = vpop.f32.mrf.mxu1  ;;  %v12295_v35 = vld [vmem:[%s14003_s10 + $0x68] ss:$16 sps:$4 sm:$0xff]  }
 0x63e   :  { %v4529_v46 = vadd.f32 %v10033_v36, %v4444_v38  ;;  %v4544_v19 = vmax.f32 %v4536_v55, 0.0  ;;  %v4534_v32 = vadd.f32 %v4526_v10, %v12031_v33  ;;  %v12247_v38 = vld [vmem:[%s14003_s10 + $0xa8] ss:$16 sps:$4 sm:$0xff]   ;;  %v12254_v36 = vld [vmem:[%s14003_s10 + $0x84] ss:$16 sps:$4 sm:$0xff]   ;;  %14262 = vst [vmem:[#allocation62_spill] sm:$0xff] %v12295_v35 }
 0x63f   :  { %v4498_v40 = vpop.f32.mrf.mxu1  ;;  %v12266_v55 = vld [vmem:[%s14003_s10 + $0x80] ss:$16 sps:$4 sm:$0xff]  }
 0x640   :  { %v4537_v29 = vadd.f32 %v4529_v46, %v12016_v12  ;;  %v4527_v20 = vadd.f32 %v4498_v40, %v4442_v17  ;;  %v4542_v33 = vmax.f32 %v4534_v32, 0.0  ;;  %v12259_v17 = vld [vmem:[%s14003_s10 + $0x8c] ss:$16 sps:$4 sm:$0xff]   ;;  %v12271_v46 = vld [vmem:[%s14003_s10 + $0x88] ss:$16 sps:$4 sm:$0xff]  }
 0x641   :  { %v10036_v37 = vpop.f32.mrf.mxu1  ;;  %v12283_v40 = vld [vmem:[%s14003_s10 + $0x6c] ss:$16 sps:$4 sm:$0xff]   ;;  %v12338_v10 = vld [vmem:[%s14003_s10 + $0x20] ss:$16 sps:$4 sm:$0xff]  }
 0x642   :  { %v4545_v8 = vmax.f32 %v4537_v29, 0.0  ;;  %v4535_v56 = vadd.f32 %v4527_v20, %v12024_v53  ;;  %v4273_v53 = vadd.f32 %v12091_v49, %v12082_v27  ;;  %14260 = vst [vmem:[#allocation60_spill] sm:$0xff] %v12283_v40  ;;  %v12302_v29 = vld [vmem:[%s14003_s10 + $0x44] ss:$16 sps:$4 sm:$0xff]   ;;  %v12307_v20 = vld [vmem:[%s14003_s10 + $0x4c] ss:$16 sps:$4 sm:$0xff]  }
 0x643   :  { %v4511_v1 = vpop.f32.mrf.mxu1  ;;  %14263 = vst [vmem:[#allocation63_spill] sm:$0xff] %v12302_v29  ;;  %14264 = vst [vmem:[#allocation64_spill] sm:$0xff] %v12307_v20 }
 0x644   :  { %v5054_v59 = vpack.c.bf16 %v4545_v8, %v4544_v19  ;;  %v4543_v43 = vmax.f32 %v4535_v56, 0.0  ;;  %v4362_v39 = vadd.f32 %v12122_v63, %v4273_v53  ;;  %v12331_v19 = vld [vmem:[%s14003_s10 + $0x2c] ss:$16 sps:$4 sm:$0xff]   ;;  %14269 = vst [vmem:[#allocation69_spill] sm:$0xff] %v12338_v10  ;;  %v12343_v8 = vld [vmem:[%s14003_s10 + $0x28] ss:$16 sps:$4 sm:$0xff]  }
 0x645   :  { %v10037_v6 = vpop.f32.mrf.mxu1  ;;  %14268 = vst [vmem:[#allocation68_spill] sm:$0xff] %v12331_v19  ;;  %14270 = vst [vmem:[#allocation70_spill] sm:$0xff] %v12343_v8 }
 0x646   :  { %9044 = vmatmul.mubr.msk.bf16.vlgmr.msra.gmra.mxu0 %vm4582_vm4, %v5054_v59  ;;  %9045 = vmatmul.mubr.msk.bf16.vlgmr.msra.gmra.mxu1 %vm4582_vm4, %v5054_v59  ;;  %v5053_v58 = vpack.c.bf16 %v4543_v43, %v4542_v33  ;;  %v12367_v59 = vld [vmem:[%s14003_s10 + $0x8] ss:$16 sps:$4 sm:$0xff]  }
 0x647   :  { %v4514_v12 = vpop.f32.mrf.mxu1  ;;  %5164 = vmatpush1.bf16.msra.mxu0 %v12026_v13  ;;  %5207 = vmatpush1.bf16.msra.mxu1 %v12028_v50  ;;  %v4363_v13 = vadd.f32 %v10005_v54, %v4276_v42  ;;  %v4530_v50 = vadd.f32 %v4511_v1, %v4445_v3  ;;  %v12355_v1 = vld [vmem:[%s14003_s10 + $0xc] ss:$16 sps:$4 sm:$0xff]   ;;  %14274 = vst [vmem:[#allocation74_spill] sm:$0xff] %v12367_v59 }
 0x648   :  { %v4531_v48 = vadd.f32 %v4514_v12, %v4446_v60  ;;  %5181 = vmatprep.mubr.bf16.mxu0 %v14256_v15  ;;  %5224 = vmatprep.mubr.bf16.mxu1 %v14256_v15  ;;  %14272 = vst [vmem:[#allocation72_spill] sm:$0xff] %v12355_v1 }
 0x649   :  { %5252 = vmatprep.subr.bf16.mxu0 %v12033_v41  ;;  %5295 = vmatprep.subr.bf16.mxu1 %v12035_v23  ;;  %v4448_v5 = vadd.f32 %v10021_v7, %v4363_v13  ;;  %v4538_v44 = vadd.f32 %v4530_v50, %v12071_v47  ;;  %v4447_v41 = vadd.f32 %v12134_v11, %v4362_v39  ;;  %v12207_v11 = vld [vmem:[%s14003_s10 + $0xcc] ss:$16 sps:$4 sm:$0xff]   ;;  %v12278_v7 = vld [vmem:[%s14003_s10 + $0x64] ss:$16 sps:$4 sm:$0xff]  }
 0x64a   :  { %v4539_v51 = vadd.f32 %v4531_v48, %v12059_v24  ;;  %14259 = vst [vmem:[#allocation59_spill] sm:$0xff] %v12278_v7 }
 0x64b   :  { %v4533_v23 = vadd.f32 %v10037_v6, %v4448_v5  ;;  %v4532_v24 = vadd.f32 %v10036_v37, %v4447_v41  ;;  %v4546_v47 = vmax.f32 %v4538_v44, 0.0  ;;  %v12319_v37 = vld [vmem:[%s14003_s10 + $0x48] ss:$16 sps:$4 sm:$0xff]  }
 0x64c   :  { %v4547_v27 = vmax.f32 %v4539_v51, 0.0  ;;  %14266 = vst [vmem:[#allocation66_spill] sm:$0xff] %v12319_v37 }
 0x64d   :  { %v4541_v49 = vadd.f32 %v4533_v23, %v12098_v57  ;;  %v4540_v54 = vadd.f32 %v4532_v24, %v12107_v31  ;;  %v12192_v57 = vld [vmem:[%s14003_s10 + $0xe0] ss:$16 sps:$4 sm:$0xff]   ;;  %v12202_v31 = vld [vmem:[%s14003_s10 + $0xc4] ss:$16 sps:$4 sm:$0xff]  }
 0x64e   :  { %9046 = vmatmul.mubr.msk.bf16.vlgmr.msra.gmra.mxu0 %vm4582_vm4, %v5053_v58  ;;  %9047 = vmatmul.mubr.msk.bf16.vlgmr.msra.gmra.mxu1 %vm4582_vm4, %v5053_v58  ;;  %v5055_v63 = vpack.c.bf16 %v4547_v27, %v4546_v47 }
 0x64f   :  { %5253 = vmatpush1.bf16.msra.mxu0 %v12063_v22  ;;  %5296 = vmatpush1.bf16.msra.mxu1 %v12065_v2  ;;  %v12173_v22 = vld [vmem:[%s14003_s10 + $0xe4] ss:$16 sps:$4 sm:$0xff]   ;;  %v12178_v2 = vld [vmem:[%s14003_s10 + $0xec] ss:$16 sps:$4 sm:$0xff]  }
 0x650   :  { %5270 = vmatprep.mubr.bf16.mxu0 %v14256_v15  ;;  %5313 = vmatprep.mubr.bf16.mxu1 %v14256_v15  ;;  %14257 = vst [vmem:[#allocation57_spill] sm:$0xff] %v12173_v22  ;;  %14258 = vst [vmem:[#allocation58_spill] sm:$0xff] %v12178_v2 }
 0x651   :  { %5349 = vmatprep.subr.bf16.mxu0 %v12075_v52  ;;  %5392 = vmatprep.subr.bf16.mxu1 %v12077_v34  ;;  %v4549_v52 = vmax.f32 %v4541_v49, 0.0  ;;  %v4548_v34 = vmax.f32 %v4540_v54, 0.0  ;;  %v5025_v49 = vlaneseq }
 0x656   :  { %9048 = vmatmul.mubr.msk.bf16.vlgmr.msra.gmra.mxu0 %vm4582_vm4, %v5055_v63  ;;  %9049 = vmatmul.mubr.msk.bf16.vlgmr.msra.gmra.mxu1 %vm4582_vm4, %v5055_v63 }
 0x657   :  { %5350 = vmatpush1.bf16.msra.mxu0 %v12102_v0  ;;  %5393 = vmatpush1.bf16.msra.mxu1 %v12104_v16  ;;  %v12197_v0 = vld [vmem:[%s14003_s10 + $0xe8] ss:$16 sps:$4 sm:$0xff]   ;;  %v5056_v16 = vpack.c.bf16 %v4549_v52, %v4548_v34 }
 0x658   :  { %5367 = vmatprep.mubr.bf16.mxu0 %v14256_v15  ;;  %5410 = vmatprep.mubr.bf16.mxu1 %v14256_v15 }
 0x659   :  { %5629 = vmatprep.subr.bf16.mxu0 %v12173_v22  ;;  %5670 = vmatprep.subr.bf16.mxu1 %v12178_v2 }
 0x65e   :  { %9050 = vmatmul.mubr.msk.bf16.vlgmr.msra.gmra.mxu0 %vm4582_vm4, %v5056_v16  ;;  %9051 = vmatmul.mubr.msk.bf16.vlgmr.msra.gmra.mxu1 %vm4582_vm4, %v5056_v16 }
 0x65f   :  { %5630 = vmatpush1.bf16.msra.mxu0 %v12192_v57  ;;  %5671 = vmatpush1.bf16.msra.mxu1 %v12197_v0 }
 0x660   :  { %5631 = vmatprep.subr.bf16.mxu0 %v12202_v31  ;;  %5672 = vmatprep.subr.bf16.mxu1 %v12207_v11 }
 0x661   :  { %5661 = vmatprep.mubr.bf16.mxu0 %v14256_v15  ;;  %5702 = vmatprep.mubr.bf16.mxu1 %v14256_v15 }
 0x663   :  { %5632 = vmatpush1.bf16.msra.mxu0 %v12216_v45  ;;  %5673 = vmatpush1.bf16.msra.mxu1 %v12221_v14 }
 0x664   :  { %5633 = vmatprep.subr.bf16.mxu0 %v12228_v9  ;;  %5674 = vmatprep.subr.bf16.mxu1 %v12233_v25 }
 0x667   :  { %5634 = vmatpush1.bf16.msra.mxu0 %v12242_v4  ;;  %5675 = vmatpush1.bf16.msra.mxu1 %v12247_v38 }
 0x668   :  { %5635 = vmatprep.subr.bf16.mxu0 %v12254_v36  ;;  %5676 = vmatprep.subr.bf16.mxu1 %v12259_v17 }
 0x66b   :  { %5636 = vmatpush1.bf16.msra.mxu0 %v12266_v55  ;;  %5677 = vmatpush1.bf16.msra.mxu1 %v12271_v46 }
 0x66c   :  { %5637 = vmatprep.subr.bf16.mxu0 %v12278_v7  ;;  %5678 = vmatprep.subr.bf16.mxu1 %v12283_v40 }
 0x66f   :  { %5638 = vmatpush1.bf16.msra.mxu0 %v12290_v21  ;;  %5679 = vmatpush1.bf16.msra.mxu1 %v12295_v35 }
 0x670   :  { %5639 = vmatprep.subr.bf16.mxu0 %v12302_v29  ;;  %5680 = vmatprep.subr.bf16.mxu1 %v12307_v20 }
 0x673   :  { %5640 = vmatpush1.bf16.msra.mxu0 %v12314_v62  ;;  %5681 = vmatpush1.bf16.msra.mxu1 %v12319_v37 }
 0x674   :  { %5641 = vmatprep.subr.bf16.mxu0 %v12326_v18  ;;  %5682 = vmatprep.subr.bf16.mxu1 %v12331_v19 }
 0x677   :  { %5642 = vmatpush1.bf16.msra.mxu0 %v12338_v10  ;;  %5683 = vmatpush1.bf16.msra.mxu1 %v12343_v8 }
 0x678   :  { %5643 = vmatprep.subr.bf16.mxu0 %v12350_v26  ;;  %5684 = vmatprep.subr.bf16.mxu1 %v12355_v1 }
 0x67b   :  { %5644 = vmatpush1.bf16.msra.mxu0 %v12362_v61  ;;  %5685 = vmatpush1.bf16.msra.mxu1 %v12367_v59 }
 0x67c   :  { %5742 = vmatprep.subr.bf16.mxu0 %v12173_v22  ;;  %5783 = vmatprep.subr.bf16.mxu1 %v12178_v2 }
 0x67e   :  { %5662 = vmatmul.mubr.bf16.vlgmr.msra.gmra.mxu0 %v14256_v15  ;;  %5703 = vmatmul.mubr.bf16.vlgmr.msra.gmra.mxu1 %v14256_v15 }
 0x67f   :  { %5743 = vmatpush1.bf16.msra.mxu0 %v12192_v57  ;;  %5784 = vmatpush1.bf16.msra.mxu1 %v12197_v0 }
 0x680   :  { %5744 = vmatprep.subr.bf16.mxu0 %v12202_v31  ;;  %5785 = vmatprep.subr.bf16.mxu1 %v12207_v11 }
 0x681   :  { %5774 = vmatprep.mubr.bf16.mxu0 %v14256_v15  ;;  %5815 = vmatprep.mubr.bf16.mxu1 %v14256_v15 }
 0x683   :  { %5745 = vmatpush1.bf16.msra.mxu0 %v12216_v45  ;;  %5786 = vmatpush1.bf16.msra.mxu1 %v12221_v14 }
 0x684   :  { %5746 = vmatprep.subr.bf16.mxu0 %v12228_v9  ;;  %5787 = vmatprep.subr.bf16.mxu1 %v12233_v25 }
 0x687   :  { %5747 = vmatpush1.bf16.msra.mxu0 %v12242_v4  ;;  %5788 = vmatpush1.bf16.msra.mxu1 %v12247_v38 }
 0x688   :  { %5748 = vmatprep.subr.bf16.mxu0 %v12254_v36  ;;  %5789 = vmatprep.subr.bf16.mxu1 %v12259_v17 }
 0x68b   :  { %5749 = vmatpush1.bf16.msra.mxu0 %v12266_v55  ;;  %5790 = vmatpush1.bf16.msra.mxu1 %v12271_v46 }
 0x68c   :  { %5750 = vmatprep.subr.bf16.mxu0 %v12278_v7  ;;  %5791 = vmatprep.subr.bf16.mxu1 %v12283_v40 }
 0x68f   :  { %5751 = vmatpush1.bf16.msra.mxu0 %v12290_v21  ;;  %5792 = vmatpush1.bf16.msra.mxu1 %v12295_v35 }
 0x690   :  { %5752 = vmatprep.subr.bf16.mxu0 %v12302_v29  ;;  %5793 = vmatprep.subr.bf16.mxu1 %v12307_v20 }
 0x693   :  { %5753 = vmatpush1.bf16.msra.mxu0 %v12314_v62  ;;  %5794 = vmatpush1.bf16.msra.mxu1 %v12319_v37 }
 0x694   :  { %5754 = vmatprep.subr.bf16.mxu0 %v12326_v18  ;;  %5795 = vmatprep.subr.bf16.mxu1 %v12331_v19 }
 0x697   :  { %5755 = vmatpush1.bf16.msra.mxu0 %v12338_v10  ;;  %5796 = vmatpush1.bf16.msra.mxu1 %v12343_v8 }
 0x698   :  { %5756 = vmatprep.subr.bf16.mxu0 %v12350_v26  ;;  %5797 = vmatprep.subr.bf16.mxu1 %v12355_v1 }
 0x69b   :  { %5757 = vmatpush1.bf16.msra.mxu0 %v12362_v61  ;;  %5798 = vmatpush1.bf16.msra.mxu1 %v12367_v59 }
 0x69c   :  { %5873 = vmatprep.subr.bf16.mxu0 %v12173_v22  ;;  %5914 = vmatprep.subr.bf16.mxu1 %v12178_v2 }
 0x6d8   :  { %v12411_v56 = vpop.f32.mrf.mxu0  ;;  %v4663_v6 = vpop.f32.mrf.mxu1 }
 0x6da   :  { %v12413_v60 = vpop.f32.mrf.mxu0  ;;  %v12415_v32 = vpop.f32.mrf.mxu1 }
 0x6dc   :  { %v4624_v12 = vpop.f32.mrf.mxu0  ;;  %v4667_v42 = vpop.f32.mrf.mxu1 }
 0x6de   :  { %v4626_v3 = vpop.f32.mrf.mxu0  ;;  %v4669_v43 = vpop.f32.mrf.mxu1 }
 0x6e0   :  { %v12417_v48 = vpop.f32.mrf.mxu0  ;;  %v4772_v53 = vpop.f32.mrf.mxu1 }
 0x6e1   :  { %v12419_v13 = vadd.f32 %v4772_v53, %v4663_v6  ;;  %v12433_v53 = vshrl.u32 %v5025_v49, 7 }
 0x6e2   :  { %v12421_v33 = vpop.f32.mrf.mxu0  ;;  %v12423_v50 = vpop.f32.mrf.mxu1 }
 0x6e3   :  { %14275 = vst [vmem:[#allocation75_spill] sm:$0xff] %v12433_v53 }
 0x6e4   :  { %v4733_v39 = vpop.f32.mrf.mxu0  ;;  %v4776_v58 = vpop.f32.mrf.mxu1 }
 0x6e5   :  { %v4734_v51 = vadd.f32 %v4733_v39, %v4624_v12  ;;  %v4777_v5 = vadd.f32 %v4776_v58, %v4667_v42 }
 0x6e6   :  { %v4735_v44 = vpop.f32.mrf.mxu0  ;;  %v4778_v41 = vpop.f32.mrf.mxu1 }
 0x6e7   :  { %v4736_v23 = vadd.f32 %v4735_v44, %v4626_v3  ;;  %v4779_v27 = vadd.f32 %v4778_v41, %v4669_v43  ;;  %v14056_v44 = vsub.s32 0, %v12433_v53  ;;  %v14055_v41 = vsub.s32 2, %v12433_v53 }
 0x6e8   :  { %v12425_v24 = vpop.f32.mrf.mxu0  ;;  %v12427_v47 = vpop.f32.mrf.mxu1 }
 0x6ea   :  { %v12429_v63 = vpop.f32.mrf.mxu0  ;;  %v12431_v54 = vpop.f32.mrf.mxu1 }
 0x6ec   :  { %v4846_v52 = vpop.f32.mrf.mxu0  ;;  %v4889_v34 = vpop.f32.mrf.mxu1 }
 0x6ed   :  { %v4898_v16 = vadd.f32 %v4846_v52, %v4734_v51  ;;  %v4900_v6 = vadd.f32 %v4889_v34, %v4777_v5  ;;  %v5023_v51 = vld [vmem:[%s14004_s11] sm:$0xf]  ;;  %v14057_v5 = vsub.s32 1, %v12433_v53 }
 0x6ee   :  { %v4848_v12 = vpop.f32.mrf.mxu0  ;;  %v4891_v42 = vpop.f32.mrf.mxu1 }
 0x6ef   :  { %v4899_v39 = vadd.f32 %v4848_v12, %v4736_v23  ;;  %v4901_v3 = vadd.f32 %v4891_v42, %v4779_v27  ;;  %v14064_v23 = vsub.s32 3, %v12433_v53  ;;  %v12452_v12 = vrot.slane %v5023_v51, %v14056_v44 }
 0x6f0   :  { %v12435_v43 = vpop.f32.mrf.mxu0  ;;  %v12437_v58 = vpop.f32.mrf.mxu1  ;;  %v12456_v42 = vrot.slane %v5023_v51, %v14055_v41  ;;  %v12460_v59 = vrot.slane %v5023_v51, %v14057_v5 }
 0x6f1   :  { %v12464_v61 = vrot.slane %v5023_v51, %v14064_v23 }
 0x6f2   :  { %v12441_v28 = vpop.f32.mrf.mxu0  ;;  %v12443_v30 = vpop.f32.mrf.mxu1 }
 0x6f4   :  { %v4967_v27 = vpop.f32.mrf.mxu0  ;;  %v5010_v49 = vpop.f32.mrf.mxu1 }
 0x6f5   :  { %v5019_v52 = vadd.f32 %v4967_v27, %v4898_v16  ;;  %v5021_v34 = vadd.f32 %v5010_v49, %v4900_v6 }
 0x6f6   :  { %v4969_v2 = vpop.f32.mrf.mxu0  ;;  %v5012_v22 = vpop.f32.mrf.mxu1 }
 0x6f7   :  { %v5020_v16 = vadd.f32 %v4969_v2, %v4899_v39  ;;  %v5022_v6 = vadd.f32 %v5012_v22, %v4901_v3  ;;  %v12467_v27 = vadd.f32 %v12452_v12, %v5019_v52  ;;  %v12470_v49 = vadd.f32 %v12456_v42, %v5021_v34 }
 0x6f9   :  { %14276 = vst [vmem:[#allocation76_spill] sm:$0xff] %v12467_v27  ;;  %14277 = vst [vmem:[#allocation77_spill] sm:$0xff] %v12470_v49  ;;  %v12473_v41 = vadd.f32 %v12460_v59, %v5020_v16  ;;  %v12476_v44 = vadd.f32 %v12464_v61, %v5022_v6 }
 0x6fb   :  { %14278 = vst [vmem:[#allocation78_spill] sm:$0xff] %v12473_v41  ;;  %14279 = vst [vmem:[#allocation79_spill] sm:$0xff] %v12476_v44 }
 0x706   :  { %v5094_v5 = vpop.f32.mrf.mxu0  ;;  %v5137_v1 = vpop.f32.mrf.mxu1 }
 0x708   :  { %v5096_v26 = vpop.f32.mrf.mxu0  ;;  %v5139_v53 = vpop.f32.mrf.mxu1 }
 0x70a   :  { %v5098_v51 = vpop.f32.mrf.mxu0  ;;  %v5141_v23 = vpop.f32.mrf.mxu1 }
 0x70c   :  { %v5100_v2 = vpop.f32.mrf.mxu0  ;;  %v5143_v22 = vpop.f32.mrf.mxu1 }
 0x70e   :  { %v5183_v39 = vpop.f32.mrf.mxu0  ;;  %v5226_v3 = vpop.f32.mrf.mxu1 }
 0x70f   :  { %v5184_v52 = vadd.f32 %v5183_v39, %v5094_v5  ;;  %v5227_v27 = vadd.f32 %v5226_v3, %v5137_v1 }
 0x710   :  { %v5185_v34 = vpop.f32.mrf.mxu0  ;;  %v5228_v49 = vpop.f32.mrf.mxu1 }
 0x711   :  { %v5186_v8 = vadd.f32 %v5185_v34, %v5096_v26  ;;  %v5229_v16 = vadd.f32 %v5228_v49, %v5139_v53 }
 0x712   :  { %v5187_v41 = vpop.f32.mrf.mxu0  ;;  %v5230_v10 = vpop.f32.mrf.mxu1 }
 0x713   :  { %v5188_v6 = vadd.f32 %v5187_v41, %v5098_v51  ;;  %v5231_v44 = vadd.f32 %v5230_v10, %v5141_v23 }
 0x714   :  { %v5189_v19 = vpop.f32.mrf.mxu0  ;;  %v5232_v18 = vpop.f32.mrf.mxu1 }
 0x715   :  { %v5190_v37 = vadd.f32 %v5189_v19, %v5100_v2  ;;  %v5233_v62 = vadd.f32 %v5232_v18, %v5143_v22 }
 0x716   :  { %v5272_v20 = vpop.f32.mrf.mxu0  ;;  %v5315_v29 = vpop.f32.mrf.mxu1 }
 0x717   :  { %v5324_v35 = vadd.f32 %v5272_v20, %v5184_v52  ;;  %v5326_v21 = vadd.f32 %v5315_v29, %v5227_v27 }
 0x718   :  { %v5274_v40 = vpop.f32.mrf.mxu0  ;;  %v5317_v7 = vpop.f32.mrf.mxu1 }
 0x719   :  { %v5325_v5 = vadd.f32 %v5274_v40, %v5186_v8  ;;  %v5327_v1 = vadd.f32 %v5317_v7, %v5229_v16 }
 0x71a   :  { %v5276_v39 = vpop.f32.mrf.mxu0  ;;  %v5319_v3 = vpop.f32.mrf.mxu1 }
 0x71b   :  { %v5328_v26 = vadd.f32 %v5276_v39, %v5188_v6  ;;  %v5330_v53 = vadd.f32 %v5319_v3, %v5231_v44 }
 0x71c   :  { %v5278_v49 = vpop.f32.mrf.mxu0  ;;  %v5321_v34 = vpop.f32.mrf.mxu1 }
 0x71d   :  { %v5329_v41 = vadd.f32 %v5278_v49, %v5190_v37  ;;  %v5331_v10 = vadd.f32 %v5321_v34, %v5233_v62  ;;  %v4775_v49 = vadd.f32 %v12423_v50, %v12415_v32  ;;  %v4896_v32 = vadd.f32 %v12427_v47, %v12419_v13 }
 0x71e   :  { %v5369_v23 = vpop.f32.mrf.mxu0  ;;  %v5412_v51 = vpop.f32.mrf.mxu1 }
 0x71f   :  { %v5421_v19 = vadd.f32 %v5369_v23, %v5324_v35  ;;  %v5423_v18 = vadd.f32 %v5412_v51, %v5326_v21 }
 0x720   :  { %v5371_v2 = vpop.f32.mrf.mxu0  ;;  %v5414_v22 = vpop.f32.mrf.mxu1 }
 0x721   :  { %v5422_v20 = vadd.f32 %v5371_v2, %v5325_v5  ;;  %v5424_v29 = vadd.f32 %v5414_v22, %v5327_v1  ;;  %v12479_v27 = vadd.f32 %v5421_v19, %v12452_v12  ;;  %v12482_v7 = vadd.f32 %v5423_v18, %v12456_v42 }
 0x722   :  { %v5373_v40 = vpop.f32.mrf.mxu0  ;;  %v5416_v8 = vpop.f32.mrf.mxu1 }
 0x723   :  { %v5425_v44 = vadd.f32 %v5373_v40, %v5328_v26  ;;  %v5427_v52 = vadd.f32 %v5416_v8, %v5330_v53  ;;  %v12485_v62 = vadd.f32 %v5422_v20, %v12460_v59  ;;  %v12488_v35 = vadd.f32 %v5424_v29, %v12464_v61 }
 0x724   :  { %v5375_v21 = vpop.f32.mrf.mxu0  ;;  %v5418_v37 = vpop.f32.mrf.mxu1  ;;  %v4730_v26 = vadd.f32 %v12417_v48, %v12411_v56  ;;  %v4732_v53 = vadd.f32 %v12421_v33, %v12413_v60 }
 0x725   :  { %v5426_v16 = vadd.f32 %v5375_v21, %v5329_v41  ;;  %v5428_v6 = vadd.f32 %v5418_v37, %v5331_v10  ;;  %v12491_v5 = vadd.f32 %v5425_v44, %v12452_v12  ;;  %v12494_v1 = vadd.f32 %v5427_v52, %v12456_v42 }
 0x726   :  { %v4894_v34 = vadd.f32 %v12425_v24, %v4730_v26  ;;  %v4895_v41 = vadd.f32 %v12429_v63, %v4732_v53  ;;  %v4897_v10 = vadd.f32 %v12431_v54, %v4775_v49 }
 0x727   :  { %14280 = vst [vmem:[#allocation80_spill] sm:$0xff] %v12494_v1  ;;  %v12497_v39 = vadd.f32 %v5426_v16, %v12460_v59  ;;  %v12500_v3 = vadd.f32 %v5428_v6, %v12464_v61 }
 0x728   :  { %v5015_v23 = vadd.f32 %v12435_v43, %v4894_v34  ;;  %v5016_v51 = vadd.f32 %v12441_v28, %v4895_v41  ;;  %v5018_v19 = vadd.f32 %v12443_v30, %v4897_v10  ;;  %v5017_v30 = vadd.f32 %v12437_v58, %v4896_v32 }
 0x729   :  { %14281 = vst [vmem:[#allocation81_spill] sm:$0xff] %v12500_v3 }
 0x72a   :  { %v12515_v56 = vadd.f32 %v12452_v12, %v5015_v23  ;;  %v12521_v50 = vadd.f32 %v12460_v59, %v5016_v51  ;;  %v12524_v24 = vadd.f32 %v12464_v61, %v5018_v19  ;;  %v12530_v59 = vadd.f32 %v12456_v42, %v5017_v30  ;;  %v14285_v30 = vld [vmem:[#allocation61_spill] sm:$0xff] }
 0x73e   :  { %v5663_v48 = vpop.f32.mrf.mxu0  ;;  %v5704_v60 = vpop.f32.mrf.mxu1 }
 0x73f   :  { %v5711_v33 = vadd.f32 %v5663_v48, %v12515_v56  ;;  %v5713_v40 = vadd.f32 %v5704_v60, %v12530_v59 }
 0x740   :  { %v5665_v63 = vpop.f32.mrf.mxu0  ;;  %v5706_v28 = vpop.f32.mrf.mxu1 }
 0x741   :  { %v5715_v54 = vpack.c.bf16 %v5711_v33, %v5711_v33  ;;  %v5712_v43 = vadd.f32 %v5665_v63, %v12521_v50  ;;  %v5714_v12 = vadd.f32 %v5706_v28, %v12524_v24  ;;  %v5717_v58 = vpack.c.bf16 %v5713_v40, %v5713_v40  ;;  %v14283_v63 = vld [vmem:[#allocation59_spill] sm:$0xff]  ;;  %v14284_v28 = vld [vmem:[#allocation60_spill] sm:$0xff]  ;;  %v14297_v40 = vld [vmem:[#allocation73_spill] sm:$0xff] }
 0x742   :  { %v5667_v18 = vpop.f32.mrf.mxu0  ;;  %v5708_v2 = vpop.f32.mrf.mxu1 }
 0x743   :  { %v5719_v13 = vmul.bf16 1056980736, %v5715_v54  ;;  %v5716_v47 = vpack.c.bf16 %v5712_v43, %v5712_v43  ;;  %v5718_v29 = vpack.c.bf16 %v5714_v12, %v5714_v12  ;;  %v5721_v8 = vmul.bf16 1056980736, %v5717_v58  ;;  %v14286_v54 = vld [vmem:[#allocation62_spill] sm:$0xff]  ;;  %v14287_v43 = vld [vmem:[#allocation63_spill] sm:$0xff] }
 0x744   :  { %v5668_v22 = vpop.f32.mrf.mxu0  ;;  %v5709_v20 = vpop.f32.mrf.mxu1  ;;  %v14288_v12 = vld [vmem:[#allocation64_spill] sm:$0xff]  ;;  %v14289_v18 = vld [vmem:[#allocation65_spill] sm:$0xff]  ;;  %v14290_v2 = vld [vmem:[#allocation66_spill] sm:$0xff] }
 0x745   :  { %10230 = vtanh.bf16 %v5719_v13  ;;  %v5720_v61 = vmul.bf16 1056980736, %v5716_v47  ;;  %v14291_v13 = vld [vmem:[#allocation67_spill] sm:$0xff]  ;;  %v14292_v47 = vld [vmem:[#allocation68_spill] sm:$0xff]  ;;  %v14293_v22 = vld [vmem:[#allocation69_spill] sm:$0xff] }
 0x746   :  { %v14294_v20 = vld [vmem:[#allocation70_spill] sm:$0xff] }
 0x747   :  { %10232 = vtanh.bf16 %v5720_v61  ;;  %v14295_v61 = vld [vmem:[#allocation71_spill] sm:$0xff]  ;;  %v14298_v58 = vld [vmem:[#allocation74_spill] sm:$0xff] }
 0x748   :  { %10234 = vtanh.bf16 %v5718_v29  ;;  %v14296_v29 = vld [vmem:[#allocation72_spill] sm:$0xff] }
 0x749   :  { %10236 = vtanh.bf16 %v5721_v8  ;;  %v14299_v8 = vld [vmem:[#allocation57_spill] sm:$0xff] }
 0x753   :  { %v10231_v44 = vpop.eup %10230 }
 0x754   :  { %v5725_v52 = vmul.bf16 1056980736, %v10231_v44  ;;  %v14300_v44 = vld [vmem:[#allocation58_spill] sm:$0xff] }
 0x755   :  { %v10233_v21 = vpop.eup %10232 }
 0x756   :  { %v5728_v37 = vadd.bf16 1056980736, %v5725_v52  ;;  %v5726_v16 = vmul.bf16 1056980736, %v10233_v21  ;;  %v10235_v6 = vpop.eup %10234 }
 0x757   :  { %v5735_v42 = vunpack.c.l.bf16 %v10235_v6  ;;  %v10237_v23 = vpop.eup %10236 }
 0x758   :  { %v5731_v26 = vunpack.c.l.bf16 %v5728_v37  ;;  %v5729_v53 = vadd.bf16 1056980736, %v5726_v16  ;;  %v5727_v51 = vmul.bf16 1056980736, %v10237_v23 }
 0x75a   :  { %v5732_v49 = vunpack.c.l.bf16 %v5729_v53  ;;  %v5737_v41 = vmul.f32 %v5735_v42, %v5731_v26  ;;  %v5730_v19 = vadd.bf16 1056980736, %v5727_v51 }
 0x75c   :  { %v5736_v34 = vmul.f32 0.0, %v5732_v49  ;;  %v5733_v48 = vunpack.c.l.bf16 %v5730_v19 }
 0x75e   :  { %v12533_v10 = vadd.f32 %v5737_v41, %v5736_v34 }
 0x760   :  { %10238 = vtanh.f32 %v12533_v10 }
 0x76d   :  { %v10239_v60 = vpop.eup %10238 }
 0x76e   :  { %v5740_v32 = vmul.f32 %v10239_v60, %v5733_v48 }
 0x770   :  { %v12536_v33 = vpack.c.bf16 %v5740_v32, %v5740_v32 }
 0x772   :  { %14282 = vst [vmem:[#allocation82_spill] sm:$0xff] %v12536_v33  ;;  %5775 = vmatmul.mubr.bf16.vlgmr.msra.gmra.mxu0 %v12536_v33  ;;  %5816 = vmatmul.mubr.bf16.vlgmr.msra.gmra.mxu1 %v12536_v33 }
 0x773   :  { %5874 = vmatpush1.bf16.msra.mxu0 %v12192_v57  ;;  %5915 = vmatpush1.bf16.msra.mxu1 %v12197_v0 }
 0x774   :  { %5875 = vmatprep.subr.bf16.mxu0 %v12202_v31  ;;  %5916 = vmatprep.subr.bf16.mxu1 %v12207_v11 }
 0x775   :  { %5905 = vmatprep.mubr.bf16.mxu0 %v14256_v15  ;;  %5946 = vmatprep.mubr.bf16.mxu1 %v14256_v15 }
 0x777   :  { %5876 = vmatpush1.bf16.msra.mxu0 %v12216_v45  ;;  %5917 = vmatpush1.bf16.msra.mxu1 %v12221_v14 }
 0x778   :  { %5877 = vmatprep.subr.bf16.mxu0 %v12228_v9  ;;  %5918 = vmatprep.subr.bf16.mxu1 %v12233_v25 }
 0x77b   :  { %5878 = vmatpush1.bf16.msra.mxu0 %v12242_v4  ;;  %5919 = vmatpush1.bf16.msra.mxu1 %v12247_v38 }
 0x77c   :  { %5879 = vmatprep.subr.bf16.mxu0 %v12254_v36  ;;  %5920 = vmatprep.subr.bf16.mxu1 %v12259_v17 }
 0x77f   :  { %5880 = vmatpush1.bf16.msra.mxu0 %v12266_v55  ;;  %5921 = vmatpush1.bf16.msra.mxu1 %v12271_v46 }
 0x780   :  { %5881 = vmatprep.subr.bf16.mxu0 %v14283_v63  ;;  %5922 = vmatprep.subr.bf16.mxu1 %v14284_v28 }
 0x783   :  { %5882 = vmatpush1.bf16.msra.mxu0 %v14285_v30  ;;  %5923 = vmatpush1.bf16.msra.mxu1 %v14286_v54 }
 0x784   :  { %5883 = vmatprep.subr.bf16.mxu0 %v14287_v43  ;;  %5924 = vmatprep.subr.bf16.mxu1 %v14288_v12 }
 0x787   :  { %5884 = vmatpush1.bf16.msra.mxu0 %v14289_v18  ;;  %5925 = vmatpush1.bf16.msra.mxu1 %v14290_v2 }
 0x788   :  { %5885 = vmatprep.subr.bf16.mxu0 %v14291_v13  ;;  %5926 = vmatprep.subr.bf16.mxu1 %v14292_v47 }
 0x78b   :  { %5886 = vmatpush1.bf16.msra.mxu0 %v14293_v22  ;;  %5927 = vmatpush1.bf16.msra.mxu1 %v14294_v20 }
 0x78c   :  { %5887 = vmatprep.subr.bf16.mxu0 %v14295_v61  ;;  %5928 = vmatprep.subr.bf16.mxu1 %v14296_v29 }
 0x78f   :  { %5888 = vmatpush1.bf16.msra.mxu0 %v14297_v40  ;;  %5929 = vmatpush1.bf16.msra.mxu1 %v14298_v58 }
 0x790   :  { %5989 = vmatprep.subr.bf16.mxu0 %v14299_v8  ;;  %6030 = vmatprep.subr.bf16.mxu1 %v14300_v44 }
 0x832   :  { %v5776_v52 = vpop.f32.mrf.mxu0  ;;  %v5817_v21 = vpop.f32.mrf.mxu1 }
 0x833   :  { %v5828_v37 = vrot.slane %v5776_v52, 4  ;;  %v5830_v32 = vrot.slane %v5817_v21, 4  ;;  %v5862_v21 = vrot.slane %v12533_v10, 4 }
 0x834   :  { %v5778_v16 = vpop.f32.mrf.mxu0  ;;  %v5819_v6 = vpop.f32.mrf.mxu1 }
 0x835   :  { %v5836_v26 = vadd.f32 %v5828_v37, %v12515_v56  ;;  %v5829_v53 = vrot.slane %v5778_v16, 4  ;;  %v5831_v49 = vrot.slane %v5819_v6, 4  ;;  %v5838_v3 = vadd.f32 %v5830_v32, %v12530_v59 }
 0x836   :  { %v5780_v42 = vpop.f32.mrf.mxu0  ;;  %v5821_v34 = vpop.f32.mrf.mxu1 }
 0x837   :  { %v5840_v41 = vpack.c.bf16 %v5836_v26, %v5836_v26  ;;  %v5837_v23 = vadd.f32 %v5829_v53, %v12521_v50  ;;  %v5839_v51 = vadd.f32 %v5831_v49, %v12524_v24  ;;  %v5842_v56 = vpack.c.bf16 %v5838_v3, %v5838_v3 }
 0x838   :  { %v5781_v19 = vpop.f32.mrf.mxu0  ;;  %v5822_v48 = vpop.f32.mrf.mxu1 }
 0x839   :  { %v5844_v60 = vmul.bf16 1056980736, %v5840_v41  ;;  %v5841_v33 = vpack.c.bf16 %v5837_v23, %v5837_v23  ;;  %v5843_v1 = vpack.c.bf16 %v5839_v51, %v5839_v51  ;;  %v5846_v37 = vmul.bf16 1056980736, %v5842_v56 }
 0x83b   :  { %10240 = vtanh.bf16 %v5844_v60  ;;  %v5845_v52 = vmul.bf16 1056980736, %v5841_v33 }
 0x83d   :  { %10242 = vtanh.bf16 %v5845_v52 }
 0x83e   :  { %10244 = vtanh.bf16 %v5843_v1 }
 0x83f   :  { %10246 = vtanh.bf16 %v5846_v37  ;;  %v14301_v37 = vld [vmem:[#allocation76_spill] sm:$0xff] }
 0x849   :  { %v10241_v16 = vpop.eup %10240 }
 0x84a   :  { %v5850_v6 = vmul.bf16 1056980736, %v10241_v16 }
 0x84b   :  { %v10243_v50 = vpop.eup %10242 }
 0x84c   :  { %v5853_v26 = vadd.bf16 1056980736, %v5850_v6  ;;  %v5851_v24 = vmul.bf16 1056980736, %v10243_v50  ;;  %v10245_v53 = vpop.eup %10244 }
 0x84d   :  { %v5860_v33 = vunpack.c.l.bf16 %v10245_v53  ;;  %v10247_v1 = vpop.eup %10246 }
 0x84e   :  { %v5856_v49 = vunpack.c.l.bf16 %v5853_v26  ;;  %v5854_v42 = vadd.bf16 1056980736, %v5851_v24  ;;  %v5852_v3 = vmul.bf16 1056980736, %v10247_v1  ;;  %v14302_v24 = vld [vmem:[#allocation78_spill] sm:$0xff] }
 0x850   :  { %v5857_v34 = vunpack.c.l.bf16 %v5854_v42  ;;  %v5865_v23 = vmul.f32 %v5860_v33, %v5856_v49  ;;  %v5855_v51 = vadd.bf16 1056980736, %v5852_v3  ;;  %v14303_v49 = vld [vmem:[#allocation79_spill] sm:$0xff] }
 0x852   :  { %v5864_v41 = vmul.f32 %v5862_v21, %v5857_v34  ;;  %v5858_v19 = vunpack.c.l.bf16 %v5855_v51 }
 0x854   :  { %v12579_v59 = vadd.f32 %v5865_v23, %v5864_v41 }
 0x856   :  { %10248 = vtanh.f32 %v12579_v59 }
 0x863   :  { %v10249_v48 = vpop.eup %10248 }
 0x864   :  { %v5868_v60 = vmul.f32 %v10249_v48, %v5858_v19  ;;  %v14304_v19 = vld [vmem:[#allocation77_spill] sm:$0xff] }
 0x866   :  { %v5869_v32 = vpack.c.bf16 %v5868_v60, %v5868_v60 }
 0x868   :  { %v12582_v52 = vrot.slane %v5869_v32, 2 }
 0x86a   :  { %5906 = vmatmul.mubr.bf16.vlgmr.msra.gmra.mxu0 %v12582_v52  ;;  %5947 = vmatmul.mubr.bf16.vlgmr.msra.gmra.mxu1 %v12582_v52 }
 0x86b   :  { %5990 = vmatpush1.bf16.msra.mxu0 %v12192_v57  ;;  %6031 = vmatpush1.bf16.msra.mxu1 %v12197_v0 }
 0x86c   :  { %5991 = vmatprep.subr.bf16.mxu0 %v12202_v31  ;;  %6032 = vmatprep.subr.bf16.mxu1 %v12207_v11 }
 0x86d   :  { %6021 = vmatprep.mubr.bf16.mxu0 %v14256_v15  ;;  %6062 = vmatprep.mubr.bf16.mxu1 %v14256_v15 }
 0x86f   :  { %5992 = vmatpush1.bf16.msra.mxu0 %v12216_v45  ;;  %6033 = vmatpush1.bf16.msra.mxu1 %v12221_v14 }
 0x870   :  { %5993 = vmatprep.subr.bf16.mxu0 %v12228_v9  ;;  %6034 = vmatprep.subr.bf16.mxu1 %v12233_v25 }
 0x873   :  { %5994 = vmatpush1.bf16.msra.mxu0 %v12242_v4  ;;  %6035 = vmatpush1.bf16.msra.mxu1 %v12247_v38 }
 0x874   :  { %5995 = vmatprep.subr.bf16.mxu0 %v12254_v36  ;;  %6036 = vmatprep.subr.bf16.mxu1 %v12259_v17 }
 0x877   :  { %5996 = vmatpush1.bf16.msra.mxu0 %v12266_v55  ;;  %6037 = vmatpush1.bf16.msra.mxu1 %v12271_v46 }
 0x878   :  { %5997 = vmatprep.subr.bf16.mxu0 %v14283_v63  ;;  %6038 = vmatprep.subr.bf16.mxu1 %v14284_v28 }
 0x87b   :  { %5998 = vmatpush1.bf16.msra.mxu0 %v14285_v30  ;;  %6039 = vmatpush1.bf16.msra.mxu1 %v14286_v54 }
 0x87c   :  { %5999 = vmatprep.subr.bf16.mxu0 %v14287_v43  ;;  %6040 = vmatprep.subr.bf16.mxu1 %v14288_v12 }
 0x87f   :  { %6000 = vmatpush1.bf16.msra.mxu0 %v14289_v18  ;;  %6041 = vmatpush1.bf16.msra.mxu1 %v14290_v2 }
 0x880   :  { %6001 = vmatprep.subr.bf16.mxu0 %v14291_v13  ;;  %6042 = vmatprep.subr.bf16.mxu1 %v14292_v47 }
 0x883   :  { %6002 = vmatpush1.bf16.msra.mxu0 %v14293_v22  ;;  %6043 = vmatpush1.bf16.msra.mxu1 %v14294_v20 }
 0x884   :  { %6003 = vmatprep.subr.bf16.mxu0 %v14295_v61  ;;  %6044 = vmatprep.subr.bf16.mxu1 %v14296_v29 }
 0x887   :  { %6004 = vmatpush1.bf16.msra.mxu0 %v14297_v40  ;;  %6045 = vmatpush1.bf16.msra.mxu1 %v14298_v58 }
 0x888   :  { %6120 = vmatprep.subr.bf16.mxu0 %v14299_v8  ;;  %6161 = vmatprep.subr.bf16.mxu1 %v14300_v44 }
 0x92a   :  { %v5907_v10 = vpop.f32.mrf.mxu0  ;;  %v5948_v56 = vpop.f32.mrf.mxu1 }
 0x92b   :  { %v5955_v16 = vadd.f32 %v5907_v10, %v14301_v37  ;;  %v5957_v48 = vadd.f32 %v5948_v56, %v14304_v19 }
 0x92c   :  { %v5909_v6 = vpop.f32.mrf.mxu0  ;;  %v5950_v50 = vpop.f32.mrf.mxu1 }
 0x92d   :  { %v5959_v26 = vpack.c.bf16 %v5955_v16, %v5955_v16  ;;  %v5956_v53 = vadd.f32 %v5909_v6, %v14302_v24  ;;  %v5958_v42 = vadd.f32 %v5950_v50, %v14303_v49  ;;  %v5961_v60 = vpack.c.bf16 %v5957_v48, %v5957_v48 }
 0x92e   :  { %v5911_v21 = vpop.f32.mrf.mxu0  ;;  %v5952_v34 = vpop.f32.mrf.mxu1 }
 0x92f   :  { %v5963_v33 = vmul.bf16 1056980736, %v5959_v26  ;;  %v5960_v41 = vpack.c.bf16 %v5956_v53, %v5956_v53  ;;  %v5962_v51 = vpack.c.bf16 %v5958_v42, %v5958_v42  ;;  %v5965_v32 = vmul.bf16 1056980736, %v5961_v60 }
 0x930   :  { %v5912_v23 = vpop.f32.mrf.mxu0  ;;  %v5953_v1 = vpop.f32.mrf.mxu1 }
 0x931   :  { %10250 = vtanh.bf16 %v5963_v33  ;;  %v5964_v3 = vmul.bf16 1056980736, %v5960_v41  ;;  %v5981_v33 = vrot.slane %v12579_v59, 4 }
 0x933   :  { %10252 = vtanh.bf16 %v5964_v3 }
 0x934   :  { %10254 = vtanh.bf16 %v5962_v51 }
 0x935   :  { %10256 = vtanh.bf16 %v5965_v32 }
 0x93f   :  { %v10251_v10 = vpop.eup %10250 }
 0x940   :  { %v5969_v16 = vmul.bf16 1056980736, %v10251_v10 }
 0x941   :  { %v10253_v6 = vpop.eup %10252 }
 0x942   :  { %v5972_v50 = vadd.bf16 1056980736, %v5969_v16  ;;  %v5970_v21 = vmul.bf16 1056980736, %v10253_v6  ;;  %v10255_v34 = vpop.eup %10254 }
 0x943   :  { %v5979_v41 = vunpack.c.l.bf16 %v10255_v34  ;;  %v10257_v3 = vpop.eup %10256 }
 0x944   :  { %v5975_v26 = vunpack.c.l.bf16 %v5972_v50  ;;  %v5973_v53 = vadd.bf16 1056980736, %v5970_v21  ;;  %v5971_v51 = vmul.bf16 1056980736, %v10257_v3  ;;  %v12707_v3 = vld [vmem:[%s14003_s10 + $0xc0] ss:$16 sps:$4 sm:$0xff]  }
 0x946   :  { %v5976_v23 = vunpack.c.l.bf16 %v5973_v53  ;;  %v5984_v1 = vmul.f32 %v5979_v41, %v5975_v26  ;;  %v5974_v48 = vadd.bf16 1056980736, %v5971_v51  ;;  %v12681_v41 = vld [vmem:[%s14003_s10 + $0xe0] ss:$16 sps:$4 sm:$0xff]   ;;  %v12713_v51 = vld [vmem:[%s14003_s10 + $0xc8] ss:$16 sps:$4 sm:$0xff]  }
 0x948   :  { %v5983_v42 = vmul.f32 %v5981_v33, %v5976_v23  ;;  %v5977_v60 = vunpack.c.l.bf16 %v5974_v48  ;;  %v12719_v48 = vld [vmem:[%s14003_s10 + $0xa4] ss:$16 sps:$4 sm:$0xff]  }
 0x94a   :  { %v12625_v56 = vadd.f32 %v5984_v1, %v5983_v42  ;;  %v12687_v42 = vld [vmem:[%s14003_s10 + $0xe8] ss:$16 sps:$4 sm:$0xff]   ;;  %v12693_v1 = vld [vmem:[%s14003_s10 + $0xc4] ss:$16 sps:$4 sm:$0xff]  }
 0x94c   :  { %10258 = vtanh.f32 %v12625_v56 }
 0x959   :  { %v10259_v32 = vpop.eup %10258 }
 0x95a   :  { %v5987_v10 = vmul.f32 %v10259_v32, %v5977_v60  ;;  %v12725_v60 = vld [vmem:[%s14003_s10 + $0xac] ss:$16 sps:$4 sm:$0xff]   ;;  %v12731_v32 = vld [vmem:[%s14003_s10 + $0xa0] ss:$16 sps:$4 sm:$0xff]  }
 0x95c   :  { %v12628_v16 = vpack.c.bf16 %v5987_v10, %v5987_v10  ;;  %v12737_v10 = vld [vmem:[%s14003_s10 + $0xa8] ss:$16 sps:$4 sm:$0xff]  }
 0x95e   :  { %14305 = vst [vmem:[#allocation59_spill] sm:$0xff] %v12628_v16  ;;  %6022 = vmatmul.mubr.bf16.vlgmr.msra.gmra.mxu0 %v12628_v16  ;;  %6063 = vmatmul.mubr.bf16.vlgmr.msra.gmra.mxu1 %v12628_v16 }
 0x95f   :  { %6121 = vmatpush1.bf16.msra.mxu0 %v12192_v57  ;;  %6162 = vmatpush1.bf16.msra.mxu1 %v12197_v0 }
 0x960   :  { %6122 = vmatprep.subr.bf16.mxu0 %v12202_v31  ;;  %6163 = vmatprep.subr.bf16.mxu1 %v12207_v11 }
 0x961   :  { %6152 = vmatprep.mubr.bf16.mxu0 %v14256_v15  ;;  %6193 = vmatprep.mubr.bf16.mxu1 %v14256_v15 }
 0x963   :  { %6123 = vmatpush1.bf16.msra.mxu0 %v12216_v45  ;;  %6164 = vmatpush1.bf16.msra.mxu1 %v12221_v14 }
 0x964   :  { %6124 = vmatprep.subr.bf16.mxu0 %v12228_v9  ;;  %6165 = vmatprep.subr.bf16.mxu1 %v12233_v25 }
 0x967   :  { %6125 = vmatpush1.bf16.msra.mxu0 %v12242_v4  ;;  %6166 = vmatpush1.bf16.msra.mxu1 %v12247_v38 }
 0x968   :  { %6126 = vmatprep.subr.bf16.mxu0 %v12254_v36  ;;  %6167 = vmatprep.subr.bf16.mxu1 %v12259_v17 }
 0x96b   :  { %6127 = vmatpush1.bf16.msra.mxu0 %v12266_v55  ;;  %6168 = vmatpush1.bf16.msra.mxu1 %v12271_v46 }
 0x96c   :  { %6128 = vmatprep.subr.bf16.mxu0 %v14283_v63  ;;  %6169 = vmatprep.subr.bf16.mxu1 %v14284_v28 }
 0x96f   :  { %6129 = vmatpush1.bf16.msra.mxu0 %v14285_v30  ;;  %6170 = vmatpush1.bf16.msra.mxu1 %v14286_v54 }
 0x970   :  { %6130 = vmatprep.subr.bf16.mxu0 %v14287_v43  ;;  %6171 = vmatprep.subr.bf16.mxu1 %v14288_v12 }
 0x973   :  { %6131 = vmatpush1.bf16.msra.mxu0 %v14289_v18  ;;  %6172 = vmatpush1.bf16.msra.mxu1 %v14290_v2 }
 0x974   :  { %6132 = vmatprep.subr.bf16.mxu0 %v14291_v13  ;;  %6173 = vmatprep.subr.bf16.mxu1 %v14292_v47 }
 0x977   :  { %6133 = vmatpush1.bf16.msra.mxu0 %v14293_v22  ;;  %6174 = vmatpush1.bf16.msra.mxu1 %v14294_v20 }
 0x978   :  { %6134 = vmatprep.subr.bf16.mxu0 %v14295_v61  ;;  %6175 = vmatprep.subr.bf16.mxu1 %v14296_v29 }
 0x97b   :  { %6135 = vmatpush1.bf16.msra.mxu0 %v14297_v40  ;;  %6176 = vmatpush1.bf16.msra.mxu1 %v14298_v58 }
 0x97c   :  { %6236 = vmatprep.subr.bf16.mxu0 %v14299_v8  ;;  %6277 = vmatprep.subr.bf16.mxu1 %v14300_v44  ;;  %v6109_v44 = vrot.slane %v12625_v56, 4  ;;  %v12699_v56 = vld [vmem:[%s14003_s10 + $0xcc] ss:$16 sps:$4 sm:$0xff]  }
 0xa1e   :  { %v6023_v57 = vpop.f32.mrf.mxu0  ;;  %v6064_v0 = vpop.f32.mrf.mxu1 }
 0xa1f   :  { %v6075_v31 = vrot.slane %v6023_v57, 4  ;;  %v6077_v30 = vrot.slane %v6064_v0, 4  ;;  %v12743_v57 = vld [vmem:[%s14003_s10 + $0x84] ss:$16 sps:$4 sm:$0xff]   ;;  %v12749_v0 = vld [vmem:[%s14003_s10 + $0x8c] ss:$16 sps:$4 sm:$0xff]  }
 0xa20   :  { %v6025_v11 = vpop.f32.mrf.mxu0  ;;  %v6066_v45 = vpop.f32.mrf.mxu1 }
 0xa21   :  { %v6083_v14 = vadd.f32 %v6075_v31, %v14301_v37  ;;  %v6076_v9 = vrot.slane %v6025_v11, 4  ;;  %v6078_v25 = vrot.slane %v6066_v45, 4  ;;  %v6085_v18 = vadd.f32 %v6077_v30, %v14304_v19  ;;  %v12755_v31 = vld [vmem:[%s14003_s10 + $0x80] ss:$16 sps:$4 sm:$0xff]   ;;  %v12761_v11 = vld [vmem:[%s14003_s10 + $0x88] ss:$16 sps:$4 sm:$0xff]  }
 0xa22   :  { %v6027_v4 = vpop.f32.mrf.mxu0  ;;  %v6068_v38 = vpop.f32.mrf.mxu1  ;;  %v12767_v45 = vld [vmem:[%s14003_s10 + $0x64] ss:$16 sps:$4 sm:$0xff]  }
 0xa23   :  { %v6087_v36 = vpack.c.bf16 %v6083_v14, %v6083_v14  ;;  %v6084_v17 = vadd.f32 %v6076_v9, %v14302_v24  ;;  %v6086_v55 = vadd.f32 %v6078_v25, %v14303_v49  ;;  %v6089_v2 = vpack.c.bf16 %v6085_v18, %v6085_v18  ;;  %v12773_v14 = vld [vmem:[%s14003_s10 + $0x6c] ss:$16 sps:$4 sm:$0xff]   ;;  %v12779_v9 = vld [vmem:[%s14003_s10 + $0x60] ss:$16 sps:$4 sm:$0xff]   ;;  %v12785_v25 = vld [vmem:[%s14003_s10 + $0x68] ss:$16 sps:$4 sm:$0xff]  }
 0xa24   :  { %v6028_v46 = vpop.f32.mrf.mxu0  ;;  %v6069_v63 = vpop.f32.mrf.mxu1  ;;  %v12791_v4 = vld [vmem:[%s14003_s10 + $0x44] ss:$16 sps:$4 sm:$0xff]   ;;  %v12797_v38 = vld [vmem:[%s14003_s10 + $0x4c] ss:$16 sps:$4 sm:$0xff]  }
 0xa25   :  { %v6091_v28 = vmul.bf16 1056980736, %v6087_v36  ;;  %v6088_v54 = vpack.c.bf16 %v6084_v17, %v6084_v17  ;;  %v6090_v12 = vpack.c.bf16 %v6086_v55, %v6086_v55  ;;  %v6093_v13 = vmul.bf16 1056980736, %v6089_v2  ;;  %v12803_v36 = vld [vmem:[%s14003_s10 + $0x40] ss:$16 sps:$4 sm:$0xff]  }
 0xa26   :  { %v12809_v17 = vld [vmem:[%s14003_s10 + $0x48] ss:$16 sps:$4 sm:$0xff]   ;;  %v12815_v55 = vld [vmem:[%s14003_s10 + $0x24] ss:$16 sps:$4 sm:$0xff]   ;;  %v12821_v46 = vld [vmem:[%s14003_s10 + $0x2c] ss:$16 sps:$4 sm:$0xff]  }
 0xa27   :  { %10260 = vtanh.bf16 %v6091_v28  ;;  %v6092_v43 = vmul.bf16 1056980736, %v6088_v54  ;;  %v12827_v63 = vld [vmem:[%s14003_s10 + $0x20] ss:$16 sps:$4 sm:$0xff]   ;;  %v12833_v28 = vld [vmem:[%s14003_s10 + $0x28] ss:$16 sps:$4 sm:$0xff]  }
 0xa28   :  { %v12839_v30 = vld [vmem:[%s14003_s10 + $0x4] ss:$16 sps:$4 sm:$0xff]   ;;  %v12845_v54 = vld [vmem:[%s14003_s10 + $0xc] ss:$16 sps:$4 sm:$0xff]  }
 0xa29   :  { %10262 = vtanh.bf16 %v6092_v43  ;;  %v12851_v43 = vld [vmem:[%s14003_s10] ss:$16 sps:$4 sm:$0xff]   ;;  %v12863_v18 = vld [vmem:[%s14003_s10 + $0xe4] ss:$16 sps:$4 sm:$0xff]   ;;  %v12869_v2 = vld [vmem:[%s14003_s10 + $0xec] ss:$16 sps:$4 sm:$0xff]  }
 0xa2a   :  { %10264 = vtanh.bf16 %v6090_v12  ;;  %v12857_v12 = vld [vmem:[%s14003_s10 + $0x8] ss:$16 sps:$4 sm:$0xff]   ;;  %s10656_s10 = smov [#allocation3]  }
 0xa2b   :  { %10266 = vtanh.bf16 %v6093_v13  ;;  %s223_s0 = sshll.u32 %s10656_s10, 4  ;;  %s224_s0 = int_to_ptr.vmem [resolvable:$true] %s223_s0 }
 0xa2c   :  { %s10598_s6 = scalar_lea.vmem %s224_s0, 4096  ;;  %p10603_p7 = scmp.lt.s32.totalorder %s224_s0, %s224_s0 }
 0xa2d   :  { %p10599_p6 = scmp.ne.s32.totalorder %s224_s0, %s10598_s6  ;;  %p10604_p8 = scmp.lt.s32.totalorder %s10598_s6, %s10598_s6 }
 0xa2f   :  { %p10605_p9 = por %p10604_p8, %p10603_p7 }
 0xa31   :  { %p10606_p10 = pnand %p10605_p9, %p10599_p6 }
 0xa35   :  { %v10261_v47 = vpop.eup %10260 }
 0xa36   :  { %v6097_v22 = vmul.bf16 1056980736, %v10261_v47 }
 0xa37   :  { %v10263_v20 = vpop.eup %10262 }
 0xa38   :  { %v6100_v61 = vadd.bf16 1056980736, %v6097_v22  ;;  %v6098_v29 = vmul.bf16 1056980736, %v10263_v20  ;;  %v10265_v40 = vpop.eup %10264 }
 0xa39   :  { %v6107_v37 = vunpack.c.l.bf16 %v10265_v40  ;;  %v10267_v6 = vpop.eup %10266 }
 0xa3a   :  { %v6103_v58 = vunpack.c.l.bf16 %v6100_v61  ;;  %v6101_v8 = vadd.bf16 1056980736, %v6098_v29  ;;  %v6099_v50 = vmul.bf16 1056980736, %v10267_v6 }
 0xa3c   :  { %v6104_v59 = vunpack.c.l.bf16 %v6101_v8  ;;  %v6112_v49 = vmul.f32 %v6107_v37, %v6103_v58  ;;  %v6102_v21 = vadd.bf16 1056980736, %v6099_v50 }
 0xa3e   :  { %v6111_v24 = vmul.f32 %v6109_v44, %v6104_v59  ;;  %v6105_v34 = vunpack.c.l.bf16 %v6102_v21 }
 0xa40   :  { %v12671_v19 = vadd.f32 %v6112_v49, %v6111_v24 }
 0xa42   :  { %10268 = vtanh.f32 %v12671_v19 }
 0xa4f   :  { %v10269_v26 = vpop.eup %10268 }
 0xa50   :  { %v6115_v53 = vmul.f32 %v10269_v26, %v6105_v34 }
 0xa52   :  { %v6116_v23 = vpack.c.bf16 %v6115_v53, %v6115_v53 }
 0xa54   :  { %v12674_v33 = vrot.slane %v6116_v23, 2 }
 0xa56   :  { %14306 = vst [vmem:[#allocation60_spill] sm:$0xff] %v12674_v33  ;;  %6153 = vmatmul.mubr.bf16.vlgmr.msra.gmra.mxu0 %v12674_v33  ;;  %6194 = vmatmul.mubr.bf16.vlgmr.msra.gmra.mxu1 %v12674_v33 }
 0xa57   :  { %6237 = vmatpush1.bf16.msra.mxu0 %v12681_v41  ;;  %6278 = vmatpush1.bf16.msra.mxu1 %v12687_v42 }
 0xa58   :  { %6238 = vmatprep.subr.bf16.mxu0 %v12693_v1  ;;  %6279 = vmatprep.subr.bf16.mxu1 %v12699_v56 }
 0xa59   :  { %6268 = vmatprep.mubr.bf16.mxu0 %v14256_v15  ;;  %6309 = vmatprep.mubr.bf16.mxu1 %v14256_v15 }
 0xa5b   :  { %6239 = vmatpush1.bf16.msra.mxu0 %v12707_v3  ;;  %6280 = vmatpush1.bf16.msra.mxu1 %v12713_v51 }
 0xa5c   :  { %6240 = vmatprep.subr.bf16.mxu0 %v12719_v48  ;;  %6281 = vmatprep.subr.bf16.mxu1 %v12725_v60 }
 0xa5f   :  { %6241 = vmatpush1.bf16.msra.mxu0 %v12731_v32  ;;  %6282 = vmatpush1.bf16.msra.mxu1 %v12737_v10 }
 0xa60   :  { %6242 = vmatprep.subr.bf16.mxu0 %v12743_v57  ;;  %6283 = vmatprep.subr.bf16.mxu1 %v12749_v0 }
 0xa63   :  { %6243 = vmatpush1.bf16.msra.mxu0 %v12755_v31  ;;  %6284 = vmatpush1.bf16.msra.mxu1 %v12761_v11 }
 0xa64   :  { %6244 = vmatprep.subr.bf16.mxu0 %v12767_v45  ;;  %6285 = vmatprep.subr.bf16.mxu1 %v12773_v14 }
 0xa67   :  { %6245 = vmatpush1.bf16.msra.mxu0 %v12779_v9  ;;  %6286 = vmatpush1.bf16.msra.mxu1 %v12785_v25 }
 0xa68   :  { %6246 = vmatprep.subr.bf16.mxu0 %v12791_v4  ;;  %6287 = vmatprep.subr.bf16.mxu1 %v12797_v38 }
 0xa6b   :  { %6247 = vmatpush1.bf16.msra.mxu0 %v12803_v36  ;;  %6288 = vmatpush1.bf16.msra.mxu1 %v12809_v17 }
 0xa6c   :  { %6248 = vmatprep.subr.bf16.mxu0 %v12815_v55  ;;  %6289 = vmatprep.subr.bf16.mxu1 %v12821_v46 }
 0xa6f   :  { %6249 = vmatpush1.bf16.msra.mxu0 %v12827_v63  ;;  %6290 = vmatpush1.bf16.msra.mxu1 %v12833_v28 }
 0xa70   :  { %6250 = vmatprep.subr.bf16.mxu0 %v12839_v30  ;;  %6291 = vmatprep.subr.bf16.mxu1 %v12845_v54 }
 0xa73   :  { %6251 = vmatpush1.bf16.msra.mxu0 %v12851_v43  ;;  %6292 = vmatpush1.bf16.msra.mxu1 %v12857_v12 }
 0xa74   :  { %6367 = vmatprep.subr.bf16.mxu0 %v12863_v18  ;;  %6408 = vmatprep.subr.bf16.mxu1 %v12869_v2 }
 0xb16   :  { %v6154_v13 = vpop.f32.mrf.mxu0  ;;  %v6195_v47 = vpop.f32.mrf.mxu1 }
 0xb17   :  { %v6202_v22 = vadd.f32 %v6154_v13, %v12479_v27  ;;  %v6204_v21 = vadd.f32 %v6195_v47, %v12482_v7 }
 0xb18   :  { %v6156_v20 = vpop.f32.mrf.mxu0  ;;  %v6197_v61 = vpop.f32.mrf.mxu1 }
 0xb19   :  { %v6206_v29 = vpack.c.bf16 %v6202_v22, %v6202_v22  ;;  %v6203_v40 = vadd.f32 %v6156_v20, %v12485_v62  ;;  %v6205_v58 = vadd.f32 %v6197_v61, %v12488_v35  ;;  %v6208_v34 = vpack.c.bf16 %v6204_v21, %v6204_v21 }
 0xb1a   :  { %v6158_v8 = vpop.f32.mrf.mxu0  ;;  %v6199_v44 = vpop.f32.mrf.mxu1 }
 0xb1b   :  { %v6210_v59 = vmul.bf16 1056980736, %v6206_v29  ;;  %v6207_v37 = vpack.c.bf16 %v6203_v40, %v6203_v40  ;;  %v6209_v50 = vpack.c.bf16 %v6205_v58, %v6205_v58  ;;  %v6212_v26 = vmul.bf16 1056980736, %v6208_v34 }
 0xb1c   :  { %v6159_v24 = vpop.f32.mrf.mxu0  ;;  %v6200_v49 = vpop.f32.mrf.mxu1  ;;  %v6228_v44 = vrot.slane %v12671_v19, 4 }
 0xb1d   :  { %10270 = vtanh.bf16 %v6210_v59  ;;  %v6211_v6 = vmul.bf16 1056980736, %v6207_v37 }
 0xb1f   :  { %10272 = vtanh.bf16 %v6211_v6 }
 0xb20   :  { %10274 = vtanh.bf16 %v6209_v50 }
 0xb21   :  { %10276 = vtanh.bf16 %v6212_v26 }
 0xb2b   :  { %v10271_v53 = vpop.eup %10270 }
 0xb2c   :  { %v6216_v23 = vmul.bf16 1056980736, %v10271_v53 }
 0xb2d   :  { %v10273_v13 = vpop.eup %10272 }
 0xb2e   :  { %v6219_v22 = vadd.bf16 1056980736, %v6216_v23  ;;  %v6217_v20 = vmul.bf16 1056980736, %v10273_v13  ;;  %v10275_v61 = vpop.eup %10274 }
 0xb2f   :  { %v6226_v59 = vunpack.c.l.bf16 %v10275_v61  ;;  %v10277_v24 = vpop.eup %10276 }
 0xb30   :  { %v6222_v29 = vunpack.c.l.bf16 %v6219_v22  ;;  %v6220_v40 = vadd.bf16 1056980736, %v6217_v20  ;;  %v6218_v49 = vmul.bf16 1056980736, %v10277_v24 }
 0xb32   :  { %v6223_v8 = vunpack.c.l.bf16 %v6220_v40  ;;  %v6231_v37 = vmul.f32 %v6226_v59, %v6222_v29  ;;  %v6221_v6 = vadd.bf16 1056980736, %v6218_v49 }
 0xb34   :  { %v6230_v58 = vmul.f32 %v6228_v44, %v6223_v8  ;;  %v6224_v50 = vunpack.c.l.bf16 %v6221_v6 }
 0xb36   :  { %v12877_v47 = vadd.f32 %v6231_v37, %v6230_v58 }
 0xb38   :  { %10278 = vtanh.f32 %v12877_v47 }
 0xb45   :  { %v10279_v21 = vpop.eup %10278 }
 0xb46   :  { %v6234_v34 = vmul.f32 %v10279_v21, %v6224_v50 }
 0xb48   :  { %v12880_v26 = vpack.c.bf16 %v6234_v34, %v6234_v34 }
 0xb4a   :  { %14307 = vst [vmem:[#allocation61_spill] sm:$0xff] %v12880_v26  ;;  %6269 = vmatmul.mubr.bf16.vlgmr.msra.gmra.mxu0 %v12880_v26  ;;  %6310 = vmatmul.mubr.bf16.vlgmr.msra.gmra.mxu1 %v12880_v26 }
 0xb4b   :  { %6368 = vmatpush1.bf16.msra.mxu0 %v12681_v41  ;;  %6409 = vmatpush1.bf16.msra.mxu1 %v12687_v42 }
 0xb4c   :  { %6369 = vmatprep.subr.bf16.mxu0 %v12693_v1  ;;  %6410 = vmatprep.subr.bf16.mxu1 %v12699_v56 }
 0xb4d   :  { %6399 = vmatprep.mubr.bf16.mxu0 %v14256_v15  ;;  %6440 = vmatprep.mubr.bf16.mxu1 %v14256_v15 }
 0xb4f   :  { %6370 = vmatpush1.bf16.msra.mxu0 %v12707_v3  ;;  %6411 = vmatpush1.bf16.msra.mxu1 %v12713_v51 }
 0xb50   :  { %6371 = vmatprep.subr.bf16.mxu0 %v12719_v48  ;;  %6412 = vmatprep.subr.bf16.mxu1 %v12725_v60 }
 0xb53   :  { %6372 = vmatpush1.bf16.msra.mxu0 %v12731_v32  ;;  %6413 = vmatpush1.bf16.msra.mxu1 %v12737_v10 }
 0xb54   :  { %6373 = vmatprep.subr.bf16.mxu0 %v12743_v57  ;;  %6414 = vmatprep.subr.bf16.mxu1 %v12749_v0 }
 0xb57   :  { %6374 = vmatpush1.bf16.msra.mxu0 %v12755_v31  ;;  %6415 = vmatpush1.bf16.msra.mxu1 %v12761_v11 }
 0xb58   :  { %6375 = vmatprep.subr.bf16.mxu0 %v12767_v45  ;;  %6416 = vmatprep.subr.bf16.mxu1 %v12773_v14 }
 0xb5b   :  { %6376 = vmatpush1.bf16.msra.mxu0 %v12779_v9  ;;  %6417 = vmatpush1.bf16.msra.mxu1 %v12785_v25 }
 0xb5c   :  { %6377 = vmatprep.subr.bf16.mxu0 %v12791_v4  ;;  %6418 = vmatprep.subr.bf16.mxu1 %v12797_v38 }
 0xb5f   :  { %6378 = vmatpush1.bf16.msra.mxu0 %v12803_v36  ;;  %6419 = vmatpush1.bf16.msra.mxu1 %v12809_v17 }
 0xb60   :  { %6379 = vmatprep.subr.bf16.mxu0 %v12815_v55  ;;  %6420 = vmatprep.subr.bf16.mxu1 %v12821_v46 }
 0xb63   :  { %6380 = vmatpush1.bf16.msra.mxu0 %v12827_v63  ;;  %6421 = vmatpush1.bf16.msra.mxu1 %v12833_v28 }
 0xb64   :  { %6381 = vmatprep.subr.bf16.mxu0 %v12839_v30  ;;  %6422 = vmatprep.subr.bf16.mxu1 %v12845_v54 }
 0xb67   :  { %6382 = vmatpush1.bf16.msra.mxu0 %v12851_v43  ;;  %6423 = vmatpush1.bf16.msra.mxu1 %v12857_v12 }
 0xb68   :  { %6483 = vmatprep.subr.bf16.mxu0 %v12863_v18  ;;  %6524 = vmatprep.subr.bf16.mxu1 %v12869_v2 }
 0xc0a   :  { %v6270_v19 = vpop.f32.mrf.mxu0  ;;  %v6311_v53 = vpop.f32.mrf.mxu1 }
 0xc0b   :  { %v6322_v23 = vrot.slane %v6270_v19, 4  ;;  %v6324_v2 = vrot.slane %v6311_v53, 4  ;;  %v6356_v53 = vrot.slane %v12877_v47, 4 }
 0xc0c   :  { %v6272_v13 = vpop.f32.mrf.mxu0  ;;  %v6313_v22 = vpop.f32.mrf.mxu1 }
 0xc0d   :  { %v6330_v20 = vadd.f32 %v6322_v23, %v12479_v27  ;;  %v6323_v61 = vrot.slane %v6272_v13, 4  ;;  %v6325_v29 = vrot.slane %v6313_v22, 4  ;;  %v6332_v21 = vadd.f32 %v6324_v2, %v12482_v7 }
 0xc0e   :  { %v6274_v40 = vpop.f32.mrf.mxu0  ;;  %v6315_v8 = vpop.f32.mrf.mxu1 }
 0xc0f   :  { %v6334_v44 = vpack.c.bf16 %v6330_v20, %v6330_v20  ;;  %v6331_v59 = vadd.f32 %v6323_v61, %v12485_v62  ;;  %v6333_v58 = vadd.f32 %v6325_v29, %v12488_v35  ;;  %v6336_v27 = vpack.c.bf16 %v6332_v21, %v6332_v21 }
 0xc10   :  { %v6275_v37 = vpop.f32.mrf.mxu0  ;;  %v6316_v18 = vpop.f32.mrf.mxu1 }
 0xc11   :  { %v6338_v24 = vmul.bf16 1056980736, %v6334_v44  ;;  %v6335_v49 = vpack.c.bf16 %v6331_v59, %v6331_v59  ;;  %v6337_v50 = vpack.c.bf16 %v6333_v58, %v6333_v58  ;;  %v6340_v34 = vmul.bf16 1056980736, %v6336_v27 }
 0xc13   :  { %10280 = vtanh.bf16 %v6338_v24  ;;  %v6339_v6 = vmul.bf16 1056980736, %v6335_v49 }
 0xc15   :  { %10282 = vtanh.bf16 %v6339_v6 }
 0xc16   :  { %10284 = vtanh.bf16 %v6337_v50 }
 0xc17   :  { %10286 = vtanh.bf16 %v6340_v34 }
 0xc21   :  { %v10281_v19 = vpop.eup %10280 }
 0xc22   :  { %v6344_v23 = vmul.bf16 1056980736, %v10281_v19 }
 0xc23   :  { %v10283_v62 = vpop.eup %10282 }
 0xc24   :  { %v6347_v13 = vadd.bf16 1056980736, %v6344_v23  ;;  %v6345_v35 = vmul.bf16 1056980736, %v10283_v62  ;;  %v10285_v22 = vpop.eup %10284 }
 0xc25   :  { %v6354_v40 = vunpack.c.l.bf16 %v10285_v22  ;;  %v10287_v59 = vpop.eup %10286 }
 0xc26   :  { %v6350_v20 = vunpack.c.l.bf16 %v6347_v13  ;;  %v6348_v61 = vadd.bf16 1056980736, %v6345_v35  ;;  %v6346_v58 = vmul.bf16 1056980736, %v10287_v59 }
 0xc28   :  { %v6351_v29 = vunpack.c.l.bf16 %v6348_v61  ;;  %v6359_v44 = vmul.f32 %v6354_v40, %v6350_v20  ;;  %v6349_v37 = vadd.bf16 1056980736, %v6346_v58 }
 0xc2a   :  { %v6358_v8 = vmul.f32 %v6356_v53, %v6351_v29  ;;  %v6352_v18 = vunpack.c.l.bf16 %v6349_v37 }
 0xc2c   :  { %v12923_v7 = vadd.f32 %v6359_v44, %v6358_v8 }
 0xc2e   :  { %10288 = vtanh.f32 %v12923_v7  ;;  %v6475_v47 = vrot.slane %v12923_v7, 4 }
 0xc3b   :  { %v10289_v24 = vpop.eup %10288 }
 0xc3c   :  { %v6362_v2 = vmul.f32 %v10289_v24, %v6352_v18 }
 0xc3e   :  { %v6363_v49 = vpack.c.bf16 %v6362_v2, %v6362_v2 }
 0xc40   :  { %v12926_v6 = vrot.slane %v6363_v49, 2 }
 0xc42   :  { %14308 = vst [vmem:[#allocation62_spill] sm:$0xff] %v12926_v6  ;;  %6400 = vmatmul.mubr.bf16.vlgmr.msra.gmra.mxu0 %v12926_v6  ;;  %6441 = vmatmul.mubr.bf16.vlgmr.msra.gmra.mxu1 %v12926_v6 }
 0xc43   :  { %6484 = vmatpush1.bf16.msra.mxu0 %v12681_v41  ;;  %6525 = vmatpush1.bf16.msra.mxu1 %v12687_v42 }
 0xc44   :  { %6485 = vmatprep.subr.bf16.mxu0 %v12693_v1  ;;  %6526 = vmatprep.subr.bf16.mxu1 %v12699_v56 }
 0xc45   :  { %6515 = vmatprep.mubr.bf16.mxu0 %v14256_v15  ;;  %6556 = vmatprep.mubr.bf16.mxu1 %v14256_v15 }
 0xc47   :  { %6486 = vmatpush1.bf16.msra.mxu0 %v12707_v3  ;;  %6527 = vmatpush1.bf16.msra.mxu1 %v12713_v51 }
 0xc48   :  { %6487 = vmatprep.subr.bf16.mxu0 %v12719_v48  ;;  %6528 = vmatprep.subr.bf16.mxu1 %v12725_v60  ;;  %v14309_v60 = vld [vmem:[#allocation81_spill] sm:$0xff] }
 0xc4b   :  { %6488 = vmatpush1.bf16.msra.mxu0 %v12731_v32  ;;  %6529 = vmatpush1.bf16.msra.mxu1 %v12737_v10 }
 0xc4c   :  { %6489 = vmatprep.subr.bf16.mxu0 %v12743_v57  ;;  %6530 = vmatprep.subr.bf16.mxu1 %v12749_v0 }
 0xc4f   :  { %6490 = vmatpush1.bf16.msra.mxu0 %v12755_v31  ;;  %6531 = vmatpush1.bf16.msra.mxu1 %v12761_v11 }
 0xc50   :  { %6491 = vmatprep.subr.bf16.mxu0 %v12767_v45  ;;  %6532 = vmatprep.subr.bf16.mxu1 %v12773_v14 }
 0xc53   :  { %6492 = vmatpush1.bf16.msra.mxu0 %v12779_v9  ;;  %6533 = vmatpush1.bf16.msra.mxu1 %v12785_v25  ;;  %v14310_v25 = vld [vmem:[#allocation80_spill] sm:$0xff] }
 0xc54   :  { %6493 = vmatprep.subr.bf16.mxu0 %v12791_v4  ;;  %6534 = vmatprep.subr.bf16.mxu1 %v12797_v38 }
 0xc57   :  { %6494 = vmatpush1.bf16.msra.mxu0 %v12803_v36  ;;  %6535 = vmatpush1.bf16.msra.mxu1 %v12809_v17 }
 0xc58   :  { %6495 = vmatprep.subr.bf16.mxu0 %v12815_v55  ;;  %6536 = vmatprep.subr.bf16.mxu1 %v12821_v46 }
 0xc5b   :  { %6496 = vmatpush1.bf16.msra.mxu0 %v12827_v63  ;;  %6537 = vmatpush1.bf16.msra.mxu1 %v12833_v28 }
 0xc5c   :  { %6497 = vmatprep.subr.bf16.mxu0 %v12839_v30  ;;  %6538 = vmatprep.subr.bf16.mxu1 %v12845_v54 }
 0xc5f   :  { %6498 = vmatpush1.bf16.msra.mxu0 %v12851_v43  ;;  %6539 = vmatpush1.bf16.msra.mxu1 %v12857_v12 }
 0xd02   :  { %v6401_v41 = vpop.f32.mrf.mxu0  ;;  %v6442_v42 = vpop.f32.mrf.mxu1 }
 0xd03   :  { %v6449_v1 = vadd.f32 %v6401_v41, %v12491_v5  ;;  %v6451_v4 = vadd.f32 %v6442_v42, %v14310_v25 }
 0xd04   :  { %v6403_v56 = vpop.f32.mrf.mxu0  ;;  %v6444_v3 = vpop.f32.mrf.mxu1 }
 0xd05   :  { %v6453_v51 = vpack.c.bf16 %v6449_v1, %v6449_v1  ;;  %v6450_v48 = vadd.f32 %v6403_v56, %v12497_v39  ;;  %v6452_v32 = vadd.f32 %v6444_v3, %v14309_v60  ;;  %v6455_v38 = vpack.c.bf16 %v6451_v4, %v6451_v4 }
 0xd06   :  { %v6405_v10 = vpop.f32.mrf.mxu0  ;;  %v6446_v57 = vpop.f32.mrf.mxu1 }
 0xd07   :  { %v6457_v0 = vmul.bf16 1056980736, %v6453_v51  ;;  %v6454_v31 = vpack.c.bf16 %v6450_v48, %v6450_v48  ;;  %v6456_v9 = vpack.c.bf16 %v6452_v32, %v6452_v32  ;;  %v6459_v36 = vmul.bf16 1056980736, %v6455_v38 }
 0xd08   :  { %v6406_v11 = vpop.f32.mrf.mxu0  ;;  %v6447_v45 = vpop.f32.mrf.mxu1 }
 0xd09   :  { %10290 = vtanh.bf16 %v6457_v0  ;;  %v6458_v14 = vmul.bf16 1056980736, %v6454_v31 }
 0xd0b   :  { %10292 = vtanh.bf16 %v6458_v14 }
 0xd0c   :  { %10294 = vtanh.bf16 %v6456_v9 }
 0xd0d   :  { %10296 = vtanh.bf16 %v6459_v36 }
 0xd17   :  { %v10291_v17 = vpop.eup %10290 }
 0xd18   :  { %v6463_v55 = vmul.bf16 1056980736, %v10291_v17 }
 0xd19   :  { %v10293_v46 = vpop.eup %10292 }
 0xd1a   :  { %v6466_v63 = vadd.bf16 1056980736, %v6463_v55  ;;  %v6464_v28 = vmul.bf16 1056980736, %v10293_v46  ;;  %v10295_v30 = vpop.eup %10294 }
 0xd1b   :  { %v6473_v50 = vunpack.c.l.bf16 %v10295_v30  ;;  %v10297_v19 = vpop.eup %10296 }
 0xd1c   :  { %v6469_v54 = vunpack.c.l.bf16 %v6466_v63  ;;  %v6467_v43 = vadd.bf16 1056980736, %v6464_v28  ;;  %v6465_v23 = vmul.bf16 1056980736, %v10297_v19 }
 0xd1e   :  { %v6470_v12 = vunpack.c.l.bf16 %v6467_v43  ;;  %v6478_v27 = vmul.f32 %v6473_v50, %v6469_v54  ;;  %v6468_v62 = vadd.bf16 1056980736, %v6465_v23 }
 0xd20   :  { %v6477_v21 = vmul.f32 %v6475_v47, %v6470_v12  ;;  %v6471_v13 = vunpack.c.l.bf16 %v6468_v62 }
 0xd22   :  { %v6479_v34 = vadd.f32 %v6478_v27, %v6477_v21 }
 0xd24   :  { %10298 = vtanh.f32 %v6479_v34 }
 0xd31   :  { %v10299_v35 = vpop.eup %10298 }
 0xd32   :  { %v6481_v22 = vmul.f32 %v10299_v35, %v6471_v13 }
 0xd34   :  { %v12967_v20 = vpack.c.bf16 %v6481_v22, %v6481_v22 }
 0xd36   :  { %14311 = vst [vmem:[#allocation63_spill] sm:$0xff] %v12967_v20  ;;  %6516 = vmatmul.mubr.bf16.vlgmr.msra.gmra.mxu0 %v12967_v20  ;;  %6557 = vmatmul.mubr.bf16.vlgmr.msra.gmra.mxu1 %v12967_v20 }
 0xd37   :  { %10609 = shalt.err (!%p10606_p10)  }
 0xd38   :  { %226 = dma.hbm_to_vmem [thread:$0]  %s14006_s13, 4096, %s224_s0, [#allocation4 + $0x1]  ;;  %v6603_v14 = vrot.slane %v6479_v34, 4 }
 0xdf6   :  { %v6517_v61 = vpop.f32.mrf.mxu0  ;;  %v6558_v53 = vpop.f32.mrf.mxu1 }
 0xdf7   :  { %v6569_v29 = vrot.slane %v6517_v61, 4  ;;  %v6571_v1 = vrot.slane %v6558_v53, 4 }
 0xdf8   :  { %v6519_v40 = vpop.f32.mrf.mxu0  ;;  %v6560_v8 = vpop.f32.mrf.mxu1 }
 0xdf9   :  { %v6577_v44 = vadd.f32 %v6569_v29, %v12491_v5  ;;  %v6570_v7 = vrot.slane %v6519_v40, 4  ;;  %v6572_v59 = vrot.slane %v6560_v8, 4  ;;  %v6579_v48 = vadd.f32 %v6571_v1, %v14310_v25 }
 0xdfa   :  { %v6521_v58 = vpop.f32.mrf.mxu0  ;;  %v6562_v37 = vpop.f32.mrf.mxu1 }
 0xdfb   :  { %v6581_v18 = vpack.c.bf16 %v6577_v44, %v6577_v44  ;;  %v6578_v24 = vadd.f32 %v6570_v7, %v12497_v39  ;;  %v6580_v2 = vadd.f32 %v6572_v59, %v14309_v60  ;;  %v6583_v5 = vpack.c.bf16 %v6579_v48, %v6579_v48 }
 0xdfc   :  { %v6522_v49 = vpop.f32.mrf.mxu0  ;;  %v6563_v41 = vpop.f32.mrf.mxu1 }
 0xdfd   :  { %v6585_v42 = vmul.bf16 1056980736, %v6581_v18  ;;  %v6582_v56 = vpack.c.bf16 %v6578_v24, %v6578_v24  ;;  %v6584_v51 = vpack.c.bf16 %v6580_v2, %v6580_v2  ;;  %v6587_v32 = vmul.bf16 1056980736, %v6583_v5 }
 0xdff   :  { %10300 = vtanh.bf16 %v6585_v42  ;;  %v6586_v3 = vmul.bf16 1056980736, %v6582_v56 }
 0xe01   :  { %10302 = vtanh.bf16 %v6586_v3 }
 0xe02   :  { %10304 = vtanh.bf16 %v6584_v51 }
 0xe03   :  { %10306 = vtanh.bf16 %v6587_v32 }
 0xe0d   :  { %v10301_v10 = vpop.eup %10300 }
 0xe0e   :  { %v6591_v57 = vmul.bf16 1056980736, %v10301_v10 }
 0xe0f   :  { %v10303_v39 = vpop.eup %10302 }
 0xe10   :  { %v6594_v0 = vadd.bf16 1056980736, %v6591_v57  ;;  %v6592_v60 = vmul.bf16 1056980736, %v10303_v39  ;;  %v10305_v31 = vpop.eup %10304 }
 0xe11   :  { %v6601_v4 = vunpack.c.l.bf16 %v10305_v31  ;;  %v10307_v25 = vpop.eup %10306 }
 0xe12   :  { %v6597_v11 = vunpack.c.l.bf16 %v6594_v0  ;;  %v6595_v45 = vadd.bf16 1056980736, %v6592_v60  ;;  %v6593_v55 = vmul.bf16 1056980736, %v10307_v25 }
 0xe14   :  { %v6598_v9 = vunpack.c.l.bf16 %v6595_v45  ;;  %v6606_v36 = vmul.f32 %v6601_v4, %v6597_v11  ;;  %v6596_v46 = vadd.bf16 1056980736, %v6593_v55 }
 0xe16   :  { %v6605_v38 = vmul.f32 %v6603_v14, %v6598_v9  ;;  %v6599_v63 = vunpack.c.l.bf16 %v6596_v46 }
 0xe18   :  { %v12978_v17 = vadd.f32 %v6606_v36, %v6605_v38 }
 0xe1a   :  { %14312 = vst [vmem:[#allocation64_spill] sm:$0xff] %v12978_v17  ;;  %10308 = vtanh.f32 %v12978_v17 }
 0xe27   :  { %v10309_v28 = vpop.eup %10308 }
 0xe28   :  { %v12981_v30 = vmul.f32 %v10309_v28, %v6599_v63 }
 0xe29   :  { %10636 = dma.done.wait [#allocation4], 4096 }
 0xe2a   :  { %10637 = vsyncadd [#allocation4], 4294963200  ;;  %v14313_v54 = vld [vmem:[#allocation55_spill] sm:$0xff]  ;;  %v14314_v43 = vld [vmem:[#allocation53_spill] sm:$0xff] }
 0xe2b   :  { %v12985_v12 = vcombine.high %v14314_v43, %v14313_v54  ;;  %v14316_v47 = vld [vmem:[#allocation56_spill] sm:$0xff]  ;;  %v14317_v50 = vld [vmem:[#allocation54_spill] sm:$0xff]  ;;  %v12993_v27 = vcombine.low %v14314_v43, %v14313_v54 }
 0xe2c   :  { %v12989_v21 = vcombine.high %v14317_v50, %v14316_v47  ;;  %v12997_v34 = vcombine.low %v14317_v50, %v14316_v47 }
 0xe2d   :  { %14315 = vst [vmem:[#allocation65_spill] sm:$0xff] %v12985_v12 }
 0xe2e   :  { %14318 = vst [vmem:[#allocation66_spill] sm:$0xff] %v12989_v21 }
 0xe2f   :  { %10638 = dma.done.wait [#allocation4 + $0x1], 4096 }
 0xe30   :  { %10639 = vsyncadd [#allocation4 + $0x1], 4294963200  ;;  %6862 = vmatprep.mubr.bf16.mxu0 %v14256_v15  ;;  %v14319_v19 = vld [vmem:[#allocation51_spill] sm:$0xff]  ;;  %v14320_v23 = vld [vmem:[#allocation49_spill] sm:$0xff]  ;;  %6903 = vmatprep.mubr.bf16.mxu1 %v14256_v15  ;;  %vm10658_vm5 = vmmov 0   ;;  %s10659_s25 = smov [#allocation13]  }
 0xe31   :  { %v13002_v62 = vcombine.high %v14320_v23, %v14319_v19  ;;  %v14321_v13 = vld [vmem:[#allocation52_spill] sm:$0xff]  ;;  %v14322_v35 = vld [vmem:[#allocation50_spill] sm:$0xff]  ;;  %6830 = vmatprep.subr.bf16.mxu0 %v12985_v12  ;;  %6871 = vmatprep.subr.bf16.mxu1 %v12989_v21  ;;  %v13015_v61 = vcombine.low %v14320_v23, %v14319_v19  ;;  %v14323_v29 = vld [vmem:[#allocation47_spill] sm:$0xff]  ;;  %s8715_s18 = sshll.u32 %s10659_s25, 4  ;;  %vm8707_vm6 = vcmask 140288   ;;  %s8716_s18 = int_to_ptr.vmem [resolvable:$true] %s8715_s18 }
 0xe32   :  { %v13006_v22 = vcombine.high %v14322_v35, %v14321_v13  ;;  %6831 = vmatpush1.bf16.msra.mxu0 %v12993_v27  ;;  %6872 = vmatpush1.bf16.msra.mxu1 %v12997_v34  ;;  %v13019_v53 = vcombine.low %v14322_v35, %v14321_v13  ;;  %v14324_v40 = vld [vmem:[#allocation45_spill] sm:$0xff]  ;;  %v14325_v44 = vld [vmem:[#allocation48_spill] sm:$0xff]  ;;  %v14326_v7 = vld [vmem:[#allocation46_spill] sm:$0xff]  ;;  %s10610_s7 = scalar_lea.vmem %s8716_s18, 32  ;;  %p10615_p12 = scmp.lt.s32.totalorder %s8716_s18, %s8716_s18 }
 0xe33   :  { %6832 = vmatprep.subr.bf16.mxu0 %v13002_v62  ;;  %v13025_v8 = vcombine.high %v14324_v40, %v14323_v29  ;;  %v13029_v59 = vcombine.high %v14326_v7, %v14325_v44  ;;  %v13035_v58 = vcombine.low %v14324_v40, %v14323_v29  ;;  %v13039_v37 = vcombine.low %v14326_v7, %v14325_v44  ;;  %v14327_v18 = vld [vmem:[#allocation43_spill] sm:$0xff]  ;;  %v14328_v24 = vld [vmem:[#allocation41_spill] sm:$0xff]  ;;  %v14329_v49 = vld [vmem:[#allocation44_spill] sm:$0xff]  ;;  %p10611_p11 = scmp.ne.s32.totalorder %s8716_s18, %s10610_s7  ;;  %p10616_p13 = scmp.lt.s32.totalorder %s10610_s7, %s10610_s7 }
 0xe34   :  { %6873 = vmatprep.subr.bf16.mxu1 %v13006_v22  ;;  %v13045_v2 = vcombine.high %v14328_v24, %v14327_v18  ;;  %v14330_v41 = vld [vmem:[#allocation42_spill] sm:$0xff]  ;;  %v13055_v1 = vcombine.low %v14328_v24, %v14327_v18  ;;  %v14331_v3 = vld [vmem:[#allocation39_spill] sm:$0xff]  ;;  %v14332_v51 = vld [vmem:[#allocation37_spill] sm:$0xff] }
 0xe35   :  { %v13049_v42 = vcombine.high %v14330_v41, %v14329_v49  ;;  %v13059_v56 = vcombine.low %v14330_v41, %v14329_v49  ;;  %v13065_v48 = vcombine.high %v14332_v51, %v14331_v3  ;;  %v14333_v5 = vld [vmem:[#allocation40_spill] sm:$0xff]  ;;  %v14334_v32 = vld [vmem:[#allocation38_spill] sm:$0xff]  ;;  %v13075_v57 = vcombine.low %v14332_v51, %v14331_v3  ;;  %v14335_v0 = vld [vmem:[#allocation35_spill] sm:$0xff]  ;;  %p10617_p0 = por %p10616_p13, %p10615_p12 }
 0xe36   :  { %6833 = vmatpush1.bf16.msra.mxu0 %v13015_v61  ;;  %6874 = vmatpush1.bf16.msra.mxu1 %v13019_v53  ;;  %v13069_v10 = vcombine.high %v14334_v32, %v14333_v5  ;;  %v13079_v39 = vcombine.low %v14334_v32, %v14333_v5  ;;  %v14336_v60 = vld [vmem:[#allocation33_spill] sm:$0xff]  ;;  %v14337_v11 = vld [vmem:[#allocation36_spill] sm:$0xff]  ;;  %v14338_v45 = vld [vmem:[#allocation34_spill] sm:$0xff] }
 0xe37   :  { %6834 = vmatprep.subr.bf16.mxu0 %v13025_v8  ;;  %6875 = vmatprep.subr.bf16.mxu1 %v13029_v59  ;;  %v13085_v31 = vcombine.high %v14336_v60, %v14335_v0  ;;  %v13089_v14 = vcombine.high %v14338_v45, %v14337_v11  ;;  %v13095_v9 = vcombine.low %v14336_v60, %v14335_v0  ;;  %v14339_v38 = vld [vmem:[#allocation31_spill] sm:$0xff]  ;;  %v14340_v36 = vld [vmem:[#allocation29_spill] sm:$0xff]  ;;  %v14341_v55 = vld [vmem:[#allocation32_spill] sm:$0xff]  ;;  %p10618_p1 = pnand %p10617_p0, %p10611_p11 }
 0xe38   :  { %v13099_v4 = vcombine.low %v14338_v45, %v14337_v11  ;;  %v13105_v25 = vcombine.high %v14340_v36, %v14339_v38  ;;  %v14342_v46 = vld [vmem:[#allocation30_spill] sm:$0xff]  ;;  %v13115_v28 = vcombine.low %v14340_v36, %v14339_v38  ;;  %v14343_v43 = vld [vmem:[#allocation27_spill] sm:$0xff]  ;;  %v14344_v47 = vld [vmem:[#allocation25_spill] sm:$0xff] }
 0xe39   :  { %v13109_v63 = vcombine.high %v14342_v46, %v14341_v55  ;;  %v13119_v54 = vcombine.low %v14342_v46, %v14341_v55  ;;  %v13125_v50 = vcombine.high %v14344_v47, %v14343_v43  ;;  %v14345_v19 = vld [vmem:[#allocation28_spill] sm:$0xff]  ;;  %v14346_v23 = vld [vmem:[#allocation26_spill] sm:$0xff]  ;;  %v13135_v35 = vcombine.low %v14344_v47, %v14343_v43  ;;  %v13143_v40 = vld [vmem:[#allocation3 + $0xe4] ss:$16 sps:$4 sm:$0xff]  }
 0xe3a   :  { %6835 = vmatpush1.bf16.msra.mxu0 %v13035_v58  ;;  %6876 = vmatpush1.bf16.msra.mxu1 %v13039_v37  ;;  %v13129_v13 = vcombine.high %v14346_v23, %v14345_v19  ;;  %v13139_v29 = vcombine.low %v14346_v23, %v14345_v19  ;;  %v13145_v44 = vld [vmem:[#allocation3 + $0xec] ss:$16 sps:$4 sm:$0xff]   ;;  %v13147_v7 = vld [vmem:[#allocation3 + $0xe0] ss:$16 sps:$4 sm:$0xff]   ;;  %v13149_v18 = vld [vmem:[#allocation3 + $0xe8] ss:$16 sps:$4 sm:$0xff]  }
 0xe3b   :  { %6836 = vmatprep.subr.bf16.mxu0 %v13045_v2  ;;  %6877 = vmatprep.subr.bf16.mxu1 %v13049_v42  ;;  %v13151_v24 = vld [vmem:[#allocation3 + $0xc4] ss:$16 sps:$4 sm:$0xff]   ;;  %v13153_v49 = vld [vmem:[#allocation3 + $0xcc] ss:$16 sps:$4 sm:$0xff]   ;;  %v13163_v3 = vld [vmem:[#allocation3 + $0xc0] ss:$16 sps:$4 sm:$0xff]  }
 0xe3c   :  { %v14347_v41 = vld [vmem:[#allocation82_spill] sm:$0xff]  ;;  %v13169_v5 = vld [vmem:[#allocation3 + $0xa4] ss:$16 sps:$4 sm:$0xff]  }
 0xe3d   :  { %v13165_v51 = vld [vmem:[#allocation3 + $0xc8] ss:$16 sps:$4 sm:$0xff]   ;;  %14349 = vst [vmem:[#allocation68_spill] sm:$0xff] %v13169_v5  ;;  %v13171_v32 = vld [vmem:[#allocation3 + $0xac] ss:$16 sps:$4 sm:$0xff]  }
 0xe3e   :  { %6837 = vmatpush1.bf16.msra.mxu0 %v13055_v1  ;;  %6878 = vmatpush1.bf16.msra.mxu1 %v13059_v56  ;;  %14348 = vst [vmem:[#allocation67_spill] sm:$0xff] %v13165_v51  ;;  %14350 = vst [vmem:[#allocation69_spill] sm:$0xff] %v13171_v32  ;;  %v13177_v0 = vld [vmem:[#allocation3 + $0xa0] ss:$16 sps:$4 sm:$0xff]   ;;  %v13179_v60 = vld [vmem:[#allocation3 + $0xa8] ss:$16 sps:$4 sm:$0xff]  }
 0xe3f   :  { %6838 = vmatprep.subr.bf16.mxu0 %v13065_v48  ;;  %6879 = vmatprep.subr.bf16.mxu1 %v13069_v10  ;;  %14351 = vst [vmem:[#allocation70_spill] sm:$0xff] %v13177_v0  ;;  %14352 = vst [vmem:[#allocation71_spill] sm:$0xff] %v13179_v60  ;;  %v13183_v11 = vld [vmem:[#allocation3 + $0x84] ss:$16 sps:$4 sm:$0xff]   ;;  %v13185_v45 = vld [vmem:[#allocation3 + $0x8c] ss:$16 sps:$4 sm:$0xff]  }
 0xe40   :  { %14353 = vst [vmem:[#allocation72_spill] sm:$0xff] %v13183_v11  ;;  %14354 = vst [vmem:[#allocation73_spill] sm:$0xff] %v13185_v45  ;;  %v13189_v38 = vld [vmem:[#allocation3 + $0x80] ss:$16 sps:$4 sm:$0xff]   ;;  %v13191_v36 = vld [vmem:[#allocation3 + $0x88] ss:$16 sps:$4 sm:$0xff]  }
 0xe41   :  { %14355 = vst [vmem:[#allocation74_spill] sm:$0xff] %v13189_v38  ;;  %14356 = vst [vmem:[#allocation57_spill] sm:$0xff] %v13191_v36  ;;  %v13195_v55 = vld [vmem:[#allocation3 + $0x64] ss:$16 sps:$4 sm:$0xff]   ;;  %v13197_v46 = vld [vmem:[#allocation3 + $0x6c] ss:$16 sps:$4 sm:$0xff]  }
 0xe42   :  { %6839 = vmatpush1.bf16.msra.mxu0 %v13075_v57  ;;  %6880 = vmatpush1.bf16.msra.mxu1 %v13079_v39  ;;  %14357 = vst [vmem:[#allocation58_spill] sm:$0xff] %v13195_v55  ;;  %14358 = vst [vmem:[#allocation76_spill] sm:$0xff] %v13197_v46  ;;  %v13201_v43 = vld [vmem:[#allocation3 + $0x60] ss:$16 sps:$4 sm:$0xff]   ;;  %v13203_v47 = vld [vmem:[#allocation3 + $0x68] ss:$16 sps:$4 sm:$0xff]  }
 0xe43   :  { %6840 = vmatprep.subr.bf16.mxu0 %v13085_v31  ;;  %6881 = vmatprep.subr.bf16.mxu1 %v13089_v14  ;;  %14359 = vst [vmem:[#allocation78_spill] sm:$0xff] %v13201_v43  ;;  %14360 = vst [vmem:[#allocation79_spill] sm:$0xff] %v13203_v47  ;;  %v13207_v19 = vld [vmem:[#allocation3 + $0x44] ss:$16 sps:$4 sm:$0xff]   ;;  %v13209_v23 = vld [vmem:[#allocation3 + $0x4c] ss:$16 sps:$4 sm:$0xff]  }
 0xe44   :  { %14361 = vst [vmem:[#allocation77_spill] sm:$0xff] %v13207_v19  ;;  %14362 = vst [vmem:[#allocation81_spill] sm:$0xff] %v13209_v23  ;;  %v13215_v20 = vld [vmem:[#allocation3 + $0x48] ss:$16 sps:$4 sm:$0xff]   ;;  %v13219_v6 = vld [vmem:[#allocation3 + $0x24] ss:$16 sps:$4 sm:$0xff]  }
 0xe45   :  { %14364 = vst [vmem:[#allocation55_spill] sm:$0xff] %v13215_v20  ;;  %14365 = vst [vmem:[#allocation53_spill] sm:$0xff] %v13219_v6  ;;  %v13221_v26 = vld [vmem:[#allocation3 + $0x2c] ss:$16 sps:$4 sm:$0xff]   ;;  %v13225_v33 = vld [vmem:[#allocation3 + $0x20] ss:$16 sps:$4 sm:$0xff]  }
 0xe46   :  { %6841 = vmatpush1.bf16.msra.mxu0 %v13095_v9  ;;  %6882 = vmatpush1.bf16.msra.mxu1 %v13099_v4  ;;  %14366 = vst [vmem:[#allocation56_spill] sm:$0xff] %v13221_v26  ;;  %14367 = vst [vmem:[#allocation54_spill] sm:$0xff] %v13225_v33  ;;  %v13227_v16 = vld [vmem:[#allocation3 + $0x28] ss:$16 sps:$4 sm:$0xff]   ;;  %v13231_v17 = vld [vmem:[#allocation3 + $0x4] ss:$16 sps:$4 sm:$0xff]  }
 0xe47   :  { %6842 = vmatprep.subr.bf16.mxu0 %v13105_v25  ;;  %6883 = vmatprep.subr.bf16.mxu1 %v13109_v63  ;;  %14368 = vst [vmem:[#allocation51_spill] sm:$0xff] %v13227_v16  ;;  %14369 = vst [vmem:[#allocation49_spill] sm:$0xff] %v13231_v17 }
 0xe4a   :  { %6843 = vmatpush1.bf16.msra.mxu0 %v13115_v28  ;;  %6884 = vmatpush1.bf16.msra.mxu1 %v13119_v54 }
 0xe4b   :  { %6844 = vmatprep.subr.bf16.mxu0 %v13125_v50  ;;  %6885 = vmatprep.subr.bf16.mxu1 %v13129_v13 }
 0xe4e   :  { %6845 = vmatpush1.bf16.msra.mxu0 %v13135_v35  ;;  %6886 = vmatpush1.bf16.msra.mxu1 %v13139_v29 }
 0xe4f   :  { %7108 = vmatprep.subr.bf16.mxu0 %v13143_v40  ;;  %7149 = vmatprep.subr.bf16.mxu1 %v13145_v44 }
 0xe51   :  { %6863 = vmatmul.mubr.bf16.vlgmr.msra.gmra.mxu0 %v14347_v41  ;;  %6904 = vmatmul.mubr.bf16.vlgmr.msra.gmra.mxu1 %v14347_v41  ;;  %v13213_v41 = vld [vmem:[#allocation3 + $0x40] ss:$16 sps:$4 sm:$0xff]  }
 0xe52   :  { %7109 = vmatpush1.bf16.msra.mxu0 %v13147_v7  ;;  %7150 = vmatpush1.bf16.msra.mxu1 %v13149_v18  ;;  %14363 = vst [vmem:[#allocation80_spill] sm:$0xff] %v13213_v41 }
 0xe53   :  { %7110 = vmatprep.subr.bf16.mxu0 %v13151_v24  ;;  %7151 = vmatprep.subr.bf16.mxu1 %v13153_v49 }
 0xe54   :  { %7140 = vmatprep.mubr.bf16.mxu0 %v14256_v15  ;;  %7181 = vmatprep.mubr.bf16.mxu1 %v14256_v15 }
 0xe56   :  { %7111 = vmatpush1.bf16.msra.mxu0 %v13163_v3  ;;  %7152 = vmatpush1.bf16.msra.mxu1 %v13165_v51 }
 0xe57   :  { %7112 = vmatprep.subr.bf16.mxu0 %v13169_v5  ;;  %7153 = vmatprep.subr.bf16.mxu1 %v13171_v32 }
 0xe5a   :  { %7113 = vmatpush1.bf16.msra.mxu0 %v13177_v0  ;;  %7154 = vmatpush1.bf16.msra.mxu1 %v13179_v60 }
 0xe5b   :  { %7114 = vmatprep.subr.bf16.mxu0 %v13183_v11  ;;  %7155 = vmatprep.subr.bf16.mxu1 %v13185_v45 }
 0xe5e   :  { %7115 = vmatpush1.bf16.msra.mxu0 %v13189_v38  ;;  %7156 = vmatpush1.bf16.msra.mxu1 %v13191_v36 }
 0xe5f   :  { %7116 = vmatprep.subr.bf16.mxu0 %v13195_v55  ;;  %7157 = vmatprep.subr.bf16.mxu1 %v13197_v46 }
 0xe62   :  { %7117 = vmatpush1.bf16.msra.mxu0 %v13201_v43  ;;  %7158 = vmatpush1.bf16.msra.mxu1 %v13203_v47 }
 0xe63   :  { %7118 = vmatprep.subr.bf16.mxu0 %v13207_v19  ;;  %7159 = vmatprep.subr.bf16.mxu1 %v13209_v23  ;;  %v13233_v19 = vld [vmem:[#allocation3 + $0xc] ss:$16 sps:$4 sm:$0xff]   ;;  %v6912_v23 = vpack.c.bf16 %v12981_v30, %v12981_v30  ;;  %v14375_v30 = vld [vmem:[#allocation81_spill] sm:$0xff] }
 0xe64   :  { %14370 = vst [vmem:[#allocation52_spill] sm:$0xff] %v13233_v19 }
 0xe66   :  { %7119 = vmatpush1.bf16.msra.mxu0 %v13213_v41  ;;  %7160 = vmatpush1.bf16.msra.mxu1 %v13215_v20  ;;  %v13239_v20 = vld [vmem:[#allocation3] ss:$16 sps:$4 sm:$0xff]   ;;  %v13241_v41 = vld [vmem:[#allocation3 + $0x8] ss:$16 sps:$4 sm:$0xff]  }
 0xe67   :  { %7120 = vmatprep.subr.bf16.mxu0 %v13219_v6  ;;  %7161 = vmatprep.subr.bf16.mxu1 %v13221_v26  ;;  %14371 = vst [vmem:[#allocation50_spill] sm:$0xff] %v13239_v20  ;;  %14372 = vst [vmem:[#allocation47_spill] sm:$0xff] %v13241_v41  ;;  %v13245_v26 = vrot.slane %v6912_v23, 2  ;;  %v14376_v23 = vld [vmem:[#allocation80_spill] sm:$0xff] }
 0xe69   :  { %14373 = vst [vmem:[#allocation45_spill] sm:$0xff] %v13245_v26 }
 0xe6a   :  { %7121 = vmatpush1.bf16.msra.mxu0 %v13225_v33  ;;  %7162 = vmatpush1.bf16.msra.mxu1 %v13227_v16 }
 0xe6b   :  { %7122 = vmatprep.subr.bf16.mxu0 %v13231_v17  ;;  %7163 = vmatprep.subr.bf16.mxu1 %v13233_v19 }
 0xe6e   :  { %7123 = vmatpush1.bf16.msra.mxu0 %v13239_v20  ;;  %7164 = vmatpush1.bf16.msra.mxu1 %v13241_v41 }
 0xe6f   :  { %7223 = vmatprep.subr.bf16.mxu0 %v12985_v12  ;;  %7264 = vmatprep.subr.bf16.mxu1 %v12989_v21 }
 0xe71   :  { %7141 = vmatmul.mubr.bf16.vlgmr.msra.gmra.mxu0 %v13245_v26  ;;  %7182 = vmatmul.mubr.bf16.vlgmr.msra.gmra.mxu1 %v13245_v26  ;;  %v14377_v26 = vld [vmem:[#allocation55_spill] sm:$0xff] }
 0xe72   :  { %7224 = vmatpush1.bf16.msra.mxu0 %v12993_v27  ;;  %7265 = vmatpush1.bf16.msra.mxu1 %v12997_v34 }
 0xe73   :  { %7225 = vmatprep.subr.bf16.mxu0 %v13002_v62  ;;  %7266 = vmatprep.subr.bf16.mxu1 %v13006_v22 }
 0xe74   :  { %7255 = vmatprep.mubr.bf16.mxu0 %v14256_v15  ;;  %7296 = vmatprep.mubr.bf16.mxu1 %v14256_v15 }
 0xe76   :  { %7226 = vmatpush1.bf16.msra.mxu0 %v13015_v61  ;;  %7267 = vmatpush1.bf16.msra.mxu1 %v13019_v53 }
 0xe77   :  { %7227 = vmatprep.subr.bf16.mxu0 %v13025_v8  ;;  %7268 = vmatprep.subr.bf16.mxu1 %v13029_v59 }
 0xe7a   :  { %7228 = vmatpush1.bf16.msra.mxu0 %v13035_v58  ;;  %7269 = vmatpush1.bf16.msra.mxu1 %v13039_v37 }
 0xe7b   :  { %7229 = vmatprep.subr.bf16.mxu0 %v13045_v2  ;;  %7270 = vmatprep.subr.bf16.mxu1 %v13049_v42 }
 0xe7e   :  { %7230 = vmatpush1.bf16.msra.mxu0 %v13055_v1  ;;  %7271 = vmatpush1.bf16.msra.mxu1 %v13059_v56 }
 0xe7f   :  { %7231 = vmatprep.subr.bf16.mxu0 %v13065_v48  ;;  %7272 = vmatprep.subr.bf16.mxu1 %v13069_v10 }
 0xe82   :  { %7232 = vmatpush1.bf16.msra.mxu0 %v13075_v57  ;;  %7273 = vmatpush1.bf16.msra.mxu1 %v13079_v39 }
 0xe83   :  { %7233 = vmatprep.subr.bf16.mxu0 %v13085_v31  ;;  %7274 = vmatprep.subr.bf16.mxu1 %v13089_v14 }
 0xe86   :  { %7234 = vmatpush1.bf16.msra.mxu0 %v13095_v9  ;;  %7275 = vmatpush1.bf16.msra.mxu1 %v13099_v4 }
 0xe87   :  { %7235 = vmatprep.subr.bf16.mxu0 %v13105_v25  ;;  %7276 = vmatprep.subr.bf16.mxu1 %v13109_v63 }
 0xe8a   :  { %7236 = vmatpush1.bf16.msra.mxu0 %v13115_v28  ;;  %7277 = vmatpush1.bf16.msra.mxu1 %v13119_v54 }
 0xe8b   :  { %7237 = vmatprep.subr.bf16.mxu0 %v13125_v50  ;;  %7278 = vmatprep.subr.bf16.mxu1 %v13129_v13 }
 0xe8e   :  { %7238 = vmatpush1.bf16.msra.mxu0 %v13135_v35  ;;  %7279 = vmatpush1.bf16.msra.mxu1 %v13139_v29 }
 0xe8f   :  { %7306 = vmatprep.subr.bf16.mxu0 %v13143_v40  ;;  %7347 = vmatprep.subr.bf16.mxu1 %v13145_v44 }
 0xe91   :  { %7256 = vmatmul.mubr.bf16.vlgmr.msra.gmra.mxu0 %v12582_v52  ;;  %7297 = vmatmul.mubr.bf16.vlgmr.msra.gmra.mxu1 %v12582_v52  ;;  %v14374_v52 = vld [vmem:[#allocation77_spill] sm:$0xff] }
 0xe92   :  { %7307 = vmatpush1.bf16.msra.mxu0 %v13147_v7  ;;  %7348 = vmatpush1.bf16.msra.mxu1 %v13149_v18 }
 0xe93   :  { %7308 = vmatprep.subr.bf16.mxu0 %v13151_v24  ;;  %7349 = vmatprep.subr.bf16.mxu1 %v13153_v49 }
 0xe94   :  { %7338 = vmatprep.mubr.bf16.mxu0 %v14256_v15  ;;  %7379 = vmatprep.mubr.bf16.mxu1 %v14256_v15 }
 0xe96   :  { %7309 = vmatpush1.bf16.msra.mxu0 %v13163_v3  ;;  %7350 = vmatpush1.bf16.msra.mxu1 %v13165_v51 }
 0xe97   :  { %7310 = vmatprep.subr.bf16.mxu0 %v13169_v5  ;;  %7351 = vmatprep.subr.bf16.mxu1 %v13171_v32 }
 0xe9a   :  { %7311 = vmatpush1.bf16.msra.mxu0 %v13177_v0  ;;  %7352 = vmatpush1.bf16.msra.mxu1 %v13179_v60 }
 0xe9b   :  { %7312 = vmatprep.subr.bf16.mxu0 %v13183_v11  ;;  %7353 = vmatprep.subr.bf16.mxu1 %v13185_v45 }
 0xe9e   :  { %7313 = vmatpush1.bf16.msra.mxu0 %v13189_v38  ;;  %7354 = vmatpush1.bf16.msra.mxu1 %v13191_v36  ;;  %v14378_v38 = vld [vmem:[#allocation56_spill] sm:$0xff] }
 0xe9f   :  { %7314 = vmatprep.subr.bf16.mxu0 %v13195_v55  ;;  %7355 = vmatprep.subr.bf16.mxu1 %v13197_v46 }
 0xea2   :  { %7315 = vmatpush1.bf16.msra.mxu0 %v13201_v43  ;;  %7356 = vmatpush1.bf16.msra.mxu1 %v13203_v47 }
 0xea3   :  { %7316 = vmatprep.subr.bf16.mxu0 %v14374_v52  ;;  %7357 = vmatprep.subr.bf16.mxu1 %v14375_v30 }
 0xea6   :  { %7317 = vmatpush1.bf16.msra.mxu0 %v14376_v23  ;;  %7358 = vmatpush1.bf16.msra.mxu1 %v14377_v26 }
 0xea7   :  { %7318 = vmatprep.subr.bf16.mxu0 %v13219_v6  ;;  %7359 = vmatprep.subr.bf16.mxu1 %v14378_v38 }
 0xeaa   :  { %7319 = vmatpush1.bf16.msra.mxu0 %v13225_v33  ;;  %7360 = vmatpush1.bf16.msra.mxu1 %v13227_v16 }
 0xeab   :  { %7320 = vmatprep.subr.bf16.mxu0 %v13231_v17  ;;  %7361 = vmatprep.subr.bf16.mxu1 %v13233_v19  ;;  %v6648_v19 = vld [vmem:[%s14007_s14] sm:$0xf]  ;;  %v14379_v17 = vld [vmem:[#allocation75_spill] sm:$0xff] }
 0xeac   :  { %v14385_v45 = vsub.s32 2, %v14379_v17 }
 0xeae   :  { %7321 = vmatpush1.bf16.msra.mxu0 %v13239_v20  ;;  %7362 = vmatpush1.bf16.msra.mxu1 %v13241_v41  ;;  %v14380_v20 = vsub.s32 0, %v14379_v17  ;;  %v13343_v11 = vrot.slane %v6648_v19, %v14385_v45 }
 0xeaf   :  { %7418 = vmatprep.subr.bf16.mxu0 %v12985_v12  ;;  %7459 = vmatprep.subr.bf16.mxu1 %v12989_v21  ;;  %v14382_v12 = vsub.s32 1, %v14379_v17  ;;  %v14384_v21 = vsub.s32 3, %v14379_v17 }
 0xeb0   :  { %v13328_v47 = vrot.slane %v6648_v19, %v14380_v20 }
 0xeb1   :  { %v13332_v41 = vrot.slane %v6648_v19, %v14382_v12  ;;  %v13336_v43 = vrot.slane %v6648_v19, %v14384_v21 }
 0xeb2   :  { %14381 = vst [vmem:[#allocation48_spill] sm:$0xff] %v13328_v47 }
 0xeb3   :  { %14383 = vst [vmem:[#allocation46_spill] sm:$0xff] %v13332_v41 }
 0xf11   :  { %v6864_v26 = vpop.f32.mrf.mxu0  ;;  %v6905_v6 = vpop.f32.mrf.mxu1 }
 0xf13   :  { %v6866_v23 = vpop.f32.mrf.mxu0  ;;  %v6907_v38 = vpop.f32.mrf.mxu1 }
 0xf14   :  { %v6908_v46 = vadd.f32 %v6907_v38, %v13336_v43 }
 0xf15   :  { %v6868_v30 = vpop.f32.mrf.mxu0  ;;  %v6909_v33 = vpop.f32.mrf.mxu1 }
 0xf16   :  { %v6865_v33 = vadd.f32 %v6864_v26, %v13328_v47  ;;  %v6867_v30 = vadd.f32 %v6866_v23, %v13332_v41  ;;  %v6906_v23 = vadd.f32 %v6905_v6, %v13343_v11 }
 0xf17   :  { %v6869_v52 = vpop.f32.mrf.mxu0  ;;  %v6910_v16 = vpop.f32.mrf.mxu1 }
 0xf31   :  { %v7142_v52 = vpop.f32.mrf.mxu0  ;;  %v7183_v16 = vpop.f32.mrf.mxu1 }
 0xf32   :  { %v7190_v55 = vadd.f32 %v7142_v52, %v6865_v33  ;;  %v7192_v52 = vadd.f32 %v7183_v16, %v6906_v23 }
 0xf33   :  { %v7144_v36 = vpop.f32.mrf.mxu0  ;;  %v7185_v20 = vpop.f32.mrf.mxu1 }
 0xf34   :  { %v7194_v12 = vpack.c.bf16 %v7190_v55, %v7190_v55  ;;  %v7191_v60 = vadd.f32 %v7144_v36, %v6867_v30  ;;  %v7193_v0 = vadd.f32 %v7185_v20, %v6908_v46  ;;  %v7196_v17 = vpack.c.bf16 %v7192_v52, %v7192_v52 }
 0xf35   :  { %v7146_v21 = vpop.f32.mrf.mxu0  ;;  %v7187_v32 = vpop.f32.mrf.mxu1 }
 0xf36   :  { %v7198_v5 = vmul.bf16 1056980736, %v7194_v12  ;;  %v7195_v26 = vpack.c.bf16 %v7191_v60, %v7191_v60  ;;  %v7197_v33 = vpack.c.bf16 %v7193_v0, %v7193_v0  ;;  %v7200_v45 = vmul.bf16 1056980736, %v7196_v17 }
 0xf37   :  { %v7147_v47 = vpop.f32.mrf.mxu0  ;;  %v7188_v51 = vpop.f32.mrf.mxu1 }
 0xf38   :  { %10398 = vtanh.bf16 %v7198_v5  ;;  %v7199_v38 = vmul.bf16 1056980736, %v7195_v26  ;;  %v14386_v51 = vld [vmem:[#allocation64_spill] sm:$0xff] }
 0xf39   :  { %v7216_v20 = vrot.slane %v14386_v51, 4  ;;  %v14388_v51 = vld [vmem:[#allocation67_spill] sm:$0xff] }
 0xf3a   :  { %10400 = vtanh.bf16 %v7199_v38 }
 0xf3b   :  { %10402 = vtanh.bf16 %v7197_v33 }
 0xf3c   :  { %10404 = vtanh.bf16 %v7200_v45 }
 0xf46   :  { %v10399_v19 = vpop.eup %10398 }
 0xf47   :  { %v7204_v36 = vmul.bf16 1056980736, %v10399_v19 }
 0xf48   :  { %v10401_v55 = vpop.eup %10400 }
 0xf49   :  { %v7207_v46 = vadd.bf16 1056980736, %v7204_v36  ;;  %v7205_v32 = vmul.bf16 1056980736, %v10401_v55  ;;  %v10403_v30 = vpop.eup %10402 }
 0xf4a   :  { %v7214_v5 = vunpack.c.l.bf16 %v10403_v30  ;;  %v10405_v33 = vpop.eup %10404 }
 0xf4b   :  { %v7210_v60 = vunpack.c.l.bf16 %v7207_v46  ;;  %v7208_v47 = vadd.bf16 1056980736, %v7205_v32  ;;  %v7206_v45 = vmul.bf16 1056980736, %v10405_v33  ;;  %v14394_v33 = vld [vmem:[#allocation73_spill] sm:$0xff] }
 0xf4d   :  { %v7211_v6 = vunpack.c.l.bf16 %v7208_v47  ;;  %v7219_v0 = vmul.f32 %v7214_v5, %v7210_v60  ;;  %v7209_v55 = vadd.bf16 1056980736, %v7206_v45  ;;  %v14387_v47 = vld [vmem:[#allocation59_spill] sm:$0xff]  ;;  %v14391_v5 = vld [vmem:[#allocation70_spill] sm:$0xff] }
 0xf4e   :  { %v14397_v45 = vld [vmem:[#allocation58_spill] sm:$0xff] }
 0xf4f   :  { %v7218_v12 = vmul.f32 %v7216_v20, %v7211_v6  ;;  %v7212_v46 = vunpack.c.l.bf16 %v7209_v55  ;;  %v14389_v20 = vld [vmem:[#allocation68_spill] sm:$0xff]  ;;  %v14390_v6 = vld [vmem:[#allocation69_spill] sm:$0xff]  ;;  %v14400_v55 = vld [vmem:[#allocation79_spill] sm:$0xff] }
 0xf51   :  { %v13347_v16 = vadd.f32 %v7219_v0, %v7218_v12  ;;  %v13349_v21 = vpop.f32.mrf.mxu0  ;;  %v13351_v26 = vpop.f32.mrf.mxu1  ;;  %v14392_v12 = vld [vmem:[#allocation71_spill] sm:$0xff]  ;;  %v14393_v0 = vld [vmem:[#allocation72_spill] sm:$0xff] }
 0xf53   :  { %10406 = vtanh.f32 %v13347_v16  ;;  %v13354_v23 = vpop.f32.mrf.mxu0  ;;  %v13356_v38 = vpop.f32.mrf.mxu1 }
 0xf55   :  { %v7261_v52 = vpop.f32.mrf.mxu0  ;;  %v7302_v17 = vpop.f32.mrf.mxu1 }
 0xf56   :  { %v14395_v52 = vld [vmem:[#allocation74_spill] sm:$0xff]  ;;  %v14396_v17 = vld [vmem:[#allocation57_spill] sm:$0xff] }
 0xf57   :  { %v7262_v19 = vpop.f32.mrf.mxu0  ;;  %v7303_v36 = vpop.f32.mrf.mxu1 }
 0xf58   :  { %v14398_v19 = vld [vmem:[#allocation76_spill] sm:$0xff]  ;;  %v14399_v36 = vld [vmem:[#allocation78_spill] sm:$0xff] }
 0xf60   :  { %v10407_v32 = vpop.eup %10406 }
 0xf61   :  { %v7222_v30 = vmul.f32 %v10407_v32, %v7212_v46  ;;  %v14401_v46 = vld [vmem:[#allocation77_spill] sm:$0xff] }
 0xf62   :  { %v14402_v32 = vld [vmem:[#allocation81_spill] sm:$0xff] }
 0xf63   :  { %v7305_v60 = vpack.c.bf16 %v7222_v30, %v7222_v30  ;;  %v14403_v30 = vld [vmem:[#allocation80_spill] sm:$0xff] }
 0xf65   :  { %7339 = vmatmul.mubr.bf16.vlgmr.msra.gmra.mxu0 %v7305_v60  ;;  %7380 = vmatmul.mubr.bf16.vlgmr.msra.gmra.mxu1 %v7305_v60  ;;  %v14404_v60 = vld [vmem:[#allocation55_spill] sm:$0xff] }
 0xf66   :  { %7419 = vmatpush1.bf16.msra.mxu0 %v12993_v27  ;;  %7460 = vmatpush1.bf16.msra.mxu1 %v12997_v34 }
 0xf67   :  { %7420 = vmatprep.subr.bf16.mxu0 %v13002_v62  ;;  %7461 = vmatprep.subr.bf16.mxu1 %v13006_v22 }
 0xf68   :  { %7450 = vmatprep.mubr.bf16.mxu0 %v14256_v15  ;;  %7491 = vmatprep.mubr.bf16.mxu1 %v14256_v15 }
 0xf6a   :  { %7421 = vmatpush1.bf16.msra.mxu0 %v13015_v61  ;;  %7462 = vmatpush1.bf16.msra.mxu1 %v13019_v53 }
 0xf6b   :  { %7422 = vmatprep.subr.bf16.mxu0 %v13025_v8  ;;  %7463 = vmatprep.subr.bf16.mxu1 %v13029_v59 }
 0xf6e   :  { %7423 = vmatpush1.bf16.msra.mxu0 %v13035_v58  ;;  %7464 = vmatpush1.bf16.msra.mxu1 %v13039_v37 }
 0xf6f   :  { %7424 = vmatprep.subr.bf16.mxu0 %v13045_v2  ;;  %7465 = vmatprep.subr.bf16.mxu1 %v13049_v42 }
 0xf72   :  { %7425 = vmatpush1.bf16.msra.mxu0 %v13055_v1  ;;  %7466 = vmatpush1.bf16.msra.mxu1 %v13059_v56 }
 0xf73   :  { %7426 = vmatprep.subr.bf16.mxu0 %v13065_v48  ;;  %7467 = vmatprep.subr.bf16.mxu1 %v13069_v10 }
 0xf76   :  { %7427 = vmatpush1.bf16.msra.mxu0 %v13075_v57  ;;  %7468 = vmatpush1.bf16.msra.mxu1 %v13079_v39 }
 0xf77   :  { %7428 = vmatprep.subr.bf16.mxu0 %v13085_v31  ;;  %7469 = vmatprep.subr.bf16.mxu1 %v13089_v14 }
 0xf7a   :  { %7429 = vmatpush1.bf16.msra.mxu0 %v13095_v9  ;;  %7470 = vmatpush1.bf16.msra.mxu1 %v13099_v4 }
 0xf7b   :  { %7430 = vmatprep.subr.bf16.mxu0 %v13105_v25  ;;  %7471 = vmatprep.subr.bf16.mxu1 %v13109_v63 }
 0xf7e   :  { %7431 = vmatpush1.bf16.msra.mxu0 %v13115_v28  ;;  %7472 = vmatpush1.bf16.msra.mxu1 %v13119_v54 }
 0xf7f   :  { %7432 = vmatprep.subr.bf16.mxu0 %v13125_v50  ;;  %7473 = vmatprep.subr.bf16.mxu1 %v13129_v13 }
 0xf82   :  { %7433 = vmatpush1.bf16.msra.mxu0 %v13135_v35  ;;  %7474 = vmatpush1.bf16.msra.mxu1 %v13139_v29 }
 0xf83   :  { %7501 = vmatprep.subr.bf16.mxu0 %v13143_v40  ;;  %7542 = vmatprep.subr.bf16.mxu1 %v13145_v44 }
 0xf85   :  { %7451 = vmatmul.mubr.bf16.vlgmr.msra.gmra.mxu0 %v14387_v47  ;;  %7492 = vmatmul.mubr.bf16.vlgmr.msra.gmra.mxu1 %v14387_v47  ;;  %v14405_v47 = vld [vmem:[#allocation53_spill] sm:$0xff] }
 0xf86   :  { %7502 = vmatpush1.bf16.msra.mxu0 %v13147_v7  ;;  %7543 = vmatpush1.bf16.msra.mxu1 %v13149_v18 }
 0xf87   :  { %7503 = vmatprep.subr.bf16.mxu0 %v13151_v24  ;;  %7544 = vmatprep.subr.bf16.mxu1 %v13153_v49 }
 0xf88   :  { %7533 = vmatprep.mubr.bf16.mxu0 %v14256_v15  ;;  %7574 = vmatprep.mubr.bf16.mxu1 %v14256_v15 }
 0xf8a   :  { %7504 = vmatpush1.bf16.msra.mxu0 %v13163_v3  ;;  %7545 = vmatpush1.bf16.msra.mxu1 %v14388_v51  ;;  %v7299_v51 = vadd.f32 %v13351_v26, %v13343_v11 }
 0xf8b   :  { %7505 = vmatprep.subr.bf16.mxu0 %v14389_v20  ;;  %7546 = vmatprep.subr.bf16.mxu1 %v14390_v6 }
 0xf8e   :  { %7506 = vmatpush1.bf16.msra.mxu0 %v14391_v5  ;;  %7547 = vmatpush1.bf16.msra.mxu1 %v14392_v12 }
 0xf8f   :  { %7507 = vmatprep.subr.bf16.mxu0 %v14393_v0  ;;  %7548 = vmatprep.subr.bf16.mxu1 %v14394_v33 }
 0xf92   :  { %7508 = vmatpush1.bf16.msra.mxu0 %v14395_v52  ;;  %7549 = vmatpush1.bf16.msra.mxu1 %v14396_v17  ;;  %v14406_v52 = vld [vmem:[#allocation56_spill] sm:$0xff]  ;;  %v14407_v17 = vld [vmem:[#allocation54_spill] sm:$0xff] }
 0xf93   :  { %7509 = vmatprep.subr.bf16.mxu0 %v14397_v45  ;;  %7550 = vmatprep.subr.bf16.mxu1 %v14398_v19  ;;  %v14408_v45 = vld [vmem:[#allocation51_spill] sm:$0xff]  ;;  %v14409_v19 = vld [vmem:[#allocation49_spill] sm:$0xff] }
 0xf96   :  { %7510 = vmatpush1.bf16.msra.mxu0 %v14399_v36  ;;  %7551 = vmatpush1.bf16.msra.mxu1 %v14400_v55  ;;  %v14410_v36 = vld [vmem:[#allocation52_spill] sm:$0xff]  ;;  %v14411_v55 = vld [vmem:[#allocation50_spill] sm:$0xff] }
 0xf97   :  { %7511 = vmatprep.subr.bf16.mxu0 %v14401_v46  ;;  %7552 = vmatprep.subr.bf16.mxu1 %v14402_v32  ;;  %v14412_v46 = vld [vmem:[#allocation47_spill] sm:$0xff]  ;;  %v14413_v32 = vld [vmem:[#allocation65_spill] sm:$0xff] }
 0xf9a   :  { %7512 = vmatpush1.bf16.msra.mxu0 %v14403_v30  ;;  %7553 = vmatpush1.bf16.msra.mxu1 %v14404_v60  ;;  %v14414_v30 = vld [vmem:[#allocation66_spill] sm:$0xff]  ;;  %v14415_v60 = vld [vmem:[#allocation48_spill] sm:$0xff] }
 0xf9b   :  { %7513 = vmatprep.subr.bf16.mxu0 %v14405_v47  ;;  %7554 = vmatprep.subr.bf16.mxu1 %v14406_v52  ;;  %v7258_v47 = vadd.f32 %v13349_v21, %v14415_v60 }
 0xf9e   :  { %7514 = vmatpush1.bf16.msra.mxu0 %v14407_v17  ;;  %7555 = vmatpush1.bf16.msra.mxu1 %v14408_v45  ;;  %v7260_v45 = vadd.f32 %v13354_v23, %v13332_v41 }
 0xf9f   :  { %7515 = vmatprep.subr.bf16.mxu0 %v14409_v19  ;;  %7556 = vmatprep.subr.bf16.mxu1 %v14410_v36  ;;  %v7301_v19 = vadd.f32 %v13356_v38, %v13336_v43 }
 0xfa2   :  { %7516 = vmatpush1.bf16.msra.mxu0 %v14411_v55  ;;  %7557 = vmatpush1.bf16.msra.mxu1 %v14412_v46 }
 0xfa3   :  { %7613 = vmatprep.subr.bf16.mxu0 %v14413_v32  ;;  %7654 = vmatprep.subr.bf16.mxu1 %v14414_v30 }
0x1025   :  { %v7340_v52 = vpop.f32.mrf.mxu0  ;;  %v7381_v33 = vpop.f32.mrf.mxu1 }
0x1026   :  { %v7388_v36 = vadd.f32 %v7340_v52, %v7258_v47  ;;  %v7390_v41 = vadd.f32 %v7381_v33, %v7299_v51 }
0x1027   :  { %v7342_v17 = vpop.f32.mrf.mxu0  ;;  %v7383_v55 = vpop.f32.mrf.mxu1 }
0x1028   :  { %v7392_v0 = vpack.c.bf16 %v7388_v36, %v7388_v36  ;;  %v7389_v46 = vadd.f32 %v7342_v17, %v7260_v45  ;;  %v7391_v12 = vadd.f32 %v7383_v55, %v7301_v19  ;;  %v7394_v38 = vpack.c.bf16 %v7390_v41, %v7390_v41 }
0x1029   :  { %v7344_v32 = vpop.f32.mrf.mxu0  ;;  %v7385_v5 = vpop.f32.mrf.mxu1 }
0x102a   :  { %v7396_v30 = vmul.bf16 1056980736, %v7392_v0  ;;  %v7393_v6 = vpack.c.bf16 %v7389_v46, %v7389_v46  ;;  %v7395_v20 = vpack.c.bf16 %v7391_v12, %v7391_v12  ;;  %v7398_v52 = vmul.bf16 1056980736, %v7394_v38 }
0x102b   :  { %v7345_v21 = vpop.f32.mrf.mxu0  ;;  %v7386_v60 = vpop.f32.mrf.mxu1 }
0x102c   :  { %10408 = vtanh.bf16 %v7396_v30  ;;  %v7397_v23 = vmul.bf16 1056980736, %v7393_v6 }
0x102e   :  { %10410 = vtanh.bf16 %v7397_v23 }
0x102f   :  { %10412 = vtanh.bf16 %v7395_v20 }
0x1030   :  { %10414 = vtanh.bf16 %v7398_v52 }
0x103a   :  { %v10409_v36 = vpop.eup %10408 }
0x103b   :  { %v7402_v17 = vmul.bf16 1056980736, %v10409_v36 }
0x103c   :  { %v10411_v45 = vpop.eup %10410 }
0x103d   :  { %v10413_v5 = vpop.eup %10412  ;;  %v7405_v0 = vadd.bf16 1056980736, %v7402_v17  ;;  %v7403_v19 = vmul.bf16 1056980736, %v10411_v45 }
0x103e   :  { %v7412_v46 = vunpack.c.l.bf16 %v10413_v5  ;;  %v10415_v30 = vpop.eup %10414 }
0x103f   :  { %v7408_v12 = vunpack.c.l.bf16 %v7405_v0  ;;  %v7406_v55 = vadd.bf16 1056980736, %v7403_v19  ;;  %v7404_v23 = vmul.bf16 1056980736, %v10415_v30  ;;  %v14416_v0 = vld [vmem:[#allocation60_spill] sm:$0xff]  ;;  %v14419_v19 = vld [vmem:[#allocation69_spill] sm:$0xff] }
0x1040   :  { %v14430_v30 = vld [vmem:[#allocation77_spill] sm:$0xff] }
0x1041   :  { %v7409_v32 = vunpack.c.l.bf16 %v7406_v55  ;;  %v7414_v60 = vmul.f32 %v7412_v46, %v7408_v12  ;;  %v7407_v36 = vadd.bf16 1056980736, %v7404_v23  ;;  %v14420_v12 = vld [vmem:[#allocation70_spill] sm:$0xff]  ;;  %v14425_v55 = vld [vmem:[#allocation57_spill] sm:$0xff]  ;;  %v14433_v23 = vld [vmem:[#allocation55_spill] sm:$0xff] }
0x1042   :  { %v14426_v46 = vld [vmem:[#allocation58_spill] sm:$0xff] }
0x1043   :  { %v7413_v26 = vmul.f32 %v7409_v32, %v13347_v16  ;;  %v7410_v16 = vunpack.c.l.bf16 %v7407_v36  ;;  %v14427_v32 = vld [vmem:[#allocation76_spill] sm:$0xff]  ;;  %v14436_v36 = vld [vmem:[#allocation54_spill] sm:$0xff] }
0x1045   :  { %v13437_v6 = vadd.f32 %v7414_v60, %v7413_v26  ;;  %v13439_v51 = vpop.f32.mrf.mxu0  ;;  %v13441_v41 = vpop.f32.mrf.mxu1  ;;  %v14428_v60 = vld [vmem:[#allocation78_spill] sm:$0xff]  ;;  %v14429_v26 = vld [vmem:[#allocation79_spill] sm:$0xff] }
0x1047   :  { %10416 = vtanh.f32 %v13437_v6  ;;  %v13444_v20 = vpop.f32.mrf.mxu0  ;;  %v13446_v33 = vpop.f32.mrf.mxu1 }
0x1049   :  { %v7456_v47 = vpop.f32.mrf.mxu0  ;;  %v7497_v21 = vpop.f32.mrf.mxu1 }
0x104a   :  { %v14431_v47 = vld [vmem:[#allocation81_spill] sm:$0xff]  ;;  %v14432_v21 = vld [vmem:[#allocation80_spill] sm:$0xff] }
0x104b   :  { %v7457_v38 = vpop.f32.mrf.mxu0  ;;  %v7498_v52 = vpop.f32.mrf.mxu1 }
0x104c   :  { %v14434_v38 = vld [vmem:[#allocation53_spill] sm:$0xff]  ;;  %v14435_v52 = vld [vmem:[#allocation56_spill] sm:$0xff] }
0x1054   :  { %v10417_v17 = vpop.eup %10416 }
0x1055   :  { %v7417_v45 = vmul.f32 %v10417_v17, %v7410_v16  ;;  %v14437_v16 = vld [vmem:[#allocation51_spill] sm:$0xff]  ;;  %v14438_v17 = vld [vmem:[#allocation49_spill] sm:$0xff] }
0x1057   :  { %v7500_v5 = vpack.c.bf16 %v7417_v45, %v7417_v45  ;;  %v14439_v45 = vld [vmem:[#allocation52_spill] sm:$0xff] }
0x1059   :  { %7534 = vmatmul.mubr.bf16.vlgmr.msra.gmra.mxu0 %v7500_v5  ;;  %7575 = vmatmul.mubr.bf16.vlgmr.msra.gmra.mxu1 %v7500_v5  ;;  %v14440_v5 = vld [vmem:[#allocation50_spill] sm:$0xff] }
0x105a   :  { %7614 = vmatpush1.bf16.msra.mxu0 %v12993_v27  ;;  %7655 = vmatpush1.bf16.msra.mxu1 %v12997_v34 }
0x105b   :  { %7615 = vmatprep.subr.bf16.mxu0 %v13002_v62  ;;  %7656 = vmatprep.subr.bf16.mxu1 %v13006_v22 }
0x105c   :  { %7645 = vmatprep.mubr.bf16.mxu0 %v14256_v15  ;;  %7686 = vmatprep.mubr.bf16.mxu1 %v14256_v15 }
0x105e   :  { %7616 = vmatpush1.bf16.msra.mxu0 %v13015_v61  ;;  %7657 = vmatpush1.bf16.msra.mxu1 %v13019_v53 }
0x105f   :  { %7617 = vmatprep.subr.bf16.mxu0 %v13025_v8  ;;  %7658 = vmatprep.subr.bf16.mxu1 %v13029_v59 }
0x1062   :  { %7618 = vmatpush1.bf16.msra.mxu0 %v13035_v58  ;;  %7659 = vmatpush1.bf16.msra.mxu1 %v13039_v37 }
0x1063   :  { %7619 = vmatprep.subr.bf16.mxu0 %v13045_v2  ;;  %7660 = vmatprep.subr.bf16.mxu1 %v13049_v42 }
0x1066   :  { %7620 = vmatpush1.bf16.msra.mxu0 %v13055_v1  ;;  %7661 = vmatpush1.bf16.msra.mxu1 %v13059_v56 }
0x1067   :  { %7621 = vmatprep.subr.bf16.mxu0 %v13065_v48  ;;  %7662 = vmatprep.subr.bf16.mxu1 %v13069_v10 }
0x106a   :  { %7622 = vmatpush1.bf16.msra.mxu0 %v13075_v57  ;;  %7663 = vmatpush1.bf16.msra.mxu1 %v13079_v39 }
0x106b   :  { %7623 = vmatprep.subr.bf16.mxu0 %v13085_v31  ;;  %7664 = vmatprep.subr.bf16.mxu1 %v13089_v14 }
0x106e   :  { %7624 = vmatpush1.bf16.msra.mxu0 %v13095_v9  ;;  %7665 = vmatpush1.bf16.msra.mxu1 %v13099_v4 }
0x106f   :  { %7625 = vmatprep.subr.bf16.mxu0 %v13105_v25  ;;  %7666 = vmatprep.subr.bf16.mxu1 %v13109_v63 }
0x1072   :  { %7626 = vmatpush1.bf16.msra.mxu0 %v13115_v28  ;;  %7667 = vmatpush1.bf16.msra.mxu1 %v13119_v54 }
0x1073   :  { %7627 = vmatprep.subr.bf16.mxu0 %v13125_v50  ;;  %7668 = vmatprep.subr.bf16.mxu1 %v13129_v13 }
0x1076   :  { %7628 = vmatpush1.bf16.msra.mxu0 %v13135_v35  ;;  %7669 = vmatpush1.bf16.msra.mxu1 %v13139_v29 }
0x1077   :  { %7696 = vmatprep.subr.bf16.mxu0 %v13143_v40  ;;  %7737 = vmatprep.subr.bf16.mxu1 %v13145_v44  ;;  %v14417_v40 = vld [vmem:[#allocation67_spill] sm:$0xff]  ;;  %v14418_v44 = vld [vmem:[#allocation68_spill] sm:$0xff] }
0x1079   :  { %7646 = vmatmul.mubr.bf16.vlgmr.msra.gmra.mxu0 %v14416_v0  ;;  %7687 = vmatmul.mubr.bf16.vlgmr.msra.gmra.mxu1 %v14416_v0  ;;  %v14441_v0 = vld [vmem:[#allocation47_spill] sm:$0xff] }
0x107a   :  { %7697 = vmatpush1.bf16.msra.mxu0 %v13147_v7  ;;  %7738 = vmatpush1.bf16.msra.mxu1 %v13149_v18  ;;  %v14421_v7 = vld [vmem:[#allocation71_spill] sm:$0xff]  ;;  %v14422_v18 = vld [vmem:[#allocation72_spill] sm:$0xff] }
0x107b   :  { %7698 = vmatprep.subr.bf16.mxu0 %v13151_v24  ;;  %7739 = vmatprep.subr.bf16.mxu1 %v13153_v49  ;;  %v14423_v24 = vld [vmem:[#allocation73_spill] sm:$0xff]  ;;  %v14424_v49 = vld [vmem:[#allocation74_spill] sm:$0xff] }
0x107c   :  { %7728 = vmatprep.mubr.bf16.mxu0 %v14256_v15  ;;  %7769 = vmatprep.mubr.bf16.mxu1 %v14256_v15 }
0x107e   :  { %7699 = vmatpush1.bf16.msra.mxu0 %v13163_v3  ;;  %7740 = vmatpush1.bf16.msra.mxu1 %v14417_v40 }
0x107f   :  { %7700 = vmatprep.subr.bf16.mxu0 %v14418_v44  ;;  %7741 = vmatprep.subr.bf16.mxu1 %v14419_v19 }
0x1082   :  { %7701 = vmatpush1.bf16.msra.mxu0 %v14420_v12  ;;  %7742 = vmatpush1.bf16.msra.mxu1 %v14421_v7 }
0x1083   :  { %7702 = vmatprep.subr.bf16.mxu0 %v14422_v18  ;;  %7743 = vmatprep.subr.bf16.mxu1 %v14423_v24  ;;  %v7494_v24 = vadd.f32 %v13441_v41, %v13343_v11 }
0x1086   :  { %7703 = vmatpush1.bf16.msra.mxu0 %v14424_v49  ;;  %7744 = vmatpush1.bf16.msra.mxu1 %v14425_v55 }
0x1087   :  { %7704 = vmatprep.subr.bf16.mxu0 %v14426_v46  ;;  %7745 = vmatprep.subr.bf16.mxu1 %v14427_v32 }
0x108a   :  { %7705 = vmatpush1.bf16.msra.mxu0 %v14428_v60  ;;  %7746 = vmatpush1.bf16.msra.mxu1 %v14429_v26 }
0x108b   :  { %7706 = vmatprep.subr.bf16.mxu0 %v14430_v30  ;;  %7747 = vmatprep.subr.bf16.mxu1 %v14431_v47  ;;  %v14442_v47 = vld [vmem:[#allocation65_spill] sm:$0xff] }
0x108e   :  { %7707 = vmatpush1.bf16.msra.mxu0 %v14432_v21  ;;  %7748 = vmatpush1.bf16.msra.mxu1 %v14433_v23  ;;  %v14443_v21 = vld [vmem:[#allocation66_spill] sm:$0xff]  ;;  %v14444_v23 = vld [vmem:[#allocation48_spill] sm:$0xff] }
0x108f   :  { %7708 = vmatprep.subr.bf16.mxu0 %v14434_v38  ;;  %7749 = vmatprep.subr.bf16.mxu1 %v14435_v52  ;;  %v7453_v38 = vadd.f32 %v13439_v51, %v14444_v23 }
0x1092   :  { %7709 = vmatpush1.bf16.msra.mxu0 %v14436_v36  ;;  %7750 = vmatpush1.bf16.msra.mxu1 %v14437_v16  ;;  %v14445_v36 = vld [vmem:[#allocation46_spill] sm:$0xff] }
0x1093   :  { %7710 = vmatprep.subr.bf16.mxu0 %v14438_v17  ;;  %7751 = vmatprep.subr.bf16.mxu1 %v14439_v45  ;;  %v7455_v16 = vadd.f32 %v13444_v20, %v14445_v36  ;;  %v7496_v17 = vadd.f32 %v13446_v33, %v13336_v43 }
0x1096   :  { %7711 = vmatpush1.bf16.msra.mxu0 %v14440_v5  ;;  %7752 = vmatpush1.bf16.msra.mxu1 %v14441_v0 }
0x1097   :  { %7808 = vmatprep.subr.bf16.mxu0 %v14442_v47  ;;  %7849 = vmatprep.subr.bf16.mxu1 %v14443_v21 }
0x1119   :  { %v7535_v52 = vpop.f32.mrf.mxu0  ;;  %v7576_v30 = vpop.f32.mrf.mxu1 }
0x111a   :  { %v7583_v45 = vadd.f32 %v7535_v52, %v7453_v38  ;;  %v7585_v36 = vadd.f32 %v7576_v30, %v7494_v24 }
0x111b   :  { %v7537_v26 = vpop.f32.mrf.mxu0  ;;  %v7578_v5 = vpop.f32.mrf.mxu1 }
0x111c   :  { %v7587_v60 = vpack.c.bf16 %v7583_v45, %v7583_v45  ;;  %v7584_v0 = vadd.f32 %v7537_v26, %v7455_v16  ;;  %v7586_v32 = vadd.f32 %v7578_v5, %v7496_v17  ;;  %v7589_v33 = vpack.c.bf16 %v7585_v36, %v7585_v36 }
0x111d   :  { %v7539_v47 = vpop.f32.mrf.mxu0  ;;  %v7580_v46 = vpop.f32.mrf.mxu1 }
0x111e   :  { %v7591_v21 = vmul.bf16 1056980736, %v7587_v60  ;;  %v7588_v55 = vpack.c.bf16 %v7584_v0, %v7584_v0  ;;  %v7590_v49 = vpack.c.bf16 %v7586_v32, %v7586_v32  ;;  %v7593_v38 = vmul.bf16 1056980736, %v7589_v33 }
0x111f   :  { %v7540_v51 = vpop.f32.mrf.mxu0  ;;  %v7581_v23 = vpop.f32.mrf.mxu1 }
0x1120   :  { %10418 = vtanh.bf16 %v7591_v21  ;;  %v7592_v20 = vmul.bf16 1056980736, %v7588_v55 }
0x1122   :  { %10420 = vtanh.bf16 %v7592_v20 }
0x1123   :  { %10422 = vtanh.bf16 %v7590_v49 }
0x1124   :  { %10424 = vtanh.bf16 %v7593_v38 }
0x112e   :  { %v10419_v52 = vpop.eup %10418 }
0x112f   :  { %v7597_v26 = vmul.bf16 1056980736, %v10419_v52 }
0x1130   :  { %v10421_v47 = vpop.eup %10420 }
0x1131   :  { %v10423_v46 = vpop.eup %10422  ;;  %v7600_v60 = vadd.bf16 1056980736, %v7597_v26  ;;  %v7598_v16 = vmul.bf16 1056980736, %v10421_v47 }
0x1132   :  { %v7607_v23 = vunpack.c.l.bf16 %v10423_v46  ;;  %v10425_v36 = vpop.eup %10424 }
0x1133   :  { %v7603_v32 = vunpack.c.l.bf16 %v7600_v60  ;;  %v7601_v17 = vadd.bf16 1056980736, %v7598_v16  ;;  %v7599_v20 = vmul.bf16 1056980736, %v10425_v36  ;;  %v13570_v60 = vld [vmem:[#allocation3 + $0xe4] ss:$16 sps:$4 sm:$0xff]  }
0x1134   :  { %v13573_v16 = vld [vmem:[#allocation3 + $0xec] ss:$16 sps:$4 sm:$0xff]  }
0x1135   :  { %v7604_v45 = vunpack.c.l.bf16 %v7601_v17  ;;  %v7609_v5 = vmul.f32 %v7607_v23, %v7603_v32  ;;  %v7602_v52 = vadd.bf16 1056980736, %v7599_v20  ;;  %v14446_v32 = vld [vmem:[#allocation61_spill] sm:$0xff]  ;;  %v14448_v36 = vld [vmem:[#allocation74_spill] sm:$0xff] }
0x1136   :  { %v13578_v17 = vld [vmem:[#allocation3 + $0xe0] ss:$16 sps:$4 sm:$0xff]   ;;  %v13581_v23 = vld [vmem:[#allocation3 + $0xe8] ss:$16 sps:$4 sm:$0xff]  }
0x1137   :  { %v7608_v41 = vmul.f32 %v7604_v45, %v13437_v6  ;;  %v7605_v6 = vunpack.c.l.bf16 %v7602_v52  ;;  %v13584_v45 = vld [vmem:[#allocation3 + $0xc4] ss:$16 sps:$4 sm:$0xff]  }
0x1138   :  { %v14458_v20 = vld [vmem:[#allocation53_spill] sm:$0xff]  ;;  %v14461_v52 = vld [vmem:[#allocation51_spill] sm:$0xff] }
0x1139   :  { %v13527_v55 = vadd.f32 %v7609_v5, %v7608_v41  ;;  %v13529_v24 = vpop.f32.mrf.mxu0  ;;  %v13531_v49 = vpop.f32.mrf.mxu1  ;;  %v13587_v5 = vld [vmem:[#allocation3 + $0xcc] ss:$16 sps:$4 sm:$0xff]   ;;  %v14447_v41 = vld [vmem:[#allocation73_spill] sm:$0xff] }
0x113b   :  { %10426 = vtanh.f32 %v13527_v55  ;;  %v13534_v30 = vpop.f32.mrf.mxu0  ;;  %v13536_v21 = vpop.f32.mrf.mxu1 }
0x113d   :  { %v7651_v0 = vpop.f32.mrf.mxu0  ;;  %v7692_v51 = vpop.f32.mrf.mxu1 }
0x113e   :  { %v14449_v0 = vld [vmem:[#allocation57_spill] sm:$0xff]  ;;  %v14450_v51 = vld [vmem:[#allocation58_spill] sm:$0xff] }
0x113f   :  { %v7652_v33 = vpop.f32.mrf.mxu0  ;;  %v7693_v38 = vpop.f32.mrf.mxu1 }
0x1140   :  { %v14459_v33 = vld [vmem:[#allocation56_spill] sm:$0xff]  ;;  %v14460_v38 = vld [vmem:[#allocation54_spill] sm:$0xff] }
0x1148   :  { %v10427_v26 = vpop.eup %10426 }
0x1149   :  { %v7612_v47 = vmul.f32 %v10427_v26, %v7605_v6  ;;  %v14462_v6 = vld [vmem:[#allocation49_spill] sm:$0xff]  ;;  %v14463_v26 = vld [vmem:[#allocation52_spill] sm:$0xff] }
0x114b   :  { %v7695_v46 = vpack.c.bf16 %v7612_v47, %v7612_v47  ;;  %v14464_v47 = vld [vmem:[#allocation50_spill] sm:$0xff] }
0x114d   :  { %7729 = vmatmul.mubr.bf16.vlgmr.msra.gmra.mxu0 %v7695_v46  ;;  %7770 = vmatmul.mubr.bf16.vlgmr.msra.gmra.mxu1 %v7695_v46  ;;  %v14465_v46 = vld [vmem:[#allocation47_spill] sm:$0xff] }
0x114e   :  { %7809 = vmatpush1.bf16.msra.mxu0 %v12993_v27  ;;  %7850 = vmatpush1.bf16.msra.mxu1 %v12997_v34 }
0x114f   :  { %7810 = vmatprep.subr.bf16.mxu0 %v13002_v62  ;;  %7851 = vmatprep.subr.bf16.mxu1 %v13006_v22 }
0x1150   :  { %7840 = vmatprep.mubr.bf16.mxu0 %v14256_v15  ;;  %7881 = vmatprep.mubr.bf16.mxu1 %v14256_v15 }
0x1152   :  { %7811 = vmatpush1.bf16.msra.mxu0 %v13015_v61  ;;  %7852 = vmatpush1.bf16.msra.mxu1 %v13019_v53 }
0x1153   :  { %7812 = vmatprep.subr.bf16.mxu0 %v13025_v8  ;;  %7853 = vmatprep.subr.bf16.mxu1 %v13029_v59 }
0x1156   :  { %7813 = vmatpush1.bf16.msra.mxu0 %v13035_v58  ;;  %7854 = vmatpush1.bf16.msra.mxu1 %v13039_v37 }
0x1157   :  { %7814 = vmatprep.subr.bf16.mxu0 %v13045_v2  ;;  %7855 = vmatprep.subr.bf16.mxu1 %v13049_v42 }
0x115a   :  { %7815 = vmatpush1.bf16.msra.mxu0 %v13055_v1  ;;  %7856 = vmatpush1.bf16.msra.mxu1 %v13059_v56 }
0x115b   :  { %7816 = vmatprep.subr.bf16.mxu0 %v13065_v48  ;;  %7857 = vmatprep.subr.bf16.mxu1 %v13069_v10 }
0x115e   :  { %7817 = vmatpush1.bf16.msra.mxu0 %v13075_v57  ;;  %7858 = vmatpush1.bf16.msra.mxu1 %v13079_v39 }
0x115f   :  { %7818 = vmatprep.subr.bf16.mxu0 %v13085_v31  ;;  %7859 = vmatprep.subr.bf16.mxu1 %v13089_v14 }
0x1162   :  { %7819 = vmatpush1.bf16.msra.mxu0 %v13095_v9  ;;  %7860 = vmatpush1.bf16.msra.mxu1 %v13099_v4 }
0x1163   :  { %7820 = vmatprep.subr.bf16.mxu0 %v13105_v25  ;;  %7861 = vmatprep.subr.bf16.mxu1 %v13109_v63 }
0x1166   :  { %7821 = vmatpush1.bf16.msra.mxu0 %v13115_v28  ;;  %7862 = vmatpush1.bf16.msra.mxu1 %v13119_v54 }
0x1167   :  { %7822 = vmatprep.subr.bf16.mxu0 %v13125_v50  ;;  %7863 = vmatprep.subr.bf16.mxu1 %v13129_v13 }
0x116a   :  { %7823 = vmatpush1.bf16.msra.mxu0 %v13135_v35  ;;  %7864 = vmatpush1.bf16.msra.mxu1 %v13139_v29 }
0x116b   :  { %7891 = vmatprep.subr.bf16.mxu0 %v13570_v60  ;;  %7932 = vmatprep.subr.bf16.mxu1 %v13573_v16 }
0x116d   :  { %7841 = vmatmul.mubr.bf16.vlgmr.msra.gmra.mxu0 %v14446_v32  ;;  %7882 = vmatmul.mubr.bf16.vlgmr.msra.gmra.mxu1 %v14446_v32  ;;  %v14466_v32 = vld [vmem:[#allocation65_spill] sm:$0xff] }
0x116e   :  { %7892 = vmatpush1.bf16.msra.mxu0 %v13578_v17  ;;  %7933 = vmatpush1.bf16.msra.mxu1 %v13581_v23 }
0x116f   :  { %7893 = vmatprep.subr.bf16.mxu0 %v13584_v45  ;;  %7934 = vmatprep.subr.bf16.mxu1 %v13587_v5 }
0x1170   :  { %7923 = vmatprep.mubr.bf16.mxu0 %v14256_v15  ;;  %7964 = vmatprep.mubr.bf16.mxu1 %v14256_v15 }
0x1172   :  { %7894 = vmatpush1.bf16.msra.mxu0 %v13163_v3  ;;  %7935 = vmatpush1.bf16.msra.mxu1 %v14417_v40  ;;  %v14451_v3 = vld [vmem:[#allocation76_spill] sm:$0xff]  ;;  %v14452_v40 = vld [vmem:[#allocation78_spill] sm:$0xff] }
0x1173   :  { %7895 = vmatprep.subr.bf16.mxu0 %v14418_v44  ;;  %7936 = vmatprep.subr.bf16.mxu1 %v14419_v19  ;;  %v14453_v44 = vld [vmem:[#allocation79_spill] sm:$0xff]  ;;  %v14454_v19 = vld [vmem:[#allocation77_spill] sm:$0xff] }
0x1176   :  { %7896 = vmatpush1.bf16.msra.mxu0 %v14420_v12  ;;  %7937 = vmatpush1.bf16.msra.mxu1 %v14421_v7  ;;  %v14455_v12 = vld [vmem:[#allocation81_spill] sm:$0xff]  ;;  %v14456_v7 = vld [vmem:[#allocation80_spill] sm:$0xff] }
0x1177   :  { %7897 = vmatprep.subr.bf16.mxu0 %v14422_v18  ;;  %7938 = vmatprep.subr.bf16.mxu1 %v14447_v41  ;;  %v14457_v18 = vld [vmem:[#allocation55_spill] sm:$0xff]  ;;  %v14467_v41 = vld [vmem:[#allocation66_spill] sm:$0xff] }
0x117a   :  { %7898 = vmatpush1.bf16.msra.mxu0 %v14448_v36  ;;  %7939 = vmatpush1.bf16.msra.mxu1 %v14449_v0  ;;  %v14468_v36 = vld [vmem:[#allocation48_spill] sm:$0xff] }
0x117b   :  { %7899 = vmatprep.subr.bf16.mxu0 %v14450_v51  ;;  %7940 = vmatprep.subr.bf16.mxu1 %v14451_v3  ;;  %v7648_v0 = vadd.f32 %v13529_v24, %v14468_v36 }
0x117e   :  { %7900 = vmatpush1.bf16.msra.mxu0 %v14452_v40  ;;  %7941 = vmatpush1.bf16.msra.mxu1 %v14453_v44  ;;  %v14469_v40 = vld [vmem:[#allocation46_spill] sm:$0xff] }
0x117f   :  { %7901 = vmatprep.subr.bf16.mxu0 %v14454_v19  ;;  %7942 = vmatprep.subr.bf16.mxu1 %v14455_v12  ;;  %v7650_v44 = vadd.f32 %v13534_v30, %v14469_v40  ;;  %v7691_v19 = vadd.f32 %v13536_v21, %v13336_v43 }
0x1182   :  { %7902 = vmatpush1.bf16.msra.mxu0 %v14456_v7  ;;  %7943 = vmatpush1.bf16.msra.mxu1 %v14457_v18 }
0x1183   :  { %7903 = vmatprep.subr.bf16.mxu0 %v14458_v20  ;;  %7944 = vmatprep.subr.bf16.mxu1 %v14459_v33 }
0x1186   :  { %7904 = vmatpush1.bf16.msra.mxu0 %v14460_v38  ;;  %7945 = vmatpush1.bf16.msra.mxu1 %v14461_v52 }
0x1187   :  { %7905 = vmatprep.subr.bf16.mxu0 %v14462_v6  ;;  %7946 = vmatprep.subr.bf16.mxu1 %v14463_v26 }
0x118a   :  { %7906 = vmatpush1.bf16.msra.mxu0 %v14464_v47  ;;  %7947 = vmatpush1.bf16.msra.mxu1 %v14465_v46 }
0x118b   :  { %8003 = vmatprep.subr.bf16.mxu0 %v14466_v32  ;;  %8044 = vmatprep.subr.bf16.mxu1 %v14467_v41  ;;  %v7689_v41 = vadd.f32 %v13531_v49, %v13343_v11 }
0x120d   :  { %v7730_v51 = vpop.f32.mrf.mxu0  ;;  %v7771_v3 = vpop.f32.mrf.mxu1 }
0x120e   :  { %v7778_v12 = vadd.f32 %v7730_v51, %v7648_v0  ;;  %v7780_v40 = vadd.f32 %v7771_v3, %v7689_v41 }
0x120f   :  { %v7732_v7 = vpop.f32.mrf.mxu0  ;;  %v7773_v18 = vpop.f32.mrf.mxu1 }
0x1210   :  { %v7782_v20 = vpack.c.bf16 %v7778_v12, %v7778_v12  ;;  %v7779_v33 = vadd.f32 %v7732_v7, %v7650_v44  ;;  %v7781_v38 = vadd.f32 %v7773_v18, %v7691_v19  ;;  %v7784_v21 = vpack.c.bf16 %v7780_v40, %v7780_v40 }
0x1211   :  { %v7734_v52 = vpop.f32.mrf.mxu0  ;;  %v7775_v6 = vpop.f32.mrf.mxu1 }
0x1212   :  { %v7786_v26 = vmul.bf16 1056980736, %v7782_v20  ;;  %v7783_v47 = vpack.c.bf16 %v7779_v33, %v7779_v33  ;;  %v7785_v46 = vpack.c.bf16 %v7781_v38, %v7781_v38  ;;  %v7788_v0 = vmul.bf16 1056980736, %v7784_v21 }
0x1213   :  { %v7735_v24 = vpop.f32.mrf.mxu0  ;;  %v7776_v36 = vpop.f32.mrf.mxu1 }
0x1214   :  { %10428 = vtanh.bf16 %v7786_v26  ;;  %v7787_v30 = vmul.bf16 1056980736, %v7783_v47 }
0x1216   :  { %10430 = vtanh.bf16 %v7787_v30 }
0x1217   :  { %10432 = vtanh.bf16 %v7785_v46 }
0x1218   :  { %10434 = vtanh.bf16 %v7788_v0 }
0x1222   :  { %v10429_v51 = vpop.eup %10428 }
0x1223   :  { %v7792_v44 = vmul.bf16 1056980736, %v10429_v51 }
0x1224   :  { %v10431_v19 = vpop.eup %10430 }
0x1225   :  { %v10433_v12 = vpop.eup %10432  ;;  %v7795_v7 = vadd.bf16 1056980736, %v7792_v44  ;;  %v7793_v18 = vmul.bf16 1056980736, %v10431_v19 }
0x1226   :  { %v7802_v36 = vunpack.c.l.bf16 %v10433_v12  ;;  %v10435_v47 = vpop.eup %10434 }
0x1227   :  { %v7798_v20 = vunpack.c.l.bf16 %v7795_v7  ;;  %v7796_v33 = vadd.bf16 1056980736, %v7793_v18  ;;  %v7794_v30 = vmul.bf16 1056980736, %v10435_v47  ;;  %v14471_v7 = vld [vmem:[#allocation62_spill] sm:$0xff] }
0x1228   :  { %v13686_v18 = vld [vmem:[#allocation3 + $0xc0] ss:$16 sps:$4 sm:$0xff]   ;;  %v13707_v47 = vld [vmem:[#allocation3 + $0x8c] ss:$16 sps:$4 sm:$0xff]  }
0x1229   :  { %v7799_v38 = vunpack.c.l.bf16 %v7796_v33  ;;  %v7804_v52 = vmul.f32 %v7802_v36, %v7798_v20  ;;  %v7797_v51 = vadd.bf16 1056980736, %v7794_v30  ;;  %v13689_v20 = vld [vmem:[#allocation3 + $0xc8] ss:$16 sps:$4 sm:$0xff]   ;;  %v13692_v33 = vld [vmem:[#allocation3 + $0xa4] ss:$16 sps:$4 sm:$0xff]  }
0x122a   :  { %14472 = vst [vmem:[#allocation41_spill] sm:$0xff] %v13689_v20  ;;  %14473 = vst [vmem:[#allocation44_spill] sm:$0xff] %v13692_v33  ;;  %v13695_v36 = vld [vmem:[#allocation3 + $0xac] ss:$16 sps:$4 sm:$0xff]   ;;  %v13716_v30 = vld [vmem:[#allocation3 + $0x64] ss:$16 sps:$4 sm:$0xff]  }
0x122b   :  { %v7803_v49 = vmul.f32 %v7799_v38, %v13527_v55  ;;  %v7800_v55 = vunpack.c.l.bf16 %v7797_v51  ;;  %14474 = vst [vmem:[#allocation42_spill] sm:$0xff] %v13695_v36  ;;  %v13698_v38 = vld [vmem:[#allocation3 + $0xa0] ss:$16 sps:$4 sm:$0xff]   ;;  %14478 = vst [vmem:[#allocation38_spill] sm:$0xff] %v13707_v47  ;;  %v13725_v51 = vld [vmem:[#allocation3 + $0x68] ss:$16 sps:$4 sm:$0xff]  }
0x122c   :  { %14475 = vst [vmem:[#allocation39_spill] sm:$0xff] %v13698_v38  ;;  %14481 = vst [vmem:[#allocation36_spill] sm:$0xff] %v13716_v30 }
0x122d   :  { %v13629_v6 = vadd.f32 %v7804_v52, %v7803_v49  ;;  %v13631_v41 = vpop.f32.mrf.mxu0  ;;  %v13633_v3 = vpop.f32.mrf.mxu1  ;;  %v13701_v52 = vld [vmem:[#allocation3 + $0xa8] ss:$16 sps:$4 sm:$0xff]   ;;  %v13704_v49 = vld [vmem:[#allocation3 + $0x84] ss:$16 sps:$4 sm:$0xff]   ;;  %14484 = vst [vmem:[#allocation29_spill] sm:$0xff] %v13725_v51 }
0x122e   :  { %14476 = vst [vmem:[#allocation37_spill] sm:$0xff] %v13701_v52  ;;  %14477 = vst [vmem:[#allocation40_spill] sm:$0xff] %v13704_v49 }
0x122f   :  { %10436 = vtanh.f32 %v13629_v6  ;;  %v13636_v40 = vpop.f32.mrf.mxu0  ;;  %v13638_v26 = vpop.f32.mrf.mxu1 }
0x1231   :  { %v7846_v46 = vpop.f32.mrf.mxu0  ;;  %v7887_v24 = vpop.f32.mrf.mxu1 }
0x1232   :  { %v13710_v46 = vld [vmem:[#allocation3 + $0x80] ss:$16 sps:$4 sm:$0xff]   ;;  %v13713_v24 = vld [vmem:[#allocation3 + $0x88] ss:$16 sps:$4 sm:$0xff]  }
0x1233   :  { %v7847_v21 = vpop.f32.mrf.mxu0  ;;  %v7888_v0 = vpop.f32.mrf.mxu1  ;;  %14479 = vst [vmem:[#allocation35_spill] sm:$0xff] %v13710_v46  ;;  %14480 = vst [vmem:[#allocation33_spill] sm:$0xff] %v13713_v24 }
0x1234   :  { %v13719_v21 = vld [vmem:[#allocation3 + $0x6c] ss:$16 sps:$4 sm:$0xff]   ;;  %v13722_v0 = vld [vmem:[#allocation3 + $0x60] ss:$16 sps:$4 sm:$0xff]  }
0x1235   :  { %14482 = vst [vmem:[#allocation34_spill] sm:$0xff] %v13719_v21  ;;  %14483 = vst [vmem:[#allocation31_spill] sm:$0xff] %v13722_v0 }
0x123c   :  { %v10437_v44 = vpop.eup %10436 }
0x123d   :  { %v13640_v19 = vmul.f32 %v10437_v44, %v7800_v55  ;;  %v13728_v55 = vld [vmem:[#allocation3 + $0x44] ss:$16 sps:$4 sm:$0xff]   ;;  %v13731_v44 = vld [vmem:[#allocation3 + $0x4c] ss:$16 sps:$4 sm:$0xff]  }
0x123e   :  { %14485 = vst [vmem:[#allocation32_spill] sm:$0xff] %v13728_v55  ;;  %14486 = vst [vmem:[#allocation30_spill] sm:$0xff] %v13731_v44 }
0x123f   :  { %14470 = vst [vmem:[#allocation43_spill] sm:$0xff] %v13640_v19  ;;  %v7890_v12 = vpack.c.bf16 %v13640_v19, %v13640_v19  ;;  %v13740_v19 = vld [vmem:[#allocation3 + $0x24] ss:$16 sps:$4 sm:$0xff]  }
0x1240   :  { %14489 = vst [vmem:[#allocation28_spill] sm:$0xff] %v13740_v19 }
0x1241   :  { %7924 = vmatmul.mubr.bf16.vlgmr.msra.gmra.mxu0 %v7890_v12  ;;  %7965 = vmatmul.mubr.bf16.vlgmr.msra.gmra.mxu1 %v7890_v12  ;;  %v13734_v12 = vld [vmem:[#allocation3 + $0x40] ss:$16 sps:$4 sm:$0xff]  }
0x1242   :  { %8004 = vmatpush1.bf16.msra.mxu0 %v12993_v27  ;;  %8045 = vmatpush1.bf16.msra.mxu1 %v12997_v34  ;;  %14487 = vst [vmem:[#allocation27_spill] sm:$0xff] %v13734_v12 }
0x1243   :  { %8005 = vmatprep.subr.bf16.mxu0 %v13002_v62  ;;  %8046 = vmatprep.subr.bf16.mxu1 %v13006_v22 }
0x1244   :  { %8035 = vmatprep.mubr.bf16.mxu0 %v14256_v15  ;;  %8076 = vmatprep.mubr.bf16.mxu1 %v14256_v15 }
0x1246   :  { %8006 = vmatpush1.bf16.msra.mxu0 %v13015_v61  ;;  %8047 = vmatpush1.bf16.msra.mxu1 %v13019_v53 }
0x1247   :  { %8007 = vmatprep.subr.bf16.mxu0 %v13025_v8  ;;  %8048 = vmatprep.subr.bf16.mxu1 %v13029_v59 }
0x124a   :  { %8008 = vmatpush1.bf16.msra.mxu0 %v13035_v58  ;;  %8049 = vmatpush1.bf16.msra.mxu1 %v13039_v37 }
0x124b   :  { %8009 = vmatprep.subr.bf16.mxu0 %v13045_v2  ;;  %8050 = vmatprep.subr.bf16.mxu1 %v13049_v42 }
0x124e   :  { %8010 = vmatpush1.bf16.msra.mxu0 %v13055_v1  ;;  %8051 = vmatpush1.bf16.msra.mxu1 %v13059_v56 }
0x124f   :  { %8011 = vmatprep.subr.bf16.mxu0 %v13065_v48  ;;  %8052 = vmatprep.subr.bf16.mxu1 %v13069_v10 }
0x1252   :  { %8012 = vmatpush1.bf16.msra.mxu0 %v13075_v57  ;;  %8053 = vmatpush1.bf16.msra.mxu1 %v13079_v39 }
0x1253   :  { %8013 = vmatprep.subr.bf16.mxu0 %v13085_v31  ;;  %8054 = vmatprep.subr.bf16.mxu1 %v13089_v14 }
0x1256   :  { %8014 = vmatpush1.bf16.msra.mxu0 %v13095_v9  ;;  %8055 = vmatpush1.bf16.msra.mxu1 %v13099_v4 }
0x1257   :  { %8015 = vmatprep.subr.bf16.mxu0 %v13105_v25  ;;  %8056 = vmatprep.subr.bf16.mxu1 %v13109_v63 }
0x125a   :  { %8016 = vmatpush1.bf16.msra.mxu0 %v13115_v28  ;;  %8057 = vmatpush1.bf16.msra.mxu1 %v13119_v54 }
0x125b   :  { %8017 = vmatprep.subr.bf16.mxu0 %v13125_v50  ;;  %8058 = vmatprep.subr.bf16.mxu1 %v13129_v13 }
0x125e   :  { %8018 = vmatpush1.bf16.msra.mxu0 %v13135_v35  ;;  %8059 = vmatpush1.bf16.msra.mxu1 %v13139_v29 }
0x125f   :  { %8086 = vmatprep.subr.bf16.mxu0 %v13570_v60  ;;  %8127 = vmatprep.subr.bf16.mxu1 %v13573_v16 }
0x1261   :  { %8036 = vmatmul.mubr.bf16.vlgmr.msra.gmra.mxu0 %v14471_v7  ;;  %8077 = vmatmul.mubr.bf16.vlgmr.msra.gmra.mxu1 %v14471_v7  ;;  %v13737_v7 = vld [vmem:[#allocation3 + $0x48] ss:$16 sps:$4 sm:$0xff]  }
0x1262   :  { %8087 = vmatpush1.bf16.msra.mxu0 %v13578_v17  ;;  %8128 = vmatpush1.bf16.msra.mxu1 %v13581_v23  ;;  %14488 = vst [vmem:[#allocation25_spill] sm:$0xff] %v13737_v7 }
0x1263   :  { %8088 = vmatprep.subr.bf16.mxu0 %v13584_v45  ;;  %8129 = vmatprep.subr.bf16.mxu1 %v13587_v5 }
0x1264   :  { %8118 = vmatprep.mubr.bf16.mxu0 %v14256_v15  ;;  %8159 = vmatprep.mubr.bf16.mxu1 %v14256_v15 }
0x1266   :  { %8089 = vmatpush1.bf16.msra.mxu0 %v13686_v18  ;;  %8130 = vmatpush1.bf16.msra.mxu1 %v13689_v20  ;;  %v7884_v20 = vadd.f32 %v13633_v3, %v13343_v11 }
0x1267   :  { %8090 = vmatprep.subr.bf16.mxu0 %v13692_v33  ;;  %8131 = vmatprep.subr.bf16.mxu1 %v13695_v36 }
0x126a   :  { %8091 = vmatpush1.bf16.msra.mxu0 %v13698_v38  ;;  %8132 = vmatpush1.bf16.msra.mxu1 %v13701_v52 }
0x126b   :  { %8092 = vmatprep.subr.bf16.mxu0 %v13704_v49  ;;  %8133 = vmatprep.subr.bf16.mxu1 %v13707_v47 }
0x126e   :  { %8093 = vmatpush1.bf16.msra.mxu0 %v13710_v46  ;;  %8134 = vmatpush1.bf16.msra.mxu1 %v13713_v24  ;;  %v7886_v24 = vadd.f32 %v13638_v26, %v13336_v43 }
0x126f   :  { %8094 = vmatprep.subr.bf16.mxu0 %v13716_v30  ;;  %8135 = vmatprep.subr.bf16.mxu1 %v13719_v21  ;;  %v14499_v30 = vld [vmem:[#allocation46_spill] sm:$0xff] }
0x1272   :  { %8095 = vmatpush1.bf16.msra.mxu0 %v13722_v0  ;;  %8136 = vmatpush1.bf16.msra.mxu1 %v13725_v51  ;;  %v13743_v51 = vld [vmem:[#allocation3 + $0x2c] ss:$16 sps:$4 sm:$0xff]  }
0x1273   :  { %8096 = vmatprep.subr.bf16.mxu0 %v13728_v55  ;;  %8137 = vmatprep.subr.bf16.mxu1 %v13731_v44  ;;  %14490 = vst [vmem:[#allocation26_spill] sm:$0xff] %v13743_v51  ;;  %v13746_v55 = vld [vmem:[#allocation3 + $0x20] ss:$16 sps:$4 sm:$0xff]   ;;  %v13749_v44 = vld [vmem:[#allocation3 + $0x28] ss:$16 sps:$4 sm:$0xff]  }
0x1274   :  { %14491 = vst [vmem:[#allocation82_spill] sm:$0xff] %v13746_v55  ;;  %14492 = vst [vmem:[#allocation75_spill] sm:$0xff] %v13749_v44 }
0x1276   :  { %8097 = vmatpush1.bf16.msra.mxu0 %v13734_v12  ;;  %8138 = vmatpush1.bf16.msra.mxu1 %v13737_v7  ;;  %v13752_v12 = vld [vmem:[#allocation3 + $0x4] ss:$16 sps:$4 sm:$0xff]   ;;  %v13755_v7 = vld [vmem:[#allocation3 + $0xc] ss:$16 sps:$4 sm:$0xff]  }
0x1277   :  { %8098 = vmatprep.subr.bf16.mxu0 %v13740_v19  ;;  %8139 = vmatprep.subr.bf16.mxu1 %v13743_v51  ;;  %14493 = vst [vmem:[#allocation64_spill] sm:$0xff] %v13752_v12  ;;  %14494 = vst [vmem:[#allocation59_spill] sm:$0xff] %v13755_v7  ;;  %v13758_v19 = vld [vmem:[#allocation3] ss:$16 sps:$4 sm:$0xff]   ;;  %v13761_v51 = vld [vmem:[#allocation3 + $0x8] ss:$16 sps:$4 sm:$0xff]  }
0x1278   :  { %14495 = vst [vmem:[#allocation60_spill] sm:$0xff] %v13758_v19  ;;  %14496 = vst [vmem:[#allocation67_spill] sm:$0xff] %v13761_v51 }
0x127a   :  { %8099 = vmatpush1.bf16.msra.mxu0 %v13746_v55  ;;  %8140 = vmatpush1.bf16.msra.mxu1 %v13749_v44  ;;  %v14497_v55 = vld [vmem:[#allocation66_spill] sm:$0xff]  ;;  %v14498_v44 = vld [vmem:[#allocation48_spill] sm:$0xff] }
0x127b   :  { %8100 = vmatprep.subr.bf16.mxu0 %v13752_v12  ;;  %8141 = vmatprep.subr.bf16.mxu1 %v13755_v7  ;;  %v7843_v0 = vadd.f32 %v13631_v41, %v14498_v44  ;;  %v7845_v7 = vadd.f32 %v13636_v40, %v14499_v30 }
0x127e   :  { %8101 = vmatpush1.bf16.msra.mxu0 %v13758_v19  ;;  %8142 = vmatpush1.bf16.msra.mxu1 %v13761_v51 }
0x127f   :  { %8198 = vmatprep.subr.bf16.mxu0 %v14466_v32  ;;  %8239 = vmatprep.subr.bf16.mxu1 %v14497_v55 }
0x1301   :  { %v7925_v12 = vpop.f32.mrf.mxu0  ;;  %v7966_v21 = vpop.f32.mrf.mxu1 }
0x1302   :  { %v7973_v19 = vadd.f32 %v7925_v12, %v7843_v0  ;;  %v7975_v30 = vadd.f32 %v7966_v21, %v7884_v20 }
0x1303   :  { %v7927_v46 = vpop.f32.mrf.mxu0  ;;  %v7968_v47 = vpop.f32.mrf.mxu1 }
0x1304   :  { %v7977_v49 = vpack.c.bf16 %v7973_v19, %v7973_v19  ;;  %v7974_v51 = vadd.f32 %v7927_v46, %v7845_v7  ;;  %v7976_v52 = vadd.f32 %v7968_v47, %v7886_v24  ;;  %v7979_v26 = vpack.c.bf16 %v7975_v30, %v7975_v30 }
0x1305   :  { %v7929_v32 = vpop.f32.mrf.mxu0  ;;  %v7970_v38 = vpop.f32.mrf.mxu1 }
0x1306   :  { %v7981_v55 = vmul.bf16 1056980736, %v7977_v49  ;;  %v7978_v36 = vpack.c.bf16 %v7974_v51, %v7974_v51  ;;  %v7980_v33 = vpack.c.bf16 %v7976_v52, %v7976_v52  ;;  %v7983_v0 = vmul.bf16 1056980736, %v7979_v26 }
0x1307   :  { %v7930_v41 = vpop.f32.mrf.mxu0  ;;  %v7971_v44 = vpop.f32.mrf.mxu1 }
0x1308   :  { %10438 = vtanh.bf16 %v7981_v55  ;;  %v7982_v40 = vmul.bf16 1056980736, %v7978_v36 }
0x130a   :  { %10440 = vtanh.bf16 %v7982_v40 }
0x130b   :  { %10442 = vtanh.bf16 %v7980_v33 }
0x130c   :  { %10444 = vtanh.bf16 %v7983_v0 }
0x1316   :  { %v10439_v19 = vpop.eup %10438 }
0x1317   :  { %v7987_v47 = vmul.bf16 1056980736, %v10439_v19 }
0x1318   :  { %v10441_v32 = vpop.eup %10440 }
0x1319   :  { %v10443_v38 = vpop.eup %10442  ;;  %v7990_v49 = vadd.bf16 1056980736, %v7987_v47  ;;  %v7988_v46 = vmul.bf16 1056980736, %v10441_v32 }
0x131a   :  { %v7997_v51 = vunpack.c.l.bf16 %v10443_v38  ;;  %v10445_v55 = vpop.eup %10444 }
0x131b   :  { %v7993_v52 = vunpack.c.l.bf16 %v7990_v49  ;;  %v7991_v24 = vadd.bf16 1056980736, %v7988_v46  ;;  %v7989_v40 = vmul.bf16 1056980736, %v10445_v55  ;;  %v14500_v49 = vld [vmem:[#allocation63_spill] sm:$0xff]  ;;  %v14501_v46 = vld [vmem:[#allocation41_spill] sm:$0xff] }
0x131c   :  { %v14508_v55 = vld [vmem:[#allocation35_spill] sm:$0xff] }
0x131d   :  { %v7994_v44 = vunpack.c.l.bf16 %v7991_v24  ;;  %v7999_v12 = vmul.f32 %v7997_v51, %v7993_v52  ;;  %v7992_v19 = vadd.bf16 1056980736, %v7989_v40  ;;  %v14502_v52 = vld [vmem:[#allocation44_spill] sm:$0xff]  ;;  %v14503_v24 = vld [vmem:[#allocation42_spill] sm:$0xff]  ;;  %v14504_v51 = vld [vmem:[#allocation39_spill] sm:$0xff] }
0x131e   :  { %v14511_v40 = vld [vmem:[#allocation34_spill] sm:$0xff] }
0x131f   :  { %v7998_v3 = vmul.f32 %v7994_v44, %v13629_v6  ;;  %v7995_v6 = vunpack.c.l.bf16 %v7992_v19  ;;  %v14505_v44 = vld [vmem:[#allocation37_spill] sm:$0xff]  ;;  %v14514_v19 = vld [vmem:[#allocation32_spill] sm:$0xff] }
0x1321   :  { %v13775_v36 = vadd.f32 %v7999_v12, %v7998_v3  ;;  %v13777_v20 = vpop.f32.mrf.mxu0  ;;  %v13779_v33 = vpop.f32.mrf.mxu1  ;;  %v14506_v12 = vld [vmem:[#allocation40_spill] sm:$0xff]  ;;  %v14507_v3 = vld [vmem:[#allocation38_spill] sm:$0xff] }
0x1323   :  { %10446 = vtanh.f32 %v13775_v36  ;;  %v13782_v30 = vpop.f32.mrf.mxu0  ;;  %v13784_v21 = vpop.f32.mrf.mxu1 }
0x1325   :  { %v8041_v7 = vpop.f32.mrf.mxu0  ;;  %v8082_v41 = vpop.f32.mrf.mxu1 }
0x1326   :  { %v14509_v7 = vld [vmem:[#allocation33_spill] sm:$0xff]  ;;  %v14510_v41 = vld [vmem:[#allocation36_spill] sm:$0xff] }
0x1327   :  { %v8042_v26 = vpop.f32.mrf.mxu0  ;;  %v8083_v0 = vpop.f32.mrf.mxu1 }
0x1328   :  { %v14512_v26 = vld [vmem:[#allocation31_spill] sm:$0xff]  ;;  %v14513_v0 = vld [vmem:[#allocation29_spill] sm:$0xff] }
0x1330   :  { %v10447_v47 = vpop.eup %10446 }
0x1331   :  { %v8002_v32 = vmul.f32 %v10447_v47, %v7995_v6  ;;  %v14515_v6 = vld [vmem:[#allocation30_spill] sm:$0xff]  ;;  %v14516_v47 = vld [vmem:[#allocation27_spill] sm:$0xff] }
0x1333   :  { %v8085_v38 = vpack.c.bf16 %v8002_v32, %v8002_v32  ;;  %v14517_v32 = vld [vmem:[#allocation25_spill] sm:$0xff] }
0x1335   :  { %8119 = vmatmul.mubr.bf16.vlgmr.msra.gmra.mxu0 %v8085_v38  ;;  %8160 = vmatmul.mubr.bf16.vlgmr.msra.gmra.mxu1 %v8085_v38  ;;  %v14518_v38 = vld [vmem:[#allocation28_spill] sm:$0xff] }
0x1336   :  { %8199 = vmatpush1.bf16.msra.mxu0 %v12993_v27  ;;  %8240 = vmatpush1.bf16.msra.mxu1 %v12997_v34 }
0x1337   :  { %8200 = vmatprep.subr.bf16.mxu0 %v13002_v62  ;;  %8241 = vmatprep.subr.bf16.mxu1 %v13006_v22 }
0x1338   :  { %8230 = vmatprep.mubr.bf16.mxu0 %v14256_v15  ;;  %8271 = vmatprep.mubr.bf16.mxu1 %v14256_v15 }
0x133a   :  { %8201 = vmatpush1.bf16.msra.mxu0 %v13015_v61  ;;  %8242 = vmatpush1.bf16.msra.mxu1 %v13019_v53 }
0x133b   :  { %8202 = vmatprep.subr.bf16.mxu0 %v13025_v8  ;;  %8243 = vmatprep.subr.bf16.mxu1 %v13029_v59 }
0x133e   :  { %8203 = vmatpush1.bf16.msra.mxu0 %v13035_v58  ;;  %8244 = vmatpush1.bf16.msra.mxu1 %v13039_v37 }
0x133f   :  { %8204 = vmatprep.subr.bf16.mxu0 %v13045_v2  ;;  %8245 = vmatprep.subr.bf16.mxu1 %v13049_v42 }
0x1342   :  { %8205 = vmatpush1.bf16.msra.mxu0 %v13055_v1  ;;  %8246 = vmatpush1.bf16.msra.mxu1 %v13059_v56 }
0x1343   :  { %8206 = vmatprep.subr.bf16.mxu0 %v13065_v48  ;;  %8247 = vmatprep.subr.bf16.mxu1 %v13069_v10 }
0x1346   :  { %8207 = vmatpush1.bf16.msra.mxu0 %v13075_v57  ;;  %8248 = vmatpush1.bf16.msra.mxu1 %v13079_v39 }
0x1347   :  { %8208 = vmatprep.subr.bf16.mxu0 %v13085_v31  ;;  %8249 = vmatprep.subr.bf16.mxu1 %v13089_v14 }
0x134a   :  { %8209 = vmatpush1.bf16.msra.mxu0 %v13095_v9  ;;  %8250 = vmatpush1.bf16.msra.mxu1 %v13099_v4 }
0x134b   :  { %8210 = vmatprep.subr.bf16.mxu0 %v13105_v25  ;;  %8251 = vmatprep.subr.bf16.mxu1 %v13109_v63 }
0x134e   :  { %8211 = vmatpush1.bf16.msra.mxu0 %v13115_v28  ;;  %8252 = vmatpush1.bf16.msra.mxu1 %v13119_v54 }
0x134f   :  { %8212 = vmatprep.subr.bf16.mxu0 %v13125_v50  ;;  %8253 = vmatprep.subr.bf16.mxu1 %v13129_v13 }
0x1352   :  { %8213 = vmatpush1.bf16.msra.mxu0 %v13135_v35  ;;  %8254 = vmatpush1.bf16.msra.mxu1 %v13139_v29 }
0x1353   :  { %8281 = vmatprep.subr.bf16.mxu0 %v13570_v60  ;;  %8322 = vmatprep.subr.bf16.mxu1 %v13573_v16 }
0x1355   :  { %8231 = vmatmul.mubr.bf16.vlgmr.msra.gmra.mxu0 %v14500_v49  ;;  %8272 = vmatmul.mubr.bf16.vlgmr.msra.gmra.mxu1 %v14500_v49  ;;  %v14519_v49 = vld [vmem:[#allocation26_spill] sm:$0xff] }
0x1356   :  { %8282 = vmatpush1.bf16.msra.mxu0 %v13578_v17  ;;  %8323 = vmatpush1.bf16.msra.mxu1 %v13581_v23 }
0x1357   :  { %8283 = vmatprep.subr.bf16.mxu0 %v13584_v45  ;;  %8324 = vmatprep.subr.bf16.mxu1 %v13587_v5 }
0x1358   :  { %8313 = vmatprep.mubr.bf16.mxu0 %v14256_v15  ;;  %8354 = vmatprep.mubr.bf16.mxu1 %v14256_v15 }
0x135a   :  { %8284 = vmatpush1.bf16.msra.mxu0 %v13686_v18  ;;  %8325 = vmatpush1.bf16.msra.mxu1 %v14501_v46  ;;  %v8079_v46 = vadd.f32 %v13779_v33, %v13343_v11 }
0x135b   :  { %8285 = vmatprep.subr.bf16.mxu0 %v14502_v52  ;;  %8326 = vmatprep.subr.bf16.mxu1 %v14503_v24 }
0x135e   :  { %8286 = vmatpush1.bf16.msra.mxu0 %v14504_v51  ;;  %8327 = vmatpush1.bf16.msra.mxu1 %v14505_v44 }
0x135f   :  { %8287 = vmatprep.subr.bf16.mxu0 %v14506_v12  ;;  %8328 = vmatprep.subr.bf16.mxu1 %v14507_v3 }
0x1362   :  { %8288 = vmatpush1.bf16.msra.mxu0 %v14508_v55  ;;  %8329 = vmatpush1.bf16.msra.mxu1 %v14509_v7  ;;  %v14520_v7 = vld [vmem:[#allocation82_spill] sm:$0xff] }
0x1363   :  { %8289 = vmatprep.subr.bf16.mxu0 %v14510_v41  ;;  %8330 = vmatprep.subr.bf16.mxu1 %v14511_v40  ;;  %v14521_v41 = vld [vmem:[#allocation75_spill] sm:$0xff]  ;;  %v14522_v40 = vld [vmem:[#allocation64_spill] sm:$0xff] }
0x1366   :  { %8290 = vmatpush1.bf16.msra.mxu0 %v14512_v26  ;;  %8331 = vmatpush1.bf16.msra.mxu1 %v14513_v0  ;;  %v14523_v26 = vld [vmem:[#allocation59_spill] sm:$0xff]  ;;  %v14524_v0 = vld [vmem:[#allocation60_spill] sm:$0xff] }
0x1367   :  { %8291 = vmatprep.subr.bf16.mxu0 %v14514_v19  ;;  %8332 = vmatprep.subr.bf16.mxu1 %v14515_v6  ;;  %v14525_v19 = vld [vmem:[#allocation67_spill] sm:$0xff]  ;;  %v14526_v6 = vld [vmem:[#allocation65_spill] sm:$0xff] }
0x136a   :  { %8292 = vmatpush1.bf16.msra.mxu0 %v14516_v47  ;;  %8333 = vmatpush1.bf16.msra.mxu1 %v14517_v32  ;;  %v14527_v47 = vld [vmem:[#allocation66_spill] sm:$0xff]  ;;  %v14528_v32 = vld [vmem:[#allocation48_spill] sm:$0xff] }
0x136b   :  { %8293 = vmatprep.subr.bf16.mxu0 %v14518_v38  ;;  %8334 = vmatprep.subr.bf16.mxu1 %v14519_v49  ;;  %v8038_v38 = vadd.f32 %v13777_v20, %v14528_v32 }
0x136e   :  { %8294 = vmatpush1.bf16.msra.mxu0 %v14520_v7  ;;  %8335 = vmatpush1.bf16.msra.mxu1 %v14521_v41  ;;  %v14529_v7 = vld [vmem:[#allocation46_spill] sm:$0xff] }
0x136f   :  { %8295 = vmatprep.subr.bf16.mxu0 %v14522_v40  ;;  %8336 = vmatprep.subr.bf16.mxu1 %v14523_v26  ;;  %v8040_v41 = vadd.f32 %v13782_v30, %v14529_v7  ;;  %v8081_v40 = vadd.f32 %v13784_v21, %v13336_v43 }
0x1372   :  { %8296 = vmatpush1.bf16.msra.mxu0 %v14524_v0  ;;  %8337 = vmatpush1.bf16.msra.mxu1 %v14525_v19 }
0x1373   :  { %8393 = vmatprep.subr.bf16.mxu0 %v14526_v6  ;;  %8434 = vmatprep.subr.bf16.mxu1 %v14527_v47 }
0x13f5   :  { %v8120_v49 = vpop.f32.mrf.mxu0  ;;  %v8161_v55 = vpop.f32.mrf.mxu1 }
0x13f6   :  { %v8168_v26 = vadd.f32 %v8120_v49, %v8038_v38  ;;  %v8170_v7 = vadd.f32 %v8161_v55, %v8079_v46 }
0x13f7   :  { %v8122_v3 = vpop.f32.mrf.mxu0  ;;  %v8163_v0 = vpop.f32.mrf.mxu1 }
0x13f8   :  { %v8172_v12 = vpack.c.bf16 %v8168_v26, %v8168_v26  ;;  %v8169_v19 = vadd.f32 %v8122_v3, %v8040_v41  ;;  %v8171_v44 = vadd.f32 %v8163_v0, %v8081_v40  ;;  %v8174_v21 = vpack.c.bf16 %v8170_v7, %v8170_v7 }
0x13f9   :  { %v8124_v6 = vpop.f32.mrf.mxu0  ;;  %v8165_v51 = vpop.f32.mrf.mxu1 }
0x13fa   :  { %v8176_v47 = vmul.bf16 1056980736, %v8172_v12  ;;  %v8173_v24 = vpack.c.bf16 %v8169_v19, %v8169_v19  ;;  %v8175_v52 = vpack.c.bf16 %v8171_v44, %v8171_v44  ;;  %v8178_v38 = vmul.bf16 1056980736, %v8174_v21 }
0x13fb   :  { %v8125_v20 = vpop.f32.mrf.mxu0  ;;  %v8166_v32 = vpop.f32.mrf.mxu1 }
0x13fc   :  { %10448 = vtanh.bf16 %v8176_v47  ;;  %v8177_v30 = vmul.bf16 1056980736, %v8173_v24 }
0x13fe   :  { %10450 = vtanh.bf16 %v8177_v30 }
0x13ff   :  { %10452 = vtanh.bf16 %v8175_v52 }
0x1400   :  { %10454 = vtanh.bf16 %v8178_v38 }
0x140a   :  { %v10449_v26 = vpop.eup %10448 }
0x140b   :  { %v8182_v3 = vmul.bf16 1056980736, %v10449_v26 }
0x140c   :  { %v10451_v41 = vpop.eup %10450 }
0x140d   :  { %v10453_v51 = vpop.eup %10452  ;;  %v8185_v12 = vadd.bf16 1056980736, %v8182_v3  ;;  %v8183_v40 = vmul.bf16 1056980736, %v10451_v41 }
0x140e   :  { %v8192_v19 = vunpack.c.l.bf16 %v10453_v51  ;;  %v10455_v6 = vpop.eup %10454 }
0x140f   :  { %v8188_v44 = vunpack.c.l.bf16 %v8185_v12  ;;  %v8186_v0 = vadd.bf16 1056980736, %v8183_v40  ;;  %v8184_v30 = vmul.bf16 1056980736, %v10455_v6 }
0x1411   :  { %v8189_v32 = vunpack.c.l.bf16 %v8186_v0  ;;  %v8194_v49 = vmul.f32 %v8192_v19, %v8188_v44  ;;  %v8187_v26 = vadd.bf16 1056980736, %v8184_v30 }
0x1413   :  { %v8193_v33 = vmul.f32 %v8189_v32, %v13775_v36  ;;  %v8190_v36 = vunpack.c.l.bf16 %v8187_v26 }
0x1415   :  { %v13865_v24 = vadd.f32 %v8194_v49, %v8193_v33  ;;  %v13867_v46 = vpop.f32.mrf.mxu0  ;;  %v13869_v52 = vpop.f32.mrf.mxu1 }
0x1417   :  { %10456 = vtanh.f32 %v13865_v24  ;;  %v13872_v55 = vpop.f32.mrf.mxu0  ;;  %v13874_v7 = vpop.f32.mrf.mxu1 }
0x1419   :  { %v8236_v47 = vpop.f32.mrf.mxu0  ;;  %v8277_v20 = vpop.f32.mrf.mxu1 }
0x141b   :  { %v8237_v21 = vpop.f32.mrf.mxu0  ;;  %v8278_v38 = vpop.f32.mrf.mxu1 }
0x1424   :  { %v10457_v3 = vpop.eup %10456 }
0x1425   :  { %v8197_v41 = vmul.f32 %v10457_v3, %v8190_v36 }
0x1427   :  { %v8280_v51 = vpack.c.bf16 %v8197_v41, %v8197_v41 }
0x1429   :  { %8314 = vmatmul.mubr.bf16.vlgmr.msra.gmra.mxu0 %v8280_v51  ;;  %8355 = vmatmul.mubr.bf16.vlgmr.msra.gmra.mxu1 %v8280_v51 }
0x142a   :  { %8394 = vmatpush1.bf16.msra.mxu0 %v12993_v27  ;;  %8435 = vmatpush1.bf16.msra.mxu1 %v12997_v34  ;;  %v14530_v27 = vld [vmem:[#allocation45_spill] sm:$0xff] }
0x142b   :  { %8395 = vmatprep.subr.bf16.mxu0 %v13002_v62  ;;  %8436 = vmatprep.subr.bf16.mxu1 %v13006_v22  ;;  %v14531_v34 = vld [vmem:[#allocation41_spill] sm:$0xff]  ;;  %v14532_v62 = vld [vmem:[#allocation44_spill] sm:$0xff]  ;;  %v14533_v22 = vld [vmem:[#allocation42_spill] sm:$0xff] }
0x142c   :  { %8425 = vmatprep.mubr.bf16.mxu0 %v14256_v15  ;;  %8466 = vmatprep.mubr.bf16.mxu1 %v14256_v15 }
0x142e   :  { %8396 = vmatpush1.bf16.msra.mxu0 %v13015_v61  ;;  %8437 = vmatpush1.bf16.msra.mxu1 %v13019_v53  ;;  %v14534_v61 = vld [vmem:[#allocation39_spill] sm:$0xff]  ;;  %v14535_v53 = vld [vmem:[#allocation37_spill] sm:$0xff] }
0x142f   :  { %8397 = vmatprep.subr.bf16.mxu0 %v13025_v8  ;;  %8438 = vmatprep.subr.bf16.mxu1 %v13029_v59  ;;  %v14536_v8 = vld [vmem:[#allocation40_spill] sm:$0xff]  ;;  %v14537_v59 = vld [vmem:[#allocation38_spill] sm:$0xff] }
0x1432   :  { %8398 = vmatpush1.bf16.msra.mxu0 %v13035_v58  ;;  %8439 = vmatpush1.bf16.msra.mxu1 %v13039_v37  ;;  %v14538_v58 = vld [vmem:[#allocation35_spill] sm:$0xff]  ;;  %v14539_v37 = vld [vmem:[#allocation33_spill] sm:$0xff] }
0x1433   :  { %8399 = vmatprep.subr.bf16.mxu0 %v13045_v2  ;;  %8440 = vmatprep.subr.bf16.mxu1 %v13049_v42  ;;  %v14541_v2 = vld [vmem:[#allocation34_spill] sm:$0xff]  ;;  %v14542_v42 = vld [vmem:[#allocation31_spill] sm:$0xff] }
0x1436   :  { %8400 = vmatpush1.bf16.msra.mxu0 %v13055_v1  ;;  %8441 = vmatpush1.bf16.msra.mxu1 %v13059_v56  ;;  %v14543_v1 = vld [vmem:[#allocation29_spill] sm:$0xff]  ;;  %v14544_v56 = vld [vmem:[#allocation32_spill] sm:$0xff] }
0x1437   :  { %8401 = vmatprep.subr.bf16.mxu0 %v13065_v48  ;;  %8442 = vmatprep.subr.bf16.mxu1 %v13069_v10  ;;  %v14545_v48 = vld [vmem:[#allocation30_spill] sm:$0xff]  ;;  %v14546_v10 = vld [vmem:[#allocation27_spill] sm:$0xff] }
0x143a   :  { %8402 = vmatpush1.bf16.msra.mxu0 %v13075_v57  ;;  %8443 = vmatpush1.bf16.msra.mxu1 %v13079_v39  ;;  %v14547_v57 = vld [vmem:[#allocation25_spill] sm:$0xff]  ;;  %v14548_v39 = vld [vmem:[#allocation28_spill] sm:$0xff] }
0x143b   :  { %8403 = vmatprep.subr.bf16.mxu0 %v13085_v31  ;;  %8444 = vmatprep.subr.bf16.mxu1 %v13089_v14  ;;  %v14549_v31 = vld [vmem:[#allocation26_spill] sm:$0xff] }
0x143c   :  { %v14550_v14 = vld [vmem:[#allocation82_spill] sm:$0xff] }
0x143e   :  { %8404 = vmatpush1.bf16.msra.mxu0 %v13095_v9  ;;  %8445 = vmatpush1.bf16.msra.mxu1 %v13099_v4  ;;  %v14551_v9 = vld [vmem:[#allocation75_spill] sm:$0xff]  ;;  %v14552_v4 = vld [vmem:[#allocation64_spill] sm:$0xff] }
0x143f   :  { %8405 = vmatprep.subr.bf16.mxu0 %v13105_v25  ;;  %8446 = vmatprep.subr.bf16.mxu1 %v13109_v63  ;;  %v14553_v25 = vld [vmem:[#allocation59_spill] sm:$0xff]  ;;  %v14554_v63 = vld [vmem:[#allocation60_spill] sm:$0xff] }
0x1442   :  { %8406 = vmatpush1.bf16.msra.mxu0 %v13115_v28  ;;  %8447 = vmatpush1.bf16.msra.mxu1 %v13119_v54  ;;  %v14555_v28 = vld [vmem:[#allocation67_spill] sm:$0xff]  ;;  %v14556_v54 = vld [vmem:[#allocation48_spill] sm:$0xff] }
0x1443   :  { %8407 = vmatprep.subr.bf16.mxu0 %v13125_v50  ;;  %8448 = vmatprep.subr.bf16.mxu1 %v13129_v13  ;;  %v8233_v50 = vadd.f32 %v13867_v46, %v14556_v54  ;;  %v8274_v46 = vadd.f32 %v13869_v52, %v13343_v11 }
0x1446   :  { %8408 = vmatpush1.bf16.msra.mxu0 %v13135_v35  ;;  %8449 = vmatpush1.bf16.msra.mxu1 %v13139_v29  ;;  %v14557_v29 = vld [vmem:[#allocation46_spill] sm:$0xff] }
0x1447   :  { %8476 = vmatprep.subr.bf16.mxu0 %v13570_v60  ;;  %8517 = vmatprep.subr.bf16.mxu1 %v13573_v16  ;;  %v8235_v60 = vadd.f32 %v13872_v55, %v14557_v29  ;;  %v8276_v16 = vadd.f32 %v13874_v7, %v13336_v43 }
0x1449   :  { %8426 = vmatmul.mubr.bf16.vlgmr.msra.gmra.mxu0 %v14530_v27  ;;  %8467 = vmatmul.mubr.bf16.vlgmr.msra.gmra.mxu1 %v14530_v27 }
0x144a   :  { %8477 = vmatpush1.bf16.msra.mxu0 %v13578_v17  ;;  %8518 = vmatpush1.bf16.msra.mxu1 %v13581_v23 }
0x144b   :  { %8478 = vmatprep.subr.bf16.mxu0 %v13584_v45  ;;  %8519 = vmatprep.subr.bf16.mxu1 %v13587_v5 }
0x144c   :  { %8508 = vmatprep.mubr.bf16.mxu0 %v14256_v15  ;;  %8549 = vmatprep.mubr.bf16.mxu1 %v14256_v15  ;;  %v14540_v15 = vld [vmem:[#allocation36_spill] sm:$0xff] }
0x144e   :  { %8479 = vmatpush1.bf16.msra.mxu0 %v13686_v18  ;;  %8520 = vmatpush1.bf16.msra.mxu1 %v14531_v34 }
0x144f   :  { %8480 = vmatprep.subr.bf16.mxu0 %v14532_v62  ;;  %8521 = vmatprep.subr.bf16.mxu1 %v14533_v22 }
0x1452   :  { %8481 = vmatpush1.bf16.msra.mxu0 %v14534_v61  ;;  %8522 = vmatpush1.bf16.msra.mxu1 %v14535_v53 }
0x1453   :  { %8482 = vmatprep.subr.bf16.mxu0 %v14536_v8  ;;  %8523 = vmatprep.subr.bf16.mxu1 %v14537_v59 }
0x1456   :  { %8483 = vmatpush1.bf16.msra.mxu0 %v14538_v58  ;;  %8524 = vmatpush1.bf16.msra.mxu1 %v14539_v37 }
0x1457   :  { %8484 = vmatprep.subr.bf16.mxu0 %v14540_v15  ;;  %8525 = vmatprep.subr.bf16.mxu1 %v14541_v2 }
0x145a   :  { %8485 = vmatpush1.bf16.msra.mxu0 %v14542_v42  ;;  %8526 = vmatpush1.bf16.msra.mxu1 %v14543_v1 }
0x145b   :  { %8486 = vmatprep.subr.bf16.mxu0 %v14544_v56  ;;  %8527 = vmatprep.subr.bf16.mxu1 %v14545_v48 }
0x145e   :  { %8487 = vmatpush1.bf16.msra.mxu0 %v14546_v10  ;;  %8528 = vmatpush1.bf16.msra.mxu1 %v14547_v57 }
0x145f   :  { %8488 = vmatprep.subr.bf16.mxu0 %v14548_v39  ;;  %8529 = vmatprep.subr.bf16.mxu1 %v14549_v31  ;;  %v10657_v39 = vmov 0.0   ;;  %v10391_v31 = vld [vmem:[%s14008_s15 + $0x30] sm:$0xff]  }
0x1462   :  { %8489 = vmatpush1.bf16.msra.mxu0 %v14550_v14  ;;  %8530 = vmatpush1.bf16.msra.mxu1 %v14551_v9  ;;  %v10392_v14 = vld [vmem:[%s14008_s15 + $0x28] sm:$0xff]   ;;  %v10393_v9 = vld [vmem:[%s14008_s15 + $0x20] sm:$0xff]  }
0x1463   :  { %8490 = vmatprep.subr.bf16.mxu0 %v14552_v4  ;;  %8531 = vmatprep.subr.bf16.mxu1 %v14553_v25  ;;  %v10394_v4 = vld [vmem:[%s14008_s15 + $0x18] sm:$0xff]   ;;  %v10395_v25 = vld [vmem:[%s14008_s15 + $0x10] sm:$0xff]  }
0x1466   :  { %8491 = vmatpush1.bf16.msra.mxu0 %v14554_v63  ;;  %8532 = vmatpush1.bf16.msra.mxu1 %v14555_v28  ;;  %v10396_v63 = vld [vmem:[%s14008_s15 + $0x8] sm:$0xff]   ;;  %v10397_v28 = vld [vmem:[%s14008_s15] sm:$0xff]  }
0x1467   :  { %10038 = vmatprep.subr.bf16.mxu0 %v10657_v39 }
0x14e9   :  { %v8315_v13 = vpop.f32.mrf.mxu0  ;;  %v8356_v35 = vpop.f32.mrf.mxu1 }
0x14ea   :  { %v8363_v17 = vadd.f32 %v8315_v13, %v8233_v50  ;;  %v8365_v6 = vadd.f32 %v8356_v35, %v8274_v46 }
0x14eb   :  { %v8317_v23 = vpop.f32.mrf.mxu0  ;;  %v8358_v45 = vpop.f32.mrf.mxu1 }
0x14ec   :  { %v8367_v5 = vpack.c.bf16 %v8363_v17, %v8363_v17  ;;  %v8364_v18 = vadd.f32 %v8317_v23, %v8235_v60  ;;  %v8366_v12 = vadd.f32 %v8358_v45, %v8276_v16  ;;  %v8369_v7 = vpack.c.bf16 %v8365_v6, %v8365_v6 }
0x14ed   :  { %v8319_v40 = vpop.f32.mrf.mxu0  ;;  %v8360_v44 = vpop.f32.mrf.mxu1 }
0x14ee   :  { %v8371_v0 = vmul.bf16 1056980736, %v8367_v5  ;;  %v8368_v19 = vpack.c.bf16 %v8364_v18, %v8364_v18  ;;  %v8370_v32 = vpack.c.bf16 %v8366_v12, %v8366_v12  ;;  %v8373_v47 = vmul.bf16 1056980736, %v8369_v7 }
0x14ef   :  { %v8320_v49 = vpop.f32.mrf.mxu0  ;;  %v8361_v33 = vpop.f32.mrf.mxu1 }
0x14f0   :  { %10458 = vtanh.bf16 %v8371_v0  ;;  %v8372_v55 = vmul.bf16 1056980736, %v8368_v19 }
0x14f2   :  { %10460 = vtanh.bf16 %v8372_v55 }
0x14f3   :  { %10462 = vtanh.bf16 %v8370_v32 }
0x14f4   :  { %10464 = vtanh.bf16 %v8373_v47 }
0x14fe   :  { %v10459_v20 = vpop.eup %10458 }
0x14ff   :  { %v8377_v30 = vmul.bf16 1056980736, %v10459_v20 }
0x1500   :  { %v10461_v21 = vpop.eup %10460 }
0x1501   :  { %v10463_v38 = vpop.eup %10462  ;;  %v8380_v26 = vadd.bf16 1056980736, %v8377_v30  ;;  %v8378_v36 = vmul.bf16 1056980736, %v10461_v21 }
0x1502   :  { %v8387_v51 = vunpack.c.l.bf16 %v10463_v38  ;;  %v10465_v59 = vpop.eup %10464 }
0x1503   :  { %v8383_v3 = vunpack.c.l.bf16 %v8380_v26  ;;  %v8381_v41 = vadd.bf16 1056980736, %v8378_v36  ;;  %v8379_v15 = vmul.bf16 1056980736, %v10465_v59 }
0x1505   :  { %v8384_v27 = vunpack.c.l.bf16 %v8381_v41  ;;  %v8389_v34 = vmul.f32 %v8387_v51, %v8383_v3  ;;  %v8382_v1 = vadd.bf16 1056980736, %v8379_v15 }
0x1507   :  { %v8388_v52 = vmul.f32 %v8384_v27, %v13865_v24  ;;  %v8385_v56 = vunpack.c.l.bf16 %v8382_v1  ;;  %v10390_v24 = vld [vmem:[%s14008_s15 + $0x38] sm:$0xff]  }
0x1509   :  { %v13953_v62 = vadd.f32 %v8389_v34, %v8388_v52  ;;  %v8427_v22 = vpop.f32.mrf.mxu0  ;;  %v8468_v61 = vpop.f32.mrf.mxu1 }
0x150a   :  { %v8428_v50 = vadd.f32 %v8427_v22, %v14556_v54  ;;  %v8469_v54 = vadd.f32 %v8468_v61, %v13343_v11 }
0x150b   :  { %10466 = vtanh.f32 %v13953_v62  ;;  %v8429_v53 = vpop.f32.mrf.mxu0  ;;  %v8470_v8 = vpop.f32.mrf.mxu1 }
0x150c   :  { %v8430_v60 = vadd.f32 %v8429_v53, %v14557_v29  ;;  %v8471_v16 = vadd.f32 %v8470_v8, %v13336_v43  ;;  %v14558_v8 = vld [vmem:[#allocation43_spill] sm:$0xff] }
0x150d   :  { %v8431_v58 = vpop.f32.mrf.mxu0  ;;  %v8472_v37 = vpop.f32.mrf.mxu1  ;;  %v8589_v59 = vrot.slane %v14558_v8, 3 }
0x150f   :  { %v8432_v2 = vpop.f32.mrf.mxu0  ;;  %v8473_v42 = vpop.f32.mrf.mxu1 }
0x1510   :  { %v9148_v2 = vld [vmem:[%s14009_s16] ss:$0 sm:$0xff] }
0x1518   :  { %v10467_v48 = vpop.eup %10466 }
0x1519   :  { %v8392_v10 = vmul.f32 %v10467_v48, %v8385_v56 }
0x151b   :  { %v8475_v57 = vpack.c.bf16 %v8392_v10, %v8392_v10 }
0x151d   :  { %8509 = vmatmul.mubr.bf16.vlgmr.msra.gmra.mxu0 %v8475_v57  ;;  %8550 = vmatmul.mubr.bf16.vlgmr.msra.gmra.mxu1 %v8475_v57 }
0x151e   :  { %10039 = vmatpush3.bf16.msra.mxu0 %v10390_v24  ;;  %10054 = vmatprep.mubr.msk.bf16.mxu0 %vm10658_vm5, %v10657_v39 }
0x151f   :  { %10040 = vmatprep.subr.bf16.mxu0 %v10657_v39 }
0x1522   :  { %10041 = vmatpush3.bf16.msra.mxu0 %v10391_v31 }
0x1523   :  { %10042 = vmatprep.subr.bf16.mxu0 %v10657_v39 }
0x1526   :  { %10043 = vmatpush3.bf16.msra.mxu0 %v10392_v14 }
0x1527   :  { %10044 = vmatprep.subr.bf16.mxu0 %v10657_v39 }
0x152a   :  { %10045 = vmatpush3.bf16.msra.mxu0 %v10393_v9 }
0x152b   :  { %10046 = vmatprep.subr.bf16.mxu0 %v10657_v39 }
0x152e   :  { %10047 = vmatpush3.bf16.msra.mxu0 %v10394_v4 }
0x152f   :  { %10048 = vmatprep.subr.bf16.mxu0 %v10657_v39 }
0x1532   :  { %10049 = vmatpush3.bf16.msra.mxu0 %v10395_v25 }
0x1533   :  { %10050 = vmatprep.subr.bf16.mxu0 %v10657_v39 }
0x1536   :  { %10051 = vmatpush3.bf16.msra.mxu0 %v10396_v63 }
0x1537   :  { %10052 = vmatprep.subr.bf16.mxu0 %v10657_v39 }
0x153a   :  { %10053 = vmatpush3.bf16.msra.mxu0 %v10397_v28 }
0x15dd   :  { %v8510_v13 = vpop.f32.mrf.mxu0  ;;  %v8551_v35 = vpop.f32.mrf.mxu1 }
0x15de   :  { %v8558_v17 = vadd.f32 %v8510_v13, %v8428_v50  ;;  %v8560_v29 = vadd.f32 %v8551_v35, %v8469_v54 }
0x15df   :  { %v8512_v23 = vpop.f32.mrf.mxu0  ;;  %v8553_v45 = vpop.f32.mrf.mxu1 }
0x15e0   :  { %v8562_v5 = vpack.c.bf16 %v8558_v17, %v8558_v17  ;;  %v8559_v18 = vadd.f32 %v8512_v23, %v8430_v60  ;;  %v8561_v12 = vadd.f32 %v8553_v45, %v8471_v16  ;;  %v8564_v43 = vpack.c.bf16 %v8560_v29, %v8560_v29 }
0x15e1   :  { %v8514_v40 = vpop.f32.mrf.mxu0  ;;  %v8555_v44 = vpop.f32.mrf.mxu1 }
0x15e2   :  { %v8566_v0 = vmul.bf16 1056980736, %v8562_v5  ;;  %v8563_v19 = vpack.c.bf16 %v8559_v18, %v8559_v18  ;;  %v8565_v32 = vpack.c.bf16 %v8561_v12, %v8561_v12  ;;  %v8568_v55 = vmul.bf16 1056980736, %v8564_v43 }
0x15e3   :  { %v8515_v49 = vpop.f32.mrf.mxu0  ;;  %v8556_v33 = vpop.f32.mrf.mxu1 }
0x15e4   :  { %10468 = vtanh.bf16 %v8566_v0  ;;  %v8567_v46 = vmul.bf16 1056980736, %v8563_v19 }
0x15e6   :  { %10470 = vtanh.bf16 %v8567_v46 }
0x15e7   :  { %10472 = vtanh.bf16 %v8565_v32 }
0x15e8   :  { %10474 = vtanh.bf16 %v8568_v55 }
0x15f2   :  { %v10469_v6 = vpop.eup %10468 }
0x15f3   :  { %v8572_v7 = vmul.bf16 1056980736, %v10469_v6 }
0x15f4   :  { %v10471_v47 = vpop.eup %10470 }
0x15f5   :  { %v10473_v20 = vpop.eup %10472  ;;  %v8575_v30 = vadd.bf16 1056980736, %v8572_v7  ;;  %v8573_v21 = vmul.bf16 1056980736, %v10471_v47 }
0x15f6   :  { %v8582_v36 = vunpack.c.l.bf16 %v10473_v20  ;;  %v10475_v27 = vpop.eup %10474 }
0x15f7   :  { %v8578_v38 = vunpack.c.l.bf16 %v8575_v30  ;;  %v8576_v26 = vadd.bf16 1056980736, %v8573_v21  ;;  %v8574_v34 = vmul.bf16 1056980736, %v10475_v27 }
0x15f9   :  { %v8579_v3 = vunpack.c.l.bf16 %v8576_v26  ;;  %v8584_v41 = vmul.f32 %v8582_v36, %v8578_v38  ;;  %v8577_v52 = vadd.bf16 1056980736, %v8574_v34 }
0x15fb   :  { %v8583_v11 = vmul.f32 %v8579_v3, %v13953_v62  ;;  %v8580_v22 = vunpack.c.l.bf16 %v8577_v52 }
0x15fd   :  { %v8585_v51 = vadd.f32 %v8584_v41, %v8583_v11 }
0x15ff   :  { %10476 = vtanh.f32 %v8585_v51 }
0x160c   :  { %v10477_v61 = vpop.eup %10476 }
0x160d   :  { %v8587_v53 = vmul.f32 %v10477_v61, %v8580_v22 }
0x160f   :  { %v8592_v58 = vrot.slane %v8587_v53, 2 }
0x1611   :  { %v8594_v37 = vsel %vm284_vm1, %v8589_v59, %v8592_v58 }
0x1612   :  { %v8595_v15 = vpack.c.bf16 %v8594_v37, %v8594_v37 }
0x1614   :  { %10055 = vmatmul.mubr.bf16.vlgmr.msra.gmra.mxu0 %v8595_v15 }
0x16d4   :  { %v8701_v62 = vpop.f32.mrf.mxu0 }
0x16d5   :  { %v8702_v42 = vadd.f32 %v9148_v2, %v8701_v62 }
0x16d6   :  { %v10056_v1 = vpop.f32.mrf.mxu0 }
0x16d7   :  { %8708 = vst.msk [vmem:[#allocation13] sm:$0x3] %vm8707_vm6, %v8702_v42 }
0x16d8   :  { %v8704_v56 = vpop.f32.mrf.mxu0 }
0x16d9   :  { %10621 = shalt.err (!%p10618_p1)
}
0x16da   :  { %8718 = dma.vmem_to_hbm [thread:$0]  %s8716_s18, 32, %s14010_s17, [#allocation7]   ;;  %v10057_v48 = vpop.f32.mrf.mxu0 }
0x16db   :  { %10640 = dma.done.wait [#allocation7], 32  }
0x16dc   :  { %10641 = vsyncadd [#allocation7], 4294967264 }
0x16dd   :  { %8722 = vsyncpa [#allocation6], 1 }
0x16de   :  { %8723 = vsyncpa [#allocation9], 1 }
0x16df   :  { %8724 = vsyncpa [#allocation12], 1 }
0x16e0   :  { %8725 = vsyncpa [#allocation7], 1 }
0x16e1   :  { %8726 = vsyncmov [#allocation4] }
0x16e4   :  { %s8727_s16 = vpop.sfrf %8726 }
0x16e5   :  { %p9157_p2 = scmp.ne.s32.totalorder %s8727_s16, 0 }
0x16e7   :  { %8731 = shalt.err (%p9157_p2)  }
0x16e8   :  { %8733 = vsyncmov [#allocation4 + $0x1] }
0x16eb   :  { %s8734_s0 = vpop.sfrf %8733 }
0x16ec   :  { %p9158_p3 = scmp.ne.s32.totalorder %s8734_s0, 0 }
0x16ee   :  { %8738 = shalt.err (%p9158_p3)  }

</bundles_post_ra>
